<compile_context>
chip_gen: v5e
topology: v5e:2x2
jax: 0.10.0
libtpu: 0.0.40
codegen_flags: <defaults>
</compile_context>

<pallas_src>
import math
import functools

import jax
import jax.numpy as jnp
import numpy as np
from jax.experimental import pallas as pl
from jax.experimental.pallas import tpu as pltpu

HEAD_NUM = 4
QKV_DIM = 8
EMBED_DIM = HEAD_NUM * QKV_DIM        # 32
FF_HIDDEN = 64
EPS = 1e-5                            # InstanceNorm1d default eps
NEG_BIG = -1e9                        # finite stand-in for -inf


# ---------------------------------------------------------------------------
# In-kernel helpers.  All operands live in VMEM / vregs; nothing touches HBM.
# ---------------------------------------------------------------------------
def _head_block_mask(nq, nk):
    """(H*nq, H*nk) additive mask: 0 on per-head diagonal blocks, NEG_BIG off.

    Head index of a row/column is derived with threshold comparisons (no
    integer div/mod on the VPU needed)."""
    rows, cols = nq * HEAD_NUM, nk * HEAD_NUM
    ri = jax.lax.broadcasted_iota(jnp.int32, (rows, cols), 0)
    ci = jax.lax.broadcasted_iota(jnp.int32, (rows, cols), 1)
    rh = sum((ri >= t * nq).astype(jnp.int32) for t in range(1, HEAD_NUM))
    ch = sum((ci >= t * nk).astype(jnp.int32) for t in range(1, HEAD_NUM))
    return jnp.where(rh == ch, 0.0, NEG_BIG).astype(jnp.float32)


def _attention_block(xq, xkv, wqkv, wc, bias4, w1, b1, w2, *,
                     head_mask, extra_mask=None, self_attn=True):
    """One 'MHA -> combine -> add & instance-norm -> FF' block.

    xq: (Bb, nq, D) f32 queries (also the residual stream), xkv: (Bb, nkv, D).
    Heads are folded head-major into the row dim, so scores/PV are a single
    (H*nq) x (H*nkv) matmul per batch element with a block-diagonal mask and
    one full-row softmax.  Matmul inputs are bf16 with f32 accumulation."""
    Bb, nq, D = xq.shape
    nkv = xkv.shape[1]
    HK = HEAD_NUM * QKV_DIM

    xq_flat = xq.reshape(Bb * nq, D)                  # residual kept in f32
    xq_bf = xq_flat.astype(jnp.bfloat16)
    if self_attn:
        qkv = jnp.dot(xq_bf, wqkv, preferred_element_type=jnp.float32)
        q, k, v = qkv[:, :HK], qkv[:, HK:2 * HK], qkv[:, 2 * HK:]
    else:
        xkv_bf = xkv.reshape(Bb * nkv, D).astype(jnp.bfloat16)
        q = jnp.dot(xq_bf, wqkv[:, :HK], preferred_element_type=jnp.float32)
        kv = jnp.dot(xkv_bf, wqkv[:, HK:], preferred_element_type=jnp.float32)
        k, v = kv[:, :HK], kv[:, HK:]

    def fold_heads(m, n):
        # (Bb*n, H*kd) -> (Bb, H*n, kd), head-major rows.
        m3 = m.reshape(Bb, n, HK)
        return jnp.concatenate(
            [m3[:, :, h * QKV_DIM:(h + 1) * QKV_DIM] for h in range(HEAD_NUM)],
            axis=1)

    qf = fold_heads(q, nq).astype(jnp.bfloat16)
    kf = fold_heads(k, nkv).astype(jnp.bfloat16)
    vf = fold_heads(v, nkv).astype(jnp.bfloat16)

    # One score matmul per batch element covering all heads; off-diagonal head
    # blocks are removed by head_mask before the full-row softmax.
    # TODO(synk): flash-style KV tiling of this block for large node counts on
    # v7x (64 MiB VMEM) -- not needed at these shapes.
    s = jnp.einsum('bqd,bkd->bqk', qf, kf, preferred_element_type=jnp.float32)
    s = s + head_mask[None, :, :]
    if extra_mask is not None:
        s = s + extra_mask
    s = s - jnp.max(s, axis=-1, keepdims=True)
    p = jnp.exp(s)
    w = p * pl.reciprocal(jnp.sum(p, axis=-1, keepdims=True), approx=True)
    o = jnp.einsum('bqk,bkd->bqd', w.astype(jnp.bfloat16), vf,
                   preferred_element_type=jnp.float32)           # (Bb, H*nq, kd)

    # Unfold heads back to the PyTorch out_concat layout (nq, H*kd).
    oc = jnp.concatenate(
        [o[:, h * nq:(h + 1) * nq, :] for h in range(HEAD_NUM)], axis=-1)
    oc = oc.reshape(Bb * nq, HK)

    bc, gamma, beta, b2 = bias4[0:1], bias4[1:2], bias4[2:3], bias4[3:4]  # (1, D)

    # multi_head_combine + Add & InstanceNorm1d (per channel over seq, biased).
    mho = jnp.dot(oc.astype(jnp.bfloat16), wc,
                  preferred_element_type=jnp.float32) + bc
    added = (xq_flat + mho).reshape(Bb, nq, D)
    mean = jnp.mean(added, axis=1, keepdims=True)
    var = jnp.mean((added - mean) ** 2, axis=1, keepdims=True)
    normed = (added - mean) * jax.lax.rsqrt(var + EPS) * gamma[None] + beta[None]

    # Feed-forward: W2(relu(W1(x))).
    nf = normed.reshape(Bb * nq, D).astype(jnp.bfloat16)
    h1 = jnp.maximum(jnp.dot(nf, w1, preferred_element_type=jnp.float32) + b1, 0.0)
    out = jnp.dot(h1.astype(jnp.bfloat16), w2,
                  preferred_element_type=jnp.float32) + b2
    return out.reshape(Bb, nq, D)


# ---------------------------------------------------------------------------
# Fused kernel: all encoder layers for a block of batch elements per grid step.
# ---------------------------------------------------------------------------
def _encoder_stack_kernel(h_ref, rn_ref, wqkv_ref, wc_ref, w1_ref, w2_ref,
                          bias_ref, b1_ref, out_ref, *, num_layers, agent_num):
    x = h_ref[...]                                    # (Bb, S, D) f32
    agent = x[:, :agent_num, :]                       # (Bb, A, D)
    node = x[:, agent_num:, :]                        # (Bb, N, D)
    n_node = node.shape[1]

    # Block-diagonal head masks (static shapes; built once per grid step).
    mask_nn = _head_block_mask(n_node, n_node)        # block "3": node self-attn
    mask_an = _head_block_mask(agent_num, n_node)     # block "1": agent x node
    mask_na = _head_block_mask(n_node, agent_num)     # block "2": node x agent

    # Route mask for block "2": head-major key column c = h*A + a is masked
    # iff a >= route_num[b].  Vectorized from the (Bb,1,1) int32 VMEM input.
    ci = jax.lax.broadcasted_iota(jnp.int32, (1, agent_num * HEAD_NUM), 1)
    ch = sum((ci >= t * agent_num).astype(jnp.int32) for t in range(1, HEAD_NUM))
    agent_idx = ci - ch * agent_num                   # (1, A*H)
    rn = rn_ref[...]                                  # (Bb, 1, 1) int32
    route_mask = jnp.where(agent_idx[None, :, :] >= rn,
                           NEG_BIG, 0.0).astype(jnp.float32)      # (Bb, 1, A*H)

    # TODO(synk): for deep stacks (L >~ 6-8), turn this Python unroll into a
    # grid axis with per-layer weight blocks selected by index_map.
    for l in range(num_layers):
        j3, j1, j2 = 3 * l, 3 * l + 1, 3 * l + 2
        # block "3": node self-attention (1/sqrt(kd) folded into Wq at pack time)
        node2 = _attention_block(node, node, wqkv_ref[j3], wc_ref[j3],
                                 bias_ref[j3], w1_ref[j3], b1_ref[j3],
                                 w2_ref[j3], head_mask=mask_nn, self_attn=True)
        # block "1": agents attend node2 (scaled, no extra mask)
        agent = _attention_block(agent, node2, wqkv_ref[j1], wc_ref[j1],
                                 bias_ref[j1], w1_ref[j1], b1_ref[j1],
                                 w2_ref[j1], head_mask=mask_an, self_attn=False)
        # block "2": node2 attends agents (sharp => unscaled, route mask)
        node = _attention_block(node2, agent, wqkv_ref[j2], wc_ref[j2],
                                bias_ref[j2], w1_ref[j2], b1_ref[j2],
                                w2_ref[j2], head_mask=mask_na,
                                extra_mask=route_mask, self_attn=False)

    # Direct stores (agent_num rows are sublane-aligned) -- no concat temp.
    out_ref[:, :agent_num, :] = agent
    out_ref[:, agent_num:, :] = node


# ---------------------------------------------------------------------------
# Wrapper: pack weights and launch the fused kernel.
# ---------------------------------------------------------------------------
def _pack_layer_weights(layers):
    """Stack per-(layer, block) weights into 6 kernel operands.

    1/sqrt(kd) is folded into the Wq columns of the scaled blocks ("3", "1");
    matmul weights are stored as bfloat16, bias/affine params stay float32."""
    inv = 1.0 / math.sqrt(QKV_DIM)
    wqkv, wc, w1, w2, bias4, b1 = [], [], [], [], [], []
    for lp in layers:
        for blk, qscale in (('s3', inv), ('s1', inv), ('s2', 1.0)):
            p = lp[blk]
            wqkv.append(jnp.concatenate([p['Wq'] * qscale, p['Wk'], p['Wv']],
                                        axis=1))
            wc.append(p['Wc'])
            w1.append(p['W1'])
            w2.append(p['W2'])
            bias4.append(jnp.stack([p['bc'], p['gamma'], p['beta'], p['b2']],
                                   axis=0))
            b1.append(p['b1'][None, :])
    st = lambda xs, dt: jnp.stack(xs, axis=0).astype(dt)
    return (st(wqkv, jnp.bfloat16), st(wc, jnp.bfloat16),
            st(w1, jnp.bfloat16), st(w2, jnp.bfloat16),
            st(bias4, jnp.float32), st(b1, jnp.float32))


def encoder_stack_pallas(layers, h, route_num, agent_num, block_b=None):
    """Run every EncoderLayer on the packed (B, A+N, D) embedding in one kernel."""
    B, S, D = h.shape
    L = len(layers)
    if block_b is None:
        # Largest divisor of B up to 8 batch elements per grid step.  On v7x
        # (2 TensorCores) pick block_b so the resulting grid has >= 2 blocks
        # when B is large, to keep both cores busy.
        block_b = max(d for d in range(1, min(B, 8) + 1) if B % d == 0)
    assert B % block_b == 0

    wqkv, wc, w1, w2, bias4, b1 = _pack_layer_weights(layers)
    rn = route_num.astype(jnp.int32).reshape(B, 1, 1)

    def full_spec(arr):
        zeros = (0,) * arr.ndim
        return pl.BlockSpec(arr.shape, lambda g, _z=zeros: _z)

    kernel = functools.partial(_encoder_stack_kernel,
                               num_layers=L, agent_num=agent_num)
    return pl.pallas_call(
        kernel,
        grid=(B // block_b,),
        in_specs=[
            pl.BlockSpec((block_b, S, D), lambda g: (g, 0, 0)),   # h
            pl.BlockSpec((block_b, 1, 1), lambda g: (g, 0, 0)),   # route_num
            full_spec(wqkv), full_spec(wc), full_spec(w1),
            full_spec(w2), full_spec(bias4), full_spec(b1),
        ],
        out_specs=pl.BlockSpec((block_b, S, D), lambda g: (g, 0, 0)),
        out_shape=jax.ShapeDtypeStruct((B, S, D), jnp.float32),
        compiler_params=pltpu.CompilerParams(
            dimension_semantics=("parallel",),
            vmem_limit_bytes=32 * 1024 * 1024),
    )(h, rn, wqkv, wc, w1, w2, bias4, b1)


# ---------------------------------------------------------------------------
# TSP_Encoder front-end (tiny Linear(2,D) embeddings + RoPE), kept in XLA.
# ---------------------------------------------------------------------------
def _linear(x, p):
    return x @ p['W'] + p['b']


def _rope(x):
    """RotatePostionalEncoding.forward (faithful to the PyTorch code,
    including the swapped sin/cos table names and base 1000)."""
    _, seq, d = x.shape
    position = jnp.arange(seq, dtype=jnp.float32)[:, None]           # (seq, 1)
    ids = jnp.arange(d // 2, dtype=jnp.float32)
    theta = jnp.power(1000.0, -2.0 * ids / d)
    emb = position * theta                                           # (seq, d/2)
    cos_pos = jnp.repeat(jnp.sin(emb), 2, axis=-1)[None]             # "cos_embeddings"
    sin_pos = jnp.repeat(jnp.cos(emb), 2, axis=-1)[None]             # "sin_embeddings"
    x2 = jnp.stack([-x[..., 1::2], x[..., ::2]], axis=-1).reshape(x.shape)
    return x * cos_pos + x2 * sin_pos


def tsp_encoder_preprocess(params, coords, route_num, flag):
    # TODO(synk): coords[:, :route_num.max()] is a data-dependent split; the
    # depot count is resolved to a static Python int on the host (dynamic
    # shapes cannot exist inside jit/Pallas).
    num_depot = int(jnp.max(route_num))
    depot_coords = coords[:, :num_depot, :]
    nodes_coords = coords[:, num_depot:, :]

    embedded_depot = _linear(depot_coords, params['embedding_depot'])
    place_embedding = _linear(depot_coords, params['embedding_place'])
    pos = params['alpha'] * _linear(_rope(place_embedding), params['pos_emb_proj'])
    depot_embedding = embedded_depot + pos

    embedded_node = _linear(nodes_coords, params['embedding_node'])
    embedded_node = embedded_node.at[:, 0, :].set(
        _linear(embedded_node[:, 0, :], params['embedding_in']))
    depot_embedding = jnp.where((flag == 0)[:, None, None],
                                _linear(depot_embedding, params['embedding_out']),
                                depot_embedding)
    last = _linear(embedded_node[:, -1, :], params['embedding_out'])
    embedded_node = embedded_node.at[:, -1, :].set(
        jnp.where((flag == 1)[:, None], last, embedded_node[:, -1, :]))

    h0 = jnp.concatenate([depot_embedding, embedded_node], axis=1)   # (B, A+N, D)
    return h0, num_depot


def tsp_encoder_forward(params, coords, route_num, flag):
    h0, num_depot = tsp_encoder_preprocess(params, coords, route_num, flag)
    return encoder_stack_pallas(params['layers'], h0, route_num, num_depot)


# ---------------------------------------------------------------------------
# Pure-JAX reference (same preprocessing, XLA f32 encoder layers) for validation.
# ---------------------------------------------------------------------------
def _ref_block(xq, xkv, p, scale, mask):
    B, nq, _ = xq.shape
    nkv = xkv.shape[1]
    q = (xq @ p['Wq']).reshape(B, nq, HEAD_NUM, QKV_DIM).transpose(0, 2, 1, 3)
    k = (xkv @ p['Wk']).reshape(B, nkv, HEAD_NUM, QKV_DIM).transpose(0, 2, 1, 3)
    v = (xkv @ p['Wv']).reshape(B, nkv, HEAD_NUM, QKV_DIM).transpose(0, 2, 1, 3)
    s = jnp.einsum('bhnd,bhmd->bhnm', q, k) * scale
    if mask is not None:
        s = s + mask[:, None, :, :]
    w = jax.nn.softmax(s, axis=-1)
    o = jnp.einsum('bhnm,bhmd->bhnd', w, v).transpose(0, 2, 1, 3).reshape(B, nq, -1)
    added = xq + (o @ p['Wc'] + p['bc'])
    mean = added.mean(axis=1, keepdims=True)
    var = ((added - mean) ** 2).mean(axis=1, keepdims=True)
    normed = (added - mean) / jnp.sqrt(var + EPS) * p['gamma'] + p['beta']
    h1 = jax.nn.relu(normed @ p['W1'] + p['b1'])
    return h1 @ p['W2'] + p['b2']


def encoder_stack_ref(layers, h, route_num, agent_num):
    B = h.shape[0]
    agent, node = h[:, :agent_num], h[:, agent_num:]
    A, N = agent.shape[1], node.shape[1]
    inv = 1.0 / math.sqrt(QKV_DIM)
    route_mask = jnp.where(jnp.arange(A)[None, None, :] >= route_num[:, None, None],
                           -jnp.inf, 0.0).astype(jnp.float32)
    route_mask = jnp.broadcast_to(route_mask, (B, N, A))
    for lp in layers:
        node2 = _ref_block(node, node, lp['s3'], inv, None)
        agent = _ref_block(agent, node2, lp['s1'], inv, None)
        node = _ref_block(node2, agent, lp['s2'], 1.0, route_mask)
    return jnp.concatenate([agent, node], axis=1)


def tsp_encoder_ref(params, coords, route_num, flag):
    h0, num_depot = tsp_encoder_preprocess(params, coords, route_num, flag)
    return encoder_stack_ref(params['layers'], h0, route_num, num_depot)


# ---------------------------------------------------------------------------
# Deterministic parameter init (mimics uniform(-1/sqrt(fan), 1/sqrt(fan)))
# ---------------------------------------------------------------------------
def init_params(key, num_layers):
    D, HK, F = EMBED_DIM, HEAD_NUM * QKV_DIM, FF_HIDDEN

    def u(k, shape, fan):
        s = 1.0 / math.sqrt(fan)
        return jax.random.uniform(k, shape, jnp.float32, -s, s)

    keys = list(jax.random.split(key, 8 + num_layers))
    kit = iter(keys[:8])

    def lin(k, in_dim, out_dim):
        kw, kb = jax.random.split(k)
        return dict(W=u(kw, (in_dim, out_dim), in_dim),
                    b=u(kb, (out_dim,), in_dim))

    params = dict(
        embedding_depot=lin(next(kit), 2, D),
        embedding_place=lin(next(kit), 2, D),
        embedding_node=lin(next(kit), 2, D),
        pos_emb_proj=lin(next(kit), D, D),
        embedding_out=lin(next(kit), D, D),
        embedding_in=lin(next(kit), D, D),
        alpha=jnp.float32(1.0),
        layers=[],
    )
    for lk in keys[8:]:
        lkeys = iter(jax.random.split(lk, 33))
        layer = {}
        for blk in ('s3', 's1', 's2'):
            layer[blk] = dict(
                Wq=u(next(lkeys), (D, HK), D),
                Wk=u(next(lkeys), (D, HK), D),
                Wv=u(next(lkeys), (D, HK), D),
                Wc=u(next(lkeys), (HK, D), HK),
                bc=u(next(lkeys), (D,), D),
                gamma=u(next(lkeys), (D,), D),
                beta=u(next(lkeys), (D,), D),
                W1=u(next(lkeys), (D, F), D),
                b1=u(next(lkeys), (F,), F),
                W2=u(next(lkeys), (F, D), F),
                b2=u(next(lkeys), (D,), D),
            )
        params['layers'].append(layer)
    return params


if __name__ == "__main__":
    key = jax.random.PRNGKey(0)
    k_c, k_p = jax.random.split(key)

    B = 2
    ENCODER_LAYER_NUM = 2
    route_num = jnp.array([5, 8], dtype=jnp.int32)   # routes/depots per instance (>= 1)
    num_depot = int(route_num.max())                 # 8 agent rows
    num_nodes = 16
    coords = jax.random.uniform(k_c, (B, num_depot + num_nodes, 2), jnp.float32)
    flag = jnp.array([0, 1], dtype=jnp.int32)

    params = init_params(k_p, ENCODER_LAYER_NUM)

    h = tsp_encoder_forward(params, coords, route_num, flag)
    jax.block_until_ready(h)

    h_ref = tsp_encoder_ref(params, coords, route_num, flag)
    # 4e-2 tolerance: the kernel runs the MXU matmuls with bf16 inputs (f32
    # accumulation) and uses the EUP approximate reciprocal in the softmax,
    # while the reference is pure f32 XLA.
    np.testing.assert_allclose(np.asarray(h), np.asarray(h_ref),
                               rtol=4e-2, atol=4e-2)
    assert h.shape == (B, num_depot + num_nodes, EMBED_DIM)
    print("KERNEL_OK")
</pallas_src>

<mosaic_0001>
module attributes {stable_mosaic.version = 11 : i64} {
  func.func @_encoder_stack_kernel(%arg0: i32, %arg1: memref<2x24x32xf32, #tpu.memory_space<vmem>>, %arg2: memref<2x1x1xi32, #tpu.memory_space<vmem>>, %arg3: memref<6x32x96xbf16, #tpu.memory_space<vmem>>, %arg4: memref<6x32x32xbf16, #tpu.memory_space<vmem>>, %arg5: memref<6x32x64xbf16, #tpu.memory_space<vmem>>, %arg6: memref<6x64x32xbf16, #tpu.memory_space<vmem>>, %arg7: memref<6x4x32xf32, #tpu.memory_space<vmem>>, %arg8: memref<6x1x64xf32, #tpu.memory_space<vmem>>, %arg9: memref<2x24x32xf32, #tpu.memory_space<vmem>>) attributes {dimension_semantics = [#tpu.dimension_semantics<parallel>], iteration_bounds = array<i64: 1>, scalar_prefetch = 0 : i64, scratch_operands = 0 : i64, tpu.core_type = #tpu.core_type<tc>, window_params = [{transform_indices = @transform_0, window_bounds = array<i64: 2, 24, 32>}, {transform_indices = @transform_1, window_bounds = array<i64: 2, 1, 1>}, {pipeline_mode = #tpu.pipeline_mode<synchronous>, transform_indices = @transform_2, window_bounds = array<i64: 6, 32, 96>}, {pipeline_mode = #tpu.pipeline_mode<synchronous>, transform_indices = @transform_3, window_bounds = array<i64: 6, 32, 32>}, {pipeline_mode = #tpu.pipeline_mode<synchronous>, transform_indices = @transform_4, window_bounds = array<i64: 6, 32, 64>}, {pipeline_mode = #tpu.pipeline_mode<synchronous>, transform_indices = @transform_5, window_bounds = array<i64: 6, 64, 32>}, {pipeline_mode = #tpu.pipeline_mode<synchronous>, transform_indices = @transform_6, window_bounds = array<i64: 6, 4, 32>}, {pipeline_mode = #tpu.pipeline_mode<synchronous>, transform_indices = @transform_7, window_bounds = array<i64: 6, 1, 64>}, {transform_indices = @transform_8, window_bounds = array<i64: 2, 24, 32>}]} {
    %c0 = arith.constant 0 : index
    %c0_0 = arith.constant 0 : index
    %c0_1 = arith.constant 0 : index
    %0 = vector.load %arg1[%c0, %c0_0, %c0_1] : memref<2x24x32xf32, #tpu.memory_space<vmem>>, vector<2x24x32xf32>
    %1 = vector.extract_strided_slice %0 {offsets = [0, 0, 0], sizes = [2, 8, 32], strides = [1, 1, 1]} : vector<2x24x32xf32> to vector<2x8x32xf32>
    %2 = vector.extract_strided_slice %0 {offsets = [0, 8, 0], sizes = [2, 16, 32], strides = [1, 1, 1]} : vector<2x24x32xf32> to vector<2x16x32xf32>
    %3 = tpu.iota {dimensions = array<i32: 0>} : vector<64x64xi32>
    %4 = tpu.iota {dimensions = array<i32: 1>} : vector<64x64xi32>
    %c16_i32 = arith.constant 16 : i32
    %5 = vector.broadcast %c16_i32 : i32 to vector<64x64xi32>
    %6 = arith.cmpi sge, %3, %5 : vector<64x64xi32>
    %7 = arith.extui %6 : vector<64x64xi1> to vector<64x64xi32>
    %c0_i32 = arith.constant 0 : i32
    %8 = vector.broadcast %c0_i32 : i32 to vector<64x64xi32>
    %9 = arith.addi %8, %7 : vector<64x64xi32>
    %c32_i32 = arith.constant 32 : i32
    %10 = vector.broadcast %c32_i32 : i32 to vector<64x64xi32>
    %11 = arith.cmpi sge, %3, %10 : vector<64x64xi32>
    %12 = arith.extui %11 : vector<64x64xi1> to vector<64x64xi32>
    %13 = arith.addi %9, %12 : vector<64x64xi32>
    %c48_i32 = arith.constant 48 : i32
    %14 = vector.broadcast %c48_i32 : i32 to vector<64x64xi32>
    %15 = arith.cmpi sge, %3, %14 : vector<64x64xi32>
    %16 = arith.extui %15 : vector<64x64xi1> to vector<64x64xi32>
    %17 = arith.addi %13, %16 : vector<64x64xi32>
    %c16_i32_2 = arith.constant 16 : i32
    %18 = vector.broadcast %c16_i32_2 : i32 to vector<64x64xi32>
    %19 = arith.cmpi sge, %4, %18 : vector<64x64xi32>
    %20 = arith.extui %19 : vector<64x64xi1> to vector<64x64xi32>
    %c0_i32_3 = arith.constant 0 : i32
    %21 = vector.broadcast %c0_i32_3 : i32 to vector<64x64xi32>
    %22 = arith.addi %21, %20 : vector<64x64xi32>
    %c32_i32_4 = arith.constant 32 : i32
    %23 = vector.broadcast %c32_i32_4 : i32 to vector<64x64xi32>
    %24 = arith.cmpi sge, %4, %23 : vector<64x64xi32>
    %25 = arith.extui %24 : vector<64x64xi1> to vector<64x64xi32>
    %26 = arith.addi %22, %25 : vector<64x64xi32>
    %c48_i32_5 = arith.constant 48 : i32
    %27 = vector.broadcast %c48_i32_5 : i32 to vector<64x64xi32>
    %28 = arith.cmpi sge, %4, %27 : vector<64x64xi32>
    %29 = arith.extui %28 : vector<64x64xi1> to vector<64x64xi32>
    %30 = arith.addi %26, %29 : vector<64x64xi32>
    %31 = arith.cmpi eq, %17, %30 : vector<64x64xi32>
    %cst = arith.constant 0.000000e+00 : f32
    %cst_6 = arith.constant -1.000000e+09 : f32
    %32 = vector.broadcast %cst : f32 to vector<64x64xf32>
    %33 = vector.broadcast %cst_6 : f32 to vector<64x64xf32>
    %34 = arith.select %31, %32, %33 : vector<64x64xi1>, vector<64x64xf32>
    %35 = tpu.iota {dimensions = array<i32: 0>} : vector<32x64xi32>
    %36 = tpu.iota {dimensions = array<i32: 1>} : vector<32x64xi32>
    %c8_i32 = arith.constant 8 : i32
    %37 = vector.broadcast %c8_i32 : i32 to vector<32x64xi32>
    %38 = arith.cmpi sge, %35, %37 : vector<32x64xi32>
    %39 = arith.extui %38 : vector<32x64xi1> to vector<32x64xi32>
    %c0_i32_7 = arith.constant 0 : i32
    %40 = vector.broadcast %c0_i32_7 : i32 to vector<32x64xi32>
    %41 = arith.addi %40, %39 : vector<32x64xi32>
    %c16_i32_8 = arith.constant 16 : i32
    %42 = vector.broadcast %c16_i32_8 : i32 to vector<32x64xi32>
    %43 = arith.cmpi sge, %35, %42 : vector<32x64xi32>
    %44 = arith.extui %43 : vector<32x64xi1> to vector<32x64xi32>
    %45 = arith.addi %41, %44 : vector<32x64xi32>
    %c24_i32 = arith.constant 24 : i32
    %46 = vector.broadcast %c24_i32 : i32 to vector<32x64xi32>
    %47 = arith.cmpi sge, %35, %46 : vector<32x64xi32>
    %48 = arith.extui %47 : vector<32x64xi1> to vector<32x64xi32>
    %49 = arith.addi %45, %48 : vector<32x64xi32>
    %c16_i32_9 = arith.constant 16 : i32
    %50 = vector.broadcast %c16_i32_9 : i32 to vector<32x64xi32>
    %51 = arith.cmpi sge, %36, %50 : vector<32x64xi32>
    %52 = arith.extui %51 : vector<32x64xi1> to vector<32x64xi32>
    %c0_i32_10 = arith.constant 0 : i32
    %53 = vector.broadcast %c0_i32_10 : i32 to vector<32x64xi32>
    %54 = arith.addi %53, %52 : vector<32x64xi32>
    %c32_i32_11 = arith.constant 32 : i32
    %55 = vector.broadcast %c32_i32_11 : i32 to vector<32x64xi32>
    %56 = arith.cmpi sge, %36, %55 : vector<32x64xi32>
    %57 = arith.extui %56 : vector<32x64xi1> to vector<32x64xi32>
    %58 = arith.addi %54, %57 : vector<32x64xi32>
    %c48_i32_12 = arith.constant 48 : i32
    %59 = vector.broadcast %c48_i32_12 : i32 to vector<32x64xi32>
    %60 = arith.cmpi sge, %36, %59 : vector<32x64xi32>
    %61 = arith.extui %60 : vector<32x64xi1> to vector<32x64xi32>
    %62 = arith.addi %58, %61 : vector<32x64xi32>
    %63 = arith.cmpi eq, %49, %62 : vector<32x64xi32>
    %cst_13 = arith.constant 0.000000e+00 : f32
    %cst_14 = arith.constant -1.000000e+09 : f32
    %64 = vector.broadcast %cst_13 : f32 to vector<32x64xf32>
    %65 = vector.broadcast %cst_14 : f32 to vector<32x64xf32>
    %66 = arith.select %63, %64, %65 : vector<32x64xi1>, vector<32x64xf32>
    %67 = tpu.iota {dimensions = array<i32: 0>} : vector<64x32xi32>
    %68 = tpu.iota {dimensions = array<i32: 1>} : vector<64x32xi32>
    %c16_i32_15 = arith.constant 16 : i32
    %69 = vector.broadcast %c16_i32_15 : i32 to vector<64x32xi32>
    %70 = arith.cmpi sge, %67, %69 : vector<64x32xi32>
    %71 = arith.extui %70 : vector<64x32xi1> to vector<64x32xi32>
    %c0_i32_16 = arith.constant 0 : i32
    %72 = vector.broadcast %c0_i32_16 : i32 to vector<64x32xi32>
    %73 = arith.addi %72, %71 : vector<64x32xi32>
    %c32_i32_17 = arith.constant 32 : i32
    %74 = vector.broadcast %c32_i32_17 : i32 to vector<64x32xi32>
    %75 = arith.cmpi sge, %67, %74 : vector<64x32xi32>
    %76 = arith.extui %75 : vector<64x32xi1> to vector<64x32xi32>
    %77 = arith.addi %73, %76 : vector<64x32xi32>
    %c48_i32_18 = arith.constant 48 : i32
    %78 = vector.broadcast %c48_i32_18 : i32 to vector<64x32xi32>
    %79 = arith.cmpi sge, %67, %78 : vector<64x32xi32>
    %80 = arith.extui %79 : vector<64x32xi1> to vector<64x32xi32>
    %81 = arith.addi %77, %80 : vector<64x32xi32>
    %c8_i32_19 = arith.constant 8 : i32
    %82 = vector.broadcast %c8_i32_19 : i32 to vector<64x32xi32>
    %83 = arith.cmpi sge, %68, %82 : vector<64x32xi32>
    %84 = arith.extui %83 : vector<64x32xi1> to vector<64x32xi32>
    %c0_i32_20 = arith.constant 0 : i32
    %85 = vector.broadcast %c0_i32_20 : i32 to vector<64x32xi32>
    %86 = arith.addi %85, %84 : vector<64x32xi32>
    %c16_i32_21 = arith.constant 16 : i32
    %87 = vector.broadcast %c16_i32_21 : i32 to vector<64x32xi32>
    %88 = arith.cmpi sge, %68, %87 : vector<64x32xi32>
    %89 = arith.extui %88 : vector<64x32xi1> to vector<64x32xi32>
    %90 = arith.addi %86, %89 : vector<64x32xi32>
    %c24_i32_22 = arith.constant 24 : i32
    %91 = vector.broadcast %c24_i32_22 : i32 to vector<64x32xi32>
    %92 = arith.cmpi sge, %68, %91 : vector<64x32xi32>
    %93 = arith.extui %92 : vector<64x32xi1> to vector<64x32xi32>
    %94 = arith.addi %90, %93 : vector<64x32xi32>
    %95 = arith.cmpi eq, %81, %94 : vector<64x32xi32>
    %cst_23 = arith.constant 0.000000e+00 : f32
    %cst_24 = arith.constant -1.000000e+09 : f32
    %96 = vector.broadcast %cst_23 : f32 to vector<64x32xf32>
    %97 = vector.broadcast %cst_24 : f32 to vector<64x32xf32>
    %98 = arith.select %95, %96, %97 : vector<64x32xi1>, vector<64x32xf32>
    %99 = tpu.iota {dimensions = array<i32: 1>} : vector<1x32xi32>
    %c8_i32_25 = arith.constant 8 : i32
    %100 = vector.broadcast %c8_i32_25 : i32 to vector<1x32xi32>
    %101 = arith.cmpi sge, %99, %100 : vector<1x32xi32>
    %102 = arith.extui %101 : vector<1x32xi1> to vector<1x32xi32>
    %c0_i32_26 = arith.constant 0 : i32
    %103 = vector.broadcast %c0_i32_26 : i32 to vector<1x32xi32>
    %104 = arith.addi %103, %102 : vector<1x32xi32>
    %c16_i32_27 = arith.constant 16 : i32
    %105 = vector.broadcast %c16_i32_27 : i32 to vector<1x32xi32>
    %106 = arith.cmpi sge, %99, %105 : vector<1x32xi32>
    %107 = arith.extui %106 : vector<1x32xi1> to vector<1x32xi32>
    %108 = arith.addi %104, %107 : vector<1x32xi32>
    %c24_i32_28 = arith.constant 24 : i32
    %109 = vector.broadcast %c24_i32_28 : i32 to vector<1x32xi32>
    %110 = arith.cmpi sge, %99, %109 : vector<1x32xi32>
    %111 = arith.extui %110 : vector<1x32xi1> to vector<1x32xi32>
    %112 = arith.addi %108, %111 : vector<1x32xi32>
    %c8_i32_29 = arith.constant 8 : i32
    %113 = vector.broadcast %c8_i32_29 : i32 to vector<1x32xi32>
    %114 = arith.muli %112, %113 : vector<1x32xi32>
    %115 = arith.subi %99, %114 : vector<1x32xi32>
    %c0_30 = arith.constant 0 : index
    %c0_31 = arith.constant 0 : index
    %c0_32 = arith.constant 0 : index
    %116 = vector.load %arg2[%c0_30, %c0_31, %c0_32] : memref<2x1x1xi32, #tpu.memory_space<vmem>>, vector<2x1x1xi32>
    %117 = vector.shape_cast %115 : vector<1x32xi32> to vector<1x1x32xi32>
    %118 = vector.broadcast %117 : vector<1x1x32xi32> to vector<2x1x32xi32>
    %119 = vector.broadcast %116 : vector<2x1x1xi32> to vector<2x1x32xi32>
    %120 = arith.cmpi sge, %118, %119 : vector<2x1x32xi32>
    %cst_33 = arith.constant -1.000000e+09 : f32
    %cst_34 = arith.constant 0.000000e+00 : f32
    %121 = vector.broadcast %cst_33 : f32 to vector<2x1x32xf32>
    %122 = vector.broadcast %cst_34 : f32 to vector<2x1x32xf32>
    %123 = arith.select %120, %121, %122 : vector<2x1x32xi1>, vector<2x1x32xf32>
    %c0_35 = arith.constant 0 : index
    %c0_36 = arith.constant 0 : index
    %c0_37 = arith.constant 0 : index
    %124 = vector.load %arg3[%c0_35, %c0_36, %c0_37] : memref<6x32x96xbf16, #tpu.memory_space<vmem>>, vector<1x32x96xbf16>
    %125 = vector.shape_cast %124 : vector<1x32x96xbf16> to vector<32x96xbf16>
    %c0_38 = arith.constant 0 : index
    %c0_39 = arith.constant 0 : index
    %c0_40 = arith.constant 0 : index
    %126 = vector.load %arg4[%c0_38, %c0_39, %c0_40] : memref<6x32x32xbf16, #tpu.memory_space<vmem>>, vector<1x32x32xbf16>
    %127 = vector.shape_cast %126 : vector<1x32x32xbf16> to vector<32x32xbf16>
    %c0_41 = arith.constant 0 : index
    %c0_42 = arith.constant 0 : index
    %c0_43 = arith.constant 0 : index
    %128 = vector.load %arg7[%c0_41, %c0_42, %c0_43] : memref<6x4x32xf32, #tpu.memory_space<vmem>>, vector<1x4x32xf32>
    %129 = vector.shape_cast %128 : vector<1x4x32xf32> to vector<4x32xf32>
    %c0_44 = arith.constant 0 : index
    %c0_45 = arith.constant 0 : index
    %c0_46 = arith.constant 0 : index
    %130 = vector.load %arg5[%c0_44, %c0_45, %c0_46] : memref<6x32x64xbf16, #tpu.memory_space<vmem>>, vector<1x32x64xbf16>
    %131 = vector.shape_cast %130 : vector<1x32x64xbf16> to vector<32x64xbf16>
    %c0_47 = arith.constant 0 : index
    %c0_48 = arith.constant 0 : index
    %c0_49 = arith.constant 0 : index
    %132 = vector.load %arg8[%c0_47, %c0_48, %c0_49] : memref<6x1x64xf32, #tpu.memory_space<vmem>>, vector<1x1x64xf32>
    %133 = vector.shape_cast %132 : vector<1x1x64xf32> to vector<1x64xf32>
    %c0_50 = arith.constant 0 : index
    %c0_51 = arith.constant 0 : index
    %c0_52 = arith.constant 0 : index
    %134 = vector.load %arg6[%c0_50, %c0_51, %c0_52] : memref<6x64x32xbf16, #tpu.memory_space<vmem>>, vector<1x64x32xbf16>
    %135 = vector.shape_cast %134 : vector<1x64x32xbf16> to vector<64x32xbf16>
    %136 = vector.shape_cast %2 : vector<2x16x32xf32> to vector<32x32xf32>
    %137 = arith.truncf %136 : vector<32x32xf32> to vector<32x32xbf16>
    %cst_53 = arith.constant dense<0.000000e+00> : vector<32x96xf32>
    %138 = tpu.matmul %137, %125, %cst_53 {dimension_numbers = #tpu.dot_dimension_numbers<[1], [0], [0], [1], [0, 0, 1, 1], [], []>} : vector<32x32xbf16>, vector<32x96xbf16>, vector<32x96xf32> -> vector<32x96xf32>
    %139 = vector.extract_strided_slice %138 {offsets = [0, 0], sizes = [32, 32], strides = [1, 1]} : vector<32x96xf32> to vector<32x32xf32>
    %140 = vector.extract_strided_slice %138 {offsets = [0, 32], sizes = [32, 32], strides = [1, 1]} : vector<32x96xf32> to vector<32x32xf32>
    %141 = vector.extract_strided_slice %138 {offsets = [0, 64], sizes = [32, 32], strides = [1, 1]} : vector<32x96xf32> to vector<32x32xf32>
    %142 = vector.shape_cast %139 : vector<32x32xf32> to vector<2x16x32xf32>
    %143 = vector.extract_strided_slice %142 {offsets = [0, 0, 0], sizes = [2, 16, 8], strides = [1, 1, 1]} : vector<2x16x32xf32> to vector<2x16x8xf32>
    %144 = vector.extract_strided_slice %142 {offsets = [0, 0, 8], sizes = [2, 16, 8], strides = [1, 1, 1]} : vector<2x16x32xf32> to vector<2x16x8xf32>
    %145 = vector.extract_strided_slice %142 {offsets = [0, 0, 16], sizes = [2, 16, 8], strides = [1, 1, 1]} : vector<2x16x32xf32> to vector<2x16x8xf32>
    %146 = vector.extract_strided_slice %142 {offsets = [0, 0, 24], sizes = [2, 16, 8], strides = [1, 1, 1]} : vector<2x16x32xf32> to vector<2x16x8xf32>
    %147 = tpu.concatenate %143, %144, %145, %146 in 1 : vector<2x16x8xf32>, vector<2x16x8xf32>, vector<2x16x8xf32>, vector<2x16x8xf32> -> vector<2x64x8xf32>
    %148 = arith.truncf %147 : vector<2x64x8xf32> to vector<2x64x8xbf16>
    %149 = vector.shape_cast %140 : vector<32x32xf32> to vector<2x16x32xf32>
    %150 = vector.extract_strided_slice %149 {offsets = [0, 0, 0], sizes = [2, 16, 8], strides = [1, 1, 1]} : vector<2x16x32xf32> to vector<2x16x8xf32>
    %151 = vector.extract_strided_slice %149 {offsets = [0, 0, 8], sizes = [2, 16, 8], strides = [1, 1, 1]} : vector<2x16x32xf32> to vector<2x16x8xf32>
    %152 = vector.extract_strided_slice %149 {offsets = [0, 0, 16], sizes = [2, 16, 8], strides = [1, 1, 1]} : vector<2x16x32xf32> to vector<2x16x8xf32>
    %153 = vector.extract_strided_slice %149 {offsets = [0, 0, 24], sizes = [2, 16, 8], strides = [1, 1, 1]} : vector<2x16x32xf32> to vector<2x16x8xf32>
    %154 = tpu.concatenate %150, %151, %152, %153 in 1 : vector<2x16x8xf32>, vector<2x16x8xf32>, vector<2x16x8xf32>, vector<2x16x8xf32> -> vector<2x64x8xf32>
    %155 = arith.truncf %154 : vector<2x64x8xf32> to vector<2x64x8xbf16>
    %156 = vector.shape_cast %141 : vector<32x32xf32> to vector<2x16x32xf32>
    %157 = vector.extract_strided_slice %156 {offsets = [0, 0, 0], sizes = [2, 16, 8], strides = [1, 1, 1]} : vector<2x16x32xf32> to vector<2x16x8xf32>
    %158 = vector.extract_strided_slice %156 {offsets = [0, 0, 8], sizes = [2, 16, 8], strides = [1, 1, 1]} : vector<2x16x32xf32> to vector<2x16x8xf32>
    %159 = vector.extract_strided_slice %156 {offsets = [0, 0, 16], sizes = [2, 16, 8], strides = [1, 1, 1]} : vector<2x16x32xf32> to vector<2x16x8xf32>
    %160 = vector.extract_strided_slice %156 {offsets = [0, 0, 24], sizes = [2, 16, 8], strides = [1, 1, 1]} : vector<2x16x32xf32> to vector<2x16x8xf32>
    %161 = tpu.concatenate %157, %158, %159, %160 in 1 : vector<2x16x8xf32>, vector<2x16x8xf32>, vector<2x16x8xf32>, vector<2x16x8xf32> -> vector<2x64x8xf32>
    %162 = arith.truncf %161 : vector<2x64x8xf32> to vector<2x64x8xbf16>
    "tpu.trace_start"() <{level = 10 : i32, message = "bqd,bkd->bqk"}> : () -> ()
    %cst_54 = arith.constant dense<0.000000e+00> : vector<2x64x64xf32>
    %163 = tpu.matmul %148, %155, %cst_54 {dimension_numbers = #tpu.dot_dimension_numbers<[2], [2], [1], [1], [0, 0, 0, 1, 1, 1], [0], [0]>} : vector<2x64x8xbf16>, vector<2x64x8xbf16>, vector<2x64x64xf32> -> vector<2x64x64xf32>
    "tpu.trace_stop"() : () -> ()
    %164 = vector.shape_cast %34 : vector<64x64xf32> to vector<1x64x64xf32>
    %165 = vector.broadcast %164 : vector<1x64x64xf32> to vector<2x64x64xf32>
    %166 = arith.addf %163, %165 : vector<2x64x64xf32>
    %cst_55 = arith.constant dense<0xFF800000> : vector<2x64xf32>
    %167 = vector.multi_reduction <maximumf>, %166, %cst_55 [2] : vector<2x64x64xf32> to vector<2x64xf32>
    %168 = vector.shape_cast %167 : vector<2x64xf32> to vector<2x64x1xf32>
    %169 = vector.broadcast %168 : vector<2x64x1xf32> to vector<2x64x64xf32>
    %170 = arith.subf %166, %169 : vector<2x64x64xf32>
    %171 = math.exp %170 : vector<2x64x64xf32>
    %cst_56 = arith.constant dense<0.000000e+00> : vector<2x64xf32>
    %172 = vector.multi_reduction <add>, %171, %cst_56 [2] : vector<2x64x64xf32> to vector<2x64xf32>
    %173 = vector.shape_cast %172 : vector<2x64xf32> to vector<2x64x1xf32>
    %174 = tpu.reciprocal %173 {approx = true} : vector<2x64x1xf32> -> vector<2x64x1xf32>
    %175 = vector.broadcast %174 : vector<2x64x1xf32> to vector<2x64x64xf32>
    %176 = arith.mulf %171, %175 : vector<2x64x64xf32>
    %177 = arith.truncf %176 : vector<2x64x64xf32> to vector<2x64x64xbf16>
    "tpu.trace_start"() <{level = 10 : i32, message = "bqk,bkd->bqd"}> : () -> ()
    %cst_57 = arith.constant dense<0.000000e+00> : vector<2x64x8xf32>
    %178 = tpu.matmul %177, %162, %cst_57 {dimension_numbers = #tpu.dot_dimension_numbers<[2], [1], [1], [2], [0, 0, 0, 1, 1, 2], [0], [0]>} : vector<2x64x64xbf16>, vector<2x64x8xbf16>, vector<2x64x8xf32> -> vector<2x64x8xf32>
    "tpu.trace_stop"() : () -> ()
    %179 = vector.extract_strided_slice %178 {offsets = [0, 0, 0], sizes = [2, 16, 8], strides = [1, 1, 1]} : vector<2x64x8xf32> to vector<2x16x8xf32>
    %180 = vector.extract_strided_slice %178 {offsets = [0, 16, 0], sizes = [2, 16, 8], strides = [1, 1, 1]} : vector<2x64x8xf32> to vector<2x16x8xf32>
    %181 = vector.extract_strided_slice %178 {offsets = [0, 32, 0], sizes = [2, 16, 8], strides = [1, 1, 1]} : vector<2x64x8xf32> to vector<2x16x8xf32>
    %182 = vector.extract_strided_slice %178 {offsets = [0, 48, 0], sizes = [2, 16, 8], strides = [1, 1, 1]} : vector<2x64x8xf32> to vector<2x16x8xf32>
    %183 = tpu.concatenate %179, %180, %181, %182 in 2 : vector<2x16x8xf32>, vector<2x16x8xf32>, vector<2x16x8xf32>, vector<2x16x8xf32> -> vector<2x16x32xf32>
    %184 = vector.shape_cast %183 : vector<2x16x32xf32> to vector<32x32xf32>
    %185 = vector.extract_strided_slice %129 {offsets = [0, 0], sizes = [1, 32], strides = [1, 1]} : vector<4x32xf32> to vector<1x32xf32>
    %186 = vector.extract_strided_slice %129 {offsets = [1, 0], sizes = [1, 32], strides = [1, 1]} : vector<4x32xf32> to vector<1x32xf32>
    %187 = vector.extract_strided_slice %129 {offsets = [2, 0], sizes = [1, 32], strides = [1, 1]} : vector<4x32xf32> to vector<1x32xf32>
    %188 = vector.extract_strided_slice %129 {offsets = [3, 0], sizes = [1, 32], strides = [1, 1]} : vector<4x32xf32> to vector<1x32xf32>
    %189 = arith.truncf %184 : vector<32x32xf32> to vector<32x32xbf16>
    %cst_58 = arith.constant dense<0.000000e+00> : vector<32x32xf32>
    %190 = tpu.matmul %189, %127, %cst_58 {dimension_numbers = #tpu.dot_dimension_numbers<[1], [0], [0], [1], [0, 0, 1, 1], [], []>} : vector<32x32xbf16>, vector<32x32xbf16>, vector<32x32xf32> -> vector<32x32xf32>
    %191 = vector.broadcast %185 : vector<1x32xf32> to vector<32x32xf32>
    %192 = arith.addf %190, %191 : vector<32x32xf32>
    %193 = arith.addf %136, %192 : vector<32x32xf32>
    %194 = vector.shape_cast %193 : vector<32x32xf32> to vector<2x16x32xf32>
    %cst_59 = arith.constant dense<0.000000e+00> : vector<2x32xf32>
    %195 = vector.multi_reduction <add>, %194, %cst_59 [1] : vector<2x16x32xf32> to vector<2x32xf32>
    %196 = vector.shape_cast %195 : vector<2x32xf32> to vector<2x1x32xf32>
    %cst_60 = arith.constant 1.600000e+01 : f32
    %197 = vector.broadcast %cst_60 : f32 to vector<2x1x32xf32>
    %198 = arith.divf %196, %197 : vector<2x1x32xf32>
    %199 = vector.broadcast %198 : vector<2x1x32xf32> to vector<2x16x32xf32>
    %200 = arith.subf %194, %199 : vector<2x16x32xf32>
    %201 = arith.mulf %200, %200 : vector<2x16x32xf32>
    %cst_61 = arith.constant dense<0.000000e+00> : vector<2x32xf32>
    %202 = vector.multi_reduction <add>, %201, %cst_61 [1] : vector<2x16x32xf32> to vector<2x32xf32>
    %203 = vector.shape_cast %202 : vector<2x32xf32> to vector<2x1x32xf32>
    %cst_62 = arith.constant 1.600000e+01 : f32
    %204 = vector.broadcast %cst_62 : f32 to vector<2x1x32xf32>
    %205 = arith.divf %203, %204 : vector<2x1x32xf32>
    %206 = vector.broadcast %198 : vector<2x1x32xf32> to vector<2x16x32xf32>
    %207 = arith.subf %194, %206 : vector<2x16x32xf32>
    %cst_63 = arith.constant 9.99999974E-6 : f32
    %208 = vector.broadcast %cst_63 : f32 to vector<2x1x32xf32>
    %209 = arith.addf %205, %208 : vector<2x1x32xf32>
    %210 = math.rsqrt %209 : vector<2x1x32xf32>
    %211 = vector.broadcast %210 : vector<2x1x32xf32> to vector<2x16x32xf32>
    %212 = arith.mulf %207, %211 : vector<2x16x32xf32>
    %213 = vector.shape_cast %186 : vector<1x32xf32> to vector<1x1x32xf32>
    %214 = vector.broadcast %213 : vector<1x1x32xf32> to vector<2x16x32xf32>
    %215 = arith.mulf %212, %214 : vector<2x16x32xf32>
    %216 = vector.shape_cast %187 : vector<1x32xf32> to vector<1x1x32xf32>
    %217 = vector.broadcast %216 : vector<1x1x32xf32> to vector<2x16x32xf32>
    %218 = arith.addf %215, %217 : vector<2x16x32xf32>
    %219 = vector.shape_cast %218 : vector<2x16x32xf32> to vector<32x32xf32>
    %220 = arith.truncf %219 : vector<32x32xf32> to vector<32x32xbf16>
    %cst_64 = arith.constant dense<0.000000e+00> : vector<32x64xf32>
    %221 = tpu.matmul %220, %131, %cst_64 {dimension_numbers = #tpu.dot_dimension_numbers<[1], [0], [0], [1], [0, 0, 1, 1], [], []>} : vector<32x32xbf16>, vector<32x64xbf16>, vector<32x64xf32> -> vector<32x64xf32>
    %222 = vector.broadcast %133 : vector<1x64xf32> to vector<32x64xf32>
    %223 = arith.addf %221, %222 : vector<32x64xf32>
    %cst_65 = arith.constant 0.000000e+00 : f32
    %224 = vector.broadcast %cst_65 : f32 to vector<32x64xf32>
    %225 = arith.maximumf %223, %224 : vector<32x64xf32>
    %226 = arith.truncf %225 : vector<32x64xf32> to vector<32x64xbf16>
    %cst_66 = arith.constant dense<0.000000e+00> : vector<32x32xf32>
    %227 = tpu.matmul %226, %135, %cst_66 {dimension_numbers = #tpu.dot_dimension_numbers<[1], [0], [0], [1], [0, 0, 1, 1], [], []>} : vector<32x64xbf16>, vector<64x32xbf16>, vector<32x32xf32> -> vector<32x32xf32>
    %228 = vector.broadcast %188 : vector<1x32xf32> to vector<32x32xf32>
    %229 = arith.addf %227, %228 : vector<32x32xf32>
    %230 = vector.shape_cast %229 : vector<32x32xf32> to vector<2x16x32xf32>
    %c1 = arith.constant 1 : index
    %c0_67 = arith.constant 0 : index
    %c0_68 = arith.constant 0 : index
    %231 = vector.load %arg3[%c1, %c0_67, %c0_68] : memref<6x32x96xbf16, #tpu.memory_space<vmem>>, vector<1x32x96xbf16>
    %232 = vector.shape_cast %231 : vector<1x32x96xbf16> to vector<32x96xbf16>
    %c1_69 = arith.constant 1 : index
    %c0_70 = arith.constant 0 : index
    %c0_71 = arith.constant 0 : index
    %233 = vector.load %arg4[%c1_69, %c0_70, %c0_71] : memref<6x32x32xbf16, #tpu.memory_space<vmem>>, vector<1x32x32xbf16>
    %234 = vector.shape_cast %233 : vector<1x32x32xbf16> to vector<32x32xbf16>
    %c1_72 = arith.constant 1 : index
    %c0_73 = arith.constant 0 : index
    %c0_74 = arith.constant 0 : index
    %235 = vector.load %arg7[%c1_72, %c0_73, %c0_74] : memref<6x4x32xf32, #tpu.memory_space<vmem>>, vector<1x4x32xf32>
    %236 = vector.shape_cast %235 : vector<1x4x32xf32> to vector<4x32xf32>
    %c1_75 = arith.constant 1 : index
    %c0_76 = arith.constant 0 : index
    %c0_77 = arith.constant 0 : index
    %237 = vector.load %arg5[%c1_75, %c0_76, %c0_77] : memref<6x32x64xbf16, #tpu.memory_space<vmem>>, vector<1x32x64xbf16>
    %238 = vector.shape_cast %237 : vector<1x32x64xbf16> to vector<32x64xbf16>
    %c1_78 = arith.constant 1 : index
    %c0_79 = arith.constant 0 : index
    %c0_80 = arith.constant 0 : index
    %239 = vector.load %arg8[%c1_78, %c0_79, %c0_80] : memref<6x1x64xf32, #tpu.memory_space<vmem>>, vector<1x1x64xf32>
    %240 = vector.shape_cast %239 : vector<1x1x64xf32> to vector<1x64xf32>
    %c1_81 = arith.constant 1 : index
    %c0_82 = arith.constant 0 : index
    %c0_83 = arith.constant 0 : index
    %241 = vector.load %arg6[%c1_81, %c0_82, %c0_83] : memref<6x64x32xbf16, #tpu.memory_space<vmem>>, vector<1x64x32xbf16>
    %242 = vector.shape_cast %241 : vector<1x64x32xbf16> to vector<64x32xbf16>
    %243 = vector.shape_cast %1 : vector<2x8x32xf32> to vector<16x32xf32>
    %244 = arith.truncf %243 : vector<16x32xf32> to vector<16x32xbf16>
    %245 = vector.shape_cast %230 : vector<2x16x32xf32> to vector<32x32xf32>
    %246 = arith.truncf %245 : vector<32x32xf32> to vector<32x32xbf16>
    %247 = vector.extract_strided_slice %232 {offsets = [0, 0], sizes = [32, 32], strides = [1, 1]} : vector<32x96xbf16> to vector<32x32xbf16>
    %cst_84 = arith.constant dense<0.000000e+00> : vector<16x32xf32>
    %248 = tpu.matmul %244, %247, %cst_84 {dimension_numbers = #tpu.dot_dimension_numbers<[1], [0], [0], [1], [0, 0, 1, 1], [], []>} : vector<16x32xbf16>, vector<32x32xbf16>, vector<16x32xf32> -> vector<16x32xf32>
    %249 = vector.extract_strided_slice %232 {offsets = [0, 32], sizes = [32, 64], strides = [1, 1]} : vector<32x96xbf16> to vector<32x64xbf16>
    %cst_85 = arith.constant dense<0.000000e+00> : vector<32x64xf32>
    %250 = tpu.matmul %246, %249, %cst_85 {dimension_numbers = #tpu.dot_dimension_numbers<[1], [0], [0], [1], [0, 0, 1, 1], [], []>} : vector<32x32xbf16>, vector<32x64xbf16>, vector<32x64xf32> -> vector<32x64xf32>
    %251 = vector.extract_strided_slice %250 {offsets = [0, 0], sizes = [32, 32], strides = [1, 1]} : vector<32x64xf32> to vector<32x32xf32>
    %252 = vector.extract_strided_slice %250 {offsets = [0, 32], sizes = [32, 32], strides = [1, 1]} : vector<32x64xf32> to vector<32x32xf32>
    %253 = vector.shape_cast %248 : vector<16x32xf32> to vector<2x8x32xf32>
    %254 = vector.extract_strided_slice %253 {offsets = [0, 0, 0], sizes = [2, 8, 8], strides = [1, 1, 1]} : vector<2x8x32xf32> to vector<2x8x8xf32>
    %255 = vector.extract_strided_slice %253 {offsets = [0, 0, 8], sizes = [2, 8, 8], strides = [1, 1, 1]} : vector<2x8x32xf32> to vector<2x8x8xf32>
    %256 = vector.extract_strided_slice %253 {offsets = [0, 0, 16], sizes = [2, 8, 8], strides = [1, 1, 1]} : vector<2x8x32xf32> to vector<2x8x8xf32>
    %257 = vector.extract_strided_slice %253 {offsets = [0, 0, 24], sizes = [2, 8, 8], strides = [1, 1, 1]} : vector<2x8x32xf32> to vector<2x8x8xf32>
    %258 = tpu.concatenate %254, %255, %256, %257 in 1 : vector<2x8x8xf32>, vector<2x8x8xf32>, vector<2x8x8xf32>, vector<2x8x8xf32> -> vector<2x32x8xf32>
    %259 = arith.truncf %258 : vector<2x32x8xf32> to vector<2x32x8xbf16>
    %260 = vector.shape_cast %251 : vector<32x32xf32> to vector<2x16x32xf32>
    %261 = vector.extract_strided_slice %260 {offsets = [0, 0, 0], sizes = [2, 16, 8], strides = [1, 1, 1]} : vector<2x16x32xf32> to vector<2x16x8xf32>
    %262 = vector.extract_strided_slice %260 {offsets = [0, 0, 8], sizes = [2, 16, 8], strides = [1, 1, 1]} : vector<2x16x32xf32> to vector<2x16x8xf32>
    %263 = vector.extract_strided_slice %260 {offsets = [0, 0, 16], sizes = [2, 16, 8], strides = [1, 1, 1]} : vector<2x16x32xf32> to vector<2x16x8xf32>
    %264 = vector.extract_strided_slice %260 {offsets = [0, 0, 24], sizes = [2, 16, 8], strides = [1, 1, 1]} : vector<2x16x32xf32> to vector<2x16x8xf32>
    %265 = tpu.concatenate %261, %262, %263, %264 in 1 : vector<2x16x8xf32>, vector<2x16x8xf32>, vector<2x16x8xf32>, vector<2x16x8xf32> -> vector<2x64x8xf32>
    %266 = arith.truncf %265 : vector<2x64x8xf32> to vector<2x64x8xbf16>
    %267 = vector.shape_cast %252 : vector<32x32xf32> to vector<2x16x32xf32>
    %268 = vector.extract_strided_slice %267 {offsets = [0, 0, 0], sizes = [2, 16, 8], strides = [1, 1, 1]} : vector<2x16x32xf32> to vector<2x16x8xf32>
    %269 = vector.extract_strided_slice %267 {offsets = [0, 0, 8], sizes = [2, 16, 8], strides = [1, 1, 1]} : vector<2x16x32xf32> to vector<2x16x8xf32>
    %270 = vector.extract_strided_slice %267 {offsets = [0, 0, 16], sizes = [2, 16, 8], strides = [1, 1, 1]} : vector<2x16x32xf32> to vector<2x16x8xf32>
    %271 = vector.extract_strided_slice %267 {offsets = [0, 0, 24], sizes = [2, 16, 8], strides = [1, 1, 1]} : vector<2x16x32xf32> to vector<2x16x8xf32>
    %272 = tpu.concatenate %268, %269, %270, %271 in 1 : vector<2x16x8xf32>, vector<2x16x8xf32>, vector<2x16x8xf32>, vector<2x16x8xf32> -> vector<2x64x8xf32>
    %273 = arith.truncf %272 : vector<2x64x8xf32> to vector<2x64x8xbf16>
    "tpu.trace_start"() <{level = 10 : i32, message = "bqd,bkd->bqk"}> : () -> ()
    %cst_86 = arith.constant dense<0.000000e+00> : vector<2x32x64xf32>
    %274 = tpu.matmul %259, %266, %cst_86 {dimension_numbers = #tpu.dot_dimension_numbers<[2], [2], [1], [1], [0, 0, 0, 1, 1, 1], [0], [0]>} : vector<2x32x8xbf16>, vector<2x64x8xbf16>, vector<2x32x64xf32> -> vector<2x32x64xf32>
    "tpu.trace_stop"() : () -> ()
    %275 = vector.shape_cast %66 : vector<32x64xf32> to vector<1x32x64xf32>
    %276 = vector.broadcast %275 : vector<1x32x64xf32> to vector<2x32x64xf32>
    %277 = arith.addf %274, %276 : vector<2x32x64xf32>
    %cst_87 = arith.constant dense<0xFF800000> : vector<2x32xf32>
    %278 = vector.multi_reduction <maximumf>, %277, %cst_87 [2] : vector<2x32x64xf32> to vector<2x32xf32>
    %279 = vector.shape_cast %278 : vector<2x32xf32> to vector<2x32x1xf32>
    %280 = vector.broadcast %279 : vector<2x32x1xf32> to vector<2x32x64xf32>
    %281 = arith.subf %277, %280 : vector<2x32x64xf32>
    %282 = math.exp %281 : vector<2x32x64xf32>
    %cst_88 = arith.constant dense<0.000000e+00> : vector<2x32xf32>
    %283 = vector.multi_reduction <add>, %282, %cst_88 [2] : vector<2x32x64xf32> to vector<2x32xf32>
    %284 = vector.shape_cast %283 : vector<2x32xf32> to vector<2x32x1xf32>
    %285 = tpu.reciprocal %284 {approx = true} : vector<2x32x1xf32> -> vector<2x32x1xf32>
    %286 = vector.broadcast %285 : vector<2x32x1xf32> to vector<2x32x64xf32>
    %287 = arith.mulf %282, %286 : vector<2x32x64xf32>
    %288 = arith.truncf %287 : vector<2x32x64xf32> to vector<2x32x64xbf16>
    "tpu.trace_start"() <{level = 10 : i32, message = "bqk,bkd->bqd"}> : () -> ()
    %cst_89 = arith.constant dense<0.000000e+00> : vector<2x32x8xf32>
    %289 = tpu.matmul %288, %273, %cst_89 {dimension_numbers = #tpu.dot_dimension_numbers<[2], [1], [1], [2], [0, 0, 0, 1, 1, 2], [0], [0]>} : vector<2x32x64xbf16>, vector<2x64x8xbf16>, vector<2x32x8xf32> -> vector<2x32x8xf32>
    "tpu.trace_stop"() : () -> ()
    %290 = vector.extract_strided_slice %289 {offsets = [0, 0, 0], sizes = [2, 8, 8], strides = [1, 1, 1]} : vector<2x32x8xf32> to vector<2x8x8xf32>
    %291 = vector.extract_strided_slice %289 {offsets = [0, 8, 0], sizes = [2, 8, 8], strides = [1, 1, 1]} : vector<2x32x8xf32> to vector<2x8x8xf32>
    %292 = vector.extract_strided_slice %289 {offsets = [0, 16, 0], sizes = [2, 8, 8], strides = [1, 1, 1]} : vector<2x32x8xf32> to vector<2x8x8xf32>
    %293 = vector.extract_strided_slice %289 {offsets = [0, 24, 0], sizes = [2, 8, 8], strides = [1, 1, 1]} : vector<2x32x8xf32> to vector<2x8x8xf32>
    %294 = tpu.concatenate %290, %291, %292, %293 in 2 : vector<2x8x8xf32>, vector<2x8x8xf32>, vector<2x8x8xf32>, vector<2x8x8xf32> -> vector<2x8x32xf32>
    %295 = vector.shape_cast %294 : vector<2x8x32xf32> to vector<16x32xf32>
    %296 = vector.extract_strided_slice %236 {offsets = [0, 0], sizes = [1, 32], strides = [1, 1]} : vector<4x32xf32> to vector<1x32xf32>
    %297 = vector.extract_strided_slice %236 {offsets = [1, 0], sizes = [1, 32], strides = [1, 1]} : vector<4x32xf32> to vector<1x32xf32>
    %298 = vector.extract_strided_slice %236 {offsets = [2, 0], sizes = [1, 32], strides = [1, 1]} : vector<4x32xf32> to vector<1x32xf32>
    %299 = vector.extract_strided_slice %236 {offsets = [3, 0], sizes = [1, 32], strides = [1, 1]} : vector<4x32xf32> to vector<1x32xf32>
    %300 = arith.truncf %295 : vector<16x32xf32> to vector<16x32xbf16>
    %cst_90 = arith.constant dense<0.000000e+00> : vector<16x32xf32>
    %301 = tpu.matmul %300, %234, %cst_90 {dimension_numbers = #tpu.dot_dimension_numbers<[1], [0], [0], [1], [0, 0, 1, 1], [], []>} : vector<16x32xbf16>, vector<32x32xbf16>, vector<16x32xf32> -> vector<16x32xf32>
    %302 = vector.broadcast %296 : vector<1x32xf32> to vector<16x32xf32>
    %303 = arith.addf %301, %302 : vector<16x32xf32>
    %304 = arith.addf %243, %303 : vector<16x32xf32>
    %305 = vector.shape_cast %304 : vector<16x32xf32> to vector<2x8x32xf32>
    %cst_91 = arith.constant dense<0.000000e+00> : vector<2x32xf32>
    %306 = vector.multi_reduction <add>, %305, %cst_91 [1] : vector<2x8x32xf32> to vector<2x32xf32>
    %307 = vector.shape_cast %306 : vector<2x32xf32> to vector<2x1x32xf32>
    %cst_92 = arith.constant 8.000000e+00 : f32
    %308 = vector.broadcast %cst_92 : f32 to vector<2x1x32xf32>
    %309 = arith.divf %307, %308 : vector<2x1x32xf32>
    %310 = vector.broadcast %309 : vector<2x1x32xf32> to vector<2x8x32xf32>
    %311 = arith.subf %305, %310 : vector<2x8x32xf32>
    %312 = arith.mulf %311, %311 : vector<2x8x32xf32>
    %cst_93 = arith.constant dense<0.000000e+00> : vector<2x32xf32>
    %313 = vector.multi_reduction <add>, %312, %cst_93 [1] : vector<2x8x32xf32> to vector<2x32xf32>
    %314 = vector.shape_cast %313 : vector<2x32xf32> to vector<2x1x32xf32>
    %cst_94 = arith.constant 8.000000e+00 : f32
    %315 = vector.broadcast %cst_94 : f32 to vector<2x1x32xf32>
    %316 = arith.divf %314, %315 : vector<2x1x32xf32>
    %317 = vector.broadcast %309 : vector<2x1x32xf32> to vector<2x8x32xf32>
    %318 = arith.subf %305, %317 : vector<2x8x32xf32>
    %cst_95 = arith.constant 9.99999974E-6 : f32
    %319 = vector.broadcast %cst_95 : f32 to vector<2x1x32xf32>
    %320 = arith.addf %316, %319 : vector<2x1x32xf32>
    %321 = math.rsqrt %320 : vector<2x1x32xf32>
    %322 = vector.broadcast %321 : vector<2x1x32xf32> to vector<2x8x32xf32>
    %323 = arith.mulf %318, %322 : vector<2x8x32xf32>
    %324 = vector.shape_cast %297 : vector<1x32xf32> to vector<1x1x32xf32>
    %325 = vector.broadcast %324 : vector<1x1x32xf32> to vector<2x8x32xf32>
    %326 = arith.mulf %323, %325 : vector<2x8x32xf32>
    %327 = vector.shape_cast %298 : vector<1x32xf32> to vector<1x1x32xf32>
    %328 = vector.broadcast %327 : vector<1x1x32xf32> to vector<2x8x32xf32>
    %329 = arith.addf %326, %328 : vector<2x8x32xf32>
    %330 = vector.shape_cast %329 : vector<2x8x32xf32> to vector<16x32xf32>
    %331 = arith.truncf %330 : vector<16x32xf32> to vector<16x32xbf16>
    %cst_96 = arith.constant dense<0.000000e+00> : vector<16x64xf32>
    %332 = tpu.matmul %331, %238, %cst_96 {dimension_numbers = #tpu.dot_dimension_numbers<[1], [0], [0], [1], [0, 0, 1, 1], [], []>} : vector<16x32xbf16>, vector<32x64xbf16>, vector<16x64xf32> -> vector<16x64xf32>
    %333 = vector.broadcast %240 : vector<1x64xf32> to vector<16x64xf32>
    %334 = arith.addf %332, %333 : vector<16x64xf32>
    %cst_97 = arith.constant 0.000000e+00 : f32
    %335 = vector.broadcast %cst_97 : f32 to vector<16x64xf32>
    %336 = arith.maximumf %334, %335 : vector<16x64xf32>
    %337 = arith.truncf %336 : vector<16x64xf32> to vector<16x64xbf16>
    %cst_98 = arith.constant dense<0.000000e+00> : vector<16x32xf32>
    %338 = tpu.matmul %337, %242, %cst_98 {dimension_numbers = #tpu.dot_dimension_numbers<[1], [0], [0], [1], [0, 0, 1, 1], [], []>} : vector<16x64xbf16>, vector<64x32xbf16>, vector<16x32xf32> -> vector<16x32xf32>
    %339 = vector.broadcast %299 : vector<1x32xf32> to vector<16x32xf32>
    %340 = arith.addf %338, %339 : vector<16x32xf32>
    %341 = vector.shape_cast %340 : vector<16x32xf32> to vector<2x8x32xf32>
    %c2 = arith.constant 2 : index
    %c0_99 = arith.constant 0 : index
    %c0_100 = arith.constant 0 : index
    %342 = vector.load %arg3[%c2, %c0_99, %c0_100] : memref<6x32x96xbf16, #tpu.memory_space<vmem>>, vector<1x32x96xbf16>
    %343 = vector.shape_cast %342 : vector<1x32x96xbf16> to vector<32x96xbf16>
    %c2_101 = arith.constant 2 : index
    %c0_102 = arith.constant 0 : index
    %c0_103 = arith.constant 0 : index
    %344 = vector.load %arg4[%c2_101, %c0_102, %c0_103] : memref<6x32x32xbf16, #tpu.memory_space<vmem>>, vector<1x32x32xbf16>
    %345 = vector.shape_cast %344 : vector<1x32x32xbf16> to vector<32x32xbf16>
    %c2_104 = arith.constant 2 : index
    %c0_105 = arith.constant 0 : index
    %c0_106 = arith.constant 0 : index
    %346 = vector.load %arg7[%c2_104, %c0_105, %c0_106] : memref<6x4x32xf32, #tpu.memory_space<vmem>>, vector<1x4x32xf32>
    %347 = vector.shape_cast %346 : vector<1x4x32xf32> to vector<4x32xf32>
    %c2_107 = arith.constant 2 : index
    %c0_108 = arith.constant 0 : index
    %c0_109 = arith.constant 0 : index
    %348 = vector.load %arg5[%c2_107, %c0_108, %c0_109] : memref<6x32x64xbf16, #tpu.memory_space<vmem>>, vector<1x32x64xbf16>
    %349 = vector.shape_cast %348 : vector<1x32x64xbf16> to vector<32x64xbf16>
    %c2_110 = arith.constant 2 : index
    %c0_111 = arith.constant 0 : index
    %c0_112 = arith.constant 0 : index
    %350 = vector.load %arg8[%c2_110, %c0_111, %c0_112] : memref<6x1x64xf32, #tpu.memory_space<vmem>>, vector<1x1x64xf32>
    %351 = vector.shape_cast %350 : vector<1x1x64xf32> to vector<1x64xf32>
    %c2_113 = arith.constant 2 : index
    %c0_114 = arith.constant 0 : index
    %c0_115 = arith.constant 0 : index
    %352 = vector.load %arg6[%c2_113, %c0_114, %c0_115] : memref<6x64x32xbf16, #tpu.memory_space<vmem>>, vector<1x64x32xbf16>
    %353 = vector.shape_cast %352 : vector<1x64x32xbf16> to vector<64x32xbf16>
    %354 = vector.shape_cast %230 : vector<2x16x32xf32> to vector<32x32xf32>
    %355 = arith.truncf %354 : vector<32x32xf32> to vector<32x32xbf16>
    %356 = vector.shape_cast %341 : vector<2x8x32xf32> to vector<16x32xf32>
    %357 = arith.truncf %356 : vector<16x32xf32> to vector<16x32xbf16>
    %358 = vector.extract_strided_slice %343 {offsets = [0, 0], sizes = [32, 32], strides = [1, 1]} : vector<32x96xbf16> to vector<32x32xbf16>
    %cst_116 = arith.constant dense<0.000000e+00> : vector<32x32xf32>
    %359 = tpu.matmul %355, %358, %cst_116 {dimension_numbers = #tpu.dot_dimension_numbers<[1], [0], [0], [1], [0, 0, 1, 1], [], []>} : vector<32x32xbf16>, vector<32x32xbf16>, vector<32x32xf32> -> vector<32x32xf32>
    %360 = vector.extract_strided_slice %343 {offsets = [0, 32], sizes = [32, 64], strides = [1, 1]} : vector<32x96xbf16> to vector<32x64xbf16>
    %cst_117 = arith.constant dense<0.000000e+00> : vector<16x64xf32>
    %361 = tpu.matmul %357, %360, %cst_117 {dimension_numbers = #tpu.dot_dimension_numbers<[1], [0], [0], [1], [0, 0, 1, 1], [], []>} : vector<16x32xbf16>, vector<32x64xbf16>, vector<16x64xf32> -> vector<16x64xf32>
    %362 = vector.extract_strided_slice %361 {offsets = [0, 0], sizes = [16, 32], strides = [1, 1]} : vector<16x64xf32> to vector<16x32xf32>
    %363 = vector.extract_strided_slice %361 {offsets = [0, 32], sizes = [16, 32], strides = [1, 1]} : vector<16x64xf32> to vector<16x32xf32>
    %364 = vector.shape_cast %359 : vector<32x32xf32> to vector<2x16x32xf32>
    %365 = vector.extract_strided_slice %364 {offsets = [0, 0, 0], sizes = [2, 16, 8], strides = [1, 1, 1]} : vector<2x16x32xf32> to vector<2x16x8xf32>
    %366 = vector.extract_strided_slice %364 {offsets = [0, 0, 8], sizes = [2, 16, 8], strides = [1, 1, 1]} : vector<2x16x32xf32> to vector<2x16x8xf32>
    %367 = vector.extract_strided_slice %364 {offsets = [0, 0, 16], sizes = [2, 16, 8], strides = [1, 1, 1]} : vector<2x16x32xf32> to vector<2x16x8xf32>
    %368 = vector.extract_strided_slice %364 {offsets = [0, 0, 24], sizes = [2, 16, 8], strides = [1, 1, 1]} : vector<2x16x32xf32> to vector<2x16x8xf32>
    %369 = tpu.concatenate %365, %366, %367, %368 in 1 : vector<2x16x8xf32>, vector<2x16x8xf32>, vector<2x16x8xf32>, vector<2x16x8xf32> -> vector<2x64x8xf32>
    %370 = arith.truncf %369 : vector<2x64x8xf32> to vector<2x64x8xbf16>
    %371 = vector.shape_cast %362 : vector<16x32xf32> to vector<2x8x32xf32>
    %372 = vector.extract_strided_slice %371 {offsets = [0, 0, 0], sizes = [2, 8, 8], strides = [1, 1, 1]} : vector<2x8x32xf32> to vector<2x8x8xf32>
    %373 = vector.extract_strided_slice %371 {offsets = [0, 0, 8], sizes = [2, 8, 8], strides = [1, 1, 1]} : vector<2x8x32xf32> to vector<2x8x8xf32>
    %374 = vector.extract_strided_slice %371 {offsets = [0, 0, 16], sizes = [2, 8, 8], strides = [1, 1, 1]} : vector<2x8x32xf32> to vector<2x8x8xf32>
    %375 = vector.extract_strided_slice %371 {offsets = [0, 0, 24], sizes = [2, 8, 8], strides = [1, 1, 1]} : vector<2x8x32xf32> to vector<2x8x8xf32>
    %376 = tpu.concatenate %372, %373, %374, %375 in 1 : vector<2x8x8xf32>, vector<2x8x8xf32>, vector<2x8x8xf32>, vector<2x8x8xf32> -> vector<2x32x8xf32>
    %377 = arith.truncf %376 : vector<2x32x8xf32> to vector<2x32x8xbf16>
    %378 = vector.shape_cast %363 : vector<16x32xf32> to vector<2x8x32xf32>
    %379 = vector.extract_strided_slice %378 {offsets = [0, 0, 0], sizes = [2, 8, 8], strides = [1, 1, 1]} : vector<2x8x32xf32> to vector<2x8x8xf32>
    %380 = vector.extract_strided_slice %378 {offsets = [0, 0, 8], sizes = [2, 8, 8], strides = [1, 1, 1]} : vector<2x8x32xf32> to vector<2x8x8xf32>
    %381 = vector.extract_strided_slice %378 {offsets = [0, 0, 16], sizes = [2, 8, 8], strides = [1, 1, 1]} : vector<2x8x32xf32> to vector<2x8x8xf32>
    %382 = vector.extract_strided_slice %378 {offsets = [0, 0, 24], sizes = [2, 8, 8], strides = [1, 1, 1]} : vector<2x8x32xf32> to vector<2x8x8xf32>
    %383 = tpu.concatenate %379, %380, %381, %382 in 1 : vector<2x8x8xf32>, vector<2x8x8xf32>, vector<2x8x8xf32>, vector<2x8x8xf32> -> vector<2x32x8xf32>
    %384 = arith.truncf %383 : vector<2x32x8xf32> to vector<2x32x8xbf16>
    "tpu.trace_start"() <{level = 10 : i32, message = "bqd,bkd->bqk"}> : () -> ()
    %cst_118 = arith.constant dense<0.000000e+00> : vector<2x64x32xf32>
    %385 = tpu.matmul %370, %377, %cst_118 {dimension_numbers = #tpu.dot_dimension_numbers<[2], [2], [1], [1], [0, 0, 0, 1, 1, 1], [0], [0]>} : vector<2x64x8xbf16>, vector<2x32x8xbf16>, vector<2x64x32xf32> -> vector<2x64x32xf32>
    "tpu.trace_stop"() : () -> ()
    %386 = vector.shape_cast %98 : vector<64x32xf32> to vector<1x64x32xf32>
    %387 = vector.broadcast %386 : vector<1x64x32xf32> to vector<2x64x32xf32>
    %388 = arith.addf %385, %387 : vector<2x64x32xf32>
    %389 = vector.broadcast %123 : vector<2x1x32xf32> to vector<2x64x32xf32>
    %390 = arith.addf %388, %389 : vector<2x64x32xf32>
    %cst_119 = arith.constant dense<0xFF800000> : vector<2x64xf32>
    %391 = vector.multi_reduction <maximumf>, %390, %cst_119 [2] : vector<2x64x32xf32> to vector<2x64xf32>
    %392 = vector.shape_cast %391 : vector<2x64xf32> to vector<2x64x1xf32>
    %393 = vector.broadcast %392 : vector<2x64x1xf32> to vector<2x64x32xf32>
    %394 = arith.subf %390, %393 : vector<2x64x32xf32>
    %395 = math.exp %394 : vector<2x64x32xf32>
    %cst_120 = arith.constant dense<0.000000e+00> : vector<2x64xf32>
    %396 = vector.multi_reduction <add>, %395, %cst_120 [2] : vector<2x64x32xf32> to vector<2x64xf32>
    %397 = vector.shape_cast %396 : vector<2x64xf32> to vector<2x64x1xf32>
    %398 = tpu.reciprocal %397 {approx = true} : vector<2x64x1xf32> -> vector<2x64x1xf32>
    %399 = vector.broadcast %398 : vector<2x64x1xf32> to vector<2x64x32xf32>
    %400 = arith.mulf %395, %399 : vector<2x64x32xf32>
    %401 = arith.truncf %400 : vector<2x64x32xf32> to vector<2x64x32xbf16>
    "tpu.trace_start"() <{level = 10 : i32, message = "bqk,bkd->bqd"}> : () -> ()
    %cst_121 = arith.constant dense<0.000000e+00> : vector<2x64x8xf32>
    %402 = tpu.matmul %401, %384, %cst_121 {dimension_numbers = #tpu.dot_dimension_numbers<[2], [1], [1], [2], [0, 0, 0, 1, 1, 2], [0], [0]>} : vector<2x64x32xbf16>, vector<2x32x8xbf16>, vector<2x64x8xf32> -> vector<2x64x8xf32>
    "tpu.trace_stop"() : () -> ()
    %403 = vector.extract_strided_slice %402 {offsets = [0, 0, 0], sizes = [2, 16, 8], strides = [1, 1, 1]} : vector<2x64x8xf32> to vector<2x16x8xf32>
    %404 = vector.extract_strided_slice %402 {offsets = [0, 16, 0], sizes = [2, 16, 8], strides = [1, 1, 1]} : vector<2x64x8xf32> to vector<2x16x8xf32>
    %405 = vector.extract_strided_slice %402 {offsets = [0, 32, 0], sizes = [2, 16, 8], strides = [1, 1, 1]} : vector<2x64x8xf32> to vector<2x16x8xf32>
    %406 = vector.extract_strided_slice %402 {offsets = [0, 48, 0], sizes = [2, 16, 8], strides = [1, 1, 1]} : vector<2x64x8xf32> to vector<2x16x8xf32>
    %407 = tpu.concatenate %403, %404, %405, %406 in 2 : vector<2x16x8xf32>, vector<2x16x8xf32>, vector<2x16x8xf32>, vector<2x16x8xf32> -> vector<2x16x32xf32>
    %408 = vector.shape_cast %407 : vector<2x16x32xf32> to vector<32x32xf32>
    %409 = vector.extract_strided_slice %347 {offsets = [0, 0], sizes = [1, 32], strides = [1, 1]} : vector<4x32xf32> to vector<1x32xf32>
    %410 = vector.extract_strided_slice %347 {offsets = [1, 0], sizes = [1, 32], strides = [1, 1]} : vector<4x32xf32> to vector<1x32xf32>
    %411 = vector.extract_strided_slice %347 {offsets = [2, 0], sizes = [1, 32], strides = [1, 1]} : vector<4x32xf32> to vector<1x32xf32>
    %412 = vector.extract_strided_slice %347 {offsets = [3, 0], sizes = [1, 32], strides = [1, 1]} : vector<4x32xf32> to vector<1x32xf32>
    %413 = arith.truncf %408 : vector<32x32xf32> to vector<32x32xbf16>
    %cst_122 = arith.constant dense<0.000000e+00> : vector<32x32xf32>
    %414 = tpu.matmul %413, %345, %cst_122 {dimension_numbers = #tpu.dot_dimension_numbers<[1], [0], [0], [1], [0, 0, 1, 1], [], []>} : vector<32x32xbf16>, vector<32x32xbf16>, vector<32x32xf32> -> vector<32x32xf32>
    %415 = vector.broadcast %409 : vector<1x32xf32> to vector<32x32xf32>
    %416 = arith.addf %414, %415 : vector<32x32xf32>
    %417 = arith.addf %354, %416 : vector<32x32xf32>
    %418 = vector.shape_cast %417 : vector<32x32xf32> to vector<2x16x32xf32>
    %cst_123 = arith.constant dense<0.000000e+00> : vector<2x32xf32>
    %419 = vector.multi_reduction <add>, %418, %cst_123 [1] : vector<2x16x32xf32> to vector<2x32xf32>
    %420 = vector.shape_cast %419 : vector<2x32xf32> to vector<2x1x32xf32>
    %cst_124 = arith.constant 1.600000e+01 : f32
    %421 = vector.broadcast %cst_124 : f32 to vector<2x1x32xf32>
    %422 = arith.divf %420, %421 : vector<2x1x32xf32>
    %423 = vector.broadcast %422 : vector<2x1x32xf32> to vector<2x16x32xf32>
    %424 = arith.subf %418, %423 : vector<2x16x32xf32>
    %425 = arith.mulf %424, %424 : vector<2x16x32xf32>
    %cst_125 = arith.constant dense<0.000000e+00> : vector<2x32xf32>
    %426 = vector.multi_reduction <add>, %425, %cst_125 [1] : vector<2x16x32xf32> to vector<2x32xf32>
    %427 = vector.shape_cast %426 : vector<2x32xf32> to vector<2x1x32xf32>
    %cst_126 = arith.constant 1.600000e+01 : f32
    %428 = vector.broadcast %cst_126 : f32 to vector<2x1x32xf32>
    %429 = arith.divf %427, %428 : vector<2x1x32xf32>
    %430 = vector.broadcast %422 : vector<2x1x32xf32> to vector<2x16x32xf32>
    %431 = arith.subf %418, %430 : vector<2x16x32xf32>
    %cst_127 = arith.constant 9.99999974E-6 : f32
    %432 = vector.broadcast %cst_127 : f32 to vector<2x1x32xf32>
    %433 = arith.addf %429, %432 : vector<2x1x32xf32>
    %434 = math.rsqrt %433 : vector<2x1x32xf32>
    %435 = vector.broadcast %434 : vector<2x1x32xf32> to vector<2x16x32xf32>
    %436 = arith.mulf %431, %435 : vector<2x16x32xf32>
    %437 = vector.shape_cast %410 : vector<1x32xf32> to vector<1x1x32xf32>
    %438 = vector.broadcast %437 : vector<1x1x32xf32> to vector<2x16x32xf32>
    %439 = arith.mulf %436, %438 : vector<2x16x32xf32>
    %440 = vector.shape_cast %411 : vector<1x32xf32> to vector<1x1x32xf32>
    %441 = vector.broadcast %440 : vector<1x1x32xf32> to vector<2x16x32xf32>
    %442 = arith.addf %439, %441 : vector<2x16x32xf32>
    %443 = vector.shape_cast %442 : vector<2x16x32xf32> to vector<32x32xf32>
    %444 = arith.truncf %443 : vector<32x32xf32> to vector<32x32xbf16>
    %cst_128 = arith.constant dense<0.000000e+00> : vector<32x64xf32>
    %445 = tpu.matmul %444, %349, %cst_128 {dimension_numbers = #tpu.dot_dimension_numbers<[1], [0], [0], [1], [0, 0, 1, 1], [], []>} : vector<32x32xbf16>, vector<32x64xbf16>, vector<32x64xf32> -> vector<32x64xf32>
    %446 = vector.broadcast %351 : vector<1x64xf32> to vector<32x64xf32>
    %447 = arith.addf %445, %446 : vector<32x64xf32>
    %cst_129 = arith.constant 0.000000e+00 : f32
    %448 = vector.broadcast %cst_129 : f32 to vector<32x64xf32>
    %449 = arith.maximumf %447, %448 : vector<32x64xf32>
    %450 = arith.truncf %449 : vector<32x64xf32> to vector<32x64xbf16>
    %cst_130 = arith.constant dense<0.000000e+00> : vector<32x32xf32>
    %451 = tpu.matmul %450, %353, %cst_130 {dimension_numbers = #tpu.dot_dimension_numbers<[1], [0], [0], [1], [0, 0, 1, 1], [], []>} : vector<32x64xbf16>, vector<64x32xbf16>, vector<32x32xf32> -> vector<32x32xf32>
    %452 = vector.broadcast %412 : vector<1x32xf32> to vector<32x32xf32>
    %453 = arith.addf %451, %452 : vector<32x32xf32>
    %454 = vector.shape_cast %453 : vector<32x32xf32> to vector<2x16x32xf32>
    %c3 = arith.constant 3 : index
    %c0_131 = arith.constant 0 : index
    %c0_132 = arith.constant 0 : index
    %455 = vector.load %arg3[%c3, %c0_131, %c0_132] : memref<6x32x96xbf16, #tpu.memory_space<vmem>>, vector<1x32x96xbf16>
    %456 = vector.shape_cast %455 : vector<1x32x96xbf16> to vector<32x96xbf16>
    %c3_133 = arith.constant 3 : index
    %c0_134 = arith.constant 0 : index
    %c0_135 = arith.constant 0 : index
    %457 = vector.load %arg4[%c3_133, %c0_134, %c0_135] : memref<6x32x32xbf16, #tpu.memory_space<vmem>>, vector<1x32x32xbf16>
    %458 = vector.shape_cast %457 : vector<1x32x32xbf16> to vector<32x32xbf16>
    %c3_136 = arith.constant 3 : index
    %c0_137 = arith.constant 0 : index
    %c0_138 = arith.constant 0 : index
    %459 = vector.load %arg7[%c3_136, %c0_137, %c0_138] : memref<6x4x32xf32, #tpu.memory_space<vmem>>, vector<1x4x32xf32>
    %460 = vector.shape_cast %459 : vector<1x4x32xf32> to vector<4x32xf32>
    %c3_139 = arith.constant 3 : index
    %c0_140 = arith.constant 0 : index
    %c0_141 = arith.constant 0 : index
    %461 = vector.load %arg5[%c3_139, %c0_140, %c0_141] : memref<6x32x64xbf16, #tpu.memory_space<vmem>>, vector<1x32x64xbf16>
    %462 = vector.shape_cast %461 : vector<1x32x64xbf16> to vector<32x64xbf16>
    %c3_142 = arith.constant 3 : index
    %c0_143 = arith.constant 0 : index
    %c0_144 = arith.constant 0 : index
    %463 = vector.load %arg8[%c3_142, %c0_143, %c0_144] : memref<6x1x64xf32, #tpu.memory_space<vmem>>, vector<1x1x64xf32>
    %464 = vector.shape_cast %463 : vector<1x1x64xf32> to vector<1x64xf32>
    %c3_145 = arith.constant 3 : index
    %c0_146 = arith.constant 0 : index
    %c0_147 = arith.constant 0 : index
    %465 = vector.load %arg6[%c3_145, %c0_146, %c0_147] : memref<6x64x32xbf16, #tpu.memory_space<vmem>>, vector<1x64x32xbf16>
    %466 = vector.shape_cast %465 : vector<1x64x32xbf16> to vector<64x32xbf16>
    %467 = vector.shape_cast %454 : vector<2x16x32xf32> to vector<32x32xf32>
    %468 = arith.truncf %467 : vector<32x32xf32> to vector<32x32xbf16>
    %cst_148 = arith.constant dense<0.000000e+00> : vector<32x96xf32>
    %469 = tpu.matmul %468, %456, %cst_148 {dimension_numbers = #tpu.dot_dimension_numbers<[1], [0], [0], [1], [0, 0, 1, 1], [], []>} : vector<32x32xbf16>, vector<32x96xbf16>, vector<32x96xf32> -> vector<32x96xf32>
    %470 = vector.extract_strided_slice %469 {offsets = [0, 0], sizes = [32, 32], strides = [1, 1]} : vector<32x96xf32> to vector<32x32xf32>
    %471 = vector.extract_strided_slice %469 {offsets = [0, 32], sizes = [32, 32], strides = [1, 1]} : vector<32x96xf32> to vector<32x32xf32>
    %472 = vector.extract_strided_slice %469 {offsets = [0, 64], sizes = [32, 32], strides = [1, 1]} : vector<32x96xf32> to vector<32x32xf32>
    %473 = vector.shape_cast %470 : vector<32x32xf32> to vector<2x16x32xf32>
    %474 = vector.extract_strided_slice %473 {offsets = [0, 0, 0], sizes = [2, 16, 8], strides = [1, 1, 1]} : vector<2x16x32xf32> to vector<2x16x8xf32>
    %475 = vector.extract_strided_slice %473 {offsets = [0, 0, 8], sizes = [2, 16, 8], strides = [1, 1, 1]} : vector<2x16x32xf32> to vector<2x16x8xf32>
    %476 = vector.extract_strided_slice %473 {offsets = [0, 0, 16], sizes = [2, 16, 8], strides = [1, 1, 1]} : vector<2x16x32xf32> to vector<2x16x8xf32>
    %477 = vector.extract_strided_slice %473 {offsets = [0, 0, 24], sizes = [2, 16, 8], strides = [1, 1, 1]} : vector<2x16x32xf32> to vector<2x16x8xf32>
    %478 = tpu.concatenate %474, %475, %476, %477 in 1 : vector<2x16x8xf32>, vector<2x16x8xf32>, vector<2x16x8xf32>, vector<2x16x8xf32> -> vector<2x64x8xf32>
    %479 = arith.truncf %478 : vector<2x64x8xf32> to vector<2x64x8xbf16>
    %480 = vector.shape_cast %471 : vector<32x32xf32> to vector<2x16x32xf32>
    %481 = vector.extract_strided_slice %480 {offsets = [0, 0, 0], sizes = [2, 16, 8], strides = [1, 1, 1]} : vector<2x16x32xf32> to vector<2x16x8xf32>
    %482 = vector.extract_strided_slice %480 {offsets = [0, 0, 8], sizes = [2, 16, 8], strides = [1, 1, 1]} : vector<2x16x32xf32> to vector<2x16x8xf32>
    %483 = vector.extract_strided_slice %480 {offsets = [0, 0, 16], sizes = [2, 16, 8], strides = [1, 1, 1]} : vector<2x16x32xf32> to vector<2x16x8xf32>
    %484 = vector.extract_strided_slice %480 {offsets = [0, 0, 24], sizes = [2, 16, 8], strides = [1, 1, 1]} : vector<2x16x32xf32> to vector<2x16x8xf32>
    %485 = tpu.concatenate %481, %482, %483, %484 in 1 : vector<2x16x8xf32>, vector<2x16x8xf32>, vector<2x16x8xf32>, vector<2x16x8xf32> -> vector<2x64x8xf32>
    %486 = arith.truncf %485 : vector<2x64x8xf32> to vector<2x64x8xbf16>
    %487 = vector.shape_cast %472 : vector<32x32xf32> to vector<2x16x32xf32>
    %488 = vector.extract_strided_slice %487 {offsets = [0, 0, 0], sizes = [2, 16, 8], strides = [1, 1, 1]} : vector<2x16x32xf32> to vector<2x16x8xf32>
    %489 = vector.extract_strided_slice %487 {offsets = [0, 0, 8], sizes = [2, 16, 8], strides = [1, 1, 1]} : vector<2x16x32xf32> to vector<2x16x8xf32>
    %490 = vector.extract_strided_slice %487 {offsets = [0, 0, 16], sizes = [2, 16, 8], strides = [1, 1, 1]} : vector<2x16x32xf32> to vector<2x16x8xf32>
    %491 = vector.extract_strided_slice %487 {offsets = [0, 0, 24], sizes = [2, 16, 8], strides = [1, 1, 1]} : vector<2x16x32xf32> to vector<2x16x8xf32>
    %492 = tpu.concatenate %488, %489, %490, %491 in 1 : vector<2x16x8xf32>, vector<2x16x8xf32>, vector<2x16x8xf32>, vector<2x16x8xf32> -> vector<2x64x8xf32>
    %493 = arith.truncf %492 : vector<2x64x8xf32> to vector<2x64x8xbf16>
    "tpu.trace_start"() <{level = 10 : i32, message = "bqd,bkd->bqk"}> : () -> ()
    %cst_149 = arith.constant dense<0.000000e+00> : vector<2x64x64xf32>
    %494 = tpu.matmul %479, %486, %cst_149 {dimension_numbers = #tpu.dot_dimension_numbers<[2], [2], [1], [1], [0, 0, 0, 1, 1, 1], [0], [0]>} : vector<2x64x8xbf16>, vector<2x64x8xbf16>, vector<2x64x64xf32> -> vector<2x64x64xf32>
    "tpu.trace_stop"() : () -> ()
    %495 = vector.shape_cast %34 : vector<64x64xf32> to vector<1x64x64xf32>
    %496 = vector.broadcast %495 : vector<1x64x64xf32> to vector<2x64x64xf32>
    %497 = arith.addf %494, %496 : vector<2x64x64xf32>
    %cst_150 = arith.constant dense<0xFF800000> : vector<2x64xf32>
    %498 = vector.multi_reduction <maximumf>, %497, %cst_150 [2] : vector<2x64x64xf32> to vector<2x64xf32>
    %499 = vector.shape_cast %498 : vector<2x64xf32> to vector<2x64x1xf32>
    %500 = vector.broadcast %499 : vector<2x64x1xf32> to vector<2x64x64xf32>
    %501 = arith.subf %497, %500 : vector<2x64x64xf32>
    %502 = math.exp %501 : vector<2x64x64xf32>
    %cst_151 = arith.constant dense<0.000000e+00> : vector<2x64xf32>
    %503 = vector.multi_reduction <add>, %502, %cst_151 [2] : vector<2x64x64xf32> to vector<2x64xf32>
    %504 = vector.shape_cast %503 : vector<2x64xf32> to vector<2x64x1xf32>
    %505 = tpu.reciprocal %504 {approx = true} : vector<2x64x1xf32> -> vector<2x64x1xf32>
    %506 = vector.broadcast %505 : vector<2x64x1xf32> to vector<2x64x64xf32>
    %507 = arith.mulf %502, %506 : vector<2x64x64xf32>
    %508 = arith.truncf %507 : vector<2x64x64xf32> to vector<2x64x64xbf16>
    "tpu.trace_start"() <{level = 10 : i32, message = "bqk,bkd->bqd"}> : () -> ()
    %cst_152 = arith.constant dense<0.000000e+00> : vector<2x64x8xf32>
    %509 = tpu.matmul %508, %493, %cst_152 {dimension_numbers = #tpu.dot_dimension_numbers<[2], [1], [1], [2], [0, 0, 0, 1, 1, 2], [0], [0]>} : vector<2x64x64xbf16>, vector<2x64x8xbf16>, vector<2x64x8xf32> -> vector<2x64x8xf32>
    "tpu.trace_stop"() : () -> ()
    %510 = vector.extract_strided_slice %509 {offsets = [0, 0, 0], sizes = [2, 16, 8], strides = [1, 1, 1]} : vector<2x64x8xf32> to vector<2x16x8xf32>
    %511 = vector.extract_strided_slice %509 {offsets = [0, 16, 0], sizes = [2, 16, 8], strides = [1, 1, 1]} : vector<2x64x8xf32> to vector<2x16x8xf32>
    %512 = vector.extract_strided_slice %509 {offsets = [0, 32, 0], sizes = [2, 16, 8], strides = [1, 1, 1]} : vector<2x64x8xf32> to vector<2x16x8xf32>
    %513 = vector.extract_strided_slice %509 {offsets = [0, 48, 0], sizes = [2, 16, 8], strides = [1, 1, 1]} : vector<2x64x8xf32> to vector<2x16x8xf32>
    %514 = tpu.concatenate %510, %511, %512, %513 in 2 : vector<2x16x8xf32>, vector<2x16x8xf32>, vector<2x16x8xf32>, vector<2x16x8xf32> -> vector<2x16x32xf32>
    %515 = vector.shape_cast %514 : vector<2x16x32xf32> to vector<32x32xf32>
    %516 = vector.extract_strided_slice %460 {offsets = [0, 0], sizes = [1, 32], strides = [1, 1]} : vector<4x32xf32> to vector<1x32xf32>
    %517 = vector.extract_strided_slice %460 {offsets = [1, 0], sizes = [1, 32], strides = [1, 1]} : vector<4x32xf32> to vector<1x32xf32>
    %518 = vector.extract_strided_slice %460 {offsets = [2, 0], sizes = [1, 32], strides = [1, 1]} : vector<4x32xf32> to vector<1x32xf32>
    %519 = vector.extract_strided_slice %460 {offsets = [3, 0], sizes = [1, 32], strides = [1, 1]} : vector<4x32xf32> to vector<1x32xf32>
    %520 = arith.truncf %515 : vector<32x32xf32> to vector<32x32xbf16>
    %cst_153 = arith.constant dense<0.000000e+00> : vector<32x32xf32>
    %521 = tpu.matmul %520, %458, %cst_153 {dimension_numbers = #tpu.dot_dimension_numbers<[1], [0], [0], [1], [0, 0, 1, 1], [], []>} : vector<32x32xbf16>, vector<32x32xbf16>, vector<32x32xf32> -> vector<32x32xf32>
    %522 = vector.broadcast %516 : vector<1x32xf32> to vector<32x32xf32>
    %523 = arith.addf %521, %522 : vector<32x32xf32>
    %524 = arith.addf %467, %523 : vector<32x32xf32>
    %525 = vector.shape_cast %524 : vector<32x32xf32> to vector<2x16x32xf32>
    %cst_154 = arith.constant dense<0.000000e+00> : vector<2x32xf32>
    %526 = vector.multi_reduction <add>, %525, %cst_154 [1] : vector<2x16x32xf32> to vector<2x32xf32>
    %527 = vector.shape_cast %526 : vector<2x32xf32> to vector<2x1x32xf32>
    %cst_155 = arith.constant 1.600000e+01 : f32
    %528 = vector.broadcast %cst_155 : f32 to vector<2x1x32xf32>
    %529 = arith.divf %527, %528 : vector<2x1x32xf32>
    %530 = vector.broadcast %529 : vector<2x1x32xf32> to vector<2x16x32xf32>
    %531 = arith.subf %525, %530 : vector<2x16x32xf32>
    %532 = arith.mulf %531, %531 : vector<2x16x32xf32>
    %cst_156 = arith.constant dense<0.000000e+00> : vector<2x32xf32>
    %533 = vector.multi_reduction <add>, %532, %cst_156 [1] : vector<2x16x32xf32> to vector<2x32xf32>
    %534 = vector.shape_cast %533 : vector<2x32xf32> to vector<2x1x32xf32>
    %cst_157 = arith.constant 1.600000e+01 : f32
    %535 = vector.broadcast %cst_157 : f32 to vector<2x1x32xf32>
    %536 = arith.divf %534, %535 : vector<2x1x32xf32>
    %537 = vector.broadcast %529 : vector<2x1x32xf32> to vector<2x16x32xf32>
    %538 = arith.subf %525, %537 : vector<2x16x32xf32>
    %cst_158 = arith.constant 9.99999974E-6 : f32
    %539 = vector.broadcast %cst_158 : f32 to vector<2x1x32xf32>
    %540 = arith.addf %536, %539 : vector<2x1x32xf32>
    %541 = math.rsqrt %540 : vector<2x1x32xf32>
    %542 = vector.broadcast %541 : vector<2x1x32xf32> to vector<2x16x32xf32>
    %543 = arith.mulf %538, %542 : vector<2x16x32xf32>
    %544 = vector.shape_cast %517 : vector<1x32xf32> to vector<1x1x32xf32>
    %545 = vector.broadcast %544 : vector<1x1x32xf32> to vector<2x16x32xf32>
    %546 = arith.mulf %543, %545 : vector<2x16x32xf32>
    %547 = vector.shape_cast %518 : vector<1x32xf32> to vector<1x1x32xf32>
    %548 = vector.broadcast %547 : vector<1x1x32xf32> to vector<2x16x32xf32>
    %549 = arith.addf %546, %548 : vector<2x16x32xf32>
    %550 = vector.shape_cast %549 : vector<2x16x32xf32> to vector<32x32xf32>
    %551 = arith.truncf %550 : vector<32x32xf32> to vector<32x32xbf16>
    %cst_159 = arith.constant dense<0.000000e+00> : vector<32x64xf32>
    %552 = tpu.matmul %551, %462, %cst_159 {dimension_numbers = #tpu.dot_dimension_numbers<[1], [0], [0], [1], [0, 0, 1, 1], [], []>} : vector<32x32xbf16>, vector<32x64xbf16>, vector<32x64xf32> -> vector<32x64xf32>
    %553 = vector.broadcast %464 : vector<1x64xf32> to vector<32x64xf32>
    %554 = arith.addf %552, %553 : vector<32x64xf32>
    %cst_160 = arith.constant 0.000000e+00 : f32
    %555 = vector.broadcast %cst_160 : f32 to vector<32x64xf32>
    %556 = arith.maximumf %554, %555 : vector<32x64xf32>
    %557 = arith.truncf %556 : vector<32x64xf32> to vector<32x64xbf16>
    %cst_161 = arith.constant dense<0.000000e+00> : vector<32x32xf32>
    %558 = tpu.matmul %557, %466, %cst_161 {dimension_numbers = #tpu.dot_dimension_numbers<[1], [0], [0], [1], [0, 0, 1, 1], [], []>} : vector<32x64xbf16>, vector<64x32xbf16>, vector<32x32xf32> -> vector<32x32xf32>
    %559 = vector.broadcast %519 : vector<1x32xf32> to vector<32x32xf32>
    %560 = arith.addf %558, %559 : vector<32x32xf32>
    %561 = vector.shape_cast %560 : vector<32x32xf32> to vector<2x16x32xf32>
    %c4 = arith.constant 4 : index
    %c0_162 = arith.constant 0 : index
    %c0_163 = arith.constant 0 : index
    %562 = vector.load %arg3[%c4, %c0_162, %c0_163] : memref<6x32x96xbf16, #tpu.memory_space<vmem>>, vector<1x32x96xbf16>
    %563 = vector.shape_cast %562 : vector<1x32x96xbf16> to vector<32x96xbf16>
    %c4_164 = arith.constant 4 : index
    %c0_165 = arith.constant 0 : index
    %c0_166 = arith.constant 0 : index
    %564 = vector.load %arg4[%c4_164, %c0_165, %c0_166] : memref<6x32x32xbf16, #tpu.memory_space<vmem>>, vector<1x32x32xbf16>
    %565 = vector.shape_cast %564 : vector<1x32x32xbf16> to vector<32x32xbf16>
    %c4_167 = arith.constant 4 : index
    %c0_168 = arith.constant 0 : index
    %c0_169 = arith.constant 0 : index
    %566 = vector.load %arg7[%c4_167, %c0_168, %c0_169] : memref<6x4x32xf32, #tpu.memory_space<vmem>>, vector<1x4x32xf32>
    %567 = vector.shape_cast %566 : vector<1x4x32xf32> to vector<4x32xf32>
    %c4_170 = arith.constant 4 : index
    %c0_171 = arith.constant 0 : index
    %c0_172 = arith.constant 0 : index
    %568 = vector.load %arg5[%c4_170, %c0_171, %c0_172] : memref<6x32x64xbf16, #tpu.memory_space<vmem>>, vector<1x32x64xbf16>
    %569 = vector.shape_cast %568 : vector<1x32x64xbf16> to vector<32x64xbf16>
    %c4_173 = arith.constant 4 : index
    %c0_174 = arith.constant 0 : index
    %c0_175 = arith.constant 0 : index
    %570 = vector.load %arg8[%c4_173, %c0_174, %c0_175] : memref<6x1x64xf32, #tpu.memory_space<vmem>>, vector<1x1x64xf32>
    %571 = vector.shape_cast %570 : vector<1x1x64xf32> to vector<1x64xf32>
    %c4_176 = arith.constant 4 : index
    %c0_177 = arith.constant 0 : index
    %c0_178 = arith.constant 0 : index
    %572 = vector.load %arg6[%c4_176, %c0_177, %c0_178] : memref<6x64x32xbf16, #tpu.memory_space<vmem>>, vector<1x64x32xbf16>
    %573 = vector.shape_cast %572 : vector<1x64x32xbf16> to vector<64x32xbf16>
    %574 = vector.shape_cast %341 : vector<2x8x32xf32> to vector<16x32xf32>
    %575 = arith.truncf %574 : vector<16x32xf32> to vector<16x32xbf16>
    %576 = vector.shape_cast %561 : vector<2x16x32xf32> to vector<32x32xf32>
    %577 = arith.truncf %576 : vector<32x32xf32> to vector<32x32xbf16>
    %578 = vector.extract_strided_slice %563 {offsets = [0, 0], sizes = [32, 32], strides = [1, 1]} : vector<32x96xbf16> to vector<32x32xbf16>
    %cst_179 = arith.constant dense<0.000000e+00> : vector<16x32xf32>
    %579 = tpu.matmul %575, %578, %cst_179 {dimension_numbers = #tpu.dot_dimension_numbers<[1], [0], [0], [1], [0, 0, 1, 1], [], []>} : vector<16x32xbf16>, vector<32x32xbf16>, vector<16x32xf32> -> vector<16x32xf32>
    %580 = vector.extract_strided_slice %563 {offsets = [0, 32], sizes = [32, 64], strides = [1, 1]} : vector<32x96xbf16> to vector<32x64xbf16>
    %cst_180 = arith.constant dense<0.000000e+00> : vector<32x64xf32>
    %581 = tpu.matmul %577, %580, %cst_180 {dimension_numbers = #tpu.dot_dimension_numbers<[1], [0], [0], [1], [0, 0, 1, 1], [], []>} : vector<32x32xbf16>, vector<32x64xbf16>, vector<32x64xf32> -> vector<32x64xf32>
    %582 = vector.extract_strided_slice %581 {offsets = [0, 0], sizes = [32, 32], strides = [1, 1]} : vector<32x64xf32> to vector<32x32xf32>
    %583 = vector.extract_strided_slice %581 {offsets = [0, 32], sizes = [32, 32], strides = [1, 1]} : vector<32x64xf32> to vector<32x32xf32>
    %584 = vector.shape_cast %579 : vector<16x32xf32> to vector<2x8x32xf32>
    %585 = vector.extract_strided_slice %584 {offsets = [0, 0, 0], sizes = [2, 8, 8], strides = [1, 1, 1]} : vector<2x8x32xf32> to vector<2x8x8xf32>
    %586 = vector.extract_strided_slice %584 {offsets = [0, 0, 8], sizes = [2, 8, 8], strides = [1, 1, 1]} : vector<2x8x32xf32> to vector<2x8x8xf32>
    %587 = vector.extract_strided_slice %584 {offsets = [0, 0, 16], sizes = [2, 8, 8], strides = [1, 1, 1]} : vector<2x8x32xf32> to vector<2x8x8xf32>
    %588 = vector.extract_strided_slice %584 {offsets = [0, 0, 24], sizes = [2, 8, 8], strides = [1, 1, 1]} : vector<2x8x32xf32> to vector<2x8x8xf32>
    %589 = tpu.concatenate %585, %586, %587, %588 in 1 : vector<2x8x8xf32>, vector<2x8x8xf32>, vector<2x8x8xf32>, vector<2x8x8xf32> -> vector<2x32x8xf32>
    %590 = arith.truncf %589 : vector<2x32x8xf32> to vector<2x32x8xbf16>
    %591 = vector.shape_cast %582 : vector<32x32xf32> to vector<2x16x32xf32>
    %592 = vector.extract_strided_slice %591 {offsets = [0, 0, 0], sizes = [2, 16, 8], strides = [1, 1, 1]} : vector<2x16x32xf32> to vector<2x16x8xf32>
    %593 = vector.extract_strided_slice %591 {offsets = [0, 0, 8], sizes = [2, 16, 8], strides = [1, 1, 1]} : vector<2x16x32xf32> to vector<2x16x8xf32>
    %594 = vector.extract_strided_slice %591 {offsets = [0, 0, 16], sizes = [2, 16, 8], strides = [1, 1, 1]} : vector<2x16x32xf32> to vector<2x16x8xf32>
    %595 = vector.extract_strided_slice %591 {offsets = [0, 0, 24], sizes = [2, 16, 8], strides = [1, 1, 1]} : vector<2x16x32xf32> to vector<2x16x8xf32>
    %596 = tpu.concatenate %592, %593, %594, %595 in 1 : vector<2x16x8xf32>, vector<2x16x8xf32>, vector<2x16x8xf32>, vector<2x16x8xf32> -> vector<2x64x8xf32>
    %597 = arith.truncf %596 : vector<2x64x8xf32> to vector<2x64x8xbf16>
    %598 = vector.shape_cast %583 : vector<32x32xf32> to vector<2x16x32xf32>
    %599 = vector.extract_strided_slice %598 {offsets = [0, 0, 0], sizes = [2, 16, 8], strides = [1, 1, 1]} : vector<2x16x32xf32> to vector<2x16x8xf32>
    %600 = vector.extract_strided_slice %598 {offsets = [0, 0, 8], sizes = [2, 16, 8], strides = [1, 1, 1]} : vector<2x16x32xf32> to vector<2x16x8xf32>
    %601 = vector.extract_strided_slice %598 {offsets = [0, 0, 16], sizes = [2, 16, 8], strides = [1, 1, 1]} : vector<2x16x32xf32> to vector<2x16x8xf32>
    %602 = vector.extract_strided_slice %598 {offsets = [0, 0, 24], sizes = [2, 16, 8], strides = [1, 1, 1]} : vector<2x16x32xf32> to vector<2x16x8xf32>
    %603 = tpu.concatenate %599, %600, %601, %602 in 1 : vector<2x16x8xf32>, vector<2x16x8xf32>, vector<2x16x8xf32>, vector<2x16x8xf32> -> vector<2x64x8xf32>
    %604 = arith.truncf %603 : vector<2x64x8xf32> to vector<2x64x8xbf16>
    "tpu.trace_start"() <{level = 10 : i32, message = "bqd,bkd->bqk"}> : () -> ()
    %cst_181 = arith.constant dense<0.000000e+00> : vector<2x32x64xf32>
    %605 = tpu.matmul %590, %597, %cst_181 {dimension_numbers = #tpu.dot_dimension_numbers<[2], [2], [1], [1], [0, 0, 0, 1, 1, 1], [0], [0]>} : vector<2x32x8xbf16>, vector<2x64x8xbf16>, vector<2x32x64xf32> -> vector<2x32x64xf32>
    "tpu.trace_stop"() : () -> ()
    %606 = vector.shape_cast %66 : vector<32x64xf32> to vector<1x32x64xf32>
    %607 = vector.broadcast %606 : vector<1x32x64xf32> to vector<2x32x64xf32>
    %608 = arith.addf %605, %607 : vector<2x32x64xf32>
    %cst_182 = arith.constant dense<0xFF800000> : vector<2x32xf32>
    %609 = vector.multi_reduction <maximumf>, %608, %cst_182 [2] : vector<2x32x64xf32> to vector<2x32xf32>
    %610 = vector.shape_cast %609 : vector<2x32xf32> to vector<2x32x1xf32>
    %611 = vector.broadcast %610 : vector<2x32x1xf32> to vector<2x32x64xf32>
    %612 = arith.subf %608, %611 : vector<2x32x64xf32>
    %613 = math.exp %612 : vector<2x32x64xf32>
    %cst_183 = arith.constant dense<0.000000e+00> : vector<2x32xf32>
    %614 = vector.multi_reduction <add>, %613, %cst_183 [2] : vector<2x32x64xf32> to vector<2x32xf32>
    %615 = vector.shape_cast %614 : vector<2x32xf32> to vector<2x32x1xf32>
    %616 = tpu.reciprocal %615 {approx = true} : vector<2x32x1xf32> -> vector<2x32x1xf32>
    %617 = vector.broadcast %616 : vector<2x32x1xf32> to vector<2x32x64xf32>
    %618 = arith.mulf %613, %617 : vector<2x32x64xf32>
    %619 = arith.truncf %618 : vector<2x32x64xf32> to vector<2x32x64xbf16>
    "tpu.trace_start"() <{level = 10 : i32, message = "bqk,bkd->bqd"}> : () -> ()
    %cst_184 = arith.constant dense<0.000000e+00> : vector<2x32x8xf32>
    %620 = tpu.matmul %619, %604, %cst_184 {dimension_numbers = #tpu.dot_dimension_numbers<[2], [1], [1], [2], [0, 0, 0, 1, 1, 2], [0], [0]>} : vector<2x32x64xbf16>, vector<2x64x8xbf16>, vector<2x32x8xf32> -> vector<2x32x8xf32>
    "tpu.trace_stop"() : () -> ()
    %621 = vector.extract_strided_slice %620 {offsets = [0, 0, 0], sizes = [2, 8, 8], strides = [1, 1, 1]} : vector<2x32x8xf32> to vector<2x8x8xf32>
    %622 = vector.extract_strided_slice %620 {offsets = [0, 8, 0], sizes = [2, 8, 8], strides = [1, 1, 1]} : vector<2x32x8xf32> to vector<2x8x8xf32>
    %623 = vector.extract_strided_slice %620 {offsets = [0, 16, 0], sizes = [2, 8, 8], strides = [1, 1, 1]} : vector<2x32x8xf32> to vector<2x8x8xf32>
    %624 = vector.extract_strided_slice %620 {offsets = [0, 24, 0], sizes = [2, 8, 8], strides = [1, 1, 1]} : vector<2x32x8xf32> to vector<2x8x8xf32>
    %625 = tpu.concatenate %621, %622, %623, %624 in 2 : vector<2x8x8xf32>, vector<2x8x8xf32>, vector<2x8x8xf32>, vector<2x8x8xf32> -> vector<2x8x32xf32>
    %626 = vector.shape_cast %625 : vector<2x8x32xf32> to vector<16x32xf32>
    %627 = vector.extract_strided_slice %567 {offsets = [0, 0], sizes = [1, 32], strides = [1, 1]} : vector<4x32xf32> to vector<1x32xf32>
    %628 = vector.extract_strided_slice %567 {offsets = [1, 0], sizes = [1, 32], strides = [1, 1]} : vector<4x32xf32> to vector<1x32xf32>
    %629 = vector.extract_strided_slice %567 {offsets = [2, 0], sizes = [1, 32], strides = [1, 1]} : vector<4x32xf32> to vector<1x32xf32>
    %630 = vector.extract_strided_slice %567 {offsets = [3, 0], sizes = [1, 32], strides = [1, 1]} : vector<4x32xf32> to vector<1x32xf32>
    %631 = arith.truncf %626 : vector<16x32xf32> to vector<16x32xbf16>
    %cst_185 = arith.constant dense<0.000000e+00> : vector<16x32xf32>
    %632 = tpu.matmul %631, %565, %cst_185 {dimension_numbers = #tpu.dot_dimension_numbers<[1], [0], [0], [1], [0, 0, 1, 1], [], []>} : vector<16x32xbf16>, vector<32x32xbf16>, vector<16x32xf32> -> vector<16x32xf32>
    %633 = vector.broadcast %627 : vector<1x32xf32> to vector<16x32xf32>
    %634 = arith.addf %632, %633 : vector<16x32xf32>
    %635 = arith.addf %574, %634 : vector<16x32xf32>
    %636 = vector.shape_cast %635 : vector<16x32xf32> to vector<2x8x32xf32>
    %cst_186 = arith.constant dense<0.000000e+00> : vector<2x32xf32>
    %637 = vector.multi_reduction <add>, %636, %cst_186 [1] : vector<2x8x32xf32> to vector<2x32xf32>
    %638 = vector.shape_cast %637 : vector<2x32xf32> to vector<2x1x32xf32>
    %cst_187 = arith.constant 8.000000e+00 : f32
    %639 = vector.broadcast %cst_187 : f32 to vector<2x1x32xf32>
    %640 = arith.divf %638, %639 : vector<2x1x32xf32>
    %641 = vector.broadcast %640 : vector<2x1x32xf32> to vector<2x8x32xf32>
    %642 = arith.subf %636, %641 : vector<2x8x32xf32>
    %643 = arith.mulf %642, %642 : vector<2x8x32xf32>
    %cst_188 = arith.constant dense<0.000000e+00> : vector<2x32xf32>
    %644 = vector.multi_reduction <add>, %643, %cst_188 [1] : vector<2x8x32xf32> to vector<2x32xf32>
    %645 = vector.shape_cast %644 : vector<2x32xf32> to vector<2x1x32xf32>
    %cst_189 = arith.constant 8.000000e+00 : f32
    %646 = vector.broadcast %cst_189 : f32 to vector<2x1x32xf32>
    %647 = arith.divf %645, %646 : vector<2x1x32xf32>
    %648 = vector.broadcast %640 : vector<2x1x32xf32> to vector<2x8x32xf32>
    %649 = arith.subf %636, %648 : vector<2x8x32xf32>
    %cst_190 = arith.constant 9.99999974E-6 : f32
    %650 = vector.broadcast %cst_190 : f32 to vector<2x1x32xf32>
    %651 = arith.addf %647, %650 : vector<2x1x32xf32>
    %652 = math.rsqrt %651 : vector<2x1x32xf32>
    %653 = vector.broadcast %652 : vector<2x1x32xf32> to vector<2x8x32xf32>
    %654 = arith.mulf %649, %653 : vector<2x8x32xf32>
    %655 = vector.shape_cast %628 : vector<1x32xf32> to vector<1x1x32xf32>
    %656 = vector.broadcast %655 : vector<1x1x32xf32> to vector<2x8x32xf32>
    %657 = arith.mulf %654, %656 : vector<2x8x32xf32>
    %658 = vector.shape_cast %629 : vector<1x32xf32> to vector<1x1x32xf32>
    %659 = vector.broadcast %658 : vector<1x1x32xf32> to vector<2x8x32xf32>
    %660 = arith.addf %657, %659 : vector<2x8x32xf32>
    %661 = vector.shape_cast %660 : vector<2x8x32xf32> to vector<16x32xf32>
    %662 = arith.truncf %661 : vector<16x32xf32> to vector<16x32xbf16>
    %cst_191 = arith.constant dense<0.000000e+00> : vector<16x64xf32>
    %663 = tpu.matmul %662, %569, %cst_191 {dimension_numbers = #tpu.dot_dimension_numbers<[1], [0], [0], [1], [0, 0, 1, 1], [], []>} : vector<16x32xbf16>, vector<32x64xbf16>, vector<16x64xf32> -> vector<16x64xf32>
    %664 = vector.broadcast %571 : vector<1x64xf32> to vector<16x64xf32>
    %665 = arith.addf %663, %664 : vector<16x64xf32>
    %cst_192 = arith.constant 0.000000e+00 : f32
    %666 = vector.broadcast %cst_192 : f32 to vector<16x64xf32>
    %667 = arith.maximumf %665, %666 : vector<16x64xf32>
    %668 = arith.truncf %667 : vector<16x64xf32> to vector<16x64xbf16>
    %cst_193 = arith.constant dense<0.000000e+00> : vector<16x32xf32>
    %669 = tpu.matmul %668, %573, %cst_193 {dimension_numbers = #tpu.dot_dimension_numbers<[1], [0], [0], [1], [0, 0, 1, 1], [], []>} : vector<16x64xbf16>, vector<64x32xbf16>, vector<16x32xf32> -> vector<16x32xf32>
    %670 = vector.broadcast %630 : vector<1x32xf32> to vector<16x32xf32>
    %671 = arith.addf %669, %670 : vector<16x32xf32>
    %672 = vector.shape_cast %671 : vector<16x32xf32> to vector<2x8x32xf32>
    %c5 = arith.constant 5 : index
    %c0_194 = arith.constant 0 : index
    %c0_195 = arith.constant 0 : index
    %673 = vector.load %arg3[%c5, %c0_194, %c0_195] : memref<6x32x96xbf16, #tpu.memory_space<vmem>>, vector<1x32x96xbf16>
    %674 = vector.shape_cast %673 : vector<1x32x96xbf16> to vector<32x96xbf16>
    %c5_196 = arith.constant 5 : index
    %c0_197 = arith.constant 0 : index
    %c0_198 = arith.constant 0 : index
    %675 = vector.load %arg4[%c5_196, %c0_197, %c0_198] : memref<6x32x32xbf16, #tpu.memory_space<vmem>>, vector<1x32x32xbf16>
    %676 = vector.shape_cast %675 : vector<1x32x32xbf16> to vector<32x32xbf16>
    %c5_199 = arith.constant 5 : index
    %c0_200 = arith.constant 0 : index
    %c0_201 = arith.constant 0 : index
    %677 = vector.load %arg7[%c5_199, %c0_200, %c0_201] : memref<6x4x32xf32, #tpu.memory_space<vmem>>, vector<1x4x32xf32>
    %678 = vector.shape_cast %677 : vector<1x4x32xf32> to vector<4x32xf32>
    %c5_202 = arith.constant 5 : index
    %c0_203 = arith.constant 0 : index
    %c0_204 = arith.constant 0 : index
    %679 = vector.load %arg5[%c5_202, %c0_203, %c0_204] : memref<6x32x64xbf16, #tpu.memory_space<vmem>>, vector<1x32x64xbf16>
    %680 = vector.shape_cast %679 : vector<1x32x64xbf16> to vector<32x64xbf16>
    %c5_205 = arith.constant 5 : index
    %c0_206 = arith.constant 0 : index
    %c0_207 = arith.constant 0 : index
    %681 = vector.load %arg8[%c5_205, %c0_206, %c0_207] : memref<6x1x64xf32, #tpu.memory_space<vmem>>, vector<1x1x64xf32>
    %682 = vector.shape_cast %681 : vector<1x1x64xf32> to vector<1x64xf32>
    %c5_208 = arith.constant 5 : index
    %c0_209 = arith.constant 0 : index
    %c0_210 = arith.constant 0 : index
    %683 = vector.load %arg6[%c5_208, %c0_209, %c0_210] : memref<6x64x32xbf16, #tpu.memory_space<vmem>>, vector<1x64x32xbf16>
    %684 = vector.shape_cast %683 : vector<1x64x32xbf16> to vector<64x32xbf16>
    %685 = vector.shape_cast %561 : vector<2x16x32xf32> to vector<32x32xf32>
    %686 = arith.truncf %685 : vector<32x32xf32> to vector<32x32xbf16>
    %687 = vector.shape_cast %672 : vector<2x8x32xf32> to vector<16x32xf32>
    %688 = arith.truncf %687 : vector<16x32xf32> to vector<16x32xbf16>
    %689 = vector.extract_strided_slice %674 {offsets = [0, 0], sizes = [32, 32], strides = [1, 1]} : vector<32x96xbf16> to vector<32x32xbf16>
    %cst_211 = arith.constant dense<0.000000e+00> : vector<32x32xf32>
    %690 = tpu.matmul %686, %689, %cst_211 {dimension_numbers = #tpu.dot_dimension_numbers<[1], [0], [0], [1], [0, 0, 1, 1], [], []>} : vector<32x32xbf16>, vector<32x32xbf16>, vector<32x32xf32> -> vector<32x32xf32>
    %691 = vector.extract_strided_slice %674 {offsets = [0, 32], sizes = [32, 64], strides = [1, 1]} : vector<32x96xbf16> to vector<32x64xbf16>
    %cst_212 = arith.constant dense<0.000000e+00> : vector<16x64xf32>
    %692 = tpu.matmul %688, %691, %cst_212 {dimension_numbers = #tpu.dot_dimension_numbers<[1], [0], [0], [1], [0, 0, 1, 1], [], []>} : vector<16x32xbf16>, vector<32x64xbf16>, vector<16x64xf32> -> vector<16x64xf32>
    %693 = vector.extract_strided_slice %692 {offsets = [0, 0], sizes = [16, 32], strides = [1, 1]} : vector<16x64xf32> to vector<16x32xf32>
    %694 = vector.extract_strided_slice %692 {offsets = [0, 32], sizes = [16, 32], strides = [1, 1]} : vector<16x64xf32> to vector<16x32xf32>
    %695 = vector.shape_cast %690 : vector<32x32xf32> to vector<2x16x32xf32>
    %696 = vector.extract_strided_slice %695 {offsets = [0, 0, 0], sizes = [2, 16, 8], strides = [1, 1, 1]} : vector<2x16x32xf32> to vector<2x16x8xf32>
    %697 = vector.extract_strided_slice %695 {offsets = [0, 0, 8], sizes = [2, 16, 8], strides = [1, 1, 1]} : vector<2x16x32xf32> to vector<2x16x8xf32>
    %698 = vector.extract_strided_slice %695 {offsets = [0, 0, 16], sizes = [2, 16, 8], strides = [1, 1, 1]} : vector<2x16x32xf32> to vector<2x16x8xf32>
    %699 = vector.extract_strided_slice %695 {offsets = [0, 0, 24], sizes = [2, 16, 8], strides = [1, 1, 1]} : vector<2x16x32xf32> to vector<2x16x8xf32>
    %700 = tpu.concatenate %696, %697, %698, %699 in 1 : vector<2x16x8xf32>, vector<2x16x8xf32>, vector<2x16x8xf32>, vector<2x16x8xf32> -> vector<2x64x8xf32>
    %701 = arith.truncf %700 : vector<2x64x8xf32> to vector<2x64x8xbf16>
    %702 = vector.shape_cast %693 : vector<16x32xf32> to vector<2x8x32xf32>
    %703 = vector.extract_strided_slice %702 {offsets = [0, 0, 0], sizes = [2, 8, 8], strides = [1, 1, 1]} : vector<2x8x32xf32> to vector<2x8x8xf32>
    %704 = vector.extract_strided_slice %702 {offsets = [0, 0, 8], sizes = [2, 8, 8], strides = [1, 1, 1]} : vector<2x8x32xf32> to vector<2x8x8xf32>
    %705 = vector.extract_strided_slice %702 {offsets = [0, 0, 16], sizes = [2, 8, 8], strides = [1, 1, 1]} : vector<2x8x32xf32> to vector<2x8x8xf32>
    %706 = vector.extract_strided_slice %702 {offsets = [0, 0, 24], sizes = [2, 8, 8], strides = [1, 1, 1]} : vector<2x8x32xf32> to vector<2x8x8xf32>
    %707 = tpu.concatenate %703, %704, %705, %706 in 1 : vector<2x8x8xf32>, vector<2x8x8xf32>, vector<2x8x8xf32>, vector<2x8x8xf32> -> vector<2x32x8xf32>
    %708 = arith.truncf %707 : vector<2x32x8xf32> to vector<2x32x8xbf16>
    %709 = vector.shape_cast %694 : vector<16x32xf32> to vector<2x8x32xf32>
    %710 = vector.extract_strided_slice %709 {offsets = [0, 0, 0], sizes = [2, 8, 8], strides = [1, 1, 1]} : vector<2x8x32xf32> to vector<2x8x8xf32>
    %711 = vector.extract_strided_slice %709 {offsets = [0, 0, 8], sizes = [2, 8, 8], strides = [1, 1, 1]} : vector<2x8x32xf32> to vector<2x8x8xf32>
    %712 = vector.extract_strided_slice %709 {offsets = [0, 0, 16], sizes = [2, 8, 8], strides = [1, 1, 1]} : vector<2x8x32xf32> to vector<2x8x8xf32>
    %713 = vector.extract_strided_slice %709 {offsets = [0, 0, 24], sizes = [2, 8, 8], strides = [1, 1, 1]} : vector<2x8x32xf32> to vector<2x8x8xf32>
    %714 = tpu.concatenate %710, %711, %712, %713 in 1 : vector<2x8x8xf32>, vector<2x8x8xf32>, vector<2x8x8xf32>, vector<2x8x8xf32> -> vector<2x32x8xf32>
    %715 = arith.truncf %714 : vector<2x32x8xf32> to vector<2x32x8xbf16>
    "tpu.trace_start"() <{level = 10 : i32, message = "bqd,bkd->bqk"}> : () -> ()
    %cst_213 = arith.constant dense<0.000000e+00> : vector<2x64x32xf32>
    %716 = tpu.matmul %701, %708, %cst_213 {dimension_numbers = #tpu.dot_dimension_numbers<[2], [2], [1], [1], [0, 0, 0, 1, 1, 1], [0], [0]>} : vector<2x64x8xbf16>, vector<2x32x8xbf16>, vector<2x64x32xf32> -> vector<2x64x32xf32>
    "tpu.trace_stop"() : () -> ()
    %717 = vector.shape_cast %98 : vector<64x32xf32> to vector<1x64x32xf32>
    %718 = vector.broadcast %717 : vector<1x64x32xf32> to vector<2x64x32xf32>
    %719 = arith.addf %716, %718 : vector<2x64x32xf32>
    %720 = vector.broadcast %123 : vector<2x1x32xf32> to vector<2x64x32xf32>
    %721 = arith.addf %719, %720 : vector<2x64x32xf32>
    %cst_214 = arith.constant dense<0xFF800000> : vector<2x64xf32>
    %722 = vector.multi_reduction <maximumf>, %721, %cst_214 [2] : vector<2x64x32xf32> to vector<2x64xf32>
    %723 = vector.shape_cast %722 : vector<2x64xf32> to vector<2x64x1xf32>
    %724 = vector.broadcast %723 : vector<2x64x1xf32> to vector<2x64x32xf32>
    %725 = arith.subf %721, %724 : vector<2x64x32xf32>
    %726 = math.exp %725 : vector<2x64x32xf32>
    %cst_215 = arith.constant dense<0.000000e+00> : vector<2x64xf32>
    %727 = vector.multi_reduction <add>, %726, %cst_215 [2] : vector<2x64x32xf32> to vector<2x64xf32>
    %728 = vector.shape_cast %727 : vector<2x64xf32> to vector<2x64x1xf32>
    %729 = tpu.reciprocal %728 {approx = true} : vector<2x64x1xf32> -> vector<2x64x1xf32>
    %730 = vector.broadcast %729 : vector<2x64x1xf32> to vector<2x64x32xf32>
    %731 = arith.mulf %726, %730 : vector<2x64x32xf32>
    %732 = arith.truncf %731 : vector<2x64x32xf32> to vector<2x64x32xbf16>
    "tpu.trace_start"() <{level = 10 : i32, message = "bqk,bkd->bqd"}> : () -> ()
    %cst_216 = arith.constant dense<0.000000e+00> : vector<2x64x8xf32>
    %733 = tpu.matmul %732, %715, %cst_216 {dimension_numbers = #tpu.dot_dimension_numbers<[2], [1], [1], [2], [0, 0, 0, 1, 1, 2], [0], [0]>} : vector<2x64x32xbf16>, vector<2x32x8xbf16>, vector<2x64x8xf32> -> vector<2x64x8xf32>
    "tpu.trace_stop"() : () -> ()
    %734 = vector.extract_strided_slice %733 {offsets = [0, 0, 0], sizes = [2, 16, 8], strides = [1, 1, 1]} : vector<2x64x8xf32> to vector<2x16x8xf32>
    %735 = vector.extract_strided_slice %733 {offsets = [0, 16, 0], sizes = [2, 16, 8], strides = [1, 1, 1]} : vector<2x64x8xf32> to vector<2x16x8xf32>
    %736 = vector.extract_strided_slice %733 {offsets = [0, 32, 0], sizes = [2, 16, 8], strides = [1, 1, 1]} : vector<2x64x8xf32> to vector<2x16x8xf32>
    %737 = vector.extract_strided_slice %733 {offsets = [0, 48, 0], sizes = [2, 16, 8], strides = [1, 1, 1]} : vector<2x64x8xf32> to vector<2x16x8xf32>
    %738 = tpu.concatenate %734, %735, %736, %737 in 2 : vector<2x16x8xf32>, vector<2x16x8xf32>, vector<2x16x8xf32>, vector<2x16x8xf32> -> vector<2x16x32xf32>
    %739 = vector.shape_cast %738 : vector<2x16x32xf32> to vector<32x32xf32>
    %740 = vector.extract_strided_slice %678 {offsets = [0, 0], sizes = [1, 32], strides = [1, 1]} : vector<4x32xf32> to vector<1x32xf32>
    %741 = vector.extract_strided_slice %678 {offsets = [1, 0], sizes = [1, 32], strides = [1, 1]} : vector<4x32xf32> to vector<1x32xf32>
    %742 = vector.extract_strided_slice %678 {offsets = [2, 0], sizes = [1, 32], strides = [1, 1]} : vector<4x32xf32> to vector<1x32xf32>
    %743 = vector.extract_strided_slice %678 {offsets = [3, 0], sizes = [1, 32], strides = [1, 1]} : vector<4x32xf32> to vector<1x32xf32>
    %744 = arith.truncf %739 : vector<32x32xf32> to vector<32x32xbf16>
    %cst_217 = arith.constant dense<0.000000e+00> : vector<32x32xf32>
    %745 = tpu.matmul %744, %676, %cst_217 {dimension_numbers = #tpu.dot_dimension_numbers<[1], [0], [0], [1], [0, 0, 1, 1], [], []>} : vector<32x32xbf16>, vector<32x32xbf16>, vector<32x32xf32> -> vector<32x32xf32>
    %746 = vector.broadcast %740 : vector<1x32xf32> to vector<32x32xf32>
    %747 = arith.addf %745, %746 : vector<32x32xf32>
    %748 = arith.addf %685, %747 : vector<32x32xf32>
    %749 = vector.shape_cast %748 : vector<32x32xf32> to vector<2x16x32xf32>
    %cst_218 = arith.constant dense<0.000000e+00> : vector<2x32xf32>
    %750 = vector.multi_reduction <add>, %749, %cst_218 [1] : vector<2x16x32xf32> to vector<2x32xf32>
    %751 = vector.shape_cast %750 : vector<2x32xf32> to vector<2x1x32xf32>
    %cst_219 = arith.constant 1.600000e+01 : f32
    %752 = vector.broadcast %cst_219 : f32 to vector<2x1x32xf32>
    %753 = arith.divf %751, %752 : vector<2x1x32xf32>
    %754 = vector.broadcast %753 : vector<2x1x32xf32> to vector<2x16x32xf32>
    %755 = arith.subf %749, %754 : vector<2x16x32xf32>
    %756 = arith.mulf %755, %755 : vector<2x16x32xf32>
    %cst_220 = arith.constant dense<0.000000e+00> : vector<2x32xf32>
    %757 = vector.multi_reduction <add>, %756, %cst_220 [1] : vector<2x16x32xf32> to vector<2x32xf32>
    %758 = vector.shape_cast %757 : vector<2x32xf32> to vector<2x1x32xf32>
    %cst_221 = arith.constant 1.600000e+01 : f32
    %759 = vector.broadcast %cst_221 : f32 to vector<2x1x32xf32>
    %760 = arith.divf %758, %759 : vector<2x1x32xf32>
    %761 = vector.broadcast %753 : vector<2x1x32xf32> to vector<2x16x32xf32>
    %762 = arith.subf %749, %761 : vector<2x16x32xf32>
    %cst_222 = arith.constant 9.99999974E-6 : f32
    %763 = vector.broadcast %cst_222 : f32 to vector<2x1x32xf32>
    %764 = arith.addf %760, %763 : vector<2x1x32xf32>
    %765 = math.rsqrt %764 : vector<2x1x32xf32>
    %766 = vector.broadcast %765 : vector<2x1x32xf32> to vector<2x16x32xf32>
    %767 = arith.mulf %762, %766 : vector<2x16x32xf32>
    %768 = vector.shape_cast %741 : vector<1x32xf32> to vector<1x1x32xf32>
    %769 = vector.broadcast %768 : vector<1x1x32xf32> to vector<2x16x32xf32>
    %770 = arith.mulf %767, %769 : vector<2x16x32xf32>
    %771 = vector.shape_cast %742 : vector<1x32xf32> to vector<1x1x32xf32>
    %772 = vector.broadcast %771 : vector<1x1x32xf32> to vector<2x16x32xf32>
    %773 = arith.addf %770, %772 : vector<2x16x32xf32>
    %774 = vector.shape_cast %773 : vector<2x16x32xf32> to vector<32x32xf32>
    %775 = arith.truncf %774 : vector<32x32xf32> to vector<32x32xbf16>
    %cst_223 = arith.constant dense<0.000000e+00> : vector<32x64xf32>
    %776 = tpu.matmul %775, %680, %cst_223 {dimension_numbers = #tpu.dot_dimension_numbers<[1], [0], [0], [1], [0, 0, 1, 1], [], []>} : vector<32x32xbf16>, vector<32x64xbf16>, vector<32x64xf32> -> vector<32x64xf32>
    %777 = vector.broadcast %682 : vector<1x64xf32> to vector<32x64xf32>
    %778 = arith.addf %776, %777 : vector<32x64xf32>
    %cst_224 = arith.constant 0.000000e+00 : f32
    %779 = vector.broadcast %cst_224 : f32 to vector<32x64xf32>
    %780 = arith.maximumf %778, %779 : vector<32x64xf32>
    %781 = arith.truncf %780 : vector<32x64xf32> to vector<32x64xbf16>
    %cst_225 = arith.constant dense<0.000000e+00> : vector<32x32xf32>
    %782 = tpu.matmul %781, %684, %cst_225 {dimension_numbers = #tpu.dot_dimension_numbers<[1], [0], [0], [1], [0, 0, 1, 1], [], []>} : vector<32x64xbf16>, vector<64x32xbf16>, vector<32x32xf32> -> vector<32x32xf32>
    %783 = vector.broadcast %743 : vector<1x32xf32> to vector<32x32xf32>
    %784 = arith.addf %782, %783 : vector<32x32xf32>
    %785 = vector.shape_cast %784 : vector<32x32xf32> to vector<2x16x32xf32>
    %c0_226 = arith.constant 0 : index
    %c0_227 = arith.constant 0 : index
    %c0_228 = arith.constant 0 : index
    %786 = vector.load %arg9[%c0_226, %c0_227, %c0_228] : memref<2x24x32xf32, #tpu.memory_space<vmem>>, vector<2x8x32xf32>
    tpu.vector_store %arg9[%c0_226, %c0_227, %c0_228], %672 {strides = array<i32>} : memref<2x24x32xf32, #tpu.memory_space<vmem>>, vector<2x8x32xf32>,
    %c0_229 = arith.constant 0 : index
    %c8 = arith.constant 8 : index
    %c0_230 = arith.constant 0 : index
    %787 = vector.load %arg9[%c0_229, %c8, %c0_230] : memref<2x24x32xf32, #tpu.memory_space<vmem>>, vector<2x16x32xf32>
    tpu.vector_store %arg9[%c0_229, %c8, %c0_230], %785 {strides = array<i32>} : memref<2x24x32xf32, #tpu.memory_space<vmem>>, vector<2x16x32xf32>,
    return
  }
  func.func @transform_0(%arg0: i32) -> (i32, i32, i32) {
    %c0_i32 = arith.constant 0 : i32
    %c0_i32_0 = arith.constant 0 : i32
    %c0_i32_1 = arith.constant 0 : i32
    return %arg0, %c0_i32, %c0_i32_0 : i32, i32, i32
  }
  func.func @transform_1(%arg0: i32) -> (i32, i32, i32) {
    %c0_i32 = arith.constant 0 : i32
    %c0_i32_0 = arith.constant 0 : i32
    %c0_i32_1 = arith.constant 0 : i32
    return %arg0, %c0_i32, %c0_i32_0 : i32, i32, i32
  }
  func.func @transform_2(%arg0: i32) -> (i32, i32, i32) {
    %c0_i32 = arith.constant 0 : i32
    %c0_i32_0 = arith.constant 0 : i32
    %c0_i32_1 = arith.constant 0 : i32
    %c0_i32_2 = arith.constant 0 : i32
    return %c0_i32, %c0_i32_0, %c0_i32_1 : i32, i32, i32
  }
  func.func @transform_3(%arg0: i32) -> (i32, i32, i32) {
    %c0_i32 = arith.constant 0 : i32
    %c0_i32_0 = arith.constant 0 : i32
    %c0_i32_1 = arith.constant 0 : i32
    %c0_i32_2 = arith.constant 0 : i32
    return %c0_i32, %c0_i32_0, %c0_i32_1 : i32, i32, i32
  }
  func.func @transform_4(%arg0: i32) -> (i32, i32, i32) {
    %c0_i32 = arith.constant 0 : i32
    %c0_i32_0 = arith.constant 0 : i32
    %c0_i32_1 = arith.constant 0 : i32
    %c0_i32_2 = arith.constant 0 : i32
    return %c0_i32, %c0_i32_0, %c0_i32_1 : i32, i32, i32
  }
  func.func @transform_5(%arg0: i32) -> (i32, i32, i32) {
    %c0_i32 = arith.constant 0 : i32
    %c0_i32_0 = arith.constant 0 : i32
    %c0_i32_1 = arith.constant 0 : i32
    %c0_i32_2 = arith.constant 0 : i32
    return %c0_i32, %c0_i32_0, %c0_i32_1 : i32, i32, i32
  }
  func.func @transform_6(%arg0: i32) -> (i32, i32, i32) {
    %c0_i32 = arith.constant 0 : i32
    %c0_i32_0 = arith.constant 0 : i32
    %c0_i32_1 = arith.constant 0 : i32
    %c0_i32_2 = arith.constant 0 : i32
    return %c0_i32, %c0_i32_0, %c0_i32_1 : i32, i32, i32
  }
  func.func @transform_7(%arg0: i32) -> (i32, i32, i32) {
    %c0_i32 = arith.constant 0 : i32
    %c0_i32_0 = arith.constant 0 : i32
    %c0_i32_1 = arith.constant 0 : i32
    %c0_i32_2 = arith.constant 0 : i32
    return %c0_i32, %c0_i32_0, %c0_i32_1 : i32, i32, i32
  }
  func.func @transform_8(%arg0: i32) -> (i32, i32, i32) {
    %c0_i32 = arith.constant 0 : i32
    %c0_i32_0 = arith.constant 0 : i32
    %c0_i32_1 = arith.constant 0 : i32
    return %arg0, %c0_i32, %c0_i32_0 : i32, i32, i32
  }
}

</mosaic_0001>

<bundles_post_ra>
// kernel: tpu_custom_call.1
= control target key start
LH: loop header
LB: loop body
LE: loop exit
PB: predicated region body
PF: predicated region fallthrough
CT: control target
= control target key end

     0   :  { %13 = vsyncpa [#allocation3], 0  ;;  %s8726_s0 = inlined_call_operand.hbm [shape: f32[2,24,32], index: 0, kind: input, shape index: {}]   ;;  %s8727_s1 = inlined_call_operand.vmem [shape: s32[2,1,1], index: 1, kind: input, shape index: {}]   ;;  %s8728_s2 = inlined_call_operand.vmem [shape: bf16[6,32,96], index: 2, kind: input, shape index: {}]   ;;  %s8729_s3 = inlined_call_operand.vmem [shape: bf16[6,32,32], index: 3, kind: input, shape index: {}]   ;;  %s8730_s4 = inlined_call_operand.vmem [shape: bf16[6,32,64], index: 4, kind: input, shape index: {}]   ;;  %s8731_s5 = inlined_call_operand.vmem [shape: bf16[6,64,32], index: 5, kind: input, shape index: {}]   ;;  %s8732_s6 = inlined_call_operand.hbm [shape: f32[6,4,32], index: 6, kind: input, shape index: {}]   ;;  %s8733_s7 = inlined_call_operand.vmem [shape: f32[6,1,64], index: 7, kind: input, shape index: {}]   ;;  %s8734_s8 = inlined_call_operand.hbm [shape: f32[2,24,32], index: 8, kind: output, shape index: {}]  }
   0x1   :  { %14 = vsyncpa [#allocation6], 0 }
   0x2   :  { %15 = vsyncpa [#allocation4], 0  ;;  %s20_s29 = sshll.u32 %s8726_s0, 4  ;;  %s6760_s30 = smov [#allocation2]   ;;  %s21_s29 = int_to_ptr.hbm [resolvable:$true] %s20_s29 }
   0x3   :  { %s22_s9 = sshll.u32 %s6760_s30, 4  ;;  %s43_s12 = sshll.u32 %s8732_s6, 4  ;;  %s23_s9 = int_to_ptr.vmem [resolvable:$true] %s22_s9  ;;  %s44_s12 = int_to_ptr.hbm [resolvable:$true] %s43_s12 }
   0x4   :  { %s6761_s13 = smov 128   ;;  %s6762_s14 = smov 8  }
   0x5   :  { %28 = dma.hbm_to_vmem [thread:$0]  %s21_s29, 768, %s23_s9, [#allocation3], %s6761_s13, %s6761_s13, %s6762_s14  }
   0x6   :  { %s6763_s15 = smov [#allocation5]   ;;  %s6764_s17 = smov 64  }
   0x7   :  { %s45_s16 = sshll.u32 %s6763_s15, 4  ;;  %s6765_s0 = smov 4   ;;  %s46_s16 = int_to_ptr.vmem [resolvable:$true] %s45_s16 }
   0x8   :  { %51 = dma.hbm_to_vmem [thread:$0]  %s44_s12, 384, %s46_s16, [#allocation6], %s6764_s17, %s6764_s17, %s6765_s0  }
   0x9   :  { %6754 = dma.done.wait [#allocation3], 768  }
   0xa   :  { %6755 = vsyncadd [#allocation3], 4294966528 }
   0xb   :  { %6756 = dma.done.wait [#allocation6], 384  }
   0xc   :  { %6757 = vsyncadd [#allocation6], 4294966912  ;;  %v5893_v0 = vld [vmem:[%s8728_s2 + $0x8] sm:$0xff]  ;;  %v5892_v1 = vld [vmem:[%s8728_s2] sm:$0xff]  ;;  %vm274_vm0 = vcmask 261120   ;;  %s6766_s21 = smov 120  }
   0xd   :  { %v64_v2 = vld [vmem:[#allocation2 + $0x8] sm:$0xff]  ;;  %v65_v3 = vld [vmem:[#allocation2 + $0x10] sm:$0xff]  ;;  %v67_v4 = vld [vmem:[#allocation2 + $0x20] sm:$0xff]  ;;  %287 = vmatpush.bf16.msra.mxu0 %v5893_v0  ;;  %5952 = vmatpush.bf16.msra.mxu3 %v5893_v0  ;;  %s6767_s22 = smov 104   ;;  %s6768_s23 = smov 112   ;;  %vm384_vm1 = vcmask 64512  }
   0xe   :  { %v68_v5 = vld [vmem:[#allocation2 + $0x28] sm:$0xff]  ;;  %v260_v6 = vpack.c.bf16 %v65_v3, %v64_v2  ;;  %s6769_s24 = smov 96   ;;  %vm519_vm6 = vcmask 523264   ;;  %s6772_s25 = smov 16   ;;  %vm910_vm10 = vcmask 130048   ;;  %vm915_vm11 = vcmask 195584  }
   0xf   :  { %v261_v7 = vpack.c.bf16 %v68_v5, %v67_v4  ;;  %s6773_s26 = smov 24   ;;  %s5387_s0 = sshll.u32 %s8734_s8, 4  ;;  %s5388_s0 = int_to_ptr.hbm [resolvable:$true] %s5387_s0 }
  0x11   :  { %288 = vmatpush.bf16.msra.mxu0 %v5892_v1  ;;  %5953 = vmatpush.bf16.msra.mxu3 %v5892_v1 }
  0x14   :  { %5429 = vmatmul.msk.bf16.vlgmr.msra.gmra.mxu0 %vm274_vm0, %v260_v6  ;;  %5430 = vmatmul.msk.bf16.vlgmr.msra.gmra.mxu3 %vm274_vm0, %v261_v7 }
  0x91   :  { %v6842_v8 = vpop.f32.mrf.mxu0 }
  0x92   :  { %v340_v60 = vpack.c.bf16 %v6842_v8, %v6842_v8 }
  0x94   :  { %v364_v0 = vunpack.c.l.b16 %v340_v60 }
  0x97   :  { %v6844_v9 = vpop.f32.mrf.mxu3 }
  0x98   :  { %v348_v1 = vpack.c.bf16 %v6844_v9, %v6844_v9 }
  0x99   :  { %v6846_v10 = vpop.f32.mrf.mxu0 }
  0x9a   :  { %v5982_v11 = vpack.i.bf16 %v6846_v10, %v6842_v8  ;;  %v341_v57 = vpack.c.bf16 %v6846_v10, %v6846_v10  ;;  %v446_v5 = vunpack.c.l.b16 %v348_v1 }
  0x9c   :  { %5983 = vrot.lane.b32.xlu1 %v5982_v11, %s6766_s21  ;;  %5973 = vrot.lane.b32.xlu0 %v5982_v11, %s6767_s22  ;;  %v365_v61 = vunpack.c.l.b16 %v341_v57 }
  0x9e   :  { %v372_v2 = vpack.c.b16 %v365_v61, %v364_v0 }
  0x9f   :  { %v6852_v12 = vpop.f32.mrf.mxu3 }
  0xa0   :  { %v5987_v13 = vpack.i.bf16 %v6852_v12, %v6844_v9  ;;  %v349_v3 = vpack.c.bf16 %v6852_v12, %v6852_v12 }
  0xa2   :  { %5993 = vrot.lane.b32.xlu2 %v5987_v13, %s6768_s23  ;;  %v447_v6 = vunpack.c.l.b16 %v349_v3 }
  0xa4   :  { %5988 = vrot.lane.b32.xlu1 %v5987_v13, %s6767_s22  ;;  %5978 = vrot.lane.b32.xlu0 %v5982_v11, %s6768_s23  ;;  %v6895_v7 = vpack.c.b16 %v447_v6, %v446_v5 }
  0xaa   :  { %5998 = vrot.lane.b32.xlu2 %v5987_v13, %s6766_s21 }
  0xfc   :  { %v5994_v14 = vpop.permute.xlu2 %5993 }
  0xfd   :  { %v5996_v17 = vunpack.i.h.bf16 %v5994_v14  ;;  %v5995_v18 = vunpack.i.l.bf16 %v5994_v14 }
  0xff   :  { %v353_v27 = vpack.c.bf16 %v5996_v17, %v5996_v17  ;;  %v352_v28 = vpack.c.bf16 %v5995_v18, %v5995_v18 }
 0x101   :  { %v451_v35 = vunpack.c.l.b16 %v353_v27  ;;  %v450_v36 = vunpack.c.l.b16 %v352_v28  ;;  %v6770_v28 = vmov 0  }
 0x102   :  { %6108 = vset.pattern.permute.xlu0 %v6770_v28  ;;  %6107 = vset.pattern.permute.xlu2 %v6770_v28 }
 0x103   :  { %v6868_v50 = vpack.c.b16 %v451_v35, %v450_v36  ;;  %v6771_v36 = vmov -1e+09  }
 0x104   :  { %v5999_v43 = vpop.permute.xlu2 %5998 }
 0x105   :  { %v6001_v48 = vunpack.i.h.bf16 %v5999_v43  ;;  %v6000_v49 = vunpack.i.l.bf16 %v5999_v43 }
 0x107   :  { %v351_v58 = vpack.c.bf16 %v6001_v48, %v6001_v48  ;;  %v350_v59 = vpack.c.bf16 %v6000_v49, %v6000_v49 }
 0x109   :  { %v449_v62 = vunpack.c.l.b16 %v351_v58  ;;  %v448_v63 = vunpack.c.l.b16 %v350_v59 }
 0x10b   :  { %v6888_v4 = vpack.c.b16 %v449_v62, %v448_v63 }
 0x10e   :  { %v5984_v15 = vpop.permute.xlu1 %5983  ;;  %v5974_v16 = vpop.permute.xlu0 %5973 }
 0x10f   :  { %v5986_v19 = vunpack.i.h.bf16 %v5984_v15  ;;  %v5985_v20 = vunpack.i.l.bf16 %v5984_v15  ;;  %v5976_v21 = vunpack.i.h.bf16 %v5974_v16  ;;  %v5975_v22 = vunpack.i.l.bf16 %v5974_v16 }
 0x111   :  { %v343_v23 = vpack.c.bf16 %v5986_v19, %v5986_v19  ;;  %v342_v24 = vpack.c.bf16 %v5985_v20, %v5985_v20  ;;  %v347_v25 = vpack.c.bf16 %v5976_v21, %v5976_v21  ;;  %v346_v26 = vpack.c.bf16 %v5975_v22, %v5975_v22 }
 0x113   :  { %v367_v29 = vunpack.c.l.b16 %v343_v23  ;;  %v366_v30 = vunpack.c.l.b16 %v342_v24  ;;  %v371_v31 = vunpack.c.l.b16 %v347_v25  ;;  %v370_v32 = vunpack.c.l.b16 %v346_v26 }
 0x115   :  { %v6860_v33 = vpack.c.b16 %v367_v29, %v366_v30  ;;  %v6862_v34 = vpack.c.b16 %v371_v31, %v370_v32  ;;  %v78_v29 = vlaneseq }
 0x116   :  { %v5989_v37 = vpop.permute.xlu1 %5988  ;;  %v5979_v38 = vpop.permute.xlu0 %5978 }
 0x117   :  { %v5991_v39 = vunpack.i.h.bf16 %v5989_v37  ;;  %v5990_v40 = vunpack.i.l.bf16 %v5989_v37  ;;  %v5981_v41 = vunpack.i.h.bf16 %v5979_v38  ;;  %v5980_v42 = vunpack.i.l.bf16 %v5979_v38  ;;  %378 = vrot.lane.b32.xlu2 %v6860_v33, %s6769_s24  ;;  %382 = vrot.lane.b32.xlu0 %v6862_v34, %s6769_s24 }
 0x118   :  { %v6929_v30 = vand.u32 127, %v78_v29 }
 0x119   :  { %v355_v44 = vpack.c.bf16 %v5991_v39, %v5991_v39  ;;  %v354_v45 = vpack.c.bf16 %v5990_v40, %v5990_v40  ;;  %v345_v46 = vpack.c.bf16 %v5981_v41, %v5981_v41  ;;  %v344_v47 = vpack.c.bf16 %v5980_v42, %v5980_v42 }
 0x11a   :  { %vm144_vm2 = vcmp.ge.s32.totalorder %v6929_v30, 16  ;;  %vm146_vm3 = vcmp.ge.s32.totalorder %v6929_v30, 32  ;;  %vm149_vm4 = vcmp.ge.s32.totalorder %v6929_v30, 48 }
 0x11b   :  { %v453_v51 = vunpack.c.l.b16 %v355_v44  ;;  %v452_v52 = vunpack.c.l.b16 %v354_v45  ;;  %v369_v53 = vunpack.c.l.b16 %v345_v46  ;;  %v368_v54 = vunpack.c.l.b16 %v344_v47 }
 0x11c   :  { %v6934_v31 = vsel %vm144_vm2, 1, %v6770_v28  ;;  %v147_v32 = vsel %vm146_vm3, 1, %v6770_v28 }
 0x11d   :  { %v6870_v55 = vpack.c.b16 %v369_v53, %v368_v54  ;;  %v6872_v56 = vpack.c.b16 %v453_v51, %v452_v52 }
 0x11f   :  { %462 = vrot.lane.b32.xlu2 %v6868_v50, %s6769_s24  ;;  %380 = vrot.lane.b32.xlu1 %v6870_v55, %s6769_s24 }
 0x120   :  { %464 = vrot.lane.b32.xlu0 %v6872_v56, %s6769_s24 }
 0x127   :  { %734 = vrot.lane.b32.xlu2 %v6860_v33, %s6764_s17  ;;  %376 = vrot.lane.b32.xlu1 %v372_v2, %s6769_s24 }
 0x128   :  { %460 = vrot.lane.b32.xlu0 %v6888_v4, %s6769_s24 }
 0x12f   :  { %458 = vrot.lane.b32.xlu1 %v6895_v7, %s6769_s24 }
 0x130   :  { %738 = vrot.lane.b32.xlu0 %v6862_v34, %s6764_s17 }
 0x137   :  { %736 = vrot.lane.b32.xlu1 %v6870_v55, %s6764_s17 }
 0x138   :  { %732 = vrot.lane.b32.xlu0 %v372_v2, %s6764_s17 }
 0x171   :  { %v379_v10 = vpop.permute.xlu2 %378 }
 0x172   :  { %v401_v18 = vsel %vm384_vm1, %v379_v10, 0 }
 0x179   :  { %v463_v16 = vpop.permute.xlu2 %462 }
 0x17a   :  { %v485_v19 = vsel %vm384_vm1, %v463_v16, 0 }
 0x181   :  { %v735_v26 = vpop.permute.xlu2 %734 }
 0x189   :  { %v383_v8 = vpop.permute.xlu0 %382 }
 0x18a   :  { %v407_v9 = vsel %vm384_vm1, %v383_v8, 0 }
 0x18b   :  { %413 = vmatpush.bf16.xpose.msra.mxu1 %v407_v9 }
 0x191   :  { %v381_v11 = vpop.permute.xlu1 %380 }
 0x192   :  { %v465_v12 = vpop.permute.xlu0 %464  ;;  %v404_v13 = vsel %vm384_vm1, %v381_v11, 0 }
 0x193   :  { %414 = vmatpush.bf16.xpose.msra.mxu1 %v404_v13  ;;  %v488_v14 = vsel %vm384_vm1, %v465_v12, 0 }
 0x194   :  { %494 = vmatpush.bf16.xpose.msra.mxu2 %v488_v14 }
 0x199   :  { %v377_v15 = vpop.permute.xlu1 %376 }
 0x19a   :  { %v461_v17 = vpop.permute.xlu0 %460  ;;  %v398_v22 = vsel %vm384_vm1, %v377_v15, 0 }
 0x19b   :  { %415 = vmatpush.bf16.xpose.msra.mxu1 %v401_v18  ;;  %v482_v23 = vsel %vm384_vm1, %v461_v17, 0 }
 0x19c   :  { %495 = vmatpush.bf16.xpose.msra.mxu2 %v485_v19 }
 0x1a1   :  { %v459_v20 = vpop.permute.xlu1 %458 }
 0x1a2   :  { %v739_v21 = vpop.permute.xlu0 %738  ;;  %v479_v25 = vsel %vm384_vm1, %v459_v20, 0 }
 0x1a3   :  { %760 = vmatpush.bf16.msrb.mxu3 %v739_v21  ;;  %416 = vmatpush.bf16.xpose.msra.mxu1 %v398_v22 }
 0x1a4   :  { %496 = vmatpush.bf16.xpose.msra.mxu2 %v482_v23 }
 0x1a9   :  { %v737_v24 = vpop.permute.xlu1 %736 }
 0x1aa   :  { %5431 = vmatmul.msk.bf16.vlgmr.msra.gmra.mxu1 %vm384_vm1, %v372_v2  ;;  %761 = vmatpush.bf16.msrb.mxu3 %v737_v24  ;;  %v733_v27 = vpop.permute.xlu0 %732 }
 0x1ac   :  { %497 = vmatpush.bf16.xpose.msra.mxu2 %v479_v25 }
 0x1ae   :  { %762 = vmatpush.bf16.msrb.mxu3 %v735_v26 }
 0x1b2   :  { %763 = vmatpush.bf16.msrb.mxu3 %v733_v27 }
 0x1b3   :  { %5435 = vmatmul.msk.bf16.vlgmr.msra.gmra.mxu2 %vm384_vm1, %v6895_v7 }
 0x1ba   :  { %5432 = vmatmul.msk.bf16.gmra.mxu1 %vm384_vm1, %v6860_v33  ;;  %v148_v33 = vadd.s32 %v147_v32, %v6934_v31 }
 0x1c3   :  { %5436 = vmatmul.msk.bf16.gmra.mxu2 %vm384_vm1, %v6888_v4 }
 0x1ca   :  { %5433 = vmatmul.msk.bf16.gmra.mxu1 %vm384_vm1, %v6870_v55 }
 0x1d3   :  { %5437 = vmatmul.msk.bf16.gmra.mxu2 %vm384_vm1, %v6868_v50 }
 0x1da   :  { %5434 = vmatmul.msk.bf16.gmra.mxu1 %vm384_vm1, %v6862_v34  ;;  %v150_v34 = vsel %vm149_vm4, 1, %v6770_v28 }
 0x1db   :  { %v151_v35 = vadd.s32 %v150_v34, %v148_v33 }
 0x1dd   :  { %vm5401_vm5 = vcmp.eq.s32.totalorder %v151_v35, 0  ;;  %vm5403_vm7 = vcmp.eq.s32.totalorder %v151_v35, 1  ;;  %vm5405_vm8 = vcmp.eq.s32.totalorder %v151_v35, 2  ;;  %vm5407_vm9 = vcmp.eq.s32.totalorder %v151_v35, 3 }
 0x1de   :  { %v6941_v37 = vsel %vm5401_vm5, 0.0, %v6771_v36  ;;  %v6954_v44 = vsel %vm5403_vm7, 0.0, %v6771_v36  ;;  %v6977_v59 = vsel %vm5405_vm8, 0.0, %v6771_v36  ;;  %v7000_v10 = vsel %vm5407_vm9, 0.0, %v6771_v36 }
 0x1e3   :  { %5438 = vmatmul.msk.bf16.gmra.mxu2 %vm384_vm1, %v6872_v56 }
 0x227   :  { %v418_v38 = vpop.f32.mrf.mxu1 }
 0x228   :  { %v6944_v39 = vadd.f32 %v418_v38, %v6941_v37 }
 0x22a   :  { %v520_v40 = vsel %vm519_vm6, %v6944_v39, -inf }
 0x22b   :  { %521 = vmax.xlane.f32.xlu2 %v520_v40 }
 0x22f   :  { %v420_v41 = vpop.f32.mrf.mxu1 }
 0x230   :  { %v6949_v42 = vadd.f32 %v420_v41, %v6941_v37 }
 0x232   :  { %v523_v43 = vsel %vm519_vm6, %v6949_v42, -inf }
 0x233   :  { %524 = vmax.xlane.f32.xlu0 %v523_v43 }
 0x236   :  { %v499_v45 = vpop.f32.mrf.mxu2 }
 0x237   :  { %v6957_v46 = vadd.f32 %v499_v45, %v6941_v37  ;;  %v423_v47 = vpop.f32.mrf.mxu1 }
 0x238   :  { %v6960_v48 = vadd.f32 %v423_v47, %v6954_v44 }
 0x239   :  { %v544_v49 = vsel %vm519_vm6, %v6957_v46, -inf }
 0x23a   :  { %545 = vmax.xlane.f32.xlu2 %v544_v49  ;;  %v526_v51 = vsel %vm519_vm6, %v6960_v48, -inf }
 0x23b   :  { %527 = vmax.xlane.f32.xlu1 %v526_v51 }
 0x23e   :  { %v501_v52 = vpop.f32.mrf.mxu2 }
 0x23f   :  { %v6967_v53 = vadd.f32 %v501_v52, %v6941_v37  ;;  %v425_v54 = vpop.f32.mrf.mxu1 }
 0x240   :  { %v6970_v55 = vadd.f32 %v425_v54, %v6954_v44 }
 0x241   :  { %v547_v57 = vsel %vm519_vm6, %v6967_v53, -inf }
 0x242   :  { %548 = vmax.xlane.f32.xlu0 %v547_v57  ;;  %v529_v58 = vsel %vm519_vm6, %v6970_v55, -inf }
 0x243   :  { %530 = vmax.xlane.f32.xlu2 %v529_v58 }
 0x246   :  { %v504_v60 = vpop.f32.mrf.mxu2 }
 0x247   :  { %v6980_v61 = vadd.f32 %v504_v60, %v6954_v44  ;;  %v428_v62 = vpop.f32.mrf.mxu1 }
 0x248   :  { %v6983_v63 = vadd.f32 %v428_v62, %v6977_v59 }
 0x249   :  { %v550_v0 = vsel %vm519_vm6, %v6980_v61, -inf }
 0x24a   :  { %551 = vmax.xlane.f32.xlu0 %v550_v0  ;;  %v532_v1 = vsel %vm519_vm6, %v6983_v63, -inf }
 0x24b   :  { %533 = vmax.xlane.f32.xlu1 %v532_v1 }
 0x24e   :  { %v506_v2 = vpop.f32.mrf.mxu2 }
 0x24f   :  { %v6990_v3 = vadd.f32 %v506_v2, %v6954_v44  ;;  %v430_v5 = vpop.f32.mrf.mxu1 }
 0x250   :  { %v6993_v6 = vadd.f32 %v430_v5, %v6977_v59 }
 0x251   :  { %v553_v8 = vsel %vm519_vm6, %v6990_v3, -inf }
 0x252   :  { %v535_v9 = vsel %vm519_vm6, %v6993_v6, -inf }
 0x253   :  { %554 = vmax.xlane.f32.xlu1 %v553_v8  ;;  %536 = vmax.xlane.f32.xlu2 %v535_v9 }
 0x256   :  { %v509_v11 = vpop.f32.mrf.mxu2 }
 0x257   :  { %v7003_v12 = vadd.f32 %v509_v11, %v6977_v59  ;;  %v433_v13 = vpop.f32.mrf.mxu1 }
 0x258   :  { %v7006_v14 = vadd.f32 %v433_v13, %v7000_v10 }
 0x259   :  { %v556_v15 = vsel %vm519_vm6, %v7003_v12, -inf }
 0x25a   :  { %v538_v16 = vsel %vm519_vm6, %v7006_v14, -inf }
 0x25b   :  { %557 = vmax.xlane.f32.xlu1 %v556_v15  ;;  %539 = vmax.xlane.f32.xlu2 %v538_v16 }
 0x25e   :  { %v511_v17 = vpop.f32.mrf.mxu2 }
 0x25f   :  { %v7013_v18 = vadd.f32 %v511_v17, %v6977_v59  ;;  %v435_v19 = vpop.f32.mrf.mxu1 }
 0x260   :  { %v7016_v20 = vadd.f32 %v435_v19, %v7000_v10 }
 0x261   :  { %v559_v22 = vsel %vm519_vm6, %v7013_v18, -inf }
 0x262   :  { %v541_v21 = vsel %vm519_vm6, %v7016_v20, -inf }
 0x263   :  { %542 = vmax.xlane.f32.xlu0 %v541_v21  ;;  %560 = vmax.xlane.f32.xlu2 %v559_v22 }
 0x266   :  { %v514_v23 = vpop.f32.mrf.mxu2 }
 0x267   :  { %v7023_v24 = vadd.f32 %v514_v23, %v7000_v10 }
 0x269   :  { %v562_v25 = vsel %vm519_vm6, %v7023_v24, -inf }
 0x26b   :  { %563 = vmax.xlane.f32.xlu2 %v562_v25 }
 0x26e   :  { %v516_v26 = vpop.f32.mrf.mxu2 }
 0x26f   :  { %v7028_v27 = vadd.f32 %v516_v26, %v7000_v10 }
 0x271   :  { %v565_v29 = vsel %vm519_vm6, %v7028_v27, -inf }
 0x272   :  { %566 = vmax.xlane.f32.xlu0 %v565_v29 }
 0x29e   :  { %v522_v32 = vpop.xlane.xlu2 %521 }
 0x29f   :  { %v568_v33 = vsub.f32 %v6944_v39, %v522_v32 }
 0x2a1   :  { %v584_v34 = vmul.f32 1.442695, %v568_v33 }
 0x2a3   :  { %6330 = vpow2.f32 %v584_v34 }
 0x2a6   :  { %v525_v35 = vpop.xlane.xlu0 %524 }
 0x2a7   :  { %v569_v38 = vsub.f32 %v6949_v42, %v525_v35 }
 0x2a9   :  { %v7034_v40 = vpop.eup %6330  ;;  %v586_v41 = vmul.f32 1.442695, %v569_v38 }
 0x2aa   :  { %v616_v43 = vsel %vm519_vm6, %v7034_v40, 0.0 }
 0x2ab   :  { %6332 = vpow2.f32 %v586_v41  ;;  %617 = vadd.xlane.f32.xlu1 %v616_v43 }
 0x2ad   :  { %v546_v62 = vpop.xlane.xlu2 %545 }
 0x2ae   :  { %v528_v45 = vpop.xlane.xlu1 %527  ;;  %v576_v1 = vsub.f32 %v6957_v46, %v546_v62 }
 0x2af   :  { %v570_v47 = vsub.f32 %v6960_v48, %v528_v45 }
 0x2b0   :  { %v600_v5 = vmul.f32 1.442695, %v576_v1 }
 0x2b1   :  { %v7039_v49 = vpop.eup %6332  ;;  %v588_v51 = vmul.f32 1.442695, %v570_v47 }
 0x2b2   :  { %v619_v39 = vsel %vm519_vm6, %v7039_v49, 0.0 }
 0x2b3   :  { %6334 = vpow2.f32 %v588_v51  ;;  %620 = vadd.xlane.f32.xlu2 %v619_v39 }
 0x2b5   :  { %v549_v42 = vpop.xlane.xlu0 %548 }
 0x2b6   :  { %v577_v52 = vsub.f32 %v6967_v53, %v549_v42  ;;  %v531_v53 = vpop.xlane.xlu2 %530 }
 0x2b7   :  { %v571_v11 = vsub.f32 %v6970_v55, %v531_v53 }
 0x2b8   :  { %v602_v54 = vmul.f32 1.442695, %v577_v52 }
 0x2b9   :  { %v7044_v57 = vpop.eup %6334 }
 0x2ba   :  { %6336 = vpow2.f32 %v602_v54  ;;  %v622_v58 = vsel %vm519_vm6, %v7044_v57, 0.0 }
 0x2bb   :  { %623 = vadd.xlane.f32.xlu0 %v622_v58  ;;  %6338 = vpow2.f32 %v600_v5 }
 0x2bd   :  { %v7061_v13 = vpop.xlane.xlu0 %551 }
 0x2be   :  { %v534_v2 = vpop.xlane.xlu1 %533 }
 0x2bf   :  { %v572_v8 = vsub.f32 %v6983_v63, %v534_v2 }
 0x2c0   :  { %v7048_v48 = vpop.eup %6336 }
 0x2c1   :  { %v643_v60 = vsel %vm519_vm6, %v7048_v48, 0.0  ;;  %v7063_v16 = vpop.eup %6338 }
 0x2c2   :  { %v640_v63 = vsel %vm519_vm6, %v7063_v16, 0.0 }
 0x2c3   :  { %644 = vadd.xlane.f32.xlu0 %v643_v60 }
 0x2c4   :  { %809 = vrot.lane.b32.xlu1 %v6868_v50, %s6764_s17  ;;  %v592_v50 = vmul.f32 1.442695, %v572_v8  ;;  %v578_v8 = vsub.f32 %v6980_v61, %v7061_v13 }
 0x2c6   :  { %v537_v0 = vpop.xlane.xlu2 %536  ;;  %v555_v15 = vpop.xlane.xlu1 %554  ;;  %6340 = vpow2.f32 %v592_v50 }
 0x2c7   :  { %v573_v55 = vsub.f32 %v6993_v6, %v537_v0 }
 0x2c9   :  { %v594_v25 = vmul.f32 1.442695, %v573_v55 }
 0x2cb   :  { %811 = vrot.lane.b32.xlu2 %v6872_v56, %s6764_s17  ;;  %v590_v56 = vmul.f32 1.442695, %v571_v11 }
 0x2cc   :  { %v7071_v21 = vpop.eup %6340 }
 0x2cd   :  { %6342 = vpow2.f32 %v590_v56 }
 0x2ce   :  { %v540_v9 = vpop.xlane.xlu2 %539  ;;  %v558_v38 = vpop.xlane.xlu1 %557 }
 0x2cf   :  { %v574_v6 = vsub.f32 %v7006_v14, %v540_v9  ;;  %v580_v45 = vsub.f32 %v7003_v12, %v558_v38  ;;  %v604_v9 = vmul.f32 1.442695, %v578_v8 }
 0x2d3   :  { %v7073_v22 = vpop.eup %6342 }
 0x2d4   :  { %v625_v26 = vsel %vm519_vm6, %v7073_v22, 0.0 }
 0x2d6   :  { %v7066_v46 = vpop.xlane.xlu2 %560  ;;  %v543_v19 = vpop.xlane.xlu0 %542 }
 0x2d7   :  { %807 = vrot.lane.b32.xlu0 %v6888_v4, %s6764_s17  ;;  %v579_v4 = vsub.f32 %v6990_v3, %v555_v15  ;;  %v575_v23 = vsub.f32 %v7016_v20, %v543_v19  ;;  %v628_v3 = vsel %vm519_vm6, %v7071_v21, 0.0  ;;  %v596_v20 = vmul.f32 1.442695, %v574_v6 }
 0x2d9   :  { %v606_v17 = vmul.f32 1.442695, %v579_v4  ;;  %v598_v29 = vmul.f32 1.442695, %v575_v23  ;;  %v581_v4 = vsub.f32 %v7013_v18, %v7066_v46 }
 0x2db   :  { %6344 = vpow2.f32 %v606_v17  ;;  %v610_v19 = vmul.f32 1.442695, %v581_v4 }
 0x2dc   :  { %6346 = vpow2.f32 %v594_v25 }
 0x2dd   :  { %6348 = vpow2.f32 %v598_v29 }
 0x2de   :  { %v564_v32 = vpop.xlane.xlu2 %563  ;;  %6350 = vpow2.f32 %v596_v20 }
 0x2df   :  { %v582_v34 = vsub.f32 %v7023_v24, %v564_v32  ;;  %v608_v24 = vmul.f32 1.442695, %v580_v45 }
 0x2e1   :  { %v7081_v33 = vpop.eup %6344  ;;  %v612_v43 = vmul.f32 1.442695, %v582_v34 }
 0x2e2   :  { %v649_v35 = vsel %vm519_vm6, %v7081_v33, 0.0  ;;  %v7086_v41 = vpop.eup %6346 }
 0x2e3   :  { %v7089_v47 = vpop.eup %6348  ;;  %v631_v14 = vsel %vm519_vm6, %v7086_v41, 0.0  ;;  %6352 = vpow2.f32 %v612_v43 }
 0x2e4   :  { %v637_v51 = vsel %vm519_vm6, %v7089_v47, 0.0  ;;  %v7095_v42 = vpop.eup %6350  ;;  %6354 = vpow2.f32 %v608_v24 }
 0x2e5   :  { %v567_v39 = vpop.xlane.xlu0 %566  ;;  %v634_v12 = vsel %vm519_vm6, %v7095_v42, 0.0 }
 0x2e6   :  { %v583_v52 = vsub.f32 %v7028_v27, %v567_v39 }
 0x2e8   :  { %v614_v58 = vmul.f32 1.442695, %v583_v52 }
 0x2e9   :  { %v7098_v54 = vpop.eup %6352 }
 0x2ea   :  { %v658_v60 = vsel %vm519_vm6, %v7098_v54, 0.0  ;;  %v7104_v62 = vpop.eup %6354  ;;  %6356 = vpow2.f32 %v614_v58 }
 0x2eb   :  { %v652_v27 = vsel %vm519_vm6, %v7104_v62, 0.0 }
 0x2ee   :  { %641 = vadd.xlane.f32.xlu1 %v640_v63 }
 0x2f0   :  { %v7110_v53 = vpop.eup %6356 }
 0x2f1   :  { %v661_v0 = vsel %vm519_vm6, %v7110_v53, 0.0 }
 0x2f4   :  { %629 = vadd.xlane.f32.xlu2 %v628_v3 }
 0x2f6   :  { %626 = vadd.xlane.f32.xlu1 %v625_v26 }
 0x2fc   :  { %650 = vadd.xlane.f32.xlu2 %v649_v35 }
 0x301   :  { %632 = vadd.xlane.f32.xlu0 %v631_v14 }
 0x304   :  { %638 = vadd.xlane.f32.xlu2 %v637_v51 }
 0x309   :  { %635 = vadd.xlane.f32.xlu0 %v634_v12 }
 0x30c   :  { %659 = vadd.xlane.f32.xlu2 %v658_v60 }
 0x30f   :  { %805 = vrot.lane.b32.xlu1 %v6895_v7, %s6764_s17 }
 0x311   :  { %653 = vadd.xlane.f32.xlu0 %v652_v27 }
 0x319   :  { %662 = vadd.xlane.f32.xlu0 %v661_v0 }
 0x31e   :  { %v618_v1 = vpop.xlane.xlu1 %617 }
 0x31f   :  { %6358 = vrcp.f32 %v618_v1 }
 0x325   :  { %v6359_v5 = vpop.eup %6358 }
 0x326   :  { %v621_v2 = vpop.xlane.xlu2 %620  ;;  %v680_v7 = vmul.f32 %v6359_v5, %v7034_v40 }
 0x327   :  { %6360 = vrcp.f32 %v621_v2 }
 0x328   :  { %v696_v50 = vpack.c.bf16 %v680_v7, %v680_v7  ;;  %6362 = vpow2.f32 %v604_v9 }
 0x329   :  { %6364 = vpow2.f32 %v610_v19 }
 0x32a   :  { %v720_v17 = vunpack.c.l.b16 %v696_v50 }
 0x32d   :  { %v6361_v11 = vpop.eup %6360 }
 0x32e   :  { %v681_v15 = vmul.f32 %v6361_v11, %v7039_v49  ;;  %v812_v56 = vpop.permute.xlu2 %811  ;;  %v7120_v61 = vpop.eup %6362 }
 0x32f   :  { %833 = vmatpush.bf16.msrb.mxu0 %v812_v56  ;;  %v624_v13 = vpop.xlane.xlu0 %623  ;;  %v646_v49 = vsel %vm519_vm6, %v7120_v61, 0.0  ;;  %v7125_v25 = vpop.eup %6364 }
 0x330   :  { %v697_v63 = vpack.c.bf16 %v681_v15, %v681_v15  ;;  %v655_v18 = vsel %vm519_vm6, %v7125_v25, 0.0  ;;  %6366 = vrcp.f32 %v624_v13 }
 0x332   :  { %v721_v55 = vunpack.c.l.b16 %v697_v63 }
 0x334   :  { %v728_v23 = vpack.c.b16 %v721_v55, %v720_v17 }
 0x336   :  { %5439 = vmatmul.msk.bf16.vlgmr.msrb.gmra.mxu3 %vm519_vm6, %v728_v23  ;;  %v810_v40 = vpop.permute.xlu1 %809  ;;  %v6367_v6 = vpop.eup %6366 }
 0x337   :  { %834 = vmatpush.bf16.msrb.mxu0 %v810_v40  ;;  %v645_v46 = vpop.xlane.xlu0 %644  ;;  %v682_v34 = vmul.f32 %v6367_v6, %v7044_v57 }
 0x339   :  { %647 = vadd.xlane.f32.xlu1 %v646_v49  ;;  %v698_v38 = vpack.c.bf16 %v682_v34, %v682_v34 }
 0x33b   :  { %v722_v24 = vunpack.c.l.b16 %v698_v38 }
 0x341   :  { %656 = vadd.xlane.f32.xlu1 %v655_v18 }
 0x349   :  { %v808_v3 = vpop.permute.xlu0 %807 }
 0x34a   :  { %835 = vmatpush.bf16.msrb.mxu0 %v808_v3 }
 0x361   :  { %v642_v26 = vpop.xlane.xlu1 %641 }
 0x367   :  { %v630_v32 = vpop.xlane.xlu2 %629 }
 0x369   :  { %v627_v29 = vpop.xlane.xlu1 %626 }
 0x36a   :  { %6368 = vrcp.f32 %v627_v29 }
 0x36b   :  { %6370 = vrcp.f32 %v642_v26 }
 0x36c   :  { %6372 = vrcp.f32 %v645_v46 }
 0x36d   :  { %6374 = vrcp.f32 %v630_v32 }
 0x36f   :  { %v651_v12 = vpop.xlane.xlu2 %650 }
 0x370   :  { %v6369_v20 = vpop.eup %6368 }
 0x371   :  { %v683_v35 = vmul.f32 %v6369_v20, %v7073_v22  ;;  %v6371_v45 = vpop.eup %6370 }
 0x372   :  { %v6373_v39 = vpop.eup %6372  ;;  %v688_v52 = vmul.f32 %v6371_v45, %v7063_v16 }
 0x373   :  { %v699_v43 = vpack.c.bf16 %v683_v35, %v683_v35  ;;  %v689_v57 = vmul.f32 %v6373_v39, %v7048_v48  ;;  %v6375_v60 = vpop.eup %6374 }
 0x374   :  { %v633_v14 = vpop.xlane.xlu0 %632  ;;  %v704_v22 = vpack.c.bf16 %v688_v52, %v688_v52  ;;  %v684_v2 = vmul.f32 %v6375_v60, %v7071_v21 }
 0x375   :  { %6376 = vrcp.f32 %v633_v14  ;;  %v723_v51 = vunpack.c.l.b16 %v699_v43  ;;  %v705_v1 = vpack.c.bf16 %v689_v57, %v689_v57 }
 0x376   :  { %v793_v8 = vunpack.c.l.b16 %v704_v22  ;;  %v700_v50 = vpack.c.bf16 %v684_v2, %v684_v2 }
 0x377   :  { %v729_v58 = vpack.c.b16 %v723_v51, %v722_v24  ;;  %v639_v9 = vpop.xlane.xlu2 %638  ;;  %v794_v16 = vunpack.c.l.b16 %v705_v1 }
 0x378   :  { %v724_v56 = vunpack.c.l.b16 %v700_v50 }
 0x379   :  { %5440 = vmatmul.msk.bf16.gmra.mxu3 %vm519_vm6, %v729_v58  ;;  %v801_v48 = vpack.c.b16 %v794_v16, %v793_v8 }
 0x37b   :  { %v6377_v27 = vpop.eup %6376 }
 0x37c   :  { %v685_v0 = vmul.f32 %v6377_v27, %v7086_v41  ;;  %v636_v5 = vpop.xlane.xlu0 %635 }
 0x37d   :  { %6378 = vrcp.f32 %v636_v5 }
 0x37e   :  { %v701_v7 = vpack.c.bf16 %v685_v0, %v685_v0  ;;  %6380 = vrcp.f32 %v639_v9 }
 0x37f   :  { %6382 = vrcp.f32 %v651_v12  ;;  %v660_v24 = vpop.xlane.xlu2 %659 }
 0x380   :  { %v725_v15 = vunpack.c.l.b16 %v701_v7 }
 0x381   :  { %v806_v11 = vpop.permute.xlu1 %805 }
 0x382   :  { %836 = vmatpush.bf16.msrb.mxu0 %v806_v11  ;;  %v730_v4 = vpack.c.b16 %v725_v15, %v724_v56 }
 0x383   :  { %v6379_v41 = vpop.eup %6378 }
 0x384   :  { %v6381_v21 = vpop.eup %6380  ;;  %v686_v63 = vmul.f32 %v6379_v41, %v7095_v42  ;;  %v654_v26 = vpop.xlane.xlu0 %653 }
 0x385   :  { %5443 = vmatmul.msk.bf16.vlgmr.msrb.gmra.mxu0 %vm519_vm6, %v801_v48  ;;  %v687_v17 = vmul.f32 %v6381_v21, %v7089_v47  ;;  %v6383_v18 = vpop.eup %6382 }
 0x386   :  { %v702_v55 = vpack.c.bf16 %v686_v63, %v686_v63  ;;  %v691_v46 = vmul.f32 %v6383_v18, %v7081_v33 }
 0x387   :  { %v703_v19 = vpack.c.bf16 %v687_v17, %v687_v17 }
 0x388   :  { %v726_v23 = vunpack.c.l.b16 %v702_v55  ;;  %v707_v6 = vpack.c.bf16 %v691_v46, %v691_v46 }
 0x389   :  { %5441 = vmatmul.msk.bf16.gmra.mxu3 %vm519_vm6, %v730_v4  ;;  %v727_v40 = vunpack.c.l.b16 %v703_v19  ;;  %v5895_v19 = vld [vmem:[%s8729_s3 + $0x8] sm:$0xff] }
 0x38a   :  { %v796_v34 = vunpack.c.l.b16 %v707_v6  ;;  %947 = vmatpush.bf16.msra.mxu3 %v5895_v19 }
 0x38b   :  { %v731_v13 = vpack.c.b16 %v727_v40, %v726_v23 }
 0x38c   :  { %v663_v45 = vpop.xlane.xlu0 %662 }
 0x399   :  { %5442 = vmatmul.msk.bf16.gmra.mxu3 %vm519_vm6, %v731_v13  ;;  %v5894_v13 = vld [vmem:[%s8729_s3] sm:$0xff] }
 0x39a   :  { %948 = vmatpush.bf16.msra.mxu3 %v5894_v13 }
 0x3ac   :  { %v648_v49 = vpop.xlane.xlu1 %647 }
 0x3ad   :  { %6384 = vrcp.f32 %v648_v49 }
 0x3b3   :  { %v6385_v3 = vpop.eup %6384 }
 0x3b4   :  { %v657_v29 = vpop.xlane.xlu1 %656  ;;  %v690_v42 = vmul.f32 %v6385_v3, %v7120_v61 }
 0x3b5   :  { %6386 = vrcp.f32 %v657_v29 }
 0x3b6   :  { %v706_v47 = vpack.c.bf16 %v690_v42, %v690_v42  ;;  %6388 = vrcp.f32 %v654_v26 }
 0x3b7   :  { %6390 = vrcp.f32 %v663_v45 }
 0x3b8   :  { %v795_v32 = vunpack.c.l.b16 %v706_v47  ;;  %6392 = vrcp.f32 %v660_v24 }
 0x3b9   :  { %v765_v1 = vpop.f32.mrf.mxu3 }
 0x3ba   :  { %v802_v20 = vpack.c.b16 %v796_v34, %v795_v32 }
 0x3bb   :  { %v6387_v35 = vpop.eup %6386 }
 0x3bc   :  { %5444 = vmatmul.msk.bf16.gmra.mxu0 %vm519_vm6, %v802_v20  ;;  %v6389_v38 = vpop.eup %6388  ;;  %v693_v43 = vmul.f32 %v6387_v35, %v7125_v25 }
 0x3bd   :  { %v692_v33 = vmul.f32 %v6389_v38, %v7104_v62  ;;  %v6391_v12 = vpop.eup %6390 }
 0x3be   :  { %v709_v14 = vpack.c.bf16 %v693_v43, %v693_v43  ;;  %v6393_v58 = vpop.eup %6392  ;;  %v695_v57 = vmul.f32 %v6391_v12, %v7110_v53 }
 0x3bf   :  { %v708_v51 = vpack.c.bf16 %v692_v33, %v692_v33  ;;  %v694_v60 = vmul.f32 %v6393_v58, %v7098_v54 }
 0x3c0   :  { %v798_v61 = vunpack.c.l.b16 %v709_v14  ;;  %v711_v25 = vpack.c.bf16 %v695_v57, %v695_v57 }
 0x3c1   :  { %v797_v39 = vunpack.c.l.b16 %v708_v51  ;;  %v710_v27 = vpack.c.bf16 %v694_v60, %v694_v60  ;;  %v767_v2 = vpop.f32.mrf.mxu3 }
 0x3c2   :  { %v800_v62 = vunpack.c.l.b16 %v711_v25 }
 0x3c3   :  { %v803_v52 = vpack.c.b16 %v798_v61, %v797_v39  ;;  %v799_v22 = vunpack.c.l.b16 %v710_v27 }
 0x3c5   :  { %v804_v0 = vpack.c.b16 %v800_v62, %v799_v22 }
 0x3cc   :  { %5445 = vmatmul.msk.bf16.gmra.mxu0 %vm519_vm6, %v803_v52 }
 0x3dc   :  { %5446 = vmatmul.msk.bf16.gmra.mxu0 %vm519_vm6, %v804_v0 }
 0x3fc   :  { %v770_v5 = vpop.f32.mrf.mxu3 }
 0x402   :  { %v838_v48 = vpop.f32.mrf.mxu0 }
 0x404   :  { %v772_v8 = vpop.f32.mrf.mxu3 }
 0x405   :  { %v6002_v7 = vpack.i.bf16 %v772_v8, %v770_v5  ;;  %v6774_v5 = vmov 16.0  }
 0x406   :  { %6394 = vrcp.f32 %v6774_v5 }
 0x407   :  { %6003 = vrot.lane.b32.xlu1 %v6002_v7, %s6762_s14 }
 0x40a   :  { %v840_v15 = vpop.f32.mrf.mxu0 }
 0x40c   :  { %v775_v9 = vpop.f32.mrf.mxu3 }
 0x414   :  { %v777_v11 = vpop.f32.mrf.mxu3 }
 0x415   :  { %v6007_v16 = vpack.i.bf16 %v777_v11, %v775_v9  ;;  %v6395_v9 = vpop.eup %6394 }
 0x416   :  { %vm987_vm12 = vweird.f32 %v6395_v9 }
 0x417   :  { %6008 = vrot.lane.b32.xlu2 %v6007_v16, %s6772_s25  ;;  %v6678_v16 = vld [vmem:[#allocation2 + $0x8] sm:$0xff] }
 0x41c   :  { %v780_v54 = vpop.f32.mrf.mxu3 }
 0x424   :  { %v782_v53 = vpop.f32.mrf.mxu3 }
 0x425   :  { %v6012_v50 = vpack.i.bf16 %v782_v53, %v780_v54 }
 0x427   :  { %6013 = vrot.lane.b32.xlu0 %v6012_v50, %s6773_s26  ;;  %v983_v50 = vmul.f32 16.0, %v6395_v9 }
 0x439   :  { %v843_v56 = vpop.f32.mrf.mxu0 }
 0x441   :  { %v845_v4 = vpop.f32.mrf.mxu0 }
 0x442   :  { %v6017_v41 = vpack.i.bf16 %v845_v4, %v843_v56 }
 0x444   :  { %6018 = vrot.lane.b32.xlu1 %v6017_v41, %s6762_s14  ;;  %v984_v41 = vsub.f32 1.0, %v983_v50 }
 0x449   :  { %v848_v21 = vpop.f32.mrf.mxu0 }
 0x451   :  { %v850_v63 = vpop.f32.mrf.mxu0 }
 0x452   :  { %v6022_v17 = vpack.i.bf16 %v850_v63, %v848_v21 }
 0x454   :  { %6023 = vrot.lane.b32.xlu0 %v6022_v17, %s6772_s25  ;;  %v985_v17 = vmul.f32 %v6395_v9, %v984_v41 }
 0x459   :  { %v853_v55 = vpop.f32.mrf.mxu0 }
 0x461   :  { %v855_v23 = vpop.f32.mrf.mxu0 }
 0x462   :  { %v6027_v40 = vpack.i.bf16 %v855_v23, %v853_v55  ;;  %v986_v23 = vadd.f32 %v6395_v9, %v985_v17 }
 0x464   :  { %6028 = vrot.lane.b32.xlu2 %v6027_v40, %s6773_s26 }
 0x471   :  { %v6009_v3 = vpop.permute.xlu2 %6008 }
 0x472   :  { %v6011_v42 = vunpack.i.h.bf16 %v6009_v3  ;;  %v6010_v6 = vunpack.i.l.bf16 %v6009_v3 }
 0x479   :  { %v6004_v49 = vpop.permute.xlu1 %6003 }
 0x47a   :  { %v6006_v18 = vunpack.i.h.bf16 %v6004_v49  ;;  %v6005_v46 = vunpack.i.l.bf16 %v6004_v49  ;;  %v7181_v49 = vsel %vm987_vm12, %v6395_v9, %v986_v23 }
 0x47c   :  { %v907_v26 = vsel %vm384_vm1, %v767_v2, %v6006_v18  ;;  %v906_v29 = vsel %vm384_vm1, %v765_v1, %v6005_v46  ;;  %v7176_v1 = vld [vmem:[#allocation5] sm:$0xf] }
 0x47d   :  { %v911_v20 = vsel %vm910_vm10, %v906_v29, %v6010_v6  ;;  %v912_v35 = vsel %vm910_vm10, %v907_v26, %v6011_v42  ;;  %v922_v8 = vperm.slane %v7176_v1, 0 }
 0x499   :  { %v6014_v47 = vpop.permute.xlu0 %6013 }
 0x49a   :  { %v6016_v32 = vunpack.i.h.bf16 %v6014_v47  ;;  %v6015_v34 = vunpack.i.l.bf16 %v6014_v47 }
 0x49c   :  { %v916_v38 = vsel %vm915_vm11, %v911_v20, %v6015_v34  ;;  %v917_v43 = vsel %vm915_vm11, %v912_v35, %v6016_v32  ;;  %v5897_v35 = vld [vmem:[%s8730_s4 + $0x8] sm:$0xff] }
 0x49d   :  { %v920_v33 = vpack.c.bf16 %v917_v43, %v916_v38  ;;  %1084 = vmatpush.bf16.msrb.mxu1 %v5897_v35 }
 0x49f   :  { %5455 = vmatmul.msk.bf16.vlgmr.msra.gmra.mxu3 %vm274_vm0, %v920_v33  ;;  %v5896_v33 = vld [vmem:[%s8730_s4] sm:$0xff] }
 0x4a1   :  { %1085 = vmatpush.bf16.msrb.mxu1 %v5896_v33 }
 0x4b6   :  { %v6019_v45 = vpop.permute.xlu1 %6018 }
 0x4b7   :  { %v6021_v14 = vunpack.i.h.bf16 %v6019_v45  ;;  %v6020_v24 = vunpack.i.l.bf16 %v6019_v45 }
 0x4b9   :  { %v909_v12 = vsel %vm384_vm1, %v840_v15, %v6021_v14  ;;  %v908_v58 = vsel %vm384_vm1, %v838_v48, %v6020_v24  ;;  %v6679_v48 = vld [vmem:[#allocation2 + $0x10] sm:$0xff] }
 0x4be   :  { %v6029_v51 = vpop.permute.xlu2 %6028 }
 0x4bf   :  { %v6031_v57 = vunpack.i.h.bf16 %v6029_v51  ;;  %v6030_v60 = vunpack.i.l.bf16 %v6029_v51 }
 0x4c6   :  { %v6024_v61 = vpop.permute.xlu0 %6023 }
 0x4c7   :  { %v6026_v39 = vunpack.i.h.bf16 %v6024_v61  ;;  %v6025_v52 = vunpack.i.l.bf16 %v6024_v61 }
 0x4c9   :  { %v913_v25 = vsel %vm910_vm10, %v908_v58, %v6025_v52  ;;  %v914_v27 = vsel %vm910_vm10, %v909_v12, %v6026_v39  ;;  %v6680_v12 = vld [vmem:[#allocation2 + $0x20] sm:$0xff] }
 0x4ca   :  { %v918_v62 = vsel %vm915_vm11, %v913_v25, %v6030_v60  ;;  %v919_v22 = vsel %vm915_vm11, %v914_v27, %v6031_v57  ;;  %v6681_v60 = vld [vmem:[#allocation2 + $0x28] sm:$0xff] }
 0x4cb   :  { %v921_v0 = vpack.c.bf16 %v919_v22, %v918_v62 }
 0x4cd   :  { %5456 = vmatmul.msk.bf16.gmra.mxu3 %vm274_vm0, %v921_v0 }
 0x522   :  { %v950_v2 = vpop.f32.mrf.mxu3 }
 0x523   :  { %v951_v7 = vadd.f32 %v950_v2, %v922_v8 }
 0x525   :  { %v960_v54 = vadd.f32 %v6678_v16, %v951_v7 }
 0x527   :  { %v964_v56 = vsel %vm274_vm0, %v960_v54, 0.0 }
 0x52a   :  { %v952_v11 = vpop.f32.mrf.mxu3 }
 0x52b   :  { %v953_v53 = vadd.f32 %v952_v11, %v922_v8 }
 0x52d   :  { %v961_v15 = vadd.f32 %v6679_v48, %v953_v53 }
 0x52f   :  { %v965_v4 = vsel %vm274_vm0, %v961_v15, 0.0 }
 0x530   :  { %v966_v21 = vadd.f32 %v965_v4, %v964_v56  ;;  %v1050_v56 = vperm.slane %v7176_v1, 2 }
 0x532   :  { %v967_v63 = vrot.slane %v966_v21, 4 }
 0x534   :  { %v968_v55 = vadd.f32 %v967_v63, %v966_v21 }
 0x536   :  { %v969_v19 = vrot.slane %v968_v55, 2 }
 0x538   :  { %v970_v40 = vadd.f32 %v969_v19, %v968_v55 }
 0x53a   :  { %v971_v13 = vrot.slane %v970_v40, 1 }
 0x53c   :  { %v972_v18 = vadd.f32 %v971_v13, %v970_v40 }
 0x53e   :  { %v989_v46 = vmul.f32 %v7181_v49, %v972_v18 }
 0x540   :  { %v991_v3 = vsub.f32 %v960_v54, %v989_v46  ;;  %v992_v26 = vsub.f32 %v961_v15, %v989_v46 }
 0x542   :  { %v995_v29 = vmul.f32 %v991_v3, %v991_v3  ;;  %v996_v42 = vmul.f32 %v992_v26, %v992_v26 }
 0x544   :  { %v999_v6 = vsel %vm274_vm0, %v995_v29, 0.0  ;;  %v1000_v47 = vsel %vm274_vm0, %v996_v42, 0.0 }
 0x545   :  { %v1001_v32 = vadd.f32 %v1000_v47, %v999_v6 }
 0x547   :  { %v1002_v34 = vrot.slane %v1001_v32, 4 }
 0x549   :  { %v1003_v20 = vadd.f32 %v1002_v34, %v1001_v32 }
 0x54b   :  { %v1004_v38 = vrot.slane %v1003_v20, 2 }
 0x54d   :  { %v1005_v43 = vadd.f32 %v1004_v38, %v1003_v20  ;;  %v5901_v38 = vld [vmem:[%s8731_s5 + $0x18] sm:$0xff] }
 0x54e   :  { %1138 = vmatpush.bf16.msrb.mxu2 %v5901_v38 }
 0x54f   :  { %v1006_v45 = vrot.slane %v1005_v43, 1 }
 0x550   :  { %v955_v14 = vpop.f32.mrf.mxu3 }
 0x551   :  { %v1007_v24 = vadd.f32 %v1006_v45, %v1005_v43  ;;  %v956_v39 = vadd.f32 %v955_v14, %v922_v8 }
 0x553   :  { %v1017_v51 = vmul.f32 %v1007_v24, %v7181_v49  ;;  %v962_v58 = vadd.f32 %v6680_v12, %v956_v39 }
 0x555   :  { %v1019_v61 = vadd.f32 1e-05, %v1017_v51  ;;  %v973_v62 = vsel %vm274_vm0, %v962_v58, 0.0 }
 0x557   :  { %6396 = vrsqrt.f32 %v1019_v61  ;;  %vm1027_vm14 = vweird.f32 %v1019_v61 }
 0x558   :  { %v957_v52 = vpop.f32.mrf.mxu3 }
 0x559   :  { %v958_v57 = vadd.f32 %v957_v52, %v922_v8  ;;  %v1045_v8 = vperm.slane %v7176_v1, 1 }
 0x55b   :  { %v963_v25 = vadd.f32 %v6681_v60, %v958_v57 }
 0x55d   :  { %v6397_v27 = vpop.eup %6396  ;;  %v974_v22 = vsel %vm274_vm0, %v963_v25, 0.0 }
 0x55e   :  { %v1022_v0 = vmul.f32 %v6397_v27, %v1019_v61  ;;  %v975_v2 = vadd.f32 %v974_v22, %v973_v62  ;;  %vm1028_vm13 = vweird.f32 %v6397_v27  ;;  %v5900_v22 = vld [vmem:[%s8731_s5 + $0x10] sm:$0xff] }
 0x55f   :  { %vm1029_vm15 = vmor %vm1027_vm14, %vm1028_vm13  ;;  %1139 = vmatpush.bf16.msrb.mxu2 %v5900_v22 }
 0x560   :  { %v1023_v5 = vmul.f32 %v6397_v27, %v1022_v0  ;;  %v976_v7 = vrot.slane %v975_v2, 4  ;;  %v5899_v0 = vld [vmem:[%s8731_s5 + $0x8] sm:$0xff] }
 0x562   :  { %v1024_v9 = vmul.f32 0.5, %v1023_v5  ;;  %v977_v11 = vadd.f32 %v976_v7, %v975_v2  ;;  %v5898_v2 = vld [vmem:[%s8731_s5] sm:$0xff]  ;;  %v5903_v5 = vld [vmem:[%s8728_s2 + $0x18] sm:$0xff]  ;;  %v5902_v7 = vld [vmem:[%s8728_s2 + $0x10] sm:$0xff] }
 0x563   :  { %1140 = vmatpush.bf16.msrb.mxu2 %v5899_v0  ;;  %1215 = vrot.lane.b32.xlu1 %v5903_v5, %s6769_s24 }
 0x564   :  { %v1025_v16 = vsub.f32 1.5, %v1024_v9  ;;  %v978_v54 = vrot.slane %v977_v11, 2  ;;  %1213 = vrot.lane.b32.xlu0 %v5902_v7, %s6769_s24  ;;  %1205 = vmatpush.bf16.msra.mxu0 %v5903_v5 }
 0x566   :  { %v1026_v53 = vmul.f32 %v6397_v27, %v1025_v16  ;;  %v979_v50 = vadd.f32 %v978_v54, %v977_v11  ;;  %v6324_v11 = vld [vmem:[%s8733_s7] ss:$0 sm:$0xff] }
 0x567   :  { %1141 = vmatpush.bf16.msrb.mxu2 %v5898_v2 }
 0x568   :  { %v1030_v48 = vsel %vm1029_vm15, %v6397_v27, %v1026_v53  ;;  %v980_v15 = vrot.slane %v979_v50, 1  ;;  %1206 = vmatpush.bf16.msra.mxu0 %v5902_v7  ;;  %vm200_vm15 = vcmp.ge.s32.totalorder %v6929_v30, 8 }
 0x569   :  { %v1041_v4 = vmul.f32 %v1030_v48, %v991_v3  ;;  %v1042_v41 = vmul.f32 %v1030_v48, %v992_v26 }
 0x56a   :  { %v981_v21 = vadd.f32 %v980_v15, %v979_v50 }
 0x56b   :  { %v1047_v63 = vmul.f32 %v1045_v8, %v1042_v41  ;;  %v1046_v17 = vmul.f32 %v1045_v8, %v1041_v4 }
 0x56c   :  { %v990_v55 = vmul.f32 %v7181_v49, %v981_v21 }
 0x56d   :  { %v1051_v19 = vadd.f32 %v1050_v56, %v1046_v17  ;;  %v1052_v23 = vadd.f32 %v1050_v56, %v1047_v63 }
 0x56e   :  { %v993_v40 = vsub.f32 %v962_v58, %v990_v55  ;;  %v994_v13 = vsub.f32 %v963_v25, %v990_v55 }
 0x56f   :  { %v1055_v18 = vpack.c.bf16 %v1052_v23, %v1051_v19 }
 0x570   :  { %v997_v46 = vmul.f32 %v993_v40, %v993_v40  ;;  %v998_v29 = vmul.f32 %v994_v13, %v994_v13 }
 0x571   :  { %5465 = vmatmul.msk.bf16.vlgmr.msrb.gmra.mxu1 %vm274_vm0, %v1055_v18 }
 0x572   :  { %v1008_v42 = vsel %vm274_vm0, %v997_v46, 0.0  ;;  %v1009_v6 = vsel %vm274_vm0, %v998_v29, 0.0 }
 0x573   :  { %v1010_v3 = vadd.f32 %v1009_v6, %v1008_v42  ;;  %v7239_v42 = vld [vmem:[#allocation2] sm:$0xff]  ;;  %v7241_v6 = vld [vmem:[#allocation2 + $0x18] sm:$0xff] }
 0x575   :  { %v1011_v26 = vrot.slane %v1010_v3, 4 }
 0x577   :  { %v1012_v47 = vadd.f32 %v1011_v26, %v1010_v3  ;;  %v1181_v3 = vpack.c.bf16 %v7241_v6, %v7239_v42 }
 0x579   :  { %v1013_v32 = vrot.slane %v1012_v47, 2  ;;  %5514 = vmatmul.msk.bf16.vlgmr.msra.gmra.mxu0 %vm274_vm0, %v1181_v3 }
 0x57b   :  { %v1014_v34 = vadd.f32 %v1013_v32, %v1012_v47 }
 0x57d   :  { %v1015_v20 = vrot.slane %v1014_v34, 1 }
 0x57f   :  { %v1016_v35 = vadd.f32 %v1015_v20, %v1014_v34 }
 0x581   :  { %v1018_v43 = vmul.f32 %v1016_v35, %v7181_v49 }
 0x583   :  { %v1020_v33 = vadd.f32 1e-05, %v1018_v43 }
 0x585   :  { %6398 = vrsqrt.f32 %v1020_v33  ;;  %vm1037_vm3 = vweird.f32 %v1020_v33 }
 0x58b   :  { %v6399_v45 = vpop.eup %6398 }
 0x58c   :  { %v1032_v14 = vmul.f32 %v6399_v45, %v1020_v33  ;;  %vm1038_vm2 = vweird.f32 %v6399_v45 }
 0x58d   :  { %vm1039_vm4 = vmor %vm1037_vm3, %vm1038_vm2  ;;  %vm203_vm2 = vcmp.ge.s32.totalorder %v6929_v30, 24 }
 0x58e   :  { %v1033_v24 = vmul.f32 %v6399_v45, %v1032_v14 }
 0x590   :  { %v1034_v51 = vmul.f32 0.5, %v1033_v24 }
 0x592   :  { %v1035_v61 = vsub.f32 1.5, %v1034_v51 }
 0x594   :  { %v1036_v39 = vmul.f32 %v6399_v45, %v1035_v61 }
 0x596   :  { %v1040_v52 = vsel %vm1039_vm4, %v6399_v45, %v1036_v39 }
 0x597   :  { %v1043_v12 = vmul.f32 %v1040_v52, %v993_v40  ;;  %v1044_v58 = vmul.f32 %v1040_v52, %v994_v13  ;;  %v1103_v40 = vperm.slane %v7176_v1, 3 }
 0x599   :  { %v1048_v57 = vmul.f32 %v1045_v8, %v1043_v12  ;;  %v1049_v60 = vmul.f32 %v1045_v8, %v1044_v58 }
 0x59b   :  { %v1053_v25 = vadd.f32 %v1050_v56, %v1048_v57  ;;  %v1054_v27 = vadd.f32 %v1050_v56, %v1049_v60 }
 0x59d   :  { %v1056_v62 = vpack.c.bf16 %v1054_v27, %v1053_v25 }
 0x59f   :  { %5466 = vmatmul.msk.bf16.gmra.mxu1 %vm274_vm0, %v1056_v62 }
 0x5d5   :  { %v1216_v55 = vpop.permute.xlu1 %1215 }
 0x5d6   :  { %1231 = vmatpush.bf16.msrb.mxu3 %v1216_v55  ;;  %v1214_v19 = vpop.permute.xlu0 %1213 }
 0x5da   :  { %1232 = vmatpush.bf16.msrb.mxu3 %v1214_v19 }
 0x5ee   :  { %v1087_v9 = vpop.f32.mrf.mxu1 }
 0x5ef   :  { %v1088_v16 = vadd.f32 %v6324_v11, %v1087_v9 }
 0x5f1   :  { %v1097_v50 = vmax.f32 %v1088_v16, 0.0 }
 0x5f6   :  { %v1089_v54 = vpop.f32.mrf.mxu1  ;;  %v7264_v43 = vpop.f32.mrf.mxu0 }
 0x5f7   :  { %v1090_v53 = vadd.f32 %v6324_v11, %v1089_v54 }
 0x5f9   :  { %v1098_v8 = vmax.f32 %v1090_v53, 0.0 }
 0x5fb   :  { %v1101_v48 = vpack.c.bf16 %v1098_v8, %v1097_v50 }
 0x5fd   :  { %5483 = vmatmul.msk.bf16.vlgmr.msrb.gmra.mxu2 %vm519_vm6, %v1101_v48 }
 0x5fe   :  { %v7266_v33 = vpop.f32.mrf.mxu0 }
 0x61c   :  { %v1092_v15 = vpop.f32.mrf.mxu1 }
 0x61d   :  { %v1093_v56 = vadd.f32 %v6324_v11, %v1092_v15 }
 0x61f   :  { %v1099_v21 = vmax.f32 %v1093_v56, 0.0 }
 0x624   :  { %v1094_v4 = vpop.f32.mrf.mxu1 }
 0x625   :  { %v1095_v41 = vadd.f32 %v6324_v11, %v1094_v4 }
 0x627   :  { %v1100_v63 = vmax.f32 %v1095_v41, 0.0 }
 0x629   :  { %v1102_v17 = vpack.c.bf16 %v1100_v63, %v1099_v21 }
 0x62b   :  { %5484 = vmatmul.msk.bf16.gmra.mxu2 %vm519_vm6, %v1102_v17 }
 0x680   :  { %v1143_v23 = vpop.f32.mrf.mxu2 }
 0x681   :  { %v7229_v18 = vadd.f32 %v1143_v23, %v1103_v40 }
 0x688   :  { %v1145_v13 = vpop.f32.mrf.mxu2 }
 0x689   :  { %v7231_v46 = vadd.f32 %v1145_v13, %v1103_v40 }
 0x68b   :  { %v7235_v29 = vpack.c.bf16 %v7231_v46, %v7229_v18 }
 0x68d   :  { %5515 = vmatmul.msk.bf16.vlgmr.msrb.gmra.mxu3 %vm274_vm0, %v7235_v29 }
 0x6ae   :  { %v1148_v1 = vpop.f32.mrf.mxu2 }
 0x6af   :  { %v7246_v47 = vadd.f32 %v1148_v1, %v1103_v40 }
 0x6b6   :  { %v1150_v26 = vpop.f32.mrf.mxu2 }
 0x6b7   :  { %v7248_v32 = vadd.f32 %v1150_v26, %v1103_v40 }
 0x6b9   :  { %v7252_v34 = vpack.c.bf16 %v7248_v32, %v7246_v47 }
 0x6bb   :  { %5516 = vmatmul.msk.bf16.gmra.mxu3 %vm274_vm0, %v7252_v34 }
 0x710   :  { %v7256_v20 = vpop.f32.mrf.mxu3 }
 0x718   :  { %v7258_v35 = vpop.f32.mrf.mxu3 }
 0x719   :  { %v6042_v38 = vpack.i.bf16 %v7258_v35, %v7256_v20 }
 0x71b   :  { %6043 = vrot.lane.b32.xlu0 %v6042_v38, %s6767_s22 }
 0x723   :  { %6058 = vrot.lane.b32.xlu0 %v6042_v38, %s6766_s21 }
 0x72b   :  { %1254 = vrot.lane.b32.xlu0 %v7266_v33, %s6768_s23 }
 0x733   :  { %1258 = vrot.lane.b32.xlu0 %v7264_v43, %s6767_s22 }
 0x73e   :  { %v7272_v45 = vpop.f32.mrf.mxu3 }
 0x746   :  { %v7274_v14 = vpop.f32.mrf.mxu3 }
 0x747   :  { %v6037_v24 = vpack.i.bf16 %v7274_v14, %v7272_v45 }
 0x749   :  { %6038 = vrot.lane.b32.xlu1 %v6037_v24, %s6768_s23  ;;  %6033 = vrot.lane.b32.xlu2 %v6037_v24, %s6767_s22 }
 0x751   :  { %6053 = vrot.lane.b32.xlu1 %v6042_v38, %s6768_s23  ;;  %6048 = vrot.lane.b32.xlu2 %v6037_v24, %s6766_s21 }
 0x759   :  { %1246 = vrot.lane.b32.xlu1 %v7264_v43, %s6766_s21  ;;  %1248 = vrot.lane.b32.xlu2 %v7266_v33, %s6766_s21 }
 0x761   :  { %1252 = vrot.lane.b32.xlu1 %v7264_v43, %s6768_s23  ;;  %1260 = vrot.lane.b32.xlu2 %v7266_v33, %s6767_s22 }
 0x78d   :  { %v6044_v51 = vpop.permute.xlu0 %6043 }
 0x78e   :  { %v6046_v61 = vunpack.i.h.bf16 %v6044_v51  ;;  %v6045_v39 = vunpack.i.l.bf16 %v6044_v51 }
 0x790   :  { %v1319_v52 = vpack.c.bf16 %v6046_v61, %v6046_v61  ;;  %v1318_v12 = vpack.c.bf16 %v6045_v39, %v6045_v39  ;;  %v1321_v39 = vpack.c.bf16 %v7274_v14, %v7274_v14 }
 0x792   :  { %v1353_v58 = vunpack.c.l.b16 %v1319_v52  ;;  %v1352_v57 = vunpack.c.l.b16 %v1318_v12 }
 0x794   :  { %v1357_v60 = vpack.c.b16 %v1353_v58, %v1352_v57 }
 0x795   :  { %v6059_v41 = vpop.permute.xlu0 %6058 }
 0x796   :  { %1574 = vrot.lane.b32.xlu2 %v1357_v60, %s6769_s24  ;;  %v1374_v25 = vsel %vm384_vm1, %v1357_v60, 0  ;;  %v6061_v19 = vunpack.i.h.bf16 %v6059_v41  ;;  %v6060_v23 = vunpack.i.l.bf16 %v6059_v41  ;;  %v1320_v60 = vpack.c.bf16 %v7272_v45, %v7272_v45 }
 0x797   :  { %1380 = vmatpush.bf16.xpose.msra.mxu1 %v1374_v25  ;;  %v1313_v45 = vpack.c.bf16 %v7258_v35, %v7258_v35 }
 0x798   :  { %v1315_v61 = vpack.c.bf16 %v6061_v19, %v6061_v19  ;;  %v1314_v52 = vpack.c.bf16 %v6060_v23, %v6060_v23  ;;  %v1413_v14 = vunpack.c.l.b16 %v1320_v60 }
 0x7a3   :  { %v6034_v27 = vpop.permute.xlu2 %6033 }
 0x7a4   :  { %v6036_v62 = vunpack.i.h.bf16 %v6034_v27  ;;  %v6035_v22 = vunpack.i.l.bf16 %v6034_v27  ;;  %v1414_v27 = vunpack.c.l.b16 %v1321_v39 }
 0x7a6   :  { %v1327_v0 = vpack.c.bf16 %v6036_v62, %v6036_v62  ;;  %v1326_v2 = vpack.c.bf16 %v6035_v22, %v6035_v22  ;;  %v1349_v62 = vunpack.c.l.b16 %v1315_v61  ;;  %v1348_v22 = vunpack.c.l.b16 %v1314_v52 }
 0x7a8   :  { %v1420_v5 = vunpack.c.l.b16 %v1327_v0  ;;  %v1419_v7 = vunpack.c.l.b16 %v1326_v2 }
 0x7aa   :  { %v1424_v9 = vpack.c.b16 %v1420_v5, %v1419_v7  ;;  %v7303_v7 = vpack.c.b16 %v1349_v62, %v1348_v22 }
 0x7ab   :  { %v6049_v16 = vpop.permute.xlu2 %6048 }
 0x7ac   :  { %v1441_v11 = vsel %vm384_vm1, %v1424_v9, 0  ;;  %v6051_v54 = vunpack.i.h.bf16 %v6049_v16  ;;  %v6050_v50 = vunpack.i.l.bf16 %v6049_v16  ;;  %v1312_v16 = vpack.c.bf16 %v7256_v20, %v7256_v20 }
 0x7ad   :  { %1447 = vmatpush.bf16.xpose.msra.mxu2 %v1441_v11  ;;  %v7305_v11 = vpack.c.b16 %v1414_v27, %v1413_v14 }
 0x7ae   :  { %v1323_v4 = vpack.c.bf16 %v6051_v54, %v6051_v54  ;;  %v1322_v21 = vpack.c.bf16 %v6050_v50, %v6050_v50  ;;  %v1368_v50 = vsel %vm384_vm1, %v7303_v7, 0  ;;  %v1346_v35 = vunpack.c.l.b16 %v1312_v16 }
 0x7b0   :  { %v1416_v40 = vunpack.c.l.b16 %v1323_v4  ;;  %v1415_v3 = vunpack.c.l.b16 %v1322_v21 }
 0x7b2   :  { %v1422_v57 = vpack.c.b16 %v1416_v40, %v1415_v3 }
 0x7b3   :  { %v1249_v5 = vpop.permute.xlu2 %1248 }
 0x7b4   :  { %v1435_v2 = vsel %vm384_vm1, %v1422_v57, 0  ;;  %v1269_v54 = vpack.c.bf16 %v1249_v5, %v1249_v5 }
 0x7bb   :  { %v6039_v53 = vpop.permute.xlu1 %6038 }
 0x7bc   :  { %v6041_v8 = vunpack.i.h.bf16 %v6039_v53  ;;  %v6040_v48 = vunpack.i.l.bf16 %v6039_v53  ;;  %v1268_v53 = vpack.c.bf16 %v7266_v33, %v7266_v33  ;;  %v1264_v33 = vpack.c.bf16 %v7264_v43, %v7264_v43 }
 0x7be   :  { %v1325_v15 = vpack.c.bf16 %v6041_v8, %v6041_v8  ;;  %v1324_v56 = vpack.c.bf16 %v6040_v48, %v6040_v48  ;;  %v1432_v8 = vsel %vm384_vm1, %v7305_v11, 0  ;;  %v1347_v48 = vunpack.c.l.b16 %v1313_v45 }
 0x7bf   :  { %v1399_v4 = vunpack.c.l.b16 %v1268_v53  ;;  %v1332_v19 = vunpack.c.l.b16 %v1264_v33 }
 0x7c0   :  { %v1418_v63 = vunpack.c.l.b16 %v1325_v15  ;;  %v1417_v17 = vunpack.c.l.b16 %v1324_v56  ;;  %v1400_v15 = vunpack.c.l.b16 %v1269_v54  ;;  %v7318_v20 = vpack.c.b16 %v1347_v48, %v1346_v35 }
 0x7c2   :  { %v1423_v55 = vpack.c.b16 %v1418_v63, %v1417_v17  ;;  %v1403_v41 = vpack.c.b16 %v1400_v15, %v1399_v4  ;;  %v1255_v17 = vpop.permute.xlu0 %1254 }
 0x7c3   :  { %v6054_v13 = vpop.permute.xlu1 %6053  ;;  %v1270_v23 = vpack.c.bf16 %v1255_v17, %v1255_v17 }
 0x7c4   :  { %v6056_v1 = vunpack.i.h.bf16 %v6054_v13  ;;  %v6055_v26 = vunpack.i.l.bf16 %v6054_v13  ;;  %1619 = vrot.lane.b32.xlu0 %v1423_v55, %s6769_s24  ;;  %v1438_v38 = vsel %vm384_vm1, %v1423_v55, 0  ;;  %v1261_v55 = vpop.permute.xlu2 %1260 }
 0x7c5   :  { %1448 = vmatpush.bf16.xpose.msra.mxu2 %v1438_v38  ;;  %v1271_v40 = vpack.c.bf16 %v1261_v55, %v1261_v55  ;;  %v1401_v3 = vunpack.c.l.b16 %v1270_v23 }
 0x7c6   :  { %v1317_v24 = vpack.c.bf16 %v6056_v1, %v6056_v1  ;;  %v1316_v51 = vpack.c.bf16 %v6055_v26, %v6055_v26 }
 0x7c7   :  { %v1402_v1 = vunpack.c.l.b16 %v1271_v40 }
 0x7c8   :  { %v1351_v12 = vunpack.c.l.b16 %v1317_v24  ;;  %v1350_v58 = vunpack.c.l.b16 %v1316_v51 }
 0x7c9   :  { %v1404_v51 = vpack.c.b16 %v1402_v1, %v1401_v3 }
 0x7ca   :  { %v1356_v25 = vpack.c.b16 %v1351_v12, %v1350_v58  ;;  %v1259_v38 = vpop.permute.xlu0 %1258 }
 0x7cb   :  { %v1247_v56 = vpop.permute.xlu1 %1246  ;;  %v1267_v24 = vpack.c.bf16 %v1259_v38, %v1259_v38 }
 0x7cc   :  { %1572 = vrot.lane.b32.xlu1 %v1356_v25, %s6769_s24  ;;  %1617 = vrot.lane.b32.xlu0 %v1422_v57, %s6769_s24  ;;  %v1371_v0 = vsel %vm384_vm1, %v1356_v25, 0  ;;  %v1265_v21 = vpack.c.bf16 %v1247_v56, %v1247_v56 }
 0x7cd   :  { %1381 = vmatpush.bf16.xpose.msra.mxu1 %v1371_v0  ;;  %1449 = vmatpush.bf16.xpose.msra.mxu2 %v1435_v2  ;;  %v1335_v39 = vunpack.c.l.b16 %v1267_v24 }
 0x7ce   :  { %v1333_v63 = vunpack.c.l.b16 %v1265_v21 }
 0x7d0   :  { %v1336_v13 = vpack.c.b16 %v1333_v63, %v1332_v19 }
 0x7d3   :  { %v1253_v26 = vpop.permute.xlu1 %1252 }
 0x7d4   :  { %1621 = vrot.lane.b32.xlu1 %v1424_v9, %s6769_s24  ;;  %v1365_v9 = vsel %vm384_vm1, %v7318_v20, 0  ;;  %v1266_v43 = vpack.c.bf16 %v1253_v26, %v1253_v26 }
 0x7d5   :  { %1382 = vmatpush.bf16.xpose.msra.mxu1 %v1368_v50  ;;  %1450 = vmatpush.bf16.xpose.msra.mxu2 %v1432_v8 }
 0x7d6   :  { %v1334_v61 = vunpack.c.l.b16 %v1266_v43 }
 0x7d8   :  { %v1337_v12 = vpack.c.b16 %v1335_v39, %v1334_v61 }
 0x7dc   :  { %5519 = vmatmul.msk.bf16.vlgmr.msra.gmra.mxu2 %vm384_vm1, %v1403_v41 }
 0x7dd   :  { %1383 = vmatpush.bf16.xpose.msra.mxu1 %v1365_v9 }
 0x7e4   :  { %5517 = vmatmul.msk.bf16.vlgmr.msra.gmra.mxu1 %vm384_vm1, %v1336_v13 }
 0x7ec   :  { %5520 = vmatmul.msk.bf16.gmra.mxu2 %vm384_vm1, %v1404_v51 }
 0x7f0   :  { %v1575_v52 = vpop.permute.xlu2 %1574 }
 0x7f1   :  { %1590 = vmatpush.bf16.msrb.mxu0 %v1575_v52 }
 0x7f4   :  { %5518 = vmatmul.msk.bf16.gmra.mxu1 %vm384_vm1, %v1337_v12 }
 0x836   :  { %v1620_v57 = vpop.permute.xlu0 %1619 }
 0x83e   :  { %v1573_v58 = vpop.permute.xlu1 %1572  ;;  %v1618_v25 = vpop.permute.xlu0 %1617 }
 0x83f   :  { %1591 = vmatpush.bf16.msrb.mxu0 %v1573_v58 }
 0x846   :  { %v1622_v60 = vpop.permute.xlu1 %1621 }
 0x847   :  { %1637 = vmatpush.bf16.msra.mxu3 %v1622_v60 }
 0x84b   :  { %1638 = vmatpush.bf16.msra.mxu3 %v1620_v57 }
 0x84f   :  { %1639 = vmatpush.bf16.msra.mxu3 %v1618_v25 }
 0x85f   :  { %v1452_v27 = vpop.f32.mrf.mxu2 }
 0x860   :  { %v1453_v48 = vadd.f32 %v1452_v27, %v6941_v37 }
 0x861   :  { %v1385_v62 = vpop.f32.mrf.mxu1 }
 0x862   :  { %v1386_v22 = vadd.f32 %v1385_v62, %v6941_v37  ;;  %v1474_v21 = vsel %vm519_vm6, %v1453_v48, -inf }
 0x864   :  { %v1462_v0 = vsel %vm519_vm6, %v1386_v22, -inf }
 0x865   :  { %1463 = vmax.xlane.f32.xlu0 %v1462_v0 }
 0x867   :  { %v1454_v2 = vpop.f32.mrf.mxu2 }
 0x868   :  { %v1455_v33 = vadd.f32 %v1454_v2, %v6954_v44 }
 0x869   :  { %v1387_v14 = vpop.f32.mrf.mxu1 }
 0x86a   :  { %v1388_v5 = vadd.f32 %v1387_v14, %v6954_v44  ;;  %v1477_v9 = vsel %vm519_vm6, %v1455_v33, -inf }
 0x86c   :  { %v1465_v45 = vsel %vm519_vm6, %v1388_v5, -inf }
 0x86d   :  { %1466 = vmax.xlane.f32.xlu2 %v1465_v45 }
 0x86f   :  { %v1457_v16 = vpop.f32.mrf.mxu2 }
 0x870   :  { %v1458_v63 = vadd.f32 %v1457_v16, %v6977_v59 }
 0x871   :  { %v1390_v54 = vpop.f32.mrf.mxu1 }
 0x872   :  { %v7333_v53 = vadd.f32 %v1390_v54, %v6977_v59  ;;  %v1480_v17 = vsel %vm519_vm6, %v1458_v63, -inf }
 0x874   :  { %v1468_v50 = vsel %vm519_vm6, %v7333_v53, -inf }
 0x875   :  { %1469 = vmax.xlane.f32.xlu2 %v1468_v50 }
 0x877   :  { %v1459_v8 = vpop.f32.mrf.mxu2 }
 0x878   :  { %v1460_v15 = vadd.f32 %v1459_v8, %v7000_v10 }
 0x879   :  { %v1392_v35 = vpop.f32.mrf.mxu1 }
 0x87a   :  { %v1393_v56 = vadd.f32 %v1392_v35, %v7000_v10  ;;  %v1483_v4 = vsel %vm519_vm6, %v1460_v15, -inf }
 0x87b   :  { %1484 = vmax.xlane.f32.xlu0 %v1483_v4 }
 0x87c   :  { %v1471_v41 = vsel %vm519_vm6, %v1393_v56, -inf }
 0x87d   :  { %1472 = vmax.xlane.f32.xlu1 %v1471_v41  ;;  %1475 = vmax.xlane.f32.xlu2 %v1474_v21 }
 0x885   :  { %1478 = vmax.xlane.f32.xlu1 %v1477_v9 }
 0x88d   :  { %1481 = vmax.xlane.f32.xlu1 %v1480_v17 }
 0x8a6   :  { %1570 = vrot.lane.b32.xlu1 %v7303_v7, %s6769_s24 }
 0x8d8   :  { %v1464_v55 = vpop.xlane.xlu0 %1463 }
 0x8d9   :  { %v1486_v19 = vsub.f32 %v1386_v22, %v1464_v55 }
 0x8db   :  { %v1494_v23 = vmul.f32 1.442695, %v1486_v19 }
 0x8dd   :  { %6400 = vpow2.f32 %v1494_v23 }
 0x8e0   :  { %v1467_v40 = vpop.xlane.xlu2 %1466 }
 0x8e1   :  { %v1487_v13 = vsub.f32 %v1388_v5, %v1467_v40 }
 0x8e3   :  { %v7349_v3 = vpop.eup %6400  ;;  %v1496_v1 = vmul.f32 1.442695, %v1487_v13 }
 0x8e4   :  { %v1510_v26 = vsel %vm519_vm6, %v7349_v3, 0.0 }
 0x8e5   :  { %6402 = vpow2.f32 %v1496_v1  ;;  %1511 = vadd.xlane.f32.xlu2 %v1510_v26 }
 0x8e8   :  { %v1470_v38 = vpop.xlane.xlu2 %1469 }
 0x8e9   :  { %v1488_v8 = vsub.f32 %v7333_v53, %v1470_v38 }
 0x8eb   :  { %v6403_v43 = vpop.eup %6402  ;;  %v1498_v35 = vmul.f32 1.442695, %v1488_v8 }
 0x8ec   :  { %v1513_v24 = vsel %vm519_vm6, %v6403_v43, 0.0 }
 0x8ed   :  { %1514 = vadd.xlane.f32.xlu2 %v1513_v24 }
 0x8ee   :  { %v1485_v7 = vpop.xlane.xlu0 %1484 }
 0x8ef   :  { %v1493_v51 = vsub.f32 %v1460_v15, %v1485_v7 }
 0x8f0   :  { %v1473_v61 = vpop.xlane.xlu1 %1472  ;;  %v1476_v39 = vpop.xlane.xlu2 %1475 }
 0x8f1   :  { %v1508_v52 = vmul.f32 1.442695, %v1493_v51  ;;  %v1490_v12 = vsub.f32 %v1453_v48, %v1476_v39  ;;  %v1489_v50 = vsub.f32 %v1393_v56, %v1473_v61 }
 0x8f3   :  { %6404 = vpow2.f32 %v1508_v52  ;;  %v1502_v58 = vmul.f32 1.442695, %v1490_v12  ;;  %v1500_v48 = vmul.f32 1.442695, %v1489_v50 }
 0x8f5   :  { %6406 = vpow2.f32 %v1502_v58 }
 0x8f8   :  { %v1479_v57 = vpop.xlane.xlu1 %1478 }
 0x8f9   :  { %v7354_v60 = vpop.eup %6404  ;;  %v1491_v25 = vsub.f32 %v1455_v33, %v1479_v57 }
 0x8fa   :  { %v1531_v27 = vsel %vm519_vm6, %v7354_v60, 0.0 }
 0x8fb   :  { %v1504_v62 = vmul.f32 1.442695, %v1491_v25  ;;  %1532 = vadd.xlane.f32.xlu1 %v1531_v27  ;;  %v6407_v22 = vpop.eup %6406 }
 0x8fc   :  { %v1522_v0 = vsel %vm519_vm6, %v6407_v22, 0.0 }
 0x8fd   :  { %6408 = vpow2.f32 %v1504_v62  ;;  %1523 = vadd.xlane.f32.xlu0 %v1522_v0 }
 0x900   :  { %v1482_v5 = vpop.xlane.xlu1 %1481 }
 0x901   :  { %v1492_v16 = vsub.f32 %v1458_v63, %v1482_v5 }
 0x903   :  { %v6409_v2 = vpop.eup %6408  ;;  %v1506_v54 = vmul.f32 1.442695, %v1492_v16 }
 0x904   :  { %v1525_v14 = vsel %vm519_vm6, %v6409_v2, 0.0 }
 0x905   :  { %1526 = vadd.xlane.f32.xlu2 %v1525_v14  ;;  %6410 = vpow2.f32 %v1506_v54 }
 0x906   :  { %6412 = vpow2.f32 %v1500_v48 }
 0x907   :  { %6414 = vpow2.f32 %v1498_v35 }
 0x90b   :  { %v6411_v15 = vpop.eup %6410 }
 0x90c   :  { %v1528_v4 = vsel %vm519_vm6, %v6411_v15, 0.0 }
 0x911   :  { %1615 = vrot.lane.b32.xlu0 %v7305_v11, %s6769_s24  ;;  %v6413_v11 = vpop.eup %6412 }
 0x912   :  { %v6415_v41 = vpop.eup %6414  ;;  %v1519_v21 = vsel %vm519_vm6, %v6413_v11, 0.0 }
 0x918   :  { %v1571_v45 = vpop.permute.xlu1 %1570 }
 0x919   :  { %1592 = vmatpush.bf16.msrb.mxu0 %v1571_v45 }
 0x91d   :  { %1568 = vrot.lane.b32.xlu2 %v7318_v20, %s6769_s24  ;;  %v1516_v20 = vsel %vm519_vm6, %v6415_v41, 0.0 }
 0x93b   :  { %1529 = vadd.xlane.f32.xlu0 %v1528_v4 }
 0x943   :  { %1520 = vadd.xlane.f32.xlu0 %v1519_v21 }
 0x946   :  { %1517 = vadd.xlane.f32.xlu2 %v1516_v20 }
 0x958   :  { %v1512_v56 = vpop.xlane.xlu2 %1511 }
 0x960   :  { %v1515_v33 = vpop.xlane.xlu2 %1514 }
 0x961   :  { %6416 = vrcp.f32 %v1515_v33 }
 0x962   :  { %6418 = vrcp.f32 %v1512_v56 }
 0x967   :  { %v6417_v9 = vpop.eup %6416 }
 0x968   :  { %v6419_v63 = vpop.eup %6418  ;;  %v1543_v17 = vmul.f32 %v6417_v9, %v6403_v43 }
 0x969   :  { %v1542_v55 = vmul.f32 %v6419_v63, %v7349_v3 }
 0x96a   :  { %v1551_v40 = vpack.c.bf16 %v1543_v17, %v1543_v17 }
 0x96b   :  { %v1550_v13 = vpack.c.bf16 %v1542_v55, %v1542_v55 }
 0x96c   :  { %v1563_v26 = vunpack.c.l.b16 %v1551_v40 }
 0x96d   :  { %v1562_v24 = vunpack.c.l.b16 %v1550_v13  ;;  %v5905_v13 = vld [vmem:[%s8729_s3 + $0x18] sm:$0xff] }
 0x96e   :  { %v1533_v57 = vpop.xlane.xlu1 %1532 }
 0x96f   :  { %v1566_v39 = vpack.c.b16 %v1563_v26, %v1562_v24  ;;  %v5913_v26 = vld [vmem:[%s8728_s2 + $0x28] sm:$0xff] }
 0x970   :  { %v1524_v53 = vpop.xlane.xlu0 %1523 }
 0x971   :  { %6420 = vrcp.f32 %v1524_v53 }
 0x977   :  { %v6421_v23 = vpop.eup %6420 }
 0x978   :  { %v1527_v19 = vpop.xlane.xlu2 %1526  ;;  %v1546_v1 = vmul.f32 %v6421_v23, %v6407_v22 }
 0x979   :  { %6422 = vrcp.f32 %v1527_v19 }
 0x97a   :  { %v1554_v7 = vpack.c.bf16 %v1546_v1, %v1546_v1  ;;  %6424 = vrcp.f32 %v1533_v57  ;;  %v5904_v1 = vld [vmem:[%s8729_s3 + $0x10] sm:$0xff] }
 0x97c   :  { %v1609_v12 = vunpack.c.l.b16 %v1554_v7 }
 0x97f   :  { %v6423_v38 = vpop.eup %6422 }
 0x980   :  { %v1547_v51 = vmul.f32 %v6423_v38, %v6409_v2  ;;  %v1569_v61 = vpop.permute.xlu2 %1568  ;;  %v6425_v27 = vpop.eup %6424  ;;  %v5912_v38 = vld [vmem:[%s8728_s2 + $0x20] sm:$0xff] }
 0x981   :  { %1593 = vmatpush.bf16.msrb.mxu0 %v1569_v61  ;;  %v1549_v62 = vmul.f32 %v6425_v27, %v7354_v60 }
 0x982   :  { %v1555_v52 = vpack.c.bf16 %v1547_v51, %v1547_v51 }
 0x983   :  { %v1616_v43 = vpop.permute.xlu0 %1615  ;;  %v1557_v14 = vpack.c.bf16 %v1549_v62, %v1549_v62 }
 0x984   :  { %v1610_v58 = vunpack.c.l.b16 %v1555_v52  ;;  %5521 = vmatmul.msk.bf16.vlgmr.msrb.gmra.mxu0 %vm519_vm6, %v1566_v39  ;;  %1640 = vmatpush.bf16.msra.mxu3 %v1616_v43 }
 0x985   :  { %v1612_v54 = vunpack.c.l.b16 %v1557_v14  ;;  %1705 = vmatpush.bf16.msra.mxu0 %v5905_v13  ;;  %v7402_v14 = vld [vmem:[#allocation5 + $0x4] sm:$0xf] }
 0x986   :  { %v1613_v3 = vpack.c.b16 %v1610_v58, %v1609_v12 }
 0x988   :  { %5523 = vmatmul.msk.bf16.vlgmr.msra.gmra.mxu3 %vm519_vm6, %v1613_v3 }
 0x989   :  { %1706 = vmatpush.bf16.msra.mxu0 %v5904_v1 }
 0x98d   :  { %1913 = vmatpush.bf16.msrb.mxu0 %v5913_v26 }
 0x991   :  { %1914 = vmatpush.bf16.msrb.mxu0 %v5912_v38 }
 0x9ae   :  { %v1530_v25 = vpop.xlane.xlu0 %1529 }
 0x9af   :  { %6426 = vrcp.f32 %v1530_v25 }
 0x9b5   :  { %v6427_v22 = vpop.eup %6426 }
 0x9b6   :  { %v1521_v0 = vpop.xlane.xlu0 %1520  ;;  %v1548_v2 = vmul.f32 %v6427_v22, %v6411_v15 }
 0x9b7   :  { %6428 = vrcp.f32 %v1521_v0 }
 0x9b8   :  { %v1556_v45 = vpack.c.bf16 %v1548_v2, %v1548_v2  ;;  %v6775_v2 = vmov 8.0  }
 0x9b9   :  { %v1518_v5 = vpop.xlane.xlu2 %1517 }
 0x9ba   :  { %6430 = vrcp.f32 %v1518_v5  ;;  %v1611_v16 = vunpack.c.l.b16 %v1556_v45  ;;  %v1683_v45 = vperm.slane %v7402_v14, 0 }
 0x9bb   :  { %6432 = vrcp.f32 %v6775_v2 }
 0x9bc   :  { %v1614_v50 = vpack.c.b16 %v1612_v54, %v1611_v16 }
 0x9bd   :  { %v6429_v8 = vpop.eup %6428 }
 0x9be   :  { %5524 = vmatmul.msk.bf16.gmra.mxu3 %vm519_vm6, %v1614_v50  ;;  %v1545_v48 = vmul.f32 %v6429_v8, %v6413_v11 }
 0x9c0   :  { %v6431_v35 = vpop.eup %6430  ;;  %v1553_v21 = vpack.c.bf16 %v1545_v48, %v1545_v48 }
 0x9c1   :  { %v1544_v4 = vmul.f32 %v6431_v35, %v6415_v41  ;;  %v6433_v5 = vpop.eup %6432 }
 0x9c2   :  { %v1565_v56 = vunpack.c.l.b16 %v1553_v21  ;;  %v1730_v16 = vmul.f32 8.0, %v6433_v5  ;;  %vm1734_vm5 = vweird.f32 %v6433_v5 }
 0x9c3   :  { %v1552_v20 = vpack.c.bf16 %v1544_v4, %v1544_v4 }
 0x9c4   :  { %v1731_v48 = vsub.f32 1.0, %v1730_v16 }
 0x9c5   :  { %v1564_v60 = vunpack.c.l.b16 %v1552_v20 }
 0x9c7   :  { %v1567_v33 = vpack.c.b16 %v1565_v56, %v1564_v60 }
 0x9c9   :  { %5522 = vmatmul.msk.bf16.gmra.mxu0 %vm519_vm6, %v1567_v33 }
 0xa01   :  { %v1595_v15 = vpop.f32.mrf.mxu0 }
 0xa09   :  { %v1597_v9 = vpop.f32.mrf.mxu0 }
 0xa0b   :  { %v1642_v53 = vpop.f32.mrf.mxu3 }
 0xa13   :  { %v1644_v63 = vpop.f32.mrf.mxu3 }
 0xa14   :  { %v6062_v17 = vpack.i.bf16 %v1644_v63, %v1597_v9 }
 0xa16   :  { %6063 = vrot.lane.b32.xlu1 %v6062_v17, %s6762_s14 }
 0xa1e   :  { %1926 = vrot.lane.b32.xlu1 %v5912_v38, %s6769_s24 }
 0xa41   :  { %v1647_v55 = vpop.f32.mrf.mxu3 }
 0xa46   :  { %v1600_v19 = vpop.f32.mrf.mxu0 }
 0xa47   :  { %v6067_v23 = vpack.i.bf16 %v1647_v55, %v1600_v19 }
 0xa49   :  { %6068 = vrot.lane.b32.xlu0 %v6067_v23, %s6772_s25  ;;  %v1649_v11 = vpop.f32.mrf.mxu3 }
 0xa4e   :  { %v1602_v41 = vpop.f32.mrf.mxu0 }
 0xa4f   :  { %v6072_v40 = vpack.i.bf16 %v1649_v11, %v1602_v41 }
 0xa51   :  { %6073 = vrot.lane.b32.xlu2 %v6072_v40, %s6773_s26  ;;  %1928 = vrot.lane.b32.xlu0 %v5913_v26, %s6769_s24 }
 0xa88   :  { %v6064_v24 = vpop.permute.xlu1 %6063 }
 0xa89   :  { %v6066_v7 = vunpack.i.h.bf16 %v6064_v24  ;;  %v6065_v51 = vunpack.i.l.bf16 %v6064_v24 }
 0xa8b   :  { %v1677_v58 = vsel %vm384_vm1, %v1642_v53, %v6066_v7  ;;  %v1676_v43 = vsel %vm384_vm1, %v1595_v15, %v6065_v51 }
 0xaab   :  { %v6074_v61 = vpop.permute.xlu2 %6073 }
 0xaac   :  { %v6076_v3 = vunpack.i.h.bf16 %v6074_v61  ;;  %v6075_v57 = vunpack.i.l.bf16 %v6074_v61 }
 0xabb   :  { %v6069_v39 = vpop.permute.xlu0 %6068 }
 0xabc   :  { %v6071_v52 = vunpack.i.h.bf16 %v6069_v39  ;;  %v6070_v12 = vunpack.i.l.bf16 %v6069_v39 }
 0xabe   :  { %v1679_v25 = vsel %vm910_vm10, %v1677_v58, %v6071_v52  ;;  %v1678_v27 = vsel %vm910_vm10, %v1676_v43, %v6070_v12 }
 0xabf   :  { %v1680_v62 = vsel %vm915_vm11, %v1678_v27, %v6075_v57  ;;  %v1681_v22 = vsel %vm915_vm11, %v1679_v25, %v6076_v3  ;;  %v5907_v57 = vld [vmem:[%s8730_s4 + $0x18] sm:$0xff] }
 0xac0   :  { %v1682_v0 = vpack.c.bf16 %v1681_v22, %v1680_v62  ;;  %1813 = vmatpush.bf16.msrb.mxu1 %v5907_v57 }
 0xac2   :  { %5533 = vmatmul.msk.bf16.vlgmr.msra.gmra.mxu0 %vm274_vm0, %v1682_v0  ;;  %v5906_v0 = vld [vmem:[%s8730_s4 + $0x10] sm:$0xff] }
 0xac4   :  { %1814 = vmatpush.bf16.msrb.mxu1 %v5906_v0 }
 0xad2   :  { %5589 = vmatmul.msk.bf16.vlgmr.msrb.gmra.mxu0 %vm274_vm0, %v7235_v29  ;;  %v1732_v29 = vmul.f32 %v6433_v5, %v1731_v48 }
 0xad4   :  { %v1733_v56 = vadd.f32 %v6433_v5, %v1732_v29 }
 0xad6   :  { %v7409_v17 = vsel %vm1734_vm5, %v6433_v5, %v1733_v56 }
 0xae2   :  { %5590 = vmatmul.msk.bf16.gmra.mxu0 %vm274_vm0, %v7252_v34 }
 0xb3f   :  { %v1708_v54 = vpop.f32.mrf.mxu0 }
 0xb40   :  { %v1709_v50 = vadd.f32 %v1708_v54, %v1683_v45 }
 0xb42   :  { %v1713_v8 = vadd.f32 %v1709_v50, %v7239_v42 }
 0xb44   :  { %v1715_v35 = vsel %vm274_vm0, %v1713_v8, 0.0 }
 0xb45   :  { %v1716_v4 = vrot.slane %v1715_v35, 4 }
 0xb47   :  { %v1717_v21 = vadd.f32 %v1716_v4, %v1715_v35  ;;  %v1710_v20 = vpop.f32.mrf.mxu0 }
 0xb48   :  { %v1711_v34 = vadd.f32 %v1710_v20, %v1683_v45  ;;  %v5911_v45 = vld [vmem:[%s8731_s5 + $0x38] sm:$0xff] }
 0xb49   :  { %v1718_v60 = vrot.slane %v1717_v21, 2  ;;  %1856 = vmatpush.bf16.msrb.mxu2 %v5911_v45 }
 0xb4a   :  { %v1714_v33 = vadd.f32 %v1711_v34, %v7241_v6 }
 0xb4b   :  { %v1719_v15 = vadd.f32 %v1718_v60, %v1717_v21 }
 0xb4c   :  { %v1722_v53 = vsel %vm274_vm0, %v1714_v33, 0.0 }
 0xb4d   :  { %v1720_v9 = vrot.slane %v1719_v15, 1  ;;  %v1723_v63 = vrot.slane %v1722_v53, 4 }
 0xb4f   :  { %v1721_v42 = vadd.f32 %v1720_v9, %v1719_v15  ;;  %v1724_v55 = vadd.f32 %v1723_v63, %v1722_v53  ;;  %v1782_v53 = vperm.slane %v7402_v14, 1 }
 0xb51   :  { %v1736_v19 = vmul.f32 %v7409_v17, %v1721_v42  ;;  %v1725_v23 = vrot.slane %v1724_v55, 2 }
 0xb53   :  { %v1738_v11 = vsub.f32 %v1713_v8, %v1736_v19  ;;  %v1726_v41 = vadd.f32 %v1725_v23, %v1724_v55  ;;  %v1785_v55 = vperm.slane %v7402_v14, 2 }
 0xb55   :  { %v1740_v40 = vmul.f32 %v1738_v11, %v1738_v11  ;;  %v1727_v13 = vrot.slane %v1726_v41, 1 }
 0xb57   :  { %v1742_v1 = vsel %vm274_vm0, %v1740_v40, 0.0  ;;  %v1728_v6 = vadd.f32 %v1727_v13, %v1726_v41 }
 0xb58   :  { %v1743_v26 = vrot.slane %v1742_v1, 4 }
 0xb59   :  { %v1737_v38 = vmul.f32 %v7409_v17, %v1728_v6  ;;  %v5908_v6 = vld [vmem:[%s8731_s5 + $0x20] sm:$0xff] }
 0xb5a   :  { %v1744_v24 = vadd.f32 %v1743_v26, %v1742_v1  ;;  %v5909_v1 = vld [vmem:[%s8731_s5 + $0x28] sm:$0xff] }
 0xb5b   :  { %v1739_v7 = vsub.f32 %v1714_v33, %v1737_v38  ;;  %v6325_v38 = vld [vmem:[%s8733_s7 + $0x1] ss:$0 sm:$0xff] }
 0xb5c   :  { %v1745_v51 = vrot.slane %v1744_v24, 2 }
 0xb5d   :  { %v1741_v61 = vmul.f32 %v1739_v7, %v1739_v7 }
 0xb5e   :  { %v1746_v39 = vadd.f32 %v1745_v51, %v1744_v24 }
 0xb5f   :  { %v1749_v52 = vsel %vm274_vm0, %v1741_v61, 0.0 }
 0xb60   :  { %v1747_v12 = vrot.slane %v1746_v39, 1  ;;  %v1750_v58 = vrot.slane %v1749_v52, 4 }
 0xb62   :  { %v1748_v43 = vadd.f32 %v1747_v12, %v1746_v39  ;;  %v1751_v3 = vadd.f32 %v1750_v58, %v1749_v52  ;;  %v1929_v12 = vpop.permute.xlu0 %1928  ;;  %v1927_v58 = vpop.permute.xlu1 %1926 }
 0xb63   :  { %1941 = vmatpush.bf16.msra.mxu1 %v1929_v12 }
 0xb64   :  { %v1756_v25 = vmul.f32 %v1748_v43, %v7409_v17  ;;  %v1752_v27 = vrot.slane %v1751_v3, 2 }
 0xb66   :  { %v1758_v62 = vadd.f32 1e-05, %v1756_v25  ;;  %v1753_v22 = vadd.f32 %v1752_v27, %v1751_v3  ;;  %v1824_v3 = vperm.slane %v7402_v14, 3 }
 0xb67   :  { %1942 = vmatpush.bf16.msra.mxu1 %v1927_v58 }
 0xb68   :  { %6434 = vrsqrt.f32 %v1758_v62  ;;  %v1754_v2 = vrot.slane %v1753_v22, 1  ;;  %vm1766_vm8 = vweird.f32 %v1758_v62 }
 0xb6a   :  { %v1755_v5 = vadd.f32 %v1754_v2, %v1753_v22  ;;  %v1916_v22 = vpop.f32.mrf.mxu0 }
 0xb6c   :  { %v1757_v16 = vmul.f32 %v1755_v5, %v7409_v17 }
 0xb6e   :  { %v6435_v54 = vpop.eup %6434  ;;  %v1759_v50 = vadd.f32 1e-05, %v1757_v16 }
 0xb6f   :  { %v1761_v8 = vmul.f32 %v6435_v54, %v1758_v62  ;;  %vm1767_vm7 = vweird.f32 %v6435_v54 }
 0xb70   :  { %6436 = vrsqrt.f32 %v1759_v50  ;;  %vm1768_vm9 = vmor %vm1766_vm8, %vm1767_vm7  ;;  %vm1776_vm13 = vweird.f32 %v1759_v50 }
 0xb71   :  { %v1762_v48 = vmul.f32 %v6435_v54, %v1761_v8 }
 0xb72   :  { %v1918_v0 = vpop.f32.mrf.mxu0 }
 0xb73   :  { %v1763_v35 = vmul.f32 0.5, %v1762_v48  ;;  %v6087_v16 = vpack.i.bf16 %v1918_v0, %v1916_v22 }
 0xb75   :  { %v1764_v4 = vsub.f32 1.5, %v1763_v35 }
 0xb76   :  { %v6437_v29 = vpop.eup %6436 }
 0xb77   :  { %v1765_v21 = vmul.f32 %v6435_v54, %v1764_v4  ;;  %v1771_v20 = vmul.f32 %v6437_v29, %v1759_v50  ;;  %vm1777_vm12 = vweird.f32 %v6437_v29 }
 0xb78   :  { %vm1778_vm14 = vmor %vm1776_vm13, %vm1777_vm12 }
 0xb79   :  { %v1772_v34 = vmul.f32 %v6437_v29, %v1771_v20  ;;  %v1769_v60 = vsel %vm1768_vm9, %v6435_v54, %v1765_v21 }
 0xb7a   :  { %v1780_v15 = vmul.f32 %v1769_v60, %v1738_v11  ;;  %v5910_v11 = vld [vmem:[%s8731_s5 + $0x30] sm:$0xff]  ;;  %v7455_v14 = vpop.f32.mrf.mxu0 }
 0xb7b   :  { %v1773_v56 = vmul.f32 0.5, %v1772_v34  ;;  %1857 = vmatpush.bf16.msrb.mxu2 %v5910_v11  ;;  %v1990_v11 = vpack.c.bf16 %v1918_v0, %v1918_v0 }
 0xb7c   :  { %v1783_v42 = vmul.f32 %v1782_v53, %v1780_v15 }
 0xb7d   :  { %v1774_v33 = vsub.f32 1.5, %v1773_v56 }
 0xb7e   :  { %v1786_v41 = vadd.f32 %v1785_v55, %v1783_v42 }
 0xb7f   :  { %v1775_v9 = vmul.f32 %v6437_v29, %v1774_v33  ;;  %1858 = vmatpush.bf16.msrb.mxu2 %v5909_v1 }
 0xb81   :  { %v1779_v63 = vsel %vm1778_vm14, %v6437_v29, %v1775_v9  ;;  %v225_v9 = vld [vmem:[%s8727_s1 + $0x1] sm:$0x1] }
 0xb82   :  { %v1781_v19 = vmul.f32 %v1779_v63, %v1739_v7  ;;  %v1923_v45 = vpop.f32.mrf.mxu0 }
 0xb83   :  { %1859 = vmatpush.bf16.msrb.mxu2 %v5908_v6  ;;  %v6082_v54 = vpack.i.bf16 %v1923_v45, %v7455_v14  ;;  %v1998_v58 = vpack.c.bf16 %v1923_v45, %v1923_v45 }
 0xb84   :  { %v1784_v23 = vmul.f32 %v1782_v53, %v1781_v19 }
 0xb85   :  { %v2119_v0 = vunpack.c.l.b16 %v1998_v58 }
 0xb86   :  { %v1787_v40 = vadd.f32 %v1785_v55, %v1784_v23 }
 0xb88   :  { %v1788_v13 = vpack.c.bf16 %v1787_v40, %v1786_v41 }
 0xb8a   :  { %5542 = vmatmul.msk.bf16.vlgmr.msrb.gmra.mxu1 %vm274_vm0, %v1788_v13 }
 0xc07   :  { %v1816_v26 = vpop.f32.mrf.mxu1 }
 0xc08   :  { %v1817_v24 = vadd.f32 %v6325_v38, %v1816_v26  ;;  %v1989_v26 = vpack.c.bf16 %v1916_v22, %v1916_v22  ;;  %v224_v22 = vld [vmem:[%s8727_s1] sm:$0x1] }
 0xc0a   :  { %v1821_v61 = vmax.f32 %v1817_v24, 0.0 }
 0xc0f   :  { %v1818_v7 = vpop.f32.mrf.mxu1 }
 0xc10   :  { %v1819_v51 = vadd.f32 %v6325_v38, %v1818_v7 }
 0xc12   :  { %v1822_v39 = vmax.f32 %v1819_v51, 0.0  ;;  %v2042_v51 = vunpack.c.l.b16 %v1990_v11 }
 0xc14   :  { %v1823_v52 = vpack.c.bf16 %v1822_v39, %v1821_v61  ;;  %v2041_v39 = vunpack.c.l.b16 %v1989_v26 }
 0xc16   :  { %5559 = vmatmul.msk.bf16.vlgmr.msrb.gmra.mxu2 %vm519_vm6, %v1823_v52  ;;  %v2049_v12 = vpack.c.b16 %v2042_v51, %v2041_v39 }
 0xc99   :  { %v1861_v43 = vpop.f32.mrf.mxu2 }
 0xc9a   :  { %v7443_v25 = vadd.f32 %v1861_v43, %v1824_v3 }
 0xca1   :  { %v1863_v57 = vpop.f32.mrf.mxu2 }
 0xca2   :  { %v7445_v27 = vadd.f32 %v1863_v57, %v1824_v3  ;;  %v1997_v3 = vpack.c.bf16 %v7455_v14, %v7455_v14 }
 0xca4   :  { %v7449_v62 = vpack.c.bf16 %v7445_v27, %v7443_v25 }
 0xca6   :  { %5591 = vmatmul.msk.bf16.vlgmr.msra.gmra.mxu1 %vm274_vm0, %v7449_v62 }
 0xd23   :  { %v1944_v2 = vpop.f32.mrf.mxu1 }
 0xd24   :  { %2007 = vrot.lane.b32.xlu1 %v1944_v2, %s6766_s21  ;;  %2019 = vrot.lane.b32.xlu0 %v1944_v2, %s6767_s22  ;;  %v2025_v60 = vpack.c.bf16 %v1944_v2, %v1944_v2 }
 0xd25   :  { %2013 = vrot.lane.b32.xlu2 %v1944_v2, %s6768_s23 }
 0xd26   :  { %v2057_v19 = vunpack.c.l.b16 %v2025_v60 }
 0xd2b   :  { %v1946_v5 = vpop.f32.mrf.mxu1 }
 0xd2c   :  { %2009 = vrot.lane.b32.xlu1 %v1946_v5, %s6766_s21  ;;  %2021 = vrot.lane.b32.xlu0 %v1946_v5, %s6767_s22  ;;  %v2029_v6 = vpack.c.bf16 %v1946_v5, %v1946_v5 }
 0xd2d   :  { %2015 = vrot.lane.b32.xlu2 %v1946_v5, %s6768_s23 }
 0xd2e   :  { %v2134_v61 = vunpack.c.l.b16 %v2029_v6 }
 0xd34   :  { %6088 = vrot.lane.b32.xlu1 %v6087_v16, %s6768_s23  ;;  %6083 = vrot.lane.b32.xlu0 %v6082_v54, %s6766_s21 }
 0xd35   :  { %6078 = vrot.lane.b32.xlu2 %v6087_v16, %s6766_s21 }
 0xd3c   :  { %6103 = vrot.lane.b32.xlu1 %v6082_v54, %s6767_s22  ;;  %6098 = vrot.lane.b32.xlu0 %v6087_v16, %s6767_s22  ;;  %v2118_v16 = vunpack.c.l.b16 %v1997_v3 }
 0xd3d   :  { %6093 = vrot.lane.b32.xlu2 %v6082_v54, %s6768_s23 }
 0xd3e   :  { %v2126_v45 = vpack.c.b16 %v2119_v0, %v2118_v16 }
 0xd44   :  { %231 = vperm.xlu0 %6108, %v225_v9  }
 0xd45   :  { %227 = vperm.xlu2 %6107, %v224_v22  }
 0xd7f   :  { %v2014_v50 = vpop.permute.xlu2 %2013 }
 0xd80   :  { %v2027_v8 = vpack.c.bf16 %v2014_v50, %v2014_v50 }
 0xd82   :  { %v2059_v29 = vunpack.c.l.b16 %v2027_v8 }
 0xd87   :  { %v2016_v34 = vpop.permute.xlu2 %2015 }
 0xd88   :  { %v2031_v33 = vpack.c.bf16 %v2016_v34, %v2016_v34 }
 0xd8a   :  { %v2136_v23 = vunpack.c.l.b16 %v2031_v33 }
 0xd8f   :  { %v6079_v43 = vpop.permute.xlu2 %6078 }
 0xd90   :  { %v6081_v2 = vunpack.i.h.bf16 %v6079_v43  ;;  %v6080_v5 = vunpack.i.l.bf16 %v6079_v43 }
 0xd92   :  { %v1992_v54 = vpack.c.bf16 %v6081_v2, %v6081_v2  ;;  %v1991_v50 = vpack.c.bf16 %v6080_v5, %v6080_v5 }
 0xd94   :  { %v2044_v14 = vunpack.c.l.b16 %v1992_v54 }
 0xd96   :  { %v2008_v48 = vpop.permute.xlu1 %2007  ;;  %v2020_v35 = vpop.permute.xlu0 %2019 }
 0xd97   :  { %v2028_v4 = vpack.c.bf16 %v2020_v35, %v2020_v35  ;;  %v2026_v21 = vpack.c.bf16 %v2008_v48, %v2008_v48  ;;  %v2043_v48 = vunpack.c.l.b16 %v1991_v50 }
 0xd99   :  { %v2060_v20 = vunpack.c.l.b16 %v2028_v4  ;;  %v2058_v15 = vunpack.c.l.b16 %v2026_v21 }
 0xd9b   :  { %v7468_v56 = vpack.c.b16 %v2060_v20, %v2059_v29  ;;  %v7475_v13 = vpack.c.b16 %v2058_v15, %v2057_v19  ;;  %v2050_v20 = vpack.c.b16 %v2044_v14, %v2043_v48  ;;  %v204_v48 = vsel %vm203_vm2, 1, %v6770_v28 }
 0xd9d   :  { %v2079_v53 = vsel %vm384_vm1, %v7468_v56, 0  ;;  %v2076_v24 = vsel %vm384_vm1, %v7475_v13, 0 }
 0xd9e   :  { %2087 = vmatpush.bf16.xpose.msra.mxu2 %v2079_v53  ;;  %v2010_v63 = vpop.permute.xlu1 %2009  ;;  %v2022_v42 = vpop.permute.xlu0 %2021 }
 0xd9f   :  { %v2032_v55 = vpack.c.bf16 %v2022_v42, %v2022_v42  ;;  %v2030_v41 = vpack.c.bf16 %v2010_v63, %v2010_v63 }
 0xda1   :  { %v2137_v40 = vunpack.c.l.b16 %v2032_v55  ;;  %v2135_v38 = vunpack.c.l.b16 %v2030_v41  ;;  %v6094_v55 = vpop.permute.xlu2 %6093 }
 0xda2   :  { %v6096_v19 = vunpack.i.h.bf16 %v6094_v55 }
 0xda3   :  { %v7477_v1 = vpack.c.b16 %v2137_v40, %v2136_v23  ;;  %v7483_v52 = vpack.c.b16 %v2135_v38, %v2134_v61  ;;  %v6095_v23 = vunpack.i.l.bf16 %v6094_v55 }
 0xda4   :  { %v2002_v11 = vpack.c.bf16 %v6096_v19, %v6096_v19 }
 0xda5   :  { %v2156_v7 = vsel %vm384_vm1, %v7477_v1, 0  ;;  %v2153_v57 = vsel %vm384_vm1, %v7483_v52, 0  ;;  %v2001_v6 = vpack.c.bf16 %v6095_v23, %v6095_v23 }
 0xda6   :  { %2088 = vmatpush.bf16.xpose.msra.mxu2 %v2076_v24  ;;  %2164 = vmatpush.bf16.xpose.msrb.mxu3 %v2156_v7  ;;  %v6084_v8 = vpop.permute.xlu0 %6083  ;;  %v6089_v34 = vpop.permute.xlu1 %6088  ;;  %v2123_v24 = vunpack.c.l.b16 %v2002_v11 }
 0xda7   :  { %v6086_v35 = vunpack.i.h.bf16 %v6084_v8  ;;  %v6085_v4 = vunpack.i.l.bf16 %v6084_v8  ;;  %v6091_v60 = vunpack.i.h.bf16 %v6089_v34  ;;  %v6090_v33 = vunpack.i.l.bf16 %v6089_v34 }
 0xda8   :  { %v2122_v7 = vunpack.c.l.b16 %v2001_v6  ;;  %v201_v8 = vsel %vm200_vm15, 1, %v6770_v28 }
 0xda9   :  { %v2000_v29 = vpack.c.bf16 %v6086_v35, %v6086_v35  ;;  %v1999_v21 = vpack.c.bf16 %v6085_v4, %v6085_v4  ;;  %v1994_v9 = vpack.c.bf16 %v6091_v60, %v6091_v60  ;;  %v1993_v63 = vpack.c.bf16 %v6090_v33, %v6090_v33 }
 0xdaa   :  { %v2128_v39 = vpack.c.b16 %v2123_v24, %v2122_v7  ;;  %v202_v14 = vadd.s32 %v201_v8, %v6934_v31  ;;  %v6776_v60 = vmov 0.0  }
 0xdab   :  { %v2121_v15 = vunpack.c.l.b16 %v2000_v29  ;;  %v2120_v53 = vunpack.c.l.b16 %v1999_v21  ;;  %v2046_v41 = vunpack.c.l.b16 %v1994_v9  ;;  %v2045_v40 = vunpack.c.l.b16 %v1993_v63  ;;  %v228_v29 = vpop.permute.xlu2 %227 }
 0xdac   :  { %v7505_v35 = vadd.s32 %v204_v48, %v202_v14 }
 0xdad   :  { %5592 = vmatmul.msk.bf16.vlgmr.msra.gmra.mxu2 %vm384_vm1, %v2049_v12  ;;  %v2127_v42 = vpack.c.b16 %v2121_v15, %v2120_v53  ;;  %v2051_v26 = vpack.c.b16 %v2046_v41, %v2045_v40 }
 0xdae   :  { %2165 = vmatpush.bf16.xpose.msrb.mxu3 %v2153_v57  ;;  %v6099_v38 = vpop.permute.xlu0 %6098  ;;  %v6104_v43 = vpop.permute.xlu1 %6103  ;;  %v222_v4 = vmul.u32 8, %v7505_v35  ;;  %vm5413_vm3 = vcmp.eq.s32.totalorder %v7505_v35, 0  ;;  %vm5415_vm5 = vcmp.eq.s32.totalorder %v7505_v35, 1  ;;  %vm5417_vm8 = vcmp.eq.s32.totalorder %v7505_v35, 2 }
 0xdaf   :  { %v6101_v51 = vunpack.i.h.bf16 %v6099_v38  ;;  %v6100_v61 = vunpack.i.l.bf16 %v6099_v38  ;;  %v6106_v3 = vunpack.i.h.bf16 %v6104_v43  ;;  %v6105_v57 = vunpack.i.l.bf16 %v6104_v43 }
 0xdb0   :  { %v223_v21 = vsub.s32 %v6929_v30, %v222_v4  ;;  %v7511_v34 = vsel %vm5413_vm3, 0.0, %v6771_v36  ;;  %v7530_v40 = vsel %vm5415_vm5, 0.0, %v6771_v36  ;;  %vm5419_vm9 = vcmp.eq.s32.totalorder %v7505_v35, 3 }
 0xdb1   :  { %v1996_v12 = vpack.c.bf16 %v6101_v51, %v6101_v51  ;;  %v1995_v58 = vpack.c.bf16 %v6100_v61, %v6100_v61  ;;  %v2004_v2 = vpack.c.bf16 %v6106_v3, %v6106_v3  ;;  %v2003_v5 = vpack.c.bf16 %v6105_v57, %v6105_v57 }
 0xdb3   :  { %v2048_v22 = vunpack.c.l.b16 %v1996_v12  ;;  %v2047_v0 = vunpack.c.l.b16 %v1995_v58  ;;  %v2124_v54 = vunpack.c.l.b16 %v2003_v5  ;;  %v7560_v5 = vsel %vm5417_vm8, 0.0, %v6771_v36 }
 0xdb5   :  { %5596 = vmatmul.msk.bf16.vlgmr.msrb.gmra.mxu3 %vm384_vm1, %v2126_v45  ;;  %v2052_v16 = vpack.c.b16 %v2048_v22, %v2047_v0  ;;  %v2125_v45 = vunpack.c.l.b16 %v2004_v2 }
 0xdb6   :  { %v232_v53 = vpop.permute.xlu0 %231 }
 0xdb7   :  { %v2129_v50 = vpack.c.b16 %v2125_v45, %v2124_v54  ;;  %v233_v9 = vperm.slane %v232_v53, 0 }
 0xdb9   :  { %vm235_vm7 = vcmp.ge.s32.totalorder %v223_v21, %v233_v9  ;;  %v7588_v9 = vsel %vm5419_vm9, 0.0, %v6771_v36 }
 0xdba   :  { %v7532_v11 = vsel %vm235_vm7, -1e+09, %v6776_v60 }
 0xdbd   :  { %5593 = vmatmul.msk.bf16.gmra.mxu2 %vm384_vm1, %v2050_v20  ;;  %v229_v20 = vperm.slane %v228_v29, 0 }
 0xdbf   :  { %vm234_vm4 = vcmp.ge.s32.totalorder %v223_v21, %v229_v20 }
 0xdc0   :  { %v7513_v33 = vsel %vm234_vm4, -1e+09, %v6776_v60 }
 0xdc5   :  { %5597 = vmatmul.msk.bf16.gmra.mxu3 %vm384_vm1, %v2127_v42 }
 0xdcd   :  { %5594 = vmatmul.msk.bf16.gmra.mxu2 %vm384_vm1, %v2051_v26 }
 0xdd5   :  { %5598 = vmatmul.msk.bf16.gmra.mxu3 %vm384_vm1, %v2128_v39 }
 0xddd   :  { %5595 = vmatmul.msk.bf16.gmra.mxu2 %vm384_vm1, %v2052_v16 }
 0xde5   :  { %5599 = vmatmul.msk.bf16.gmra.mxu3 %vm384_vm1, %v2129_v50 }
 0xe30   :  { %v2090_v31 = vpop.f32.mrf.mxu2 }
 0xe31   :  { %v2091_v28 = vadd.f32 %v2090_v31, %v7511_v34 }
 0xe33   :  { %v7517_v15 = vadd.f32 %v2091_v28, %v7513_v33 }
 0xe35   :  { %v2203_v30 = vsel %vm274_vm0, %v7517_v15, -inf }
 0xe36   :  { %2204 = vmax.xlane.f32.xlu1 %v2203_v30 }
 0xe38   :  { %v2092_v63 = vpop.f32.mrf.mxu2  ;;  %v2167_v42 = vpop.f32.mrf.mxu3 }
 0xe39   :  { %v2093_v55 = vadd.f32 %v2092_v63, %v7511_v34  ;;  %v2168_v41 = vadd.f32 %v2167_v42, %v7511_v34 }
 0xe3b   :  { %v7523_v19 = vadd.f32 %v2093_v55, %v7513_v33  ;;  %v7537_v7 = vadd.f32 %v2168_v41, %v7532_v11 }
 0xe3d   :  { %v2206_v23 = vsel %vm274_vm0, %v7523_v19, -inf  ;;  %v2227_v58 = vsel %vm274_vm0, %v7537_v7, -inf }
 0xe3e   :  { %2207 = vmax.xlane.f32.xlu2 %v2206_v23 }
 0xe40   :  { %v2095_v6 = vpop.f32.mrf.mxu2  ;;  %v2169_v26 = vpop.f32.mrf.mxu3 }
 0xe41   :  { %v2096_v38 = vadd.f32 %v2095_v6, %v7530_v40  ;;  %v2170_v24 = vadd.f32 %v2169_v26, %v7511_v34 }
 0xe43   :  { %v7540_v51 = vadd.f32 %v2096_v38, %v7513_v33  ;;  %v7543_v61 = vadd.f32 %v2170_v24, %v7532_v11 }
 0xe45   :  { %v2209_v39 = vsel %vm274_vm0, %v7540_v51, -inf  ;;  %v2230_v12 = vsel %vm274_vm0, %v7543_v61, -inf }
 0xe46   :  { %2210 = vmax.xlane.f32.xlu0 %v2209_v39  ;;  %2231 = vmax.xlane.f32.xlu1 %v2230_v12 }
 0xe47   :  { %2228 = vmax.xlane.f32.xlu2 %v2227_v58 }
 0xe48   :  { %v2097_v43 = vpop.f32.mrf.mxu2  ;;  %v2172_v3 = vpop.f32.mrf.mxu3 }
 0xe49   :  { %v2098_v57 = vadd.f32 %v2097_v43, %v7530_v40  ;;  %v2173_v0 = vadd.f32 %v2172_v3, %v7530_v40 }
 0xe4b   :  { %v7553_v22 = vadd.f32 %v2098_v57, %v7513_v33  ;;  %v7564_v50 = vadd.f32 %v2173_v0, %v7532_v11 }
 0xe4d   :  { %v2212_v2 = vsel %vm274_vm0, %v7553_v22, -inf  ;;  %v2233_v48 = vsel %vm274_vm0, %v7564_v50, -inf }
 0xe4e   :  { %2213 = vmax.xlane.f32.xlu1 %v2212_v2 }
 0xe50   :  { %v2100_v16 = vpop.f32.mrf.mxu2  ;;  %v2174_v45 = vpop.f32.mrf.mxu3 }
 0xe51   :  { %v2101_v54 = vadd.f32 %v2100_v16, %v7560_v5  ;;  %v2175_v14 = vadd.f32 %v2174_v45, %v7530_v40 }
 0xe53   :  { %v7567_v8 = vadd.f32 %v2101_v54, %v7513_v33  ;;  %v7576_v60 = vadd.f32 %v2175_v14, %v7532_v11 }
 0xe55   :  { %v2215_v4 = vsel %vm274_vm0, %v7567_v8, -inf  ;;  %v2236_v30 = vsel %vm274_vm0, %v7576_v60, -inf }
 0xe56   :  { %2234 = vmax.xlane.f32.xlu1 %v2233_v48  ;;  %2216 = vmax.xlane.f32.xlu2 %v2215_v4 }
 0xe58   :  { %v2102_v29 = vpop.f32.mrf.mxu2  ;;  %v2177_v21 = vpop.f32.mrf.mxu3 }
 0xe59   :  { %v2103_v20 = vadd.f32 %v2102_v29, %v7560_v5  ;;  %v2178_v28 = vadd.f32 %v2177_v21, %v7560_v5 }
 0xe5b   :  { %v7579_v31 = vadd.f32 %v2103_v20, %v7513_v33  ;;  %v7592_v23 = vadd.f32 %v2178_v28, %v7532_v11 }
 0xe5d   :  { %v2218_v53 = vsel %vm274_vm0, %v7579_v31, -inf  ;;  %v2239_v26 = vsel %vm274_vm0, %v7592_v23, -inf }
 0xe5e   :  { %2219 = vmax.xlane.f32.xlu0 %v2218_v53  ;;  %2237 = vmax.xlane.f32.xlu2 %v2236_v30 }
 0xe60   :  { %v2105_v63 = vpop.f32.mrf.mxu2  ;;  %v2179_v42 = vpop.f32.mrf.mxu3 }
 0xe61   :  { %v2106_v55 = vadd.f32 %v2105_v63, %v7588_v9  ;;  %v2180_v41 = vadd.f32 %v2179_v42, %v7560_v5 }
 0xe63   :  { %v7595_v35 = vadd.f32 %v2106_v55, %v7513_v33  ;;  %v7603_v38 = vadd.f32 %v2180_v41, %v7532_v11 }
 0xe65   :  { %v2221_v6 = vsel %vm274_vm0, %v7595_v35, -inf  ;;  %v2242_v24 = vsel %vm274_vm0, %v7603_v38, -inf }
 0xe66   :  { %2222 = vmax.xlane.f32.xlu0 %v2221_v6  ;;  %2240 = vmax.xlane.f32.xlu2 %v2239_v26 }
 0xe68   :  { %v2182_v36 = vpop.f32.mrf.mxu3  ;;  %v2107_v3 = vpop.f32.mrf.mxu2 }
 0xe69   :  { %v2108_v57 = vadd.f32 %v2107_v3, %v7588_v9 }
 0xe6b   :  { %v7619_v0 = vadd.f32 %v2108_v57, %v7513_v33 }
 0xe6d   :  { %v2224_v2 = vsel %vm274_vm0, %v7619_v0, -inf }
 0xe6e   :  { %2243 = vmax.xlane.f32.xlu0 %v2242_v24 }
 0xe6f   :  { %2415 = vrot.lane.b32.xlu1 %v7475_v13, %s6769_s24  ;;  %v2183_v13 = vadd.f32 %v2182_v36, %v7588_v9 }
 0xe70   :  { %v2184_v39 = vpop.f32.mrf.mxu3 }
 0xe71   :  { %v2185_v12 = vadd.f32 %v2184_v39, %v7588_v9  ;;  %v7625_v16 = vadd.f32 %v2183_v13, %v7532_v11 }
 0xe73   :  { %v7611_v58 = vadd.f32 %v2185_v12, %v7532_v11  ;;  %v2245_v45 = vsel %vm274_vm0, %v7625_v16, -inf }
 0xe75   :  { %v2248_v43 = vsel %vm274_vm0, %v7611_v58, -inf }
 0xe76   :  { %2249 = vmax.xlane.f32.xlu2 %v2248_v43 }
 0xe82   :  { %2417 = vrot.lane.b32.xlu0 %v7468_v56, %s6769_s24 }
 0xe99   :  { %2225 = vmax.xlane.f32.xlu1 %v2224_v2 }
 0xea1   :  { %2246 = vmax.xlane.f32.xlu1 %v2245_v45 }
 0xea9   :  { %v2205_v56 = vpop.xlane.xlu1 %2204 }
 0xeaa   :  { %v2251_v54 = vsub.f32 %v7517_v15, %v2205_v56 }
 0xeac   :  { %v2267_v14 = vmul.f32 1.442695, %v2251_v54 }
 0xeae   :  { %6438 = vpow2.f32 %v2267_v14 }
 0xeb1   :  { %v2208_v48 = vpop.xlane.xlu2 %2207 }
 0xeb2   :  { %v2252_v4 = vsub.f32 %v7523_v19, %v2208_v48 }
 0xeb4   :  { %v7631_v29 = vpop.eup %6438  ;;  %v2269_v21 = vmul.f32 1.442695, %v2252_v4 }
 0xeb5   :  { %v2299_v20 = vsel %vm274_vm0, %v7631_v29, 0.0 }
 0xeb6   :  { %6440 = vpow2.f32 %v2269_v21  ;;  %2300 = vadd.xlane.f32.xlu1 %v2299_v20 }
 0xeb9   :  { %v2232_v28 = vpop.xlane.xlu1 %2231  ;;  %v2211_v53 = vpop.xlane.xlu0 %2210 }
 0xeba   :  { %v2229_v30 = vpop.xlane.xlu2 %2228  ;;  %v2253_v15 = vsub.f32 %v7540_v51, %v2211_v53 }
 0xebb   :  { %v2259_v63 = vsub.f32 %v7537_v7, %v2229_v30  ;;  %v2260_v7 = vsub.f32 %v7543_v61, %v2232_v28 }
 0xebc   :  { %v7636_v42 = vpop.eup %6440  ;;  %v2271_v41 = vmul.f32 1.442695, %v2253_v15 }
 0xebd   :  { %v2283_v55 = vmul.f32 1.442695, %v2259_v63  ;;  %v2302_v19 = vsel %vm274_vm0, %v7636_v42, 0.0  ;;  %v2285_v12 = vmul.f32 1.442695, %v2260_v7 }
 0xebe   :  { %2303 = vadd.xlane.f32.xlu2 %v2302_v19 }
 0xebf   :  { %6442 = vpow2.f32 %v2283_v55 }
 0xec0   :  { %6444 = vpow2.f32 %v2271_v41 }
 0xec1   :  { %v2214_v6 = vpop.xlane.xlu1 %2213 }
 0xec2   :  { %v2254_v26 = vsub.f32 %v7553_v22, %v2214_v6 }
 0xec4   :  { %v2273_v36 = vmul.f32 1.442695, %v2254_v26 }
 0xec5   :  { %v7642_v24 = vpop.eup %6442 }
 0xec6   :  { %6446 = vpow2.f32 %v2273_v36  ;;  %v2323_v51 = vsel %vm274_vm0, %v7642_v24, 0.0  ;;  %v7647_v43 = vpop.eup %6444 }
 0xec7   :  { %2324 = vadd.xlane.f32.xlu2 %v2323_v51  ;;  %6448 = vpow2.f32 %v2285_v12  ;;  %v2305_v57 = vsel %vm274_vm0, %v7647_v43, 0.0 }
 0xec9   :  { %v2217_v39 = vpop.xlane.xlu2 %2216  ;;  %v2235_v6 = vpop.xlane.xlu1 %2234 }
 0xeca   :  { %v2255_v63 = vsub.f32 %v7567_v8, %v2217_v39  ;;  %v2261_v39 = vsub.f32 %v7564_v50, %v2235_v6 }
 0xecc   :  { %v7649_v3 = vpop.eup %6446  ;;  %v2287_v12 = vmul.f32 1.442695, %v2261_v39 }
 0xecd   :  { %v2308_v22 = vsel %vm274_vm0, %v7649_v3, 0.0  ;;  %v7658_v45 = vpop.eup %6448 }
 0xece   :  { %2309 = vadd.xlane.f32.xlu0 %v2308_v22  ;;  %v2326_v14 = vsel %vm274_vm0, %v7658_v45, 0.0 }
 0xecf   :  { %2484 = vrot.lane.b32.xlu1 %v7477_v1, %s6769_s24  ;;  %2306 = vadd.xlane.f32.xlu2 %v2305_v57 }
 0xed1   :  { %v2220_v61 = vpop.xlane.xlu0 %2219  ;;  %v2238_v13 = vpop.xlane.xlu2 %2237 }
 0xed2   :  { %v2262_v2 = vsub.f32 %v7576_v60, %v2238_v13  ;;  %v2256_v54 = vsub.f32 %v7579_v31, %v2220_v61 }
 0xed4   :  { %v2289_v56 = vmul.f32 1.442695, %v2262_v2  ;;  %v2277_v48 = vmul.f32 1.442695, %v2256_v54 }
 0xed6   :  { %6450 = vpow2.f32 %v2289_v56 }
 0xed7   :  { %2327 = vadd.xlane.f32.xlu2 %v2326_v14  ;;  %6452 = vpow2.f32 %v2277_v48 }
 0xed9   :  { %v2223_v4 = vpop.xlane.xlu0 %2222  ;;  %v2241_v28 = vpop.xlane.xlu2 %2240 }
 0xeda   :  { %v2257_v1 = vsub.f32 %v7595_v35, %v2223_v4  ;;  %v2263_v31 = vsub.f32 %v7592_v23, %v2241_v28  ;;  %v2275_v35 = vmul.f32 1.442695, %v2255_v63 }
 0xedc   :  { %v7663_v21 = vpop.eup %6450  ;;  %v2279_v20 = vmul.f32 1.442695, %v2257_v1  ;;  %v2291_v15 = vmul.f32 1.442695, %v2263_v31 }
 0xedd   :  { %v2332_v60 = vsel %vm274_vm0, %v7663_v21, 0.0  ;;  %v7668_v53 = vpop.eup %6452 }
 0xede   :  { %2333 = vadd.xlane.f32.xlu0 %v2332_v60  ;;  %6454 = vpow2.f32 %v2279_v20  ;;  %v2314_v30 = vsel %vm274_vm0, %v7668_v53, 0.0 }
 0xedf   :  { %6456 = vpow2.f32 %v2291_v15 }
 0xee0   :  { %6458 = vpow2.f32 %v2275_v35 }
 0xee1   :  { %v2244_v19 = vpop.xlane.xlu0 %2243  ;;  %v2416_v7 = vpop.permute.xlu1 %2415  ;;  %6460 = vpow2.f32 %v2287_v12 }
 0xee2   :  { %v2264_v57 = vsub.f32 %v7603_v38, %v2244_v19 }
 0xee4   :  { %v7674_v55 = vpop.eup %6454  ;;  %v2293_v13 = vmul.f32 1.442695, %v2264_v57 }
 0xee5   :  { %v2317_v41 = vsel %vm274_vm0, %v7674_v55, 0.0  ;;  %v7680_v23 = vpop.eup %6456 }
 0xee6   :  { %2315 = vadd.xlane.f32.xlu0 %v2314_v30  ;;  %v7682_v8 = vpop.eup %6458  ;;  %v2335_v36 = vsel %vm274_vm0, %v7680_v23, 0.0 }
 0xee7   :  { %v2311_v51 = vsel %vm274_vm0, %v7682_v8, 0.0  ;;  %v7691_v54 = vpop.eup %6460 }
 0xee9   :  { %v2250_v2 = vpop.xlane.xlu2 %2249 }
 0xeea   :  { %v2266_v50 = vsub.f32 %v7611_v58, %v2250_v2 }
 0xeec   :  { %v2297_v1 = vmul.f32 1.442695, %v2266_v50 }
 0xeee   :  { %2318 = vadd.xlane.f32.xlu0 %v2317_v41 }
 0xeef   :  { %2482 = vrot.lane.b32.xlu2 %v7483_v52, %s6769_s24 }
 0xef4   :  { %v2418_v26 = vpop.permute.xlu0 %2417 }
 0xef5   :  { %2439 = vmatpush.bf16.msrb.mxu1 %v2418_v26 }
 0xef6   :  { %2336 = vadd.xlane.f32.xlu0 %v2335_v36 }
 0xef9   :  { %2440 = vmatpush.bf16.msrb.mxu1 %v2416_v7  ;;  %2312 = vadd.xlane.f32.xlu1 %v2311_v51 }
 0xf0c   :  { %v2226_v52 = vpop.xlane.xlu1 %2225 }
 0xf0d   :  { %v2258_v22 = vsub.f32 %v7619_v0, %v2226_v52  ;;  %v2329_v0 = vsel %vm274_vm0, %v7691_v54, 0.0 }
 0xf0f   :  { %v2281_v61 = vmul.f32 1.442695, %v2258_v22 }
 0xf11   :  { %6462 = vpow2.f32 %v2281_v61 }
 0xf12   :  { %6464 = vpow2.f32 %v2293_v13 }
 0xf14   :  { %v2247_v56 = vpop.xlane.xlu1 %2246 }
 0xf15   :  { %v2265_v14 = vsub.f32 %v7625_v16, %v2247_v56 }
 0xf17   :  { %v7694_v48 = vpop.eup %6462  ;;  %v2295_v4 = vmul.f32 1.442695, %v2265_v14 }
 0xf18   :  { %v2320_v38 = vsel %vm274_vm0, %v7694_v48, 0.0  ;;  %2330 = vadd.xlane.f32.xlu2 %v2329_v0  ;;  %v7701_v60 = vpop.eup %6464 }
 0xf19   :  { %6466 = vpow2.f32 %v2295_v4  ;;  %2321 = vadd.xlane.f32.xlu1 %v2320_v38  ;;  %v2338_v16 = vsel %vm274_vm0, %v7701_v60, 0.0 }
 0xf1a   :  { %6468 = vpow2.f32 %v2297_v1 }
 0xf1f   :  { %v7703_v20 = vpop.eup %6466 }
 0xf20   :  { %v2341_v58 = vsel %vm274_vm0, %v7703_v20, 0.0  ;;  %v7709_v28 = vpop.eup %6468 }
 0xf21   :  { %2339 = vadd.xlane.f32.xlu1 %v2338_v16  ;;  %2342 = vadd.xlane.f32.xlu0 %v2341_v58  ;;  %v2344_v31 = vsel %vm274_vm0, %v7709_v28, 0.0 }
 0xf29   :  { %v2301_v30 = vpop.xlane.xlu1 %2300  ;;  %2345 = vadd.xlane.f32.xlu1 %v2344_v31 }
 0xf2a   :  { %6470 = vrcp.f32 %v2301_v30 }
 0xf30   :  { %v6471_v15 = vpop.eup %6470 }
 0xf31   :  { %v2304_v63 = vpop.xlane.xlu2 %2303  ;;  %v2363_v35 = vmul.f32 %v6471_v15, %v7631_v29 }
 0xf32   :  { %6472 = vrcp.f32 %v2304_v63 }
 0xf33   :  { %v2379_v41 = vpack.c.bf16 %v2363_v35, %v2363_v35 }
 0xf35   :  { %v2403_v7 = vunpack.c.l.b16 %v2379_v41 }
 0xf38   :  { %v6473_v19 = vpop.eup %6472 }
 0xf39   :  { %v2364_v6 = vmul.f32 %v6473_v19, %v7636_v42 }
 0xf3a   :  { %v2325_v36 = vpop.xlane.xlu2 %2324 }
 0xf3b   :  { %v2380_v26 = vpack.c.bf16 %v2364_v6, %v2364_v6 }
 0xf3d   :  { %v2404_v51 = vunpack.c.l.b16 %v2380_v26 }
 0xf3f   :  { %v2411_v39 = vpack.c.b16 %v2404_v51, %v2403_v7 }
 0xf41   :  { %v2310_v12 = vpop.xlane.xlu0 %2309  ;;  %v2485_v52 = vpop.permute.xlu1 %2484  ;;  %5600 = vmatmul.msk.bf16.vlgmr.msrb.gmra.mxu1 %vm274_vm0, %v2411_v39 }
 0xf42   :  { %6474 = vrcp.f32 %v2310_v12  ;;  %2506 = vmatpush.bf16.msra.mxu0 %v2485_v52  ;;  %v2307_v22 = vpop.xlane.xlu2 %2306 }
 0xf43   :  { %6476 = vrcp.f32 %v2307_v22 }
 0xf44   :  { %6478 = vrcp.f32 %v2325_v36 }
 0xf48   :  { %v6475_v57 = vpop.eup %6474 }
 0xf49   :  { %v2366_v29 = vmul.f32 %v6475_v57, %v7649_v3  ;;  %v6477_v61 = vpop.eup %6476 }
 0xf4a   :  { %v2328_v13 = vpop.xlane.xlu2 %2327  ;;  %v2365_v42 = vmul.f32 %v6477_v61, %v7647_v43  ;;  %v6479_v56 = vpop.eup %6478 }
 0xf4b   :  { %v2382_v2 = vpack.c.bf16 %v2366_v29, %v2366_v29  ;;  %6480 = vrcp.f32 %v2328_v13  ;;  %v2371_v4 = vmul.f32 %v6479_v56, %v7642_v24 }
 0xf4c   :  { %v2381_v14 = vpack.c.bf16 %v2365_v42, %v2365_v42 }
 0xf4d   :  { %v2406_v50 = vunpack.c.l.b16 %v2382_v2  ;;  %v2387_v16 = vpack.c.bf16 %v2371_v4, %v2371_v4 }
 0xf4e   :  { %v2405_v0 = vunpack.c.l.b16 %v2381_v14 }
 0xf4f   :  { %v2470_v30 = vunpack.c.l.b16 %v2387_v16 }
 0xf50   :  { %v2412_v38 = vpack.c.b16 %v2406_v50, %v2405_v0 }
 0xf51   :  { %v6481_v1 = vpop.eup %6480  ;;  %v2334_v15 = vpop.xlane.xlu0 %2333 }
 0xf52   :  { %v2372_v58 = vmul.f32 %v6481_v1, %v7658_v45  ;;  %5601 = vmatmul.msk.bf16.gmra.mxu1 %vm274_vm0, %v2412_v38  ;;  %v2483_v3 = vpop.permute.xlu2 %2482 }
 0xf53   :  { %2507 = vmatpush.bf16.msra.mxu0 %v2483_v3 }
 0xf54   :  { %v2388_v31 = vpack.c.bf16 %v2372_v58, %v2372_v58 }
 0xf56   :  { %v2471_v43 = vunpack.c.l.b16 %v2388_v31 }
 0xf58   :  { %v2478_v63 = vpack.c.b16 %v2471_v43, %v2470_v30 }
 0xf59   :  { %v2316_v35 = vpop.xlane.xlu0 %2315 }
 0xf5a   :  { %5604 = vmatmul.msk.bf16.vlgmr.msra.gmra.mxu0 %vm274_vm0, %v2478_v63  ;;  %6482 = vrcp.f32 %v2316_v35 }
 0xf60   :  { %v6483_v19 = vpop.eup %6482 }
 0xf61   :  { %v2368_v41 = vmul.f32 %v6483_v19, %v7668_v53  ;;  %v2319_v12 = vpop.xlane.xlu0 %2318 }
 0xf63   :  { %v2384_v45 = vpack.c.bf16 %v2368_v41, %v2368_v41 }
 0xf65   :  { %v2408_v51 = vunpack.c.l.b16 %v2384_v45 }
 0xf69   :  { %v2337_v2 = vpop.xlane.xlu0 %2336 }
 0xf6c   :  { %v2313_v24 = vpop.xlane.xlu1 %2312 }
 0xf6d   :  { %6484 = vrcp.f32 %v2313_v24 }
 0xf6e   :  { %6486 = vrcp.f32 %v2334_v15 }
 0xf6f   :  { %6488 = vrcp.f32 %v2319_v12 }
 0xf73   :  { %v6485_v6 = vpop.eup %6484 }
 0xf74   :  { %v2367_v26 = vmul.f32 %v6485_v6, %v7682_v8  ;;  %v6487_v57 = vpop.eup %6486 }
 0xf75   :  { %v6489_v29 = vpop.eup %6488  ;;  %v2374_v53 = vmul.f32 %v6487_v57, %v7663_v21 }
 0xf76   :  { %v2383_v36 = vpack.c.bf16 %v2367_v26, %v2367_v26  ;;  %v2369_v61 = vmul.f32 %v6489_v29, %v7674_v55 }
 0xf77   :  { %v2390_v42 = vpack.c.bf16 %v2374_v53, %v2374_v53 }
 0xf78   :  { %v2407_v7 = vunpack.c.l.b16 %v2383_v36  ;;  %v2385_v50 = vpack.c.bf16 %v2369_v61, %v2369_v61 }
 0xf79   :  { %v2473_v16 = vunpack.c.l.b16 %v2390_v42 }
 0xf7a   :  { %v2413_v39 = vpack.c.b16 %v2408_v51, %v2407_v7  ;;  %v2409_v58 = vunpack.c.l.b16 %v2385_v50 }
 0xf7c   :  { %5602 = vmatmul.msk.bf16.gmra.mxu1 %vm274_vm0, %v2413_v39 }
 0xf8b   :  { %v2331_v52 = vpop.xlane.xlu2 %2330 }
 0xf8c   :  { %v2322_v22 = vpop.xlane.xlu1 %2321  ;;  %6490 = vrcp.f32 %v2331_v52 }
 0xf8d   :  { %6492 = vrcp.f32 %v2322_v22 }
 0xf92   :  { %v6491_v8 = vpop.eup %6490 }
 0xf93   :  { %v6493_v13 = vpop.eup %6492  ;;  %v2373_v56 = vmul.f32 %v6491_v8, %v7691_v54 }
 0xf94   :  { %v2340_v14 = vpop.xlane.xlu1 %2339  ;;  %v2370_v4 = vmul.f32 %v6493_v13, %v7694_v48  ;;  %v2343_v35 = vpop.xlane.xlu0 %2342 }
 0xf95   :  { %6494 = vrcp.f32 %v2340_v14  ;;  %v2389_v0 = vpack.c.bf16 %v2373_v56, %v2373_v56 }
 0xf96   :  { %6496 = vrcp.f32 %v2337_v2  ;;  %v2386_v38 = vpack.c.bf16 %v2370_v4, %v2370_v4 }
 0xf97   :  { %v2472_v1 = vunpack.c.l.b16 %v2389_v0 }
 0xf98   :  { %v2410_v21 = vunpack.c.l.b16 %v2386_v38 }
 0xf99   :  { %v2479_v3 = vpack.c.b16 %v2473_v16, %v2472_v1 }
 0xf9a   :  { %v2414_v31 = vpack.c.b16 %v2410_v21, %v2409_v58  ;;  %v5915_v58 = vld [vmem:[%s8729_s3 + $0x28] sm:$0xff] }
 0xf9b   :  { %v6495_v55 = vpop.eup %6494  ;;  %5605 = vmatmul.msk.bf16.gmra.mxu0 %vm274_vm0, %v2479_v3  ;;  %2616 = vmatpush.bf16.msrb.mxu2 %v5915_v58  ;;  %v5914_v3 = vld [vmem:[%s8729_s3 + $0x20] sm:$0xff] }
 0xf9c   :  { %v6497_v30 = vpop.eup %6496  ;;  %5603 = vmatmul.msk.bf16.gmra.mxu1 %vm274_vm0, %v2414_v31  ;;  %v2376_v54 = vmul.f32 %v6495_v55, %v7701_v60  ;;  %v2346_v63 = vpop.xlane.xlu1 %2345 }
 0xf9d   :  { %v2375_v48 = vmul.f32 %v6497_v30, %v7680_v23  ;;  %6498 = vrcp.f32 %v2346_v63 }
 0xf9e   :  { %v2392_v43 = vpack.c.bf16 %v2376_v54, %v2376_v54  ;;  %6500 = vrcp.f32 %v2343_v35 }
 0xf9f   :  { %v2391_v15 = vpack.c.bf16 %v2375_v48, %v2375_v48  ;;  %2617 = vmatpush.bf16.msrb.mxu2 %v5914_v3 }
 0xfa0   :  { %v2475_v24 = vunpack.c.l.b16 %v2392_v43 }
 0xfa1   :  { %v2474_v19 = vunpack.c.l.b16 %v2391_v15 }
 0xfa3   :  { %v2480_v41 = vpack.c.b16 %v2475_v24, %v2474_v19  ;;  %v6499_v6 = vpop.eup %6498 }
 0xfa4   :  { %v6501_v45 = vpop.eup %6500  ;;  %v2378_v26 = vmul.f32 %v6499_v6, %v7709_v28 }
 0xfa5   :  { %v2377_v36 = vmul.f32 %v6501_v45, %v7703_v20 }
 0xfa6   :  { %v2394_v60 = vpack.c.bf16 %v2378_v26, %v2378_v26 }
 0xfa7   :  { %v2393_v7 = vpack.c.bf16 %v2377_v36, %v2377_v36 }
 0xfa8   :  { %v2477_v23 = vunpack.c.l.b16 %v2394_v60 }
 0xfa9   :  { %v2476_v51 = vunpack.c.l.b16 %v2393_v7 }
 0xfab   :  { %5606 = vmatmul.msk.bf16.gmra.mxu0 %vm274_vm0, %v2480_v41  ;;  %v2481_v39 = vpack.c.b16 %v2477_v23, %v2476_v51 }
 0xfbb   :  { %5607 = vmatmul.msk.bf16.gmra.mxu0 %vm274_vm0, %v2481_v39 }
 0xfbe   :  { %v2442_v12 = vpop.f32.mrf.mxu1 }
 0xfc6   :  { %v2444_v52 = vpop.f32.mrf.mxu1 }
 0xfcf   :  { %v2447_v22 = vpop.f32.mrf.mxu1 }
 0xfd7   :  { %v2449_v57 = vpop.f32.mrf.mxu1  ;;  %v2509_v20 = vpop.f32.mrf.mxu0 }
 0xfd8   :  { %v6109_v29 = vpack.i.bf16 %v2449_v57, %v2447_v22 }
 0xfda   :  { %6110 = vrot.lane.b32.xlu0 %v6109_v29, %s6762_s14 }
 0xfdf   :  { %v2511_v28 = vpop.f32.mrf.mxu0 }
 0xff9   :  { %v2452_v53 = vpop.f32.mrf.mxu1 }
0x1001   :  { %v2454_v61 = vpop.f32.mrf.mxu1 }
0x1002   :  { %v6114_v8 = vpack.i.bf16 %v2454_v61, %v2452_v53 }
0x1004   :  { %6115 = vrot.lane.b32.xlu2 %v6114_v8, %s6772_s25 }
0x1018   :  { %v2514_v13 = vpop.f32.mrf.mxu0 }
0x1019   :  { %v2457_v42 = vpop.f32.mrf.mxu1 }
0x1020   :  { %v2516_v2 = vpop.f32.mrf.mxu0 }
0x1021   :  { %v6124_v56 = vpack.i.bf16 %v2516_v2, %v2514_v13  ;;  %v2459_v14 = vpop.f32.mrf.mxu1 }
0x1022   :  { %v6119_v50 = vpack.i.bf16 %v2459_v14, %v2457_v42 }
0x1023   :  { %6125 = vrot.lane.b32.xlu0 %v6124_v56, %s6762_s14  ;;  %v7763_v56 = vld [vmem:[#allocation5 + $0x8] sm:$0xf] }
0x1024   :  { %6120 = vrot.lane.b32.xlu1 %v6119_v50, %s6773_s26 }
0x1028   :  { %v2519_v4 = vpop.f32.mrf.mxu0 }
0x1030   :  { %v2521_v0 = vpop.f32.mrf.mxu0 }
0x1031   :  { %v6129_v38 = vpack.i.bf16 %v2521_v0, %v2519_v4 }
0x1033   :  { %6130 = vrot.lane.b32.xlu2 %v6129_v38, %s6772_s25 }
0x1038   :  { %v2524_v1 = vpop.f32.mrf.mxu0 }
0x1040   :  { %v2526_v16 = vpop.f32.mrf.mxu0 }
0x1041   :  { %v6134_v21 = vpack.i.bf16 %v2526_v16, %v2524_v1 }
0x1043   :  { %6135 = vrot.lane.b32.xlu0 %v6134_v21, %s6773_s26 }
0x104c   :  { %v6111_v55 = vpop.permute.xlu0 %6110 }
0x104d   :  { %v6113_v30 = vunpack.i.h.bf16 %v6111_v55  ;;  %v6112_v54 = vunpack.i.l.bf16 %v6111_v55 }
0x104f   :  { %v2578_v15 = vsel %vm384_vm1, %v2444_v52, %v6113_v30  ;;  %v2577_v35 = vsel %vm384_vm1, %v2442_v12, %v6112_v54 }
0x105e   :  { %v6116_v31 = vpop.permute.xlu2 %6115 }
0x105f   :  { %v6118_v48 = vunpack.i.h.bf16 %v6116_v31  ;;  %v6117_v43 = vunpack.i.l.bf16 %v6116_v31 }
0x1061   :  { %v2582_v41 = vsel %vm910_vm10, %v2578_v15, %v6118_v48  ;;  %v2581_v6 = vsel %vm910_vm10, %v2577_v35, %v6117_v43 }
0x108d   :  { %v6131_v51 = vpop.permute.xlu2 %6130 }
0x108e   :  { %v6133_v52 = vunpack.i.h.bf16 %v6131_v51  ;;  %v6132_v22 = vunpack.i.l.bf16 %v6131_v51 }
0x1095   :  { %v6126_v60 = vpop.permute.xlu0 %6125 }
0x1096   :  { %v6121_v63 = vpop.permute.xlu1 %6120  ;;  %v6128_v7 = vunpack.i.h.bf16 %v6126_v60  ;;  %v6127_v23 = vunpack.i.l.bf16 %v6126_v60 }
0x1097   :  { %v6123_v24 = vunpack.i.h.bf16 %v6121_v63  ;;  %v6122_v19 = vunpack.i.l.bf16 %v6121_v63 }
0x1098   :  { %v2580_v39 = vsel %vm384_vm1, %v2511_v28, %v6128_v7  ;;  %v2579_v12 = vsel %vm384_vm1, %v2509_v20, %v6127_v23  ;;  %v2591_v20 = vperm.slane %v7763_v56, 0 }
0x1099   :  { %v2585_v45 = vsel %vm915_vm11, %v2581_v6, %v6122_v19  ;;  %v2586_v26 = vsel %vm915_vm11, %v2582_v41, %v6123_v24  ;;  %v2583_v61 = vsel %vm910_vm10, %v2579_v12, %v6132_v22  ;;  %v2584_v8 = vsel %vm910_vm10, %v2580_v39, %v6133_v52  ;;  %v5916_v12 = vld [vmem:[%s8730_s4 + $0x20] sm:$0xff] }
0x109a   :  { %v2589_v36 = vpack.c.bf16 %v2586_v26, %v2585_v45 }
0x109c   :  { %5616 = vmatmul.msk.bf16.vlgmr.msrb.gmra.mxu2 %vm274_vm0, %v2589_v36  ;;  %v5917_v36 = vld [vmem:[%s8730_s4 + $0x28] sm:$0xff] }
0x109d   :  { %2746 = vmatpush.bf16.msra.mxu3 %v5917_v36 }
0x10a1   :  { %2747 = vmatpush.bf16.msra.mxu3 %v5916_v12 }
0x10b5   :  { %v6136_v57 = vpop.permute.xlu0 %6135 }
0x10b6   :  { %v6138_v29 = vunpack.i.h.bf16 %v6136_v57  ;;  %v6137_v53 = vunpack.i.l.bf16 %v6136_v57 }
0x10b8   :  { %v2587_v13 = vsel %vm915_vm11, %v2583_v61, %v6137_v53  ;;  %v2588_v42 = vsel %vm915_vm11, %v2584_v8, %v6138_v29 }
0x10b9   :  { %v2590_v2 = vpack.c.bf16 %v2588_v42, %v2587_v13 }
0x10bb   :  { %5617 = vmatmul.msk.bf16.gmra.mxu2 %vm274_vm0, %v2590_v2 }
0x111f   :  { %v2619_v28 = vpop.f32.mrf.mxu2 }
0x1120   :  { %v2620_v14 = vadd.f32 %v2619_v28, %v2591_v20 }
0x1122   :  { %v2629_v4 = vadd.f32 %v2620_v14, %v7229_v18 }
0x1124   :  { %v2633_v1 = vsel %vm274_vm0, %v2629_v4, 0.0 }
0x1127   :  { %v2621_v50 = vpop.f32.mrf.mxu2 }
0x1128   :  { %v2622_v0 = vadd.f32 %v2621_v50, %v2591_v20 }
0x112a   :  { %v2630_v38 = vadd.f32 %v2622_v0, %v7231_v46 }
0x112c   :  { %v2634_v16 = vsel %vm274_vm0, %v2630_v38, 0.0 }
0x112d   :  { %v2635_v58 = vadd.f32 %v2634_v16, %v2633_v1 }
0x112f   :  { %v2636_v21 = vrot.slane %v2635_v58, 4 }
0x1131   :  { %v2637_v3 = vadd.f32 %v2636_v21, %v2635_v58 }
0x1133   :  { %v2638_v55 = vrot.slane %v2637_v3, 2 }
0x1135   :  { %v2639_v31 = vadd.f32 %v2638_v55, %v2637_v3 }
0x1137   :  { %v2640_v30 = vrot.slane %v2639_v31, 1 }
0x1139   :  { %v2641_v54 = vadd.f32 %v2640_v30, %v2639_v31 }
0x113b   :  { %v2651_v48 = vmul.f32 %v2641_v54, %v7181_v49 }
0x113d   :  { %v2653_v43 = vsub.f32 %v2629_v4, %v2651_v48  ;;  %v2654_v63 = vsub.f32 %v2630_v38, %v2651_v48  ;;  %v2707_v48 = vperm.slane %v7763_v56, 1 }
0x113e   :  { %v2624_v15 = vpop.f32.mrf.mxu2 }
0x113f   :  { %v2657_v18 = vmul.f32 %v2653_v43, %v2653_v43  ;;  %v2658_v35 = vmul.f32 %v2654_v63, %v2654_v63  ;;  %v2625_v41 = vadd.f32 %v2624_v15, %v2591_v20 }
0x1141   :  { %v2661_v46 = vsel %vm274_vm0, %v2657_v18, 0.0  ;;  %v2662_v24 = vsel %vm274_vm0, %v2658_v35, 0.0  ;;  %v2631_v60 = vadd.f32 %v2625_v41, %v7246_v47  ;;  %v2712_v35 = vperm.slane %v7763_v56, 2 }
0x1142   :  { %v2663_v19 = vadd.f32 %v2662_v24, %v2661_v46 }
0x1143   :  { %v2642_v52 = vsel %vm274_vm0, %v2631_v60, 0.0 }
0x1144   :  { %v2664_v6 = vrot.slane %v2663_v19, 4 }
0x1146   :  { %v2665_v45 = vadd.f32 %v2664_v6, %v2663_v19  ;;  %v2626_v26 = vpop.f32.mrf.mxu2 }
0x1147   :  { %v2627_v7 = vadd.f32 %v2626_v26, %v2591_v20 }
0x1148   :  { %v2666_v23 = vrot.slane %v2665_v45, 2 }
0x1149   :  { %v2632_v51 = vadd.f32 %v2627_v7, %v7248_v32 }
0x114a   :  { %v2667_v39 = vadd.f32 %v2666_v23, %v2665_v45 }
0x114b   :  { %v2643_v22 = vsel %vm274_vm0, %v2632_v51, 0.0 }
0x114c   :  { %v2668_v57 = vrot.slane %v2667_v39, 1  ;;  %v2644_v29 = vadd.f32 %v2643_v22, %v2642_v52 }
0x114e   :  { %v2669_v53 = vadd.f32 %v2668_v57, %v2667_v39  ;;  %v2645_v61 = vrot.slane %v2644_v29, 4 }
0x1150   :  { %v2679_v47 = vmul.f32 %v2669_v53, %v7181_v49  ;;  %v2646_v8 = vadd.f32 %v2645_v61, %v2644_v29 }
0x1152   :  { %v2681_v13 = vadd.f32 1e-05, %v2679_v47  ;;  %v2647_v42 = vrot.slane %v2646_v8, 2 }
0x1154   :  { %6502 = vrsqrt.f32 %v2681_v13  ;;  %v2648_v32 = vadd.f32 %v2647_v42, %v2646_v8  ;;  %vm2689_vm13 = vweird.f32 %v2681_v13 }
0x1156   :  { %v2649_v2 = vrot.slane %v2648_v32, 1 }
0x1158   :  { %v2650_v28 = vadd.f32 %v2649_v2, %v2648_v32 }
0x115a   :  { %v6503_v20 = vpop.eup %6502  ;;  %v2652_v14 = vmul.f32 %v2650_v28, %v7181_v49 }
0x115b   :  { %v2684_v50 = vmul.f32 %v6503_v20, %v2681_v13  ;;  %vm2690_vm12 = vweird.f32 %v6503_v20 }
0x115c   :  { %v2655_v4 = vsub.f32 %v2631_v60, %v2652_v14  ;;  %v2656_v0 = vsub.f32 %v2632_v51, %v2652_v14  ;;  %vm2691_vm14 = vmor %vm2689_vm13, %vm2690_vm12  ;;  %v5921_v51 = vld [vmem:[%s8731_s5 + $0x58] sm:$0xff]  ;;  %v5918_v14 = vld [vmem:[%s8731_s5 + $0x40] sm:$0xff] }
0x115d   :  { %v2685_v38 = vmul.f32 %v6503_v20, %v2684_v50  ;;  %2800 = vmatpush.bf16.msra.mxu1 %v5921_v51 }
0x115e   :  { %v2659_v1 = vmul.f32 %v2655_v4, %v2655_v4  ;;  %v2660_v16 = vmul.f32 %v2656_v0, %v2656_v0 }
0x115f   :  { %v2686_v58 = vmul.f32 0.5, %v2685_v38 }
0x1160   :  { %v2670_v21 = vsel %vm274_vm0, %v2659_v1, 0.0  ;;  %v2671_v3 = vsel %vm274_vm0, %v2660_v16, 0.0 }
0x1161   :  { %v2687_v55 = vsub.f32 1.5, %v2686_v58  ;;  %v2672_v31 = vadd.f32 %v2671_v3, %v2670_v21  ;;  %v5923_v3 = vld [vmem:[%s8728_s2 + $0x38] sm:$0xff] }
0x1162   :  { %2869 = vmatpush.bf16.msrb.mxu0 %v5923_v3 }
0x1163   :  { %v2688_v30 = vmul.f32 %v6503_v20, %v2687_v55  ;;  %v2673_v54 = vrot.slane %v2672_v31, 4 }
0x1165   :  { %v2692_v15 = vsel %vm2691_vm14, %v6503_v20, %v2688_v30  ;;  %v2674_v18 = vadd.f32 %v2673_v54, %v2672_v31  ;;  %v5919_v20 = vld [vmem:[%s8731_s5 + $0x48] sm:$0xff] }
0x1166   :  { %v2703_v46 = vmul.f32 %v2692_v15, %v2653_v43  ;;  %v2704_v24 = vmul.f32 %v2692_v15, %v2654_v63  ;;  %v5920_v43 = vld [vmem:[%s8731_s5 + $0x50] sm:$0xff] }
0x1167   :  { %v2675_v19 = vrot.slane %v2674_v18, 2  ;;  %2801 = vmatpush.bf16.msra.mxu1 %v5920_v43 }
0x1168   :  { %v2708_v41 = vmul.f32 %v2707_v48, %v2703_v46  ;;  %v2709_v6 = vmul.f32 %v2707_v48, %v2704_v24  ;;  %v2765_v24 = vperm.slane %v7763_v56, 3 }
0x1169   :  { %v2676_v45 = vadd.f32 %v2675_v19, %v2674_v18 }
0x116a   :  { %v2713_v26 = vadd.f32 %v2712_v35, %v2708_v41  ;;  %v2714_v36 = vadd.f32 %v2712_v35, %v2709_v6 }
0x116b   :  { %v2677_v60 = vrot.slane %v2676_v45, 1  ;;  %2802 = vmatpush.bf16.msra.mxu1 %v5919_v20 }
0x116c   :  { %v2717_v7 = vpack.c.bf16 %v2714_v36, %v2713_v26 }
0x116d   :  { %v2678_v23 = vadd.f32 %v2677_v60, %v2676_v45 }
0x116e   :  { %5626 = vmatmul.msk.bf16.vlgmr.msra.gmra.mxu3 %vm274_vm0, %v2717_v7 }
0x116f   :  { %v2680_v39 = vmul.f32 %v2678_v23, %v7181_v49  ;;  %2803 = vmatpush.bf16.msra.mxu1 %v5918_v14 }
0x1171   :  { %v2682_v63 = vadd.f32 1e-05, %v2680_v39 }
0x1173   :  { %6504 = vrsqrt.f32 %v2682_v63  ;;  %vm2699_vm2 = vweird.f32 %v2682_v63 }
0x1179   :  { %v6505_v12 = vpop.eup %6504 }
0x117a   :  { %v2694_v52 = vmul.f32 %v6505_v12, %v2682_v63  ;;  %vm2700_vm15 = vweird.f32 %v6505_v12 }
0x117b   :  { %vm2701_vm3 = vmor %vm2699_vm2, %vm2700_vm15 }
0x117c   :  { %v2695_v22 = vmul.f32 %v6505_v12, %v2694_v52 }
0x117e   :  { %v2696_v57 = vmul.f32 0.5, %v2695_v22 }
0x1180   :  { %v2697_v29 = vsub.f32 1.5, %v2696_v57 }
0x1182   :  { %v2698_v53 = vmul.f32 %v6505_v12, %v2697_v29 }
0x1184   :  { %v2702_v61 = vsel %vm2701_vm3, %v6505_v12, %v2698_v53 }
0x1185   :  { %v2705_v47 = vmul.f32 %v2702_v61, %v2655_v4  ;;  %v2706_v8 = vmul.f32 %v2702_v61, %v2656_v0  ;;  %v6326_v4 = vld [vmem:[%s8733_s7 + $0x2] ss:$0 sm:$0xff] }
0x1187   :  { %v2711_v13 = vmul.f32 %v2707_v48, %v2706_v8  ;;  %v2710_v42 = vmul.f32 %v2707_v48, %v2705_v47 }
0x1189   :  { %v2715_v32 = vadd.f32 %v2712_v35, %v2710_v42  ;;  %v2716_v2 = vadd.f32 %v2712_v35, %v2711_v13  ;;  %v5922_v35 = vld [vmem:[%s8728_s2 + $0x30] sm:$0xff] }
0x118a   :  { %2870 = vmatpush.bf16.msrb.mxu0 %v5922_v35 }
0x118b   :  { %v2718_v28 = vpack.c.bf16 %v2716_v2, %v2715_v32 }
0x118d   :  { %5627 = vmatmul.msk.bf16.gmra.mxu3 %vm274_vm0, %v2718_v28 }
0x11f1   :  { %v2749_v50 = vpop.f32.mrf.mxu3 }
0x11f2   :  { %v2750_v0 = vadd.f32 %v6326_v4, %v2749_v50 }
0x11f4   :  { %v2759_v16 = vmax.f32 %v2750_v0, 0.0 }
0x11f9   :  { %v2751_v38 = vpop.f32.mrf.mxu3 }
0x11fa   :  { %v2752_v1 = vadd.f32 %v6326_v4, %v2751_v38 }
0x11fc   :  { %v2760_v58 = vmax.f32 %v2752_v1, 0.0 }
0x11fe   :  { %v2763_v21 = vpack.c.bf16 %v2760_v58, %v2759_v16 }
0x1200   :  { %5644 = vmatmul.msk.bf16.vlgmr.msra.gmra.mxu1 %vm519_vm6, %v2763_v21 }
0x1210   :  { %v2754_v55 = vpop.f32.mrf.mxu3 }
0x1211   :  { %v2755_v31 = vadd.f32 %v6326_v4, %v2754_v55 }
0x1213   :  { %v2761_v48 = vmax.f32 %v2755_v31, 0.0 }
0x1218   :  { %v2756_v30 = vpop.f32.mrf.mxu3 }
0x1219   :  { %v2757_v54 = vadd.f32 %v6326_v4, %v2756_v30 }
0x121b   :  { %v2762_v15 = vmax.f32 %v2757_v54, 0.0 }
0x121d   :  { %v2764_v18 = vpack.c.bf16 %v2762_v15, %v2761_v48 }
0x121f   :  { %5645 = vmatmul.msk.bf16.gmra.mxu1 %vm519_vm6, %v2764_v18 }
0x127d   :  { %v2805_v46 = vpop.f32.mrf.mxu1 }
0x127e   :  { %v7816_v41 = vadd.f32 %v2805_v46, %v2765_v24 }
0x1285   :  { %v2807_v19 = vpop.f32.mrf.mxu1 }
0x1286   :  { %v7818_v6 = vadd.f32 %v2807_v19, %v2765_v24 }
0x1288   :  { %v2843_v45 = vpack.c.bf16 %v7818_v6, %v7816_v41 }
0x128a   :  { %5675 = vmatmul.msk.bf16.vlgmr.msrb.gmra.mxu0 %vm274_vm0, %v2843_v45 }
0x129c   :  { %v2810_v26 = vpop.f32.mrf.mxu1 }
0x129d   :  { %v7823_v60 = vadd.f32 %v2810_v26, %v2765_v24 }
0x12a4   :  { %v2812_v36 = vpop.f32.mrf.mxu1 }
0x12a5   :  { %v7825_v7 = vadd.f32 %v2812_v36, %v2765_v24 }
0x12a7   :  { %v2844_v23 = vpack.c.bf16 %v7825_v7, %v7823_v60 }
0x12a9   :  { %5676 = vmatmul.msk.bf16.gmra.mxu0 %vm274_vm0, %v2844_v23 }
0x1307   :  { %v2872_v56 = vpop.f32.mrf.mxu0 }
0x1308   :  { %v2922_v42 = vpack.c.bf16 %v2872_v56, %v2872_v56 }
0x130a   :  { %v2946_v2 = vunpack.c.l.b16 %v2922_v42 }
0x130f   :  { %v2874_v51 = vpop.f32.mrf.mxu0 }
0x1310   :  { %v6149_v39 = vpack.i.bf16 %v2874_v51, %v2872_v56  ;;  %v2923_v8 = vpack.c.bf16 %v2874_v51, %v2874_v51 }
0x1312   :  { %6150 = vrot.lane.b32.xlu0 %v6149_v39, %s6766_s21  ;;  %6145 = vrot.lane.b32.xlu2 %v6149_v39, %s6768_s23  ;;  %v2947_v32 = vunpack.c.l.b16 %v2923_v8 }
0x1313   :  { %6140 = vrot.lane.b32.xlu1 %v6149_v39, %s6767_s22 }
0x1314   :  { %v7840_v20 = vpack.c.b16 %v2947_v32, %v2946_v2 }
0x1326   :  { %v2877_v43 = vpop.f32.mrf.mxu0 }
0x1327   :  { %v2930_v14 = vpack.c.bf16 %v2877_v43, %v2877_v43 }
0x1329   :  { %v3027_v4 = vunpack.c.l.b16 %v2930_v14 }
0x132e   :  { %v2879_v63 = vpop.f32.mrf.mxu0 }
0x132f   :  { %v6164_v12 = vpack.i.bf16 %v2879_v63, %v2877_v43  ;;  %v2931_v28 = vpack.c.bf16 %v2879_v63, %v2879_v63 }
0x1331   :  { %6165 = vrot.lane.b32.xlu0 %v6164_v12, %s6766_s21  ;;  %6160 = vrot.lane.b32.xlu2 %v6164_v12, %s6768_s23  ;;  %v3028_v50 = vunpack.c.l.b16 %v2931_v28 }
0x1332   :  { %6155 = vrot.lane.b32.xlu1 %v6164_v12, %s6767_s22 }
0x1333   :  { %v7844_v0 = vpack.c.b16 %v3028_v50, %v3027_v4 }
0x136c   :  { %v6146_v52 = vpop.permute.xlu2 %6145 }
0x136d   :  { %v6148_v22 = vunpack.i.h.bf16 %v6146_v52  ;;  %v6147_v57 = vunpack.i.l.bf16 %v6146_v52 }
0x136f   :  { %v2927_v29 = vpack.c.bf16 %v6148_v22, %v6148_v22  ;;  %v2926_v53 = vpack.c.bf16 %v6147_v57, %v6147_v57 }
0x1371   :  { %v2951_v61 = vunpack.c.l.b16 %v2927_v29  ;;  %v2950_v47 = vunpack.c.l.b16 %v2926_v53 }
0x1373   :  { %v7836_v13 = vpack.c.b16 %v2951_v61, %v2950_v47 }
0x1375   :  { %2962 = vrot.lane.b32.xlu2 %v7836_v13, %s6769_s24 }
0x137d   :  { %2958 = vrot.lane.b32.xlu2 %v7840_v20, %s6769_s24 }
0x1384   :  { %v6151_v38 = vpop.permute.xlu0 %6150 }
0x1385   :  { %v6153_v1 = vunpack.i.h.bf16 %v6151_v38  ;;  %v6152_v16 = vunpack.i.l.bf16 %v6151_v38  ;;  %v6141_v58 = vpop.permute.xlu1 %6140  ;;  %3039 = vrot.lane.b32.xlu2 %v7844_v0, %s6769_s24 }
0x1386   :  { %v6143_v21 = vunpack.i.h.bf16 %v6141_v58  ;;  %v6142_v3 = vunpack.i.l.bf16 %v6141_v58 }
0x1387   :  { %v2925_v55 = vpack.c.bf16 %v6153_v1, %v6153_v1  ;;  %v2924_v31 = vpack.c.bf16 %v6152_v16, %v6152_v16 }
0x1388   :  { %v2929_v30 = vpack.c.bf16 %v6143_v21, %v6143_v21  ;;  %v2928_v54 = vpack.c.bf16 %v6142_v3, %v6142_v3 }
0x1389   :  { %v2949_v48 = vunpack.c.l.b16 %v2925_v55  ;;  %v2948_v15 = vunpack.c.l.b16 %v2924_v31 }
0x138a   :  { %v2953_v18 = vunpack.c.l.b16 %v2929_v30  ;;  %v2952_v35 = vunpack.c.l.b16 %v2928_v54 }
0x138b   :  { %v7848_v46 = vpack.c.b16 %v2949_v48, %v2948_v15  ;;  %v6161_v24 = vpop.permute.xlu2 %6160 }
0x138c   :  { %v7850_v19 = vpack.c.b16 %v2953_v18, %v2952_v35  ;;  %v6163_v45 = vunpack.i.h.bf16 %v6161_v24  ;;  %v6162_v26 = vunpack.i.l.bf16 %v6161_v24 }
0x138d   :  { %2960 = vrot.lane.b32.xlu0 %v7848_v46, %s6769_s24  ;;  %3316 = vrot.lane.b32.xlu2 %v7836_v13, %s6764_s17 }
0x138e   :  { %v2935_v36 = vpack.c.bf16 %v6163_v45, %v6163_v45  ;;  %v2934_v23 = vpack.c.bf16 %v6162_v26, %v6162_v26  ;;  %2964 = vrot.lane.b32.xlu1 %v7850_v19, %s6769_s24 }
0x1390   :  { %v3032_v56 = vunpack.c.l.b16 %v2935_v36  ;;  %v3031_v51 = vunpack.c.l.b16 %v2934_v23 }
0x1392   :  { %v7858_v39 = vpack.c.b16 %v3032_v56, %v3031_v51 }
0x1395   :  { %3043 = vrot.lane.b32.xlu0 %v7858_v39, %s6769_s24  ;;  %3312 = vrot.lane.b32.xlu2 %v7840_v20, %s6764_s17 }
0x139d   :  { %3314 = vrot.lane.b32.xlu0 %v7848_v46, %s6764_s17 }
0x13a3   :  { %v6166_v43 = vpop.permute.xlu0 %6165 }
0x13a4   :  { %v6156_v63 = vpop.permute.xlu1 %6155  ;;  %v6168_v22 = vunpack.i.h.bf16 %v6166_v43  ;;  %v6167_v57 = vunpack.i.l.bf16 %v6166_v43 }
0x13a5   :  { %v6158_v12 = vunpack.i.h.bf16 %v6156_v63  ;;  %v6157_v52 = vunpack.i.l.bf16 %v6156_v63 }
0x13a6   :  { %v2933_v8 = vpack.c.bf16 %v6168_v22, %v6168_v22  ;;  %v2932_v42 = vpack.c.bf16 %v6167_v57, %v6167_v57 }
0x13a7   :  { %v2937_v29 = vpack.c.bf16 %v6158_v12, %v6158_v12  ;;  %v2936_v53 = vpack.c.bf16 %v6157_v52, %v6157_v52 }
0x13a8   :  { %v3030_v2 = vunpack.c.l.b16 %v2933_v8  ;;  %v3029_v28 = vunpack.c.l.b16 %v2932_v42 }
0x13a9   :  { %v3034_v61 = vunpack.c.l.b16 %v2937_v29  ;;  %v3033_v47 = vunpack.c.l.b16 %v2936_v53 }
0x13aa   :  { %v7868_v14 = vpack.c.b16 %v3030_v2, %v3029_v28 }
0x13ab   :  { %v3038_v32 = vpack.c.b16 %v3034_v61, %v3033_v47 }
0x13ad   :  { %3391 = vrot.lane.b32.xlu0 %v3038_v32, %s6764_s17  ;;  %3045 = vrot.lane.b32.xlu1 %v3038_v32, %s6769_s24 }
0x13b5   :  { %3041 = vrot.lane.b32.xlu1 %v7868_v14, %s6769_s24 }
0x13bd   :  { %3318 = vrot.lane.b32.xlu1 %v7850_v19, %s6764_s17 }
0x13cf   :  { %v2963_v1 = vpop.permute.xlu2 %2962 }
0x13d0   :  { %v2985_v16 = vsel %vm384_vm1, %v2963_v1, 0 }
0x13d7   :  { %v2959_v3 = vpop.permute.xlu2 %2958 }
0x13d8   :  { %v2979_v31 = vsel %vm384_vm1, %v2959_v3, 0 }
0x13df   :  { %v3040_v15 = vpop.permute.xlu2 %3039 }
0x13e0   :  { %v3060_v36 = vsel %vm384_vm1, %v3040_v15, 0 }
0x13e7   :  { %v3317_v26 = vpop.permute.xlu2 %3316 }
0x13ff   :  { %v2961_v38 = vpop.permute.xlu0 %2960 }
0x1400   :  { %v2965_v50 = vpop.permute.xlu1 %2964  ;;  %v2982_v21 = vsel %vm384_vm1, %v2961_v38, 0 }
0x1401   :  { %v2988_v4 = vsel %vm384_vm1, %v2965_v50, 0 }
0x1402   :  { %2994 = vmatpush.bf16.xpose.msra.mxu2 %v2988_v4 }
0x1407   :  { %v3044_v58 = vpop.permute.xlu0 %3043 }
0x1408   :  { %v3066_v35 = vsel %vm384_vm1, %v3044_v58, 0 }
0x140a   :  { %2995 = vmatpush.bf16.xpose.msra.mxu2 %v2985_v16 }
0x140f   :  { %v3315_v55 = vpop.permute.xlu0 %3314 }
0x1412   :  { %2996 = vmatpush.bf16.xpose.msra.mxu2 %v2982_v21 }
0x141a   :  { %2997 = vmatpush.bf16.xpose.msra.mxu2 %v2979_v31 }
0x141f   :  { %v3392_v30 = vpop.permute.xlu0 %3391  ;;  %v3046_v54 = vpop.permute.xlu1 %3045 }
0x1420   :  { %v3069_v48 = vsel %vm384_vm1, %v3046_v54, 0  ;;  %3413 = vmatpush.bf16.msra.mxu0 %v3392_v30 }
0x1421   :  { %3075 = vmatpush.bf16.xpose.msrb.mxu3 %v3069_v48  ;;  %5677 = vmatmul.msk.bf16.vlgmr.msra.gmra.mxu2 %vm384_vm1, %v7840_v20  ;;  %v3313_v20 = vpop.permute.xlu2 %3312 }
0x1427   :  { %v3042_v18 = vpop.permute.xlu1 %3041 }
0x1428   :  { %v3063_v45 = vsel %vm384_vm1, %v3042_v18, 0 }
0x1429   :  { %3076 = vmatpush.bf16.xpose.msrb.mxu3 %v3066_v35 }
0x142f   :  { %v3319_v24 = vpop.permute.xlu1 %3318 }
0x1430   :  { %3340 = vmatpush.bf16.msrb.mxu1 %v3319_v24 }
0x1431   :  { %3077 = vmatpush.bf16.xpose.msrb.mxu3 %v3063_v45  ;;  %5678 = vmatmul.msk.bf16.gmra.mxu2 %vm384_vm1, %v7848_v46 }
0x1434   :  { %3341 = vmatpush.bf16.msrb.mxu1 %v3317_v26 }
0x1438   :  { %3342 = vmatpush.bf16.msrb.mxu1 %v3315_v55 }
0x1439   :  { %3078 = vmatpush.bf16.xpose.msrb.mxu3 %v3060_v36 }
0x143c   :  { %3343 = vmatpush.bf16.msrb.mxu1 %v3313_v20 }
0x1440   :  { %5681 = vmatmul.msk.bf16.vlgmr.msrb.gmra.mxu3 %vm384_vm1, %v7844_v0 }
0x1441   :  { %5679 = vmatmul.msk.bf16.gmra.mxu2 %vm384_vm1, %v7836_v13 }
0x1450   :  { %5682 = vmatmul.msk.bf16.gmra.mxu3 %vm384_vm1, %v7868_v14 }
0x1451   :  { %5680 = vmatmul.msk.bf16.gmra.mxu2 %vm384_vm1, %v7850_v19 }
0x1460   :  { %5683 = vmatmul.msk.bf16.gmra.mxu3 %vm384_vm1, %v7858_v39 }
0x1470   :  { %5684 = vmatmul.msk.bf16.gmra.mxu3 %vm384_vm1, %v3038_v32 }
0x14a4   :  { %v2999_v46 = vpop.f32.mrf.mxu2 }
0x14a5   :  { %v3000_v23 = vadd.f32 %v2999_v46, %v6941_v37 }
0x14a7   :  { %v3100_v56 = vsel %vm519_vm6, %v3000_v23, -inf }
0x14a8   :  { %3101 = vmax.xlane.f32.xlu0 %v3100_v56 }
0x14ac   :  { %v3001_v51 = vpop.f32.mrf.mxu2 }
0x14ad   :  { %v7900_v13 = vadd.f32 %v3001_v51, %v6941_v37 }
0x14af   :  { %v3103_v43 = vsel %vm519_vm6, %v7900_v13, -inf }
0x14b0   :  { %3104 = vmax.xlane.f32.xlu1 %v3103_v43 }
0x14b4   :  { %v3004_v19 = vpop.f32.mrf.mxu2 }
0x14b5   :  { %v7905_v63 = vadd.f32 %v3004_v19, %v6954_v44 }
0x14b7   :  { %v3106_v12 = vsel %vm519_vm6, %v7905_v63, -inf }
0x14b8   :  { %3107 = vmax.xlane.f32.xlu2 %v3106_v12 }
0x14bc   :  { %v3006_v52 = vpop.f32.mrf.mxu2 }
0x14bd   :  { %v7910_v22 = vadd.f32 %v3006_v52, %v6954_v44 }
0x14bf   :  { %v3109_v57 = vsel %vm519_vm6, %v7910_v22, -inf }
0x14c0   :  { %3110 = vmax.xlane.f32.xlu0 %v3109_v57 }
0x14c3   :  { %v3080_v29 = vpop.f32.mrf.mxu3 }
0x14c4   :  { %v7915_v53 = vadd.f32 %v3080_v29, %v6941_v37  ;;  %v3009_v61 = vpop.f32.mrf.mxu2 }
0x14c5   :  { %v7918_v47 = vadd.f32 %v3009_v61, %v6977_v59 }
0x14c6   :  { %v3124_v8 = vsel %vm519_vm6, %v7915_v53, -inf }
0x14c7   :  { %3125 = vmax.xlane.f32.xlu1 %v3124_v8  ;;  %v3112_v42 = vsel %vm519_vm6, %v7918_v47, -inf }
0x14c8   :  { %3113 = vmax.xlane.f32.xlu0 %v3112_v42 }
0x14cb   :  { %v3082_v32 = vpop.f32.mrf.mxu3 }
0x14cc   :  { %v7925_v2 = vadd.f32 %v3082_v32, %v6941_v37  ;;  %v3011_v28 = vpop.f32.mrf.mxu2 }
0x14cd   :  { %v7928_v50 = vadd.f32 %v3011_v28, %v6977_v59 }
0x14ce   :  { %v3127_v4 = vsel %vm519_vm6, %v7925_v2, -inf }
0x14cf   :  { %3128 = vmax.xlane.f32.xlu2 %v3127_v4  ;;  %v3115_v38 = vsel %vm519_vm6, %v7928_v50, -inf }
0x14d0   :  { %3116 = vmax.xlane.f32.xlu1 %v3115_v38 }
0x14d3   :  { %v3085_v1 = vpop.f32.mrf.mxu3 }
0x14d4   :  { %v7935_v16 = vadd.f32 %v3085_v1, %v6954_v44  ;;  %v3014_v58 = vpop.f32.mrf.mxu2 }
0x14d5   :  { %v7938_v21 = vadd.f32 %v3014_v58, %v7000_v10 }
0x14d6   :  { %v3130_v3 = vsel %vm519_vm6, %v7935_v16, -inf }
0x14d7   :  { %3131 = vmax.xlane.f32.xlu2 %v3130_v3  ;;  %v3118_v55 = vsel %vm519_vm6, %v7938_v21, -inf }
0x14d8   :  { %3119 = vmax.xlane.f32.xlu1 %v3118_v55 }
0x14db   :  { %v3087_v31 = vpop.f32.mrf.mxu3 }
0x14dc   :  { %v7945_v30 = vadd.f32 %v3087_v31, %v6954_v44  ;;  %v3016_v54 = vpop.f32.mrf.mxu2 }
0x14dd   :  { %v7948_v48 = vadd.f32 %v3016_v54, %v7000_v10 }
0x14de   :  { %v3133_v15 = vsel %vm519_vm6, %v7945_v30, -inf }
0x14df   :  { %3134 = vmax.xlane.f32.xlu0 %v3133_v15  ;;  %v3121_v18 = vsel %vm519_vm6, %v7948_v48, -inf }
0x14e0   :  { %3122 = vmax.xlane.f32.xlu2 %v3121_v18 }
0x14e3   :  { %v3090_v35 = vpop.f32.mrf.mxu3 }
0x14e4   :  { %v7955_v24 = vadd.f32 %v3090_v35, %v6977_v59 }
0x14e6   :  { %v3136_v45 = vsel %vm519_vm6, %v7955_v24, -inf }
0x14e7   :  { %3137 = vmax.xlane.f32.xlu0 %v3136_v45 }
0x14eb   :  { %v3092_v26 = vpop.f32.mrf.mxu3 }
0x14ec   :  { %v7960_v36 = vadd.f32 %v3092_v26, %v6977_v59 }
0x14ee   :  { %v3139_v20 = vsel %vm519_vm6, %v7960_v36, -inf }
0x14ef   :  { %3140 = vmax.xlane.f32.xlu1 %v3139_v20 }
0x14f3   :  { %v3095_v46 = vpop.f32.mrf.mxu3 }
0x14f4   :  { %v7965_v56 = vadd.f32 %v3095_v46, %v7000_v10 }
0x14f6   :  { %v3142_v51 = vsel %vm519_vm6, %v7965_v56, -inf }
0x14f7   :  { %3143 = vmax.xlane.f32.xlu0 %v3142_v51 }
0x14fb   :  { %v3097_v42 = vpop.f32.mrf.mxu3 }
0x1508   :  { %3389 = vrot.lane.b32.xlu1 %v7858_v39, %s6764_s17  ;;  %v7978_v39 = vadd.f32 %v3097_v42, %v7000_v10 }
0x150a   :  { %v3145_v38 = vsel %vm519_vm6, %v7978_v39, -inf }
0x151b   :  { %v3102_v43 = vpop.xlane.xlu0 %3101 }
0x151c   :  { %v3148_v19 = vsub.f32 %v3000_v23, %v3102_v43 }
0x151e   :  { %v3164_v12 = vmul.f32 1.442695, %v3148_v19 }
0x1520   :  { %6506 = vpow2.f32 %v3164_v12 }
0x1523   :  { %v3105_v52 = vpop.xlane.xlu1 %3104 }
0x1524   :  { %v3149_v57 = vsub.f32 %v7900_v13, %v3105_v52 }
0x1526   :  { %v7972_v29 = vpop.eup %6506  ;;  %v3166_v61 = vmul.f32 1.442695, %v3149_v57 }
0x1527   :  { %v3196_v8 = vsel %vm519_vm6, %v7972_v29, 0.0 }
0x1528   :  { %6508 = vpow2.f32 %v3166_v61  ;;  %3197 = vadd.xlane.f32.xlu2 %v3196_v8 }
0x152b   :  { %v3108_v32 = vpop.xlane.xlu2 %3107 }
0x152c   :  { %v3150_v28 = vsub.f32 %v7905_v63, %v3108_v32 }
0x152e   :  { %v7980_v23 = vpop.eup %6508  ;;  %v3168_v4 = vmul.f32 1.442695, %v3150_v28 }
0x152f   :  { %v3199_v13 = vsel %vm519_vm6, %v7980_v23, 0.0 }
0x1530   :  { %6510 = vpow2.f32 %v3168_v4  ;;  %3200 = vadd.xlane.f32.xlu0 %v3199_v13 }
0x1532   :  { %3146 = vmax.xlane.f32.xlu1 %v3145_v38 }
0x1533   :  { %v3111_v1 = vpop.xlane.xlu0 %3110 }
0x1534   :  { %v3151_v58 = vsub.f32 %v7910_v22, %v3111_v1 }
0x1536   :  { %v7987_v3 = vpop.eup %6510  ;;  %v3170_v63 = vmul.f32 1.442695, %v3151_v58 }
0x1537   :  { %v3202_v55 = vsel %vm519_vm6, %v7987_v3, 0.0 }
0x1538   :  { %6512 = vpow2.f32 %v3170_v63  ;;  %3203 = vadd.xlane.f32.xlu2 %v3202_v55 }
0x153a   :  { %v3126_v31 = vpop.xlane.xlu1 %3125 }
0x153b   :  { %v3156_v54 = vsub.f32 %v7915_v53, %v3126_v31  ;;  %v3114_v15 = vpop.xlane.xlu0 %3113 }
0x153c   :  { %v3152_v35 = vsub.f32 %v7918_v47, %v3114_v15 }
0x153d   :  { %v3180_v18 = vmul.f32 1.442695, %v3156_v54 }
0x153e   :  { %v7993_v45 = vpop.eup %6512  ;;  %v3172_v26 = vmul.f32 1.442695, %v3152_v35 }
0x153f   :  { %6514 = vpow2.f32 %v3180_v18  ;;  %v3205_v22 = vsel %vm519_vm6, %v7993_v45, 0.0 }
0x1540   :  { %3206 = vadd.xlane.f32.xlu0 %v3205_v22  ;;  %6516 = vpow2.f32 %v3172_v26 }
0x1542   :  { %v3129_v20 = vpop.xlane.xlu2 %3128 }
0x1543   :  { %v3157_v46 = vsub.f32 %v7925_v2, %v3129_v20  ;;  %v3117_v13 = vpop.xlane.xlu1 %3116 }
0x1545   :  { %v7998_v51 = vpop.eup %6514  ;;  %v3182_v43 = vmul.f32 1.442695, %v3157_v46 }
0x1546   :  { %v3220_v53 = vsel %vm519_vm6, %v7998_v51, 0.0  ;;  %v8002_v47 = vpop.eup %6516 }
0x1547   :  { %6518 = vpow2.f32 %v3182_v43  ;;  %3221 = vadd.xlane.f32.xlu1 %v3220_v53  ;;  %v3208_v12 = vsel %vm519_vm6, %v8002_v47, 0.0 }
0x154a   :  { %v3132_v15 = vpop.xlane.xlu2 %3131 }
0x154b   :  { %v3158_v35 = vsub.f32 %v7935_v16, %v3132_v15 }
0x154d   :  { %v8004_v19 = vpop.eup %6518  ;;  %v3184_v26 = vmul.f32 1.442695, %v3158_v35 }
0x154e   :  { %v3223_v52 = vsel %vm519_vm6, %v8004_v19, 0.0 }
0x154f   :  { %3209 = vadd.xlane.f32.xlu1 %v3208_v12  ;;  %3224 = vadd.xlane.f32.xlu2 %v3223_v52 }
0x1552   :  { %v3135_v2 = vpop.xlane.xlu0 %3134 }
0x1553   :  { %v3159_v57 = vsub.f32 %v7945_v30, %v3135_v2 }
0x1554   :  { %3385 = vrot.lane.b32.xlu0 %v7844_v0, %s6764_s17  ;;  %v3120_v0 = vpop.xlane.xlu1 %3119 }
0x1555   :  { %v3186_v61 = vmul.f32 1.442695, %v3159_v57  ;;  %v3154_v63 = vsub.f32 %v7938_v21, %v3120_v0  ;;  %v3123_v21 = vpop.xlane.xlu2 %3122 }
0x1556   :  { %v3155_v46 = vsub.f32 %v7948_v48, %v3123_v21 }
0x1557   :  { %6520 = vpow2.f32 %v3186_v61  ;;  %v3176_v55 = vmul.f32 1.442695, %v3154_v63 }
0x1558   :  { %v3178_v43 = vmul.f32 1.442695, %v3155_v46 }
0x155a   :  { %v3138_v8 = vpop.xlane.xlu0 %3137 }
0x155b   :  { %v3160_v42 = vsub.f32 %v7955_v24, %v3138_v8  ;;  %v3153_v24 = vsub.f32 %v7928_v50, %v3117_v13 }
0x155d   :  { %v8014_v32 = vpop.eup %6520  ;;  %v3188_v28 = vmul.f32 1.442695, %v3160_v42  ;;  %v3174_v1 = vmul.f32 1.442695, %v3153_v24 }
0x155e   :  { %v3229_v4 = vsel %vm519_vm6, %v8014_v32, 0.0 }
0x155f   :  { %6522 = vpow2.f32 %v3188_v28  ;;  %3230 = vadd.xlane.f32.xlu1 %v3229_v4 }
0x1560   :  { %6524 = vpow2.f32 %v3174_v1 }
0x1561   :  { %6526 = vpow2.f32 %v3176_v55 }
0x1562   :  { %v3141_v58 = vpop.xlane.xlu1 %3140 }
0x1563   :  { %v3161_v18 = vsub.f32 %v7960_v36, %v3141_v58 }
0x1565   :  { %v8018_v38 = vpop.eup %6522  ;;  %v3190_v50 = vmul.f32 1.442695, %v3161_v18 }
0x1566   :  { %v3232_v30 = vsel %vm519_vm6, %v8018_v38, 0.0  ;;  %v8026_v31 = vpop.eup %6524 }
0x1567   :  { %3233 = vadd.xlane.f32.xlu1 %v3232_v30  ;;  %3387 = vrot.lane.b32.xlu2 %v7868_v14, %s6764_s17  ;;  %v3211_v14 = vsel %vm519_vm6, %v8026_v31, 0.0  ;;  %v8032_v22 = vpop.eup %6526  ;;  %6528 = vpow2.f32 %v3190_v50 }
0x1568   :  { %v3214_v20 = vsel %vm519_vm6, %v8032_v22, 0.0  ;;  %6530 = vpow2.f32 %v3184_v26 }
0x1569   :  { %6532 = vpow2.f32 %v3178_v43 }
0x156a   :  { %v3144_v53 = vpop.xlane.xlu0 %3143 }
0x156b   :  { %v3162_v52 = vsub.f32 %v7965_v56, %v3144_v53 }
0x156d   :  { %v8037_v36 = vpop.eup %6528  ;;  %v3192_v57 = vmul.f32 1.442695, %v3162_v52 }
0x156e   :  { %v8039_v12 = vpop.eup %6530  ;;  %v3235_v16 = vsel %vm519_vm6, %v8037_v36, 0.0 }
0x156f   :  { %v3226_v2 = vsel %vm519_vm6, %v8039_v12, 0.0  ;;  %v8046_v48 = vpop.eup %6532  ;;  %6534 = vpow2.f32 %v3192_v57 }
0x1570   :  { %v3217_v61 = vsel %vm519_vm6, %v8046_v48, 0.0 }
0x1575   :  { %v8050_v42 = vpop.eup %6534 }
0x1576   :  { %v3238_v56 = vsel %vm519_vm6, %v8050_v42, 0.0 }
0x157a   :  { %v3390_v54 = vpop.permute.xlu1 %3389 }
0x157b   :  { %3414 = vmatpush.bf16.msra.mxu0 %v3390_v54 }
0x157e   :  { %3212 = vadd.xlane.f32.xlu0 %v3211_v14 }
0x1586   :  { %3215 = vadd.xlane.f32.xlu0 %v3214_v20 }
0x158e   :  { %3236 = vadd.xlane.f32.xlu0 %v3235_v16 }
0x1590   :  { %3227 = vadd.xlane.f32.xlu2 %v3226_v2 }
0x1598   :  { %3218 = vadd.xlane.f32.xlu2 %v3217_v61 }
0x159b   :  { %v3198_v8 = vpop.xlane.xlu2 %3197 }
0x159c   :  { %6536 = vrcp.f32 %v3198_v8 }
0x15a0   :  { %3239 = vadd.xlane.f32.xlu2 %v3238_v56 }
0x15a2   :  { %v6537_v4 = vpop.eup %6536 }
0x15a3   :  { %v3201_v28 = vpop.xlane.xlu0 %3200  ;;  %v3260_v0 = vmul.f32 %v6537_v4, %v7972_v29 }
0x15a4   :  { %6538 = vrcp.f32 %v3201_v28 }
0x15a5   :  { %v3147_v13 = vpop.xlane.xlu1 %3146  ;;  %v3276_v58 = vpack.c.bf16 %v3260_v0, %v3260_v0 }
0x15a6   :  { %v3163_v30 = vsub.f32 %v7978_v39, %v3147_v13 }
0x15a7   :  { %v3300_v15 = vunpack.c.l.b16 %v3276_v58 }
0x15a8   :  { %v3194_v24 = vmul.f32 1.442695, %v3163_v30 }
0x15aa   :  { %v6539_v1 = vpop.eup %6538  ;;  %6540 = vpow2.f32 %v3194_v24 }
0x15ab   :  { %v3261_v63 = vmul.f32 %v6539_v1, %v7980_v23  ;;  %v3204_v55 = vpop.xlane.xlu2 %3203 }
0x15ac   :  { %6542 = vrcp.f32 %v3204_v55 }
0x15ad   :  { %v3277_v54 = vpack.c.bf16 %v3261_v63, %v3261_v63 }
0x15af   :  { %v3301_v18 = vunpack.c.l.b16 %v3277_v54 }
0x15b0   :  { %v8057_v14 = vpop.eup %6540 }
0x15b1   :  { %v3308_v35 = vpack.c.b16 %v3301_v18, %v3300_v15  ;;  %v3241_v50 = vsel %vm519_vm6, %v8057_v14, 0.0 }
0x15b2   :  { %3242 = vadd.xlane.f32.xlu1 %v3241_v50  ;;  %v6543_v29 = vpop.eup %6542 }
0x15b3   :  { %v3207_v39 = vpop.xlane.xlu0 %3206  ;;  %5685 = vmatmul.msk.bf16.vlgmr.msrb.gmra.mxu1 %vm519_vm6, %v3308_v35  ;;  %v3262_v26 = vmul.f32 %v6543_v29, %v7987_v3 }
0x15b4   :  { %6544 = vrcp.f32 %v3207_v39 }
0x15b5   :  { %v3278_v21 = vpack.c.bf16 %v3262_v26, %v3262_v26 }
0x15b7   :  { %v3302_v53 = vunpack.c.l.b16 %v3278_v21 }
0x15ba   :  { %v6545_v23 = vpop.eup %6544  ;;  %v3222_v46 = vpop.xlane.xlu1 %3221 }
0x15bb   :  { %v3263_v20 = vmul.f32 %v6545_v23, %v7993_v45  ;;  %6546 = vrcp.f32 %v3222_v46 }
0x15bd   :  { %v3279_v43 = vpack.c.bf16 %v3263_v20, %v3263_v20 }
0x15bf   :  { %v3303_v16 = vunpack.c.l.b16 %v3279_v43 }
0x15c1   :  { %v3309_v52 = vpack.c.b16 %v3303_v16, %v3302_v53  ;;  %v6547_v57 = vpop.eup %6546 }
0x15c2   :  { %v3225_v2 = vpop.xlane.xlu2 %3224  ;;  %v3268_v61 = vmul.f32 %v6547_v57, %v7998_v51  ;;  %v3210_v24 = vpop.xlane.xlu1 %3209 }
0x15c3   :  { %5686 = vmatmul.msk.bf16.gmra.mxu1 %vm519_vm6, %v3309_v52  ;;  %6548 = vrcp.f32 %v3225_v2 }
0x15c4   :  { %v3284_v3 = vpack.c.bf16 %v3268_v61, %v3268_v61  ;;  %6550 = vrcp.f32 %v3210_v24 }
0x15c6   :  { %v3386_v4 = vpop.permute.xlu0 %3385  ;;  %v3373_v13 = vunpack.c.l.b16 %v3284_v3 }
0x15c9   :  { %v6549_v8 = vpop.eup %6548 }
0x15ca   :  { %v3388_v56 = vpop.permute.xlu2 %3387  ;;  %v3269_v28 = vmul.f32 %v6549_v8, %v8004_v19  ;;  %v6551_v58 = vpop.eup %6550 }
0x15cb   :  { %3415 = vmatpush.bf16.msra.mxu0 %v3388_v56  ;;  %v3264_v51 = vmul.f32 %v6551_v58, %v8002_v47 }
0x15cc   :  { %v3285_v45 = vpack.c.bf16 %v3269_v28, %v3269_v28 }
0x15cd   :  { %v3280_v55 = vpack.c.bf16 %v3264_v51, %v3264_v51 }
0x15ce   :  { %v3374_v30 = vunpack.c.l.b16 %v3285_v45 }
0x15cf   :  { %3416 = vmatpush.bf16.msra.mxu0 %v3386_v4  ;;  %v3304_v18 = vunpack.c.l.b16 %v3280_v55 }
0x15d0   :  { %v3381_v0 = vpack.c.b16 %v3374_v30, %v3373_v13 }
0x15d2   :  { %5689 = vmatmul.msk.bf16.vlgmr.msra.gmra.mxu0 %vm519_vm6, %v3381_v0  ;;  %v3231_v54 = vpop.xlane.xlu1 %3230 }
0x15da   :  { %v3234_v46 = vpop.xlane.xlu1 %3233 }
0x15f1   :  { %v3213_v1 = vpop.xlane.xlu0 %3212 }
0x15f2   :  { %6552 = vrcp.f32 %v3213_v1 }
0x15f3   :  { %6554 = vrcp.f32 %v3231_v54 }
0x15f8   :  { %v6553_v63 = vpop.eup %6552 }
0x15f9   :  { %v3265_v19 = vmul.f32 %v6553_v63, %v8026_v31  ;;  %v3216_v50 = vpop.xlane.xlu0 %3215  ;;  %v6555_v26 = vpop.eup %6554 }
0x15fa   :  { %v3271_v23 = vmul.f32 %v6555_v26, %v8014_v32 }
0x15fb   :  { %v3281_v15 = vpack.c.bf16 %v3265_v19, %v3265_v19 }
0x15fc   :  { %v3287_v20 = vpack.c.bf16 %v3271_v23, %v3271_v23 }
0x15fd   :  { %v3305_v35 = vunpack.c.l.b16 %v3281_v15 }
0x15fe   :  { %v3376_v52 = vunpack.c.l.b16 %v3287_v20 }
0x15ff   :  { %v3310_v39 = vpack.c.b16 %v3305_v35, %v3304_v18 }
0x1601   :  { %5687 = vmatmul.msk.bf16.gmra.mxu1 %vm519_vm6, %v3310_v39  ;;  %v3237_v47 = vpop.xlane.xlu0 %3236 }
0x1603   :  { %v3228_v29 = vpop.xlane.xlu2 %3227 }
0x1604   :  { %6556 = vrcp.f32 %v3228_v29 }
0x1605   :  { %6558 = vrcp.f32 %v3216_v50 }
0x1606   :  { %6560 = vrcp.f32 %v3237_v47 }
0x160a   :  { %v6557_v21 = vpop.eup %6556 }
0x160b   :  { %v3270_v31 = vmul.f32 %v6557_v21, %v8039_v12  ;;  %v3219_v43 = vpop.xlane.xlu2 %3218  ;;  %v6559_v53 = vpop.eup %6558 }
0x160c   :  { %6562 = vrcp.f32 %v3219_v43  ;;  %v3266_v2 = vmul.f32 %v6559_v53, %v8032_v22  ;;  %v6561_v61 = vpop.eup %6560  ;;  %v5933_v22 = vld [vmem:[%s8728_s2 + $0x48] sm:$0xff] }
0x160d   :  { %v3286_v16 = vpack.c.bf16 %v3270_v31, %v3270_v31  ;;  %6564 = vrcp.f32 %v3234_v46  ;;  %v3273_v12 = vmul.f32 %v6561_v61, %v8037_v36  ;;  %3772 = vmatpush.bf16.msrb.mxu0 %v5933_v22 }
0x160e   :  { %v3282_v32 = vpack.c.bf16 %v3266_v2, %v3266_v2 }
0x160f   :  { %v3375_v57 = vunpack.c.l.b16 %v3286_v16  ;;  %v3289_v0 = vpack.c.bf16 %v3273_v12, %v3273_v12  ;;  %v5925_v12 = vld [vmem:[%s8729_s3 + $0x38] sm:$0xff] }
0x1610   :  { %v3306_v13 = vunpack.c.l.b16 %v3282_v32  ;;  %3525 = vmatpush.bf16.msrb.mxu2 %v5925_v12 }
0x1611   :  { %v3382_v8 = vpack.c.b16 %v3376_v52, %v3375_v57 }
0x1612   :  { %v6563_v56 = vpop.eup %6562 }
0x1613   :  { %v3267_v3 = vmul.f32 %v6563_v56, %v8046_v48  ;;  %5690 = vmatmul.msk.bf16.gmra.mxu0 %vm519_vm6, %v3382_v8  ;;  %v6565_v28 = vpop.eup %6564  ;;  %v3378_v48 = vunpack.c.l.b16 %v3289_v0  ;;  %v3240_v58 = vpop.xlane.xlu2 %3239 }
0x1614   :  { %v3272_v4 = vmul.f32 %v6565_v28, %v8018_v38  ;;  %6566 = vrcp.f32 %v3240_v58  ;;  %v5932_v38 = vld [vmem:[%s8728_s2 + $0x40] sm:$0xff] }
0x1615   :  { %v3283_v45 = vpack.c.bf16 %v3267_v3, %v3267_v3  ;;  %3773 = vmatpush.bf16.msrb.mxu0 %v5932_v38 }
0x1616   :  { %v3288_v1 = vpack.c.bf16 %v3272_v4, %v3272_v4 }
0x1617   :  { %v3307_v30 = vunpack.c.l.b16 %v3283_v45  ;;  %v5924_v45 = vld [vmem:[%s8729_s3 + $0x30] sm:$0xff] }
0x1618   :  { %v3377_v51 = vunpack.c.l.b16 %v3288_v1  ;;  %3526 = vmatpush.bf16.msrb.mxu2 %v5924_v45 }
0x1619   :  { %v3311_v24 = vpack.c.b16 %v3307_v30, %v3306_v13 }
0x161a   :  { %v3383_v36 = vpack.c.b16 %v3378_v48, %v3377_v51  ;;  %v6567_v55 = vpop.eup %6566 }
0x161b   :  { %5688 = vmatmul.msk.bf16.gmra.mxu1 %vm519_vm6, %v3311_v24  ;;  %v3274_v19 = vmul.f32 %v6567_v55, %v8050_v42 }
0x161d   :  { %v3290_v15 = vpack.c.bf16 %v3274_v19, %v3274_v19 }
0x161f   :  { %v3379_v39 = vunpack.c.l.b16 %v3290_v15 }
0x1623   :  { %5691 = vmatmul.msk.bf16.gmra.mxu0 %vm519_vm6, %v3383_v36 }
0x1625   :  { %v3243_v63 = vpop.xlane.xlu1 %3242 }
0x1626   :  { %6568 = vrcp.f32 %v3243_v63 }
0x162c   :  { %v6569_v54 = vpop.eup %6568 }
0x162d   :  { %v3275_v18 = vmul.f32 %v6569_v54, %v8057_v14 }
0x162f   :  { %v3291_v35 = vpack.c.bf16 %v3275_v18, %v3275_v18 }
0x1630   :  { %v3345_v50 = vpop.f32.mrf.mxu1 }
0x1631   :  { %v3380_v29 = vunpack.c.l.b16 %v3291_v35 }
0x1633   :  { %v3384_v26 = vpack.c.b16 %v3380_v29, %v3379_v39 }
0x1635   :  { %5692 = vmatmul.msk.bf16.gmra.mxu0 %vm519_vm6, %v3384_v26 }
0x1638   :  { %v3347_v23 = vpop.f32.mrf.mxu1 }
0x1640   :  { %v3350_v47 = vpop.f32.mrf.mxu1 }
0x1645   :  { %5760 = vmatmul.msk.bf16.vlgmr.msrb.gmra.mxu0 %vm274_vm0, %v7449_v62 }
0x1648   :  { %v3352_v21 = vpop.f32.mrf.mxu1 }
0x1649   :  { %v6169_v20 = vpack.i.bf16 %v3352_v21, %v3350_v47 }
0x164b   :  { %6170 = vrot.lane.b32.xlu0 %v6169_v20, %s6762_s14 }
0x164f   :  { %v3418_v42 = vpop.f32.mrf.mxu0 }
0x1657   :  { %v3420_v43 = vpop.f32.mrf.mxu0 }
0x167e   :  { %v3355_v46 = vpop.f32.mrf.mxu1 }
0x1686   :  { %v3357_v31 = vpop.f32.mrf.mxu1 }
0x1687   :  { %v6174_v14 = vpack.i.bf16 %v3357_v31, %v3355_v46 }
0x1689   :  { %6175 = vrot.lane.b32.xlu2 %v6174_v14, %s6772_s25 }
0x1690   :  { %v3423_v53 = vpop.f32.mrf.mxu0 }
0x1698   :  { %v3360_v16 = vpop.f32.mrf.mxu1  ;;  %v3425_v52 = vpop.f32.mrf.mxu0 }
0x1699   :  { %v6184_v2 = vpack.i.bf16 %v3425_v52, %v3423_v53  ;;  %v8119_v52 = vld [vmem:[#allocation5 + $0xc] sm:$0xf] }
0x169b   :  { %6185 = vrot.lane.b32.xlu0 %v6184_v2, %s6762_s14 }
0x16a0   :  { %v3362_v57 = vpop.f32.mrf.mxu1  ;;  %v3428_v61 = vpop.f32.mrf.mxu0 }
0x16a1   :  { %v6179_v62 = vpack.i.bf16 %v3362_v57, %v3360_v16 }
0x16a3   :  { %6180 = vrot.lane.b32.xlu1 %v6179_v62, %s6773_s26 }
0x16a8   :  { %v3430_v8 = vpop.f32.mrf.mxu0 }
0x16a9   :  { %v6189_v56 = vpack.i.bf16 %v3430_v8, %v3428_v61 }
0x16ab   :  { %6190 = vrot.lane.b32.xlu2 %v6189_v56, %s6772_s25  ;;  %3782 = vrot.lane.b32.xlu1 %v5933_v22, %s6769_s24 }
0x16b2   :  { %v3433_v32 = vpop.f32.mrf.mxu0 }
0x16b3   :  { %3780 = vrot.lane.b32.xlu2 %v5932_v38, %s6769_s24 }
0x16ba   :  { %v3435_v3 = vpop.f32.mrf.mxu0 }
0x16bb   :  { %v6194_v28 = vpack.i.bf16 %v3435_v3, %v3433_v32 }
0x16bd   :  { %6195 = vrot.lane.b32.xlu0 %v6194_v28, %s6773_s26  ;;  %v6171_v4 = vpop.permute.xlu0 %6170 }
0x16be   :  { %v6173_v30 = vunpack.i.h.bf16 %v6171_v4  ;;  %v6172_v22 = vunpack.i.l.bf16 %v6171_v4 }
0x16c0   :  { %v3487_v48 = vsel %vm384_vm1, %v3347_v23, %v6173_v30  ;;  %v3486_v58 = vsel %vm384_vm1, %v3345_v50, %v6172_v22 }
0x16e3   :  { %v6176_v13 = vpop.permute.xlu2 %6175 }
0x16e4   :  { %v6178_v0 = vunpack.i.h.bf16 %v6176_v13  ;;  %v6177_v24 = vunpack.i.l.bf16 %v6176_v13 }
0x16e6   :  { %v3491_v36 = vsel %vm910_vm10, %v3487_v48, %v6178_v0  ;;  %v3490_v63 = vsel %vm910_vm10, %v3486_v58, %v6177_v24 }
0x1705   :  { %v6191_v39 = vpop.permute.xlu2 %6190 }
0x1706   :  { %v6193_v26 = vunpack.i.h.bf16 %v6191_v39  ;;  %v6192_v23 = vunpack.i.l.bf16 %v6191_v39  ;;  %v5927_v39 = vld [vmem:[%s8730_s4 + $0x38] sm:$0xff] }
0x1707   :  { %3655 = vmatpush.bf16.msra.mxu3 %v5927_v39 }
0x170d   :  { %v6186_v15 = vpop.permute.xlu0 %6185 }
0x170e   :  { %v6188_v18 = vunpack.i.h.bf16 %v6186_v15  ;;  %v6187_v35 = vunpack.i.l.bf16 %v6186_v15 }
0x1710   :  { %v3489_v29 = vsel %vm384_vm1, %v3420_v43, %v6188_v18  ;;  %v3488_v50 = vsel %vm384_vm1, %v3418_v42, %v6187_v35  ;;  %v3500_v42 = vperm.slane %v8119_v52, 0 }
0x1711   :  { %v3492_v46 = vsel %vm910_vm10, %v3488_v50, %v6192_v23  ;;  %v3493_v31 = vsel %vm910_vm10, %v3489_v29, %v6193_v26 }
0x1715   :  { %v6181_v1 = vpop.permute.xlu1 %6180 }
0x1716   :  { %v6183_v51 = vunpack.i.h.bf16 %v6181_v1  ;;  %v6182_v38 = vunpack.i.l.bf16 %v6181_v1 }
0x1718   :  { %v3494_v55 = vsel %vm915_vm11, %v3490_v63, %v6182_v38  ;;  %v3495_v19 = vsel %vm915_vm11, %v3491_v36, %v6183_v51 }
0x1719   :  { %v3498_v54 = vpack.c.bf16 %v3495_v19, %v3494_v55 }
0x171b   :  { %5701 = vmatmul.msk.bf16.vlgmr.msrb.gmra.mxu2 %vm274_vm0, %v3498_v54 }
0x172f   :  { %v6196_v47 = vpop.permute.xlu0 %6195 }
0x1730   :  { %v6198_v21 = vunpack.i.h.bf16 %v6196_v47  ;;  %v6197_v20 = vunpack.i.l.bf16 %v6196_v47 }
0x1732   :  { %v3496_v14 = vsel %vm915_vm11, %v3492_v46, %v6197_v20  ;;  %v3497_v53 = vsel %vm915_vm11, %v3493_v31, %v6198_v21 }
0x1733   :  { %v3499_v16 = vpack.c.bf16 %v3497_v53, %v3496_v14 }
0x1735   :  { %5702 = vmatmul.msk.bf16.gmra.mxu2 %vm274_vm0, %v3499_v16 }
0x179e   :  { %v3528_v43 = vpop.f32.mrf.mxu2 }
0x179f   :  { %v3529_v2 = vadd.f32 %v3528_v43, %v3500_v42 }
0x17a1   :  { %v3538_v61 = vadd.f32 %v3529_v2, %v7816_v41 }
0x17a3   :  { %v3542_v56 = vsel %vm274_vm0, %v3538_v61, 0.0 }
0x17a6   :  { %v3530_v57 = vpop.f32.mrf.mxu2 }
0x17a7   :  { %v3531_v62 = vadd.f32 %v3530_v57, %v3500_v42 }
0x17a9   :  { %v3539_v8 = vadd.f32 %v3531_v62, %v7818_v6 }
0x17ab   :  { %v3543_v32 = vsel %vm274_vm0, %v3539_v8, 0.0 }
0x17ac   :  { %v3544_v3 = vadd.f32 %v3543_v32, %v3542_v56 }
0x17ae   :  { %v3545_v28 = vrot.slane %v3544_v3, 4 }
0x17b0   :  { %v3546_v12 = vadd.f32 %v3545_v28, %v3544_v3 }
0x17b2   :  { %v3547_v45 = vrot.slane %v3546_v12, 2 }
0x17b4   :  { %v3548_v4 = vadd.f32 %v3547_v45, %v3546_v12 }
0x17b6   :  { %v3549_v13 = vrot.slane %v3548_v4, 1 }
0x17b8   :  { %v3550_v30 = vadd.f32 %v3549_v13, %v3548_v4  ;;  %v3533_v22 = vpop.f32.mrf.mxu2 }
0x17b9   :  { %v3534_v41 = vadd.f32 %v3533_v22, %v3500_v42 }
0x17ba   :  { %v3560_v0 = vmul.f32 %v3550_v30, %v7181_v49 }
0x17bb   :  { %v3540_v63 = vadd.f32 %v3534_v41, %v7823_v60  ;;  %v5926_v60 = vld [vmem:[%s8730_s4 + $0x30] sm:$0xff] }
0x17bc   :  { %v3562_v24 = vsub.f32 %v3538_v61, %v3560_v0  ;;  %v3563_v1 = vsub.f32 %v3539_v8, %v3560_v0  ;;  %3656 = vmatpush.bf16.msra.mxu3 %v5926_v60  ;;  %v3616_v0 = vperm.slane %v8119_v52, 1 }
0x17bd   :  { %v3551_v18 = vsel %vm274_vm0, %v3540_v63, 0.0 }
0x17be   :  { %v3566_v48 = vmul.f32 %v3562_v24, %v3562_v24  ;;  %v3567_v58 = vmul.f32 %v3563_v1, %v3563_v1 }
0x17c0   :  { %v3570_v6 = vsel %vm274_vm0, %v3566_v48, 0.0  ;;  %v3571_v51 = vsel %vm274_vm0, %v3567_v58, 0.0  ;;  %v3535_v38 = vpop.f32.mrf.mxu2  ;;  %v3621_v58 = vperm.slane %v8119_v52, 2 }
0x17c1   :  { %v3572_v36 = vadd.f32 %v3571_v51, %v3570_v6  ;;  %v3536_v55 = vadd.f32 %v3535_v38, %v3500_v42 }
0x17c3   :  { %v3573_v19 = vrot.slane %v3572_v36, 4  ;;  %v3541_v54 = vadd.f32 %v3536_v55, %v7825_v7 }
0x17c5   :  { %v3574_v15 = vadd.f32 %v3573_v19, %v3572_v36  ;;  %v3552_v35 = vsel %vm274_vm0, %v3541_v54, 0.0  ;;  %v5931_v19 = vld [vmem:[%s8731_s5 + $0x78] sm:$0xff] }
0x17c6   :  { %v3553_v29 = vadd.f32 %v3552_v35, %v3551_v18  ;;  %3709 = vmatpush.bf16.msra.mxu1 %v5931_v19  ;;  %v5930_v35 = vld [vmem:[%s8731_s5 + $0x70] sm:$0xff] }
0x17c7   :  { %v3575_v50 = vrot.slane %v3574_v15, 2 }
0x17c8   :  { %v3554_v26 = vrot.slane %v3553_v29, 4 }
0x17c9   :  { %v3576_v23 = vadd.f32 %v3575_v50, %v3574_v15 }
0x17ca   :  { %v3555_v47 = vadd.f32 %v3554_v26, %v3553_v29  ;;  %3710 = vmatpush.bf16.msra.mxu1 %v5930_v35 }
0x17cb   :  { %v3577_v7 = vrot.slane %v3576_v23, 1 }
0x17cc   :  { %v3556_v21 = vrot.slane %v3555_v47, 2 }
0x17cd   :  { %v3578_v20 = vadd.f32 %v3577_v7, %v3576_v23 }
0x17ce   :  { %v3557_v46 = vadd.f32 %v3556_v21, %v3555_v47 }
0x17cf   :  { %v3588_v31 = vmul.f32 %v3578_v20, %v7181_v49 }
0x17d0   :  { %v3558_v14 = vrot.slane %v3557_v46, 1 }
0x17d1   :  { %v3590_v53 = vadd.f32 1e-05, %v3588_v31 }
0x17d2   :  { %v3559_v16 = vadd.f32 %v3558_v14, %v3557_v46 }
0x17d3   :  { %6570 = vrsqrt.f32 %v3590_v53  ;;  %vm3598_vm5 = vweird.f32 %v3590_v53 }
0x17d4   :  { %v3561_v43 = vmul.f32 %v3559_v16, %v7181_v49  ;;  %v5929_v16 = vld [vmem:[%s8731_s5 + $0x68] sm:$0xff] }
0x17d5   :  { %3711 = vmatpush.bf16.msra.mxu1 %v5929_v16 }
0x17d6   :  { %v3564_v42 = vsub.f32 %v3540_v63, %v3561_v43  ;;  %v3565_v2 = vsub.f32 %v3541_v54, %v3561_v43  ;;  %v5928_v43 = vld [vmem:[%s8731_s5 + $0x60] sm:$0xff] }
0x17d8   :  { %v3568_v57 = vmul.f32 %v3564_v42, %v3564_v42  ;;  %v3569_v61 = vmul.f32 %v3565_v2, %v3565_v2 }
0x17d9   :  { %v6571_v62 = vpop.eup %6570  ;;  %3712 = vmatpush.bf16.msra.mxu1 %v5928_v43 }
0x17da   :  { %v3593_v8 = vmul.f32 %v6571_v62, %v3590_v53  ;;  %v3579_v56 = vsel %vm274_vm0, %v3568_v57, 0.0  ;;  %v3580_v32 = vsel %vm274_vm0, %v3569_v61, 0.0  ;;  %vm3599_vm4 = vweird.f32 %v6571_v62 }
0x17db   :  { %v3581_v3 = vadd.f32 %v3580_v32, %v3579_v56  ;;  %vm3600_vm7 = vmor %vm3598_vm5, %vm3599_vm4 }
0x17dc   :  { %v3594_v28 = vmul.f32 %v6571_v62, %v3593_v8 }
0x17dd   :  { %v3582_v12 = vrot.slane %v3581_v3, 4 }
0x17de   :  { %v3595_v45 = vmul.f32 0.5, %v3594_v28 }
0x17df   :  { %v3583_v4 = vadd.f32 %v3582_v12, %v3581_v3 }
0x17e0   :  { %v3596_v13 = vsub.f32 1.5, %v3595_v45 }
0x17e1   :  { %v3584_v30 = vrot.slane %v3583_v4, 2 }
0x17e2   :  { %v3597_v22 = vmul.f32 %v6571_v62, %v3596_v13 }
0x17e3   :  { %v3585_v41 = vadd.f32 %v3584_v30, %v3583_v4 }
0x17e4   :  { %v3601_v48 = vsel %vm3600_vm7, %v6571_v62, %v3597_v22  ;;  %v3783_v22 = vpop.permute.xlu1 %3782 }
0x17e5   :  { %v3612_v6 = vmul.f32 %v3601_v48, %v3562_v24  ;;  %v3613_v51 = vmul.f32 %v3601_v48, %v3563_v1  ;;  %v3586_v38 = vrot.slane %v3585_v41, 1  ;;  %3798 = vmatpush.bf16.msra.mxu2 %v3783_v22  ;;  %v3674_v48 = vperm.slane %v8119_v52, 3 }
0x17e7   :  { %v3617_v36 = vmul.f32 %v3616_v0, %v3612_v6  ;;  %v3618_v63 = vmul.f32 %v3616_v0, %v3613_v51  ;;  %v3587_v55 = vadd.f32 %v3586_v38, %v3585_v41 }
0x17e9   :  { %v3622_v54 = vadd.f32 %v3621_v58, %v3617_v36  ;;  %v3623_v15 = vadd.f32 %v3621_v58, %v3618_v63  ;;  %v3589_v18 = vmul.f32 %v3587_v55, %v7181_v49 }
0x17eb   :  { %v3626_v39 = vpack.c.bf16 %v3623_v15, %v3622_v54  ;;  %v3591_v24 = vadd.f32 1e-05, %v3589_v18 }
0x17ed   :  { %6572 = vrsqrt.f32 %v3591_v24  ;;  %5711 = vmatmul.msk.bf16.vlgmr.msra.gmra.mxu3 %vm274_vm0, %v3626_v39  ;;  %vm3608_vm9 = vweird.f32 %v3591_v24 }
0x17f3   :  { %v6573_v1 = vpop.eup %6572 }
0x17f4   :  { %v3603_v29 = vmul.f32 %v6573_v1, %v3591_v24  ;;  %vm3609_vm8 = vweird.f32 %v6573_v1 }
0x17f5   :  { %vm3610_vm12 = vmor %vm3608_vm9, %vm3609_vm8 }
0x17f6   :  { %v3604_v50 = vmul.f32 %v6573_v1, %v3603_v29 }
0x17f8   :  { %v3605_v26 = vmul.f32 0.5, %v3604_v50 }
0x17fa   :  { %v3606_v23 = vsub.f32 1.5, %v3605_v26  ;;  %v8192_v26 = vpop.f32.mrf.mxu0 }
0x17fc   :  { %v3607_v60 = vmul.f32 %v6573_v1, %v3606_v23 }
0x17fe   :  { %v3611_v47 = vsel %vm3610_vm12, %v6573_v1, %v3607_v60 }
0x17ff   :  { %v3614_v7 = vmul.f32 %v3611_v47, %v3564_v42  ;;  %v3615_v21 = vmul.f32 %v3611_v47, %v3565_v2  ;;  %v6327_v42 = vld [vmem:[%s8733_s7 + $0x3] ss:$0 sm:$0xff] }
0x1801   :  { %v3619_v20 = vmul.f32 %v3616_v0, %v3614_v7  ;;  %v3620_v46 = vmul.f32 %v3616_v0, %v3615_v21  ;;  %v3781_v0 = vpop.permute.xlu2 %3780 }
0x1802   :  { %3799 = vmatpush.bf16.msra.mxu2 %v3781_v0  ;;  %v8201_v47 = vpop.f32.mrf.mxu0 }
0x1803   :  { %v3624_v31 = vadd.f32 %v3621_v58, %v3619_v20  ;;  %v3625_v14 = vadd.f32 %v3621_v58, %v3620_v46  ;;  %v6239_v7 = vpack.i.bf16 %v8201_v47, %v8192_v26 }
0x1805   :  { %v3627_v53 = vpack.c.bf16 %v3625_v14, %v3624_v31 }
0x1807   :  { %5712 = vmatmul.msk.bf16.gmra.mxu3 %vm274_vm0, %v3627_v53 }
0x1870   :  { %v3658_v57 = vpop.f32.mrf.mxu3 }
0x1871   :  { %v3659_v2 = vadd.f32 %v6327_v42, %v3658_v57 }
0x1873   :  { %v3668_v8 = vmax.f32 %v3659_v2, 0.0 }
0x1878   :  { %v3660_v61 = vpop.f32.mrf.mxu3 }
0x1879   :  { %v3661_v62 = vadd.f32 %v6327_v42, %v3660_v61 }
0x187b   :  { %v3669_v56 = vmax.f32 %v3661_v62, 0.0 }
0x187d   :  { %v3672_v32 = vpack.c.bf16 %v3669_v56, %v3668_v8 }
0x187f   :  { %5729 = vmatmul.msk.bf16.vlgmr.msra.gmra.mxu1 %vm519_vm6, %v3672_v32 }
0x188a   :  { %v3663_v3 = vpop.f32.mrf.mxu3 }
0x188b   :  { %v3664_v28 = vadd.f32 %v6327_v42, %v3663_v3 }
0x188d   :  { %v3670_v4 = vmax.f32 %v3664_v28, 0.0 }
0x1892   :  { %v3665_v12 = vpop.f32.mrf.mxu3 }
0x1893   :  { %v3666_v45 = vadd.f32 %v6327_v42, %v3665_v12 }
0x1895   :  { %v3671_v13 = vmax.f32 %v3666_v45, 0.0 }
0x1897   :  { %v3673_v30 = vpack.c.bf16 %v3671_v13, %v3670_v4 }
0x1899   :  { %5730 = vmatmul.msk.bf16.gmra.mxu1 %vm519_vm6, %v3673_v30 }
0x18fc   :  { %v3714_v41 = vpop.f32.mrf.mxu1 }
0x18fd   :  { %v8166_v6 = vadd.f32 %v3714_v41, %v3674_v48 }
0x1904   :  { %v3716_v58 = vpop.f32.mrf.mxu1 }
0x1905   :  { %v8168_v51 = vadd.f32 %v3716_v58, %v3674_v48 }
0x1907   :  { %v8172_v38 = vpack.c.bf16 %v8168_v51, %v8166_v6 }
0x1909   :  { %5761 = vmatmul.msk.bf16.vlgmr.msra.gmra.mxu2 %vm274_vm0, %v8172_v38 }
0x1916   :  { %v3719_v36 = vpop.f32.mrf.mxu1 }
0x1917   :  { %v8176_v55 = vadd.f32 %v3719_v36, %v3674_v48 }
0x191e   :  { %v3721_v63 = vpop.f32.mrf.mxu1 }
0x191f   :  { %v8178_v19 = vadd.f32 %v3721_v63, %v3674_v48 }
0x1921   :  { %v8182_v52 = vpack.c.bf16 %v8178_v19, %v8176_v55 }
0x1923   :  { %5762 = vmatmul.msk.bf16.gmra.mxu2 %vm274_vm0, %v8182_v52 }
0x198c   :  { %v3801_v54 = vpop.f32.mrf.mxu2 }
0x198d   :  { %v3879_v15 = vpack.c.bf16 %v3801_v54, %v3801_v54 }
0x198f   :  { %v3913_v24 = vunpack.c.l.b16 %v3879_v15 }
0x1994   :  { %v3803_v18 = vpop.f32.mrf.mxu2 }
0x1995   :  { %v6209_v35 = vpack.i.bf16 %v3803_v18, %v3801_v54  ;;  %v3880_v39 = vpack.c.bf16 %v3803_v18, %v3803_v18 }
0x1997   :  { %6210 = vrot.lane.b32.xlu2 %v6209_v35, %s6768_s23  ;;  %6200 = vrot.lane.b32.xlu0 %v6209_v35, %s6767_s22  ;;  %v3914_v1 = vunpack.c.l.b16 %v3880_v39 }
0x1999   :  { %v8188_v29 = vpack.c.b16 %v3914_v1, %v3913_v24 }
0x19a6   :  { %v8190_v50 = vpop.f32.mrf.mxu2 }
0x19ae   :  { %v8194_v23 = vpop.f32.mrf.mxu2 }
0x19af   :  { %v6224_v60 = vpack.i.bf16 %v8194_v23, %v8190_v50 }
0x19b1   :  { %6225 = vrot.lane.b32.xlu2 %v6224_v60, %s6766_s21  ;;  %6215 = vrot.lane.b32.xlu0 %v6224_v60, %s6768_s23 }
0x19b2   :  { %6205 = vrot.lane.b32.xlu1 %v6224_v60, %s6767_s22 }
0x19b9   :  { %6240 = vrot.lane.b32.xlu2 %v6239_v7, %s6767_s22  ;;  %6230 = vrot.lane.b32.xlu0 %v6239_v7, %s6766_s21 }
0x19ba   :  { %6220 = vrot.lane.b32.xlu1 %v6209_v35, %s6766_s21 }
0x19c2   :  { %6235 = vrot.lane.b32.xlu1 %v6239_v7, %s6768_s23 }
0x19f1   :  { %v6211_v21 = vpop.permute.xlu2 %6210 }
0x19f2   :  { %v6213_v46 = vunpack.i.h.bf16 %v6211_v21  ;;  %v6212_v31 = vunpack.i.l.bf16 %v6211_v21 }
0x19f4   :  { %v3884_v57 = vpack.c.bf16 %v6213_v46, %v6213_v46  ;;  %v3883_v42 = vpack.c.bf16 %v6212_v31, %v6212_v31 }
0x19f6   :  { %v3918_v8 = vunpack.c.l.b16 %v3884_v57  ;;  %v3917_v56 = vunpack.c.l.b16 %v3883_v42 }
0x19f8   :  { %v8213_v3 = vpack.c.b16 %v3918_v8, %v3917_v56 }
0x19fa   :  { %v3938_v28 = vsel %vm384_vm1, %v8213_v3, 0 }
0x1a09   :  { %v6201_v20 = vpop.permute.xlu0 %6200 }
0x1a0a   :  { %v6203_v14 = vunpack.i.h.bf16 %v6201_v20  ;;  %v6202_v53 = vunpack.i.l.bf16 %v6201_v20 }
0x1a0b   :  { %v6226_v54 = vpop.permute.xlu2 %6225 }
0x1a0c   :  { %v3886_v16 = vpack.c.bf16 %v6203_v14, %v6203_v14  ;;  %v3885_v43 = vpack.c.bf16 %v6202_v53, %v6202_v53  ;;  %v6228_v24 = vunpack.i.h.bf16 %v6226_v54  ;;  %v6227_v60 = vunpack.i.l.bf16 %v6226_v54 }
0x1a0e   :  { %v3920_v2 = vunpack.c.l.b16 %v3886_v16  ;;  %v3919_v61 = vunpack.c.l.b16 %v3885_v43  ;;  %v3890_v14 = vpack.c.bf16 %v6228_v24, %v6228_v24  ;;  %v3889_v53 = vpack.c.bf16 %v6227_v60, %v6227_v60 }
0x1a10   :  { %v8209_v62 = vpack.c.b16 %v3920_v2, %v3919_v61  ;;  %v3983_v2 = vunpack.c.l.b16 %v3890_v14  ;;  %v3982_v61 = vunpack.c.l.b16 %v3889_v53 }
0x1a12   :  { %v3941_v32 = vsel %vm384_vm1, %v8209_v62, 0 }
0x1a13   :  { %3947 = vmatpush.bf16.xpose.msrb.mxu3 %v3941_v32 }
0x1a1b   :  { %3948 = vmatpush.bf16.xpose.msrb.mxu3 %v3938_v28  ;;  %v3888_v28 = vpack.c.bf16 %v8194_v23, %v8194_v23 }
0x1a23   :  { %v6216_v12 = vpop.permute.xlu0 %6215 }
0x1a24   :  { %v6218_v45 = vunpack.i.h.bf16 %v6216_v12  ;;  %v6217_v4 = vunpack.i.l.bf16 %v6216_v12  ;;  %v6206_v13 = vpop.permute.xlu1 %6205  ;;  %v8227_v12 = vpack.c.b16 %v3983_v2, %v3982_v61 }
0x1a25   :  { %v6208_v30 = vunpack.i.h.bf16 %v6206_v13  ;;  %v6207_v22 = vunpack.i.l.bf16 %v6206_v13  ;;  %v3831_v13 = vpack.c.bf16 %v8192_v26, %v8192_v26  ;;  %v3835_v26 = vpack.c.bf16 %v8201_v47, %v8201_v47 }
0x1a26   :  { %v3892_v0 = vpack.c.bf16 %v6218_v45, %v6218_v45  ;;  %v3891_v41 = vpack.c.bf16 %v6217_v4, %v6217_v4  ;;  %v3887_v45 = vpack.c.bf16 %v8190_v50, %v8190_v50 }
0x1a27   :  { %v3894_v48 = vpack.c.bf16 %v6208_v30, %v6208_v30  ;;  %v3893_v58 = vpack.c.bf16 %v6207_v22, %v6207_v22  ;;  %v3932_v30 = vsel %vm384_vm1, %v8188_v29, 0  ;;  %v4002_v22 = vsel %vm384_vm1, %v8227_v12, 0 }
0x1a28   :  { %v3985_v36 = vunpack.c.l.b16 %v3892_v0  ;;  %v3984_v63 = vunpack.c.l.b16 %v3891_v41  ;;  %v3981_v0 = vunpack.c.l.b16 %v3888_v28  ;;  %v3966_v24 = vunpack.c.l.b16 %v3835_v26 }
0x1a29   :  { %v3987_v15 = vunpack.c.l.b16 %v3894_v48  ;;  %v3986_v18 = vunpack.c.l.b16 %v3893_v58  ;;  %v3980_v48 = vunpack.c.l.b16 %v3887_v45  ;;  %v3899_v58 = vunpack.c.l.b16 %v3831_v13 }
0x1a2a   :  { %v3990_v35 = vpack.c.b16 %v3985_v36, %v3984_v63 }
0x1a2b   :  { %v3991_v39 = vpack.c.b16 %v3987_v15, %v3986_v18  ;;  %v6231_v42 = vpop.permute.xlu0 %6230  ;;  %v8237_v36 = vpack.c.b16 %v3981_v0, %v3980_v48  ;;  %v6241_v18 = vpop.permute.xlu2 %6240 }
0x1a2c   :  { %v6221_v1 = vpop.permute.xlu1 %6220  ;;  %4186 = vrot.lane.b32.xlu2 %v3990_v35, %s6769_s24  ;;  %v4005_v56 = vsel %vm384_vm1, %v3990_v35, 0  ;;  %v6232_v32 = vunpack.i.l.bf16 %v6231_v42  ;;  %v6233_v41 = vunpack.i.h.bf16 %v6231_v42 }
0x1a2d   :  { %v6223_v7 = vunpack.i.h.bf16 %v6221_v1  ;;  %v6222_v21 = vunpack.i.l.bf16 %v6221_v1  ;;  %4188 = vrot.lane.b32.xlu1 %v3991_v39, %s6769_s24  ;;  %v4008_v20 = vsel %vm384_vm1, %v3991_v39, 0  ;;  %v3999_v15 = vsel %vm384_vm1, %v8237_v36, 0 }
0x1a2e   :  { %4014 = vmatpush.bf16.xpose.msrb.mxu1 %v4008_v20  ;;  %v3832_v4 = vpack.c.bf16 %v6232_v32, %v6232_v32  ;;  %v3836_v50 = vpack.c.bf16 %v6233_v41, %v6233_v41  ;;  %v6242_v1 = vunpack.i.l.bf16 %v6241_v18 }
0x1a2f   :  { %v3882_v46 = vpack.c.bf16 %v6223_v7, %v6223_v7  ;;  %v3881_v31 = vpack.c.bf16 %v6222_v21, %v6222_v21 }
0x1a30   :  { %v3900_v23 = vunpack.c.l.b16 %v3832_v4  ;;  %v3967_v35 = vunpack.c.l.b16 %v3836_v50  ;;  %v3834_v21 = vpack.c.bf16 %v6242_v1, %v6242_v1 }
0x1a31   :  { %v3916_v16 = vunpack.c.l.b16 %v3882_v46  ;;  %v3915_v43 = vunpack.c.l.b16 %v3881_v31  ;;  %v6243_v31 = vunpack.i.h.bf16 %v6241_v18 }
0x1a32   :  { %v3903_v63 = vpack.c.b16 %v3900_v23, %v3899_v58  ;;  %v3970_v60 = vpack.c.b16 %v3967_v35, %v3966_v24  ;;  %v3902_v47 = vunpack.c.l.b16 %v3834_v21 }
0x1a33   :  { %v8220_v57 = vpack.c.b16 %v3916_v16, %v3915_v43  ;;  %v3838_v16 = vpack.c.bf16 %v6243_v31, %v6243_v31 }
0x1a34   :  { %v6236_v54 = vpop.permute.xlu1 %6235 }
0x1a35   :  { %v3935_v8 = vsel %vm384_vm1, %v8220_v57, 0  ;;  %v6237_v39 = vunpack.i.l.bf16 %v6236_v54  ;;  %v6238_v20 = vunpack.i.h.bf16 %v6236_v54  ;;  %v3969_v42 = vunpack.c.l.b16 %v3838_v16 }
0x1a36   :  { %3949 = vmatpush.bf16.xpose.msrb.mxu3 %v3935_v8  ;;  %4015 = vmatpush.bf16.xpose.msrb.mxu1 %v4005_v56 }
0x1a37   :  { %v3833_v7 = vpack.c.bf16 %v6237_v39, %v6237_v39  ;;  %v3837_v14 = vpack.c.bf16 %v6238_v20, %v6238_v20 }
0x1a39   :  { %v3901_v46 = vunpack.c.l.b16 %v3833_v7  ;;  %v3968_v43 = vunpack.c.l.b16 %v3837_v14 }
0x1a3b   :  { %v3904_v53 = vpack.c.b16 %v3902_v47, %v3901_v46  ;;  %v3971_v2 = vpack.c.b16 %v3969_v42, %v3968_v43 }
0x1a3e   :  { %3950 = vmatpush.bf16.xpose.msrb.mxu3 %v3932_v30  ;;  %4016 = vmatpush.bf16.xpose.msrb.mxu1 %v4002_v22 }
0x1a45   :  { %5763 = vmatmul.msk.bf16.vlgmr.msrb.gmra.mxu3 %vm384_vm1, %v3903_v63 }
0x1a46   :  { %4017 = vmatpush.bf16.xpose.msrb.mxu1 %v3999_v15 }
0x1a4d   :  { %5765 = vmatmul.msk.bf16.vlgmr.msrb.gmra.mxu1 %vm384_vm1, %v3970_v60 }
0x1a55   :  { %5764 = vmatmul.msk.bf16.gmra.mxu3 %vm384_vm1, %v3904_v53 }
0x1a5d   :  { %5766 = vmatmul.msk.bf16.gmra.mxu1 %vm384_vm1, %v3971_v2 }
0x1a86   :  { %v4187_v8 = vpop.permute.xlu2 %4186 }
0x1a9f   :  { %v4189_v61 = vpop.permute.xlu1 %4188 }
0x1aa0   :  { %4204 = vmatpush.bf16.msrb.mxu2 %v4189_v61 }
0x1aa4   :  { %4205 = vmatpush.bf16.msrb.mxu2 %v4187_v8 }
0x1ac8   :  { %v3952_v56 = vpop.f32.mrf.mxu3 }
0x1ac9   :  { %v3953_v32 = vadd.f32 %v3952_v56, %v6941_v37 }
0x1aca   :  { %v4019_v28 = vpop.f32.mrf.mxu1 }
0x1acb   :  { %v4029_v45 = vsel %vm519_vm6, %v3953_v32, -inf  ;;  %v4020_v23 = vadd.f32 %v4019_v28, %v6941_v37 }
0x1acc   :  { %4030 = vmax.xlane.f32.xlu2 %v4029_v45 }
0x1acd   :  { %v4041_v50 = vsel %vm519_vm6, %v4020_v23, -inf }
0x1ad0   :  { %v3954_v4 = vpop.f32.mrf.mxu3 }
0x1ad1   :  { %v3955_v13 = vadd.f32 %v3954_v4, %v6954_v44 }
0x1ad2   :  { %v4021_v30 = vpop.f32.mrf.mxu1 }
0x1ad3   :  { %v4022_v22 = vadd.f32 %v4021_v30, %v6954_v44  ;;  %v4032_v0 = vsel %vm519_vm6, %v3955_v13, -inf }
0x1ad4   :  { %4033 = vmax.xlane.f32.xlu0 %v4032_v0 }
0x1ad5   :  { %v4044_v41 = vsel %vm519_vm6, %v4022_v22, -inf }
0x1ad6   :  { %4045 = vmax.xlane.f32.xlu1 %v4044_v41 }
0x1ad8   :  { %v3957_v48 = vpop.f32.mrf.mxu3 }
0x1ad9   :  { %v8256_v63 = vadd.f32 %v3957_v48, %v6977_v59 }
0x1ada   :  { %v4024_v58 = vpop.f32.mrf.mxu1 }
0x1adb   :  { %v4035_v37 = vsel %vm519_vm6, %v8256_v63, -inf  ;;  %v4025_v39 = vadd.f32 %v4024_v58, %v6977_v59 }
0x1adc   :  { %4042 = vmax.xlane.f32.xlu0 %v4041_v50 }
0x1add   :  { %v4047_v24 = vsel %vm519_vm6, %v4025_v39, -inf }
0x1ae0   :  { %v3959_v54 = vpop.f32.mrf.mxu3 }
0x1ae1   :  { %v3960_v26 = vadd.f32 %v3959_v54, %v7000_v10 }
0x1ae2   :  { %v4026_v44 = vpop.f32.mrf.mxu1 }
0x1ae3   :  { %v8260_v15 = vadd.f32 %v4026_v44, %v7000_v10  ;;  %v4038_v18 = vsel %vm519_vm6, %v3960_v26, -inf }
0x1ae4   :  { %4039 = vmax.xlane.f32.xlu1 %v4038_v18  ;;  %4036 = vmax.xlane.f32.xlu0 %v4035_v37 }
0x1ae5   :  { %v4050_v35 = vsel %vm519_vm6, %v8260_v15, -inf }
0x1ae6   :  { %4051 = vmax.xlane.f32.xlu2 %v4050_v35 }
0x1aec   :  { %4048 = vmax.xlane.f32.xlu1 %v4047_v24 }
0x1b05   :  { %4184 = vrot.lane.b32.xlu1 %v8227_v12, %s6769_s24 }
0x1b0d   :  { %4182 = vrot.lane.b32.xlu1 %v8237_v36, %s6769_s24 }
0x1b3f   :  { %v4031_v10 = vpop.xlane.xlu2 %4030 }
0x1b40   :  { %v4053_v1 = vsub.f32 %v3953_v32, %v4031_v10 }
0x1b42   :  { %v4061_v60 = vmul.f32 1.442695, %v4053_v1 }
0x1b44   :  { %6574 = vpow2.f32 %v4061_v60 }
0x1b47   :  { %v4034_v7 = vpop.xlane.xlu0 %4033 }
0x1b48   :  { %v4054_v21 = vsub.f32 %v3955_v13, %v4034_v7 }
0x1b49   :  { %v4046_v20 = vpop.xlane.xlu1 %4045 }
0x1b4a   :  { %v8273_v46 = vpop.eup %6574  ;;  %v4063_v31 = vmul.f32 1.442695, %v4054_v21  ;;  %v4058_v59 = vsub.f32 %v4022_v22, %v4046_v20 }
0x1b4b   :  { %v4077_v47 = vsel %vm519_vm6, %v8273_v46, 0.0 }
0x1b4c   :  { %6576 = vpow2.f32 %v4063_v31  ;;  %4078 = vadd.xlane.f32.xlu0 %v4077_v47  ;;  %v4071_v12 = vmul.f32 1.442695, %v4058_v59 }
0x1b4e   :  { %6578 = vpow2.f32 %v4071_v12 }
0x1b4f   :  { %v4043_v14 = vpop.xlane.xlu0 %4042 }
0x1b50   :  { %v4057_v53 = vsub.f32 %v4020_v23, %v4043_v14 }
0x1b52   :  { %v8277_v36 = vpop.eup %6576  ;;  %v4069_v16 = vmul.f32 1.442695, %v4057_v53 }
0x1b53   :  { %v4080_v43 = vsel %vm519_vm6, %v8277_v36, 0.0 }
0x1b54   :  { %6580 = vpow2.f32 %v4069_v16  ;;  %4081 = vadd.xlane.f32.xlu0 %v4080_v43  ;;  %v6579_v2 = vpop.eup %6578 }
0x1b55   :  { %v4092_v8 = vsel %vm519_vm6, %v6579_v2, 0.0 }
0x1b57   :  { %v4040_v42 = vpop.xlane.xlu1 %4039 }
0x1b58   :  { %v4056_v45 = vsub.f32 %v3960_v26, %v4040_v42  ;;  %v4037_v26 = vpop.xlane.xlu0 %4036 }
0x1b59   :  { %v4052_v58 = vpop.xlane.xlu2 %4051 }
0x1b5a   :  { %v6581_v61 = vpop.eup %6580  ;;  %v4067_v13 = vmul.f32 1.442695, %v4056_v45 }
0x1b5b   :  { %v4089_v56 = vsel %vm519_vm6, %v6581_v61, 0.0 }
0x1b5c   :  { %4093 = vadd.xlane.f32.xlu0 %v4092_v8  ;;  %4090 = vadd.xlane.f32.xlu2 %v4089_v56 }
0x1b5f   :  { %v4049_v32 = vpop.xlane.xlu1 %4048 }
0x1b60   :  { %v4059_v28 = vsub.f32 %v4025_v39, %v4049_v32 }
0x1b62   :  { %v4073_v4 = vmul.f32 1.442695, %v4059_v28 }
0x1b64   :  { %6582 = vpow2.f32 %v4073_v4 }
0x1b65   :  { %6584 = vpow2.f32 %v4067_v13 }
0x1b6a   :  { %v8283_v30 = vpop.eup %6582 }
0x1b6b   :  { %v4095_v22 = vsel %vm519_vm6, %v8283_v30, 0.0  ;;  %v8287_v0 = vpop.eup %6584 }
0x1b6c   :  { %4096 = vadd.xlane.f32.xlu1 %v4095_v22  ;;  %v4086_v41 = vsel %vm519_vm6, %v8287_v0, 0.0 }
0x1b70   :  { %4141 = vrot.lane.b32.xlu0 %v8209_v62, %s6769_s24  ;;  %v4060_v62 = vsub.f32 %v8260_v15, %v4052_v58 }
0x1b72   :  { %v4075_v50 = vmul.f32 1.442695, %v4060_v62 }
0x1b74   :  { %4087 = vadd.xlane.f32.xlu1 %v4086_v41  ;;  %4139 = vrot.lane.b32.xlu2 %v8213_v3, %s6769_s24  ;;  %6586 = vpow2.f32 %v4075_v50  ;;  %v4055_v3 = vsub.f32 %v8256_v63, %v4037_v26 }
0x1b76   :  { %v4065_v18 = vmul.f32 1.442695, %v4055_v3 }
0x1b77   :  { %v4185_v23 = vpop.permute.xlu1 %4184 }
0x1b78   :  { %4206 = vmatpush.bf16.msrb.mxu2 %v4185_v23  ;;  %6588 = vpow2.f32 %v4065_v18 }
0x1b7a   :  { %v6587_v54 = vpop.eup %6586 }
0x1b7b   :  { %v4098_v44 = vsel %vm519_vm6, %v6587_v54, 0.0 }
0x1b7c   :  { %4137 = vrot.lane.b32.xlu2 %v8220_v57, %s6769_s24 }
0x1b7e   :  { %v6589_v57 = vpop.eup %6588 }
0x1b7f   :  { %v4183_v48 = vpop.permute.xlu1 %4182  ;;  %v4083_v37 = vsel %vm519_vm6, %v6589_v57, 0.0 }
0x1b80   :  { %4207 = vmatpush.bf16.msrb.mxu2 %v4183_v48 }
0x1b84   :  { %4135 = vrot.lane.b32.xlu2 %v8188_v29, %s6769_s24 }
0x1b9a   :  { %4099 = vadd.xlane.f32.xlu0 %v4098_v44 }
0x1bad   :  { %4084 = vadd.xlane.f32.xlu2 %v4083_v37 }
0x1bbf   :  { %v4079_v35 = vpop.xlane.xlu0 %4078 }
0x1bc7   :  { %v4082_v29 = vpop.xlane.xlu0 %4081 }
0x1bcf   :  { %v4091_v39 = vpop.xlane.xlu2 %4090  ;;  %v4094_v24 = vpop.xlane.xlu0 %4093 }
0x1bd0   :  { %6590 = vrcp.f32 %v4091_v39 }
0x1bd1   :  { %6592 = vrcp.f32 %v4094_v24 }
0x1bd2   :  { %6594 = vrcp.f32 %v4082_v29 }
0x1bd3   :  { %6596 = vrcp.f32 %v4079_v35 }
0x1bd6   :  { %v6591_v15 = vpop.eup %6590 }
0x1bd7   :  { %v6593_v10 = vpop.eup %6592  ;;  %v4113_v1 = vmul.f32 %v6591_v15, %v6581_v61  ;;  %v4140_v20 = vpop.permute.xlu2 %4139 }
0x1bd8   :  { %v4114_v60 = vmul.f32 %v6593_v10, %v6579_v2  ;;  %v6595_v47 = vpop.eup %6594 }
0x1bd9   :  { %v4121_v7 = vpack.c.bf16 %v4113_v1, %v4113_v1  ;;  %v6597_v14 = vpop.eup %6596  ;;  %v4110_v53 = vmul.f32 %v6595_v47, %v8277_v36  ;;  %v5942_v47 = vld [vmem:[%s8728_s2 + $0x50] sm:$0xff] }
0x1bda   :  { %v4122_v21 = vpack.c.bf16 %v4114_v60, %v4114_v60  ;;  %v4109_v43 = vmul.f32 %v6597_v14, %v8273_v46 }
0x1bdb   :  { %v4176_v63 = vunpack.c.l.b16 %v4121_v7  ;;  %v4118_v42 = vpack.c.bf16 %v4110_v53, %v4110_v53 }
0x1bdc   :  { %v4177_v31 = vunpack.c.l.b16 %v4122_v21  ;;  %v4117_v2 = vpack.c.bf16 %v4109_v43, %v4109_v43 }
0x1bdd   :  { %v4130_v61 = vunpack.c.l.b16 %v4118_v42 }
0x1bde   :  { %v4180_v59 = vpack.c.b16 %v4177_v31, %v4176_v63  ;;  %v4129_v8 = vunpack.c.l.b16 %v4117_v2  ;;  %v5935_v63 = vld [vmem:[%s8729_s3 + $0x48] sm:$0xff]  ;;  %v5934_v31 = vld [vmem:[%s8729_s3 + $0x40] sm:$0xff] }
0x1bdf   :  { %v4138_v16 = vpop.permute.xlu2 %4137  ;;  %v4097_v28 = vpop.xlane.xlu1 %4096  ;;  %4272 = vmatpush.bf16.msra.mxu3 %v5935_v63 }
0x1be0   :  { %5769 = vmatmul.msk.bf16.vlgmr.msrb.gmra.mxu2 %vm519_vm6, %v4180_v59  ;;  %v4133_v32 = vpack.c.b16 %v4130_v61, %v4129_v8  ;;  %6598 = vrcp.f32 %v4097_v28  ;;  %v5943_v59 = vld [vmem:[%s8728_s2 + $0x58] sm:$0xff] }
0x1be2   :  { %v4142_v12 = vpop.permute.xlu0 %4141 }
0x1be3   :  { %4157 = vmatpush.bf16.msra.mxu0 %v4142_v12  ;;  %4273 = vmatpush.bf16.msra.mxu3 %v5934_v31 }
0x1be6   :  { %v6599_v4 = vpop.eup %6598 }
0x1be7   :  { %4158 = vmatpush.bf16.msra.mxu0 %v4140_v20  ;;  %v4136_v56 = vpop.permute.xlu2 %4135  ;;  %v4115_v36 = vmul.f32 %v6599_v4, %v8283_v30  ;;  %v4088_v23 = vpop.xlane.xlu1 %4087  ;;  %4473 = vmatpush.bf16.msrb.mxu3 %v5943_v59 }
0x1be9   :  { %v4123_v46 = vpack.c.bf16 %v4115_v36, %v4115_v36 }
0x1beb   :  { %4159 = vmatpush.bf16.msra.mxu0 %v4138_v16  ;;  %v4178_v48 = vunpack.c.l.b16 %v4123_v46  ;;  %4474 = vmatpush.bf16.msrb.mxu3 %v5942_v47  ;;  %v8339_v46 = vld [vmem:[#allocation5 + $0x10] sm:$0xf] }
0x1bef   :  { %4160 = vmatpush.bf16.msra.mxu0 %v4136_v56 }
0x1bf2   :  { %5767 = vmatmul.msk.bf16.vlgmr.msra.gmra.mxu0 %vm519_vm6, %v4133_v32 }
0x1c0d   :  { %v4100_v45 = vpop.xlane.xlu0 %4099 }
0x1c0e   :  { %6600 = vrcp.f32 %v4100_v45 }
0x1c0f   :  { %6602 = vrcp.f32 %v4088_v23 }
0x1c14   :  { %v6601_v13 = vpop.eup %6600 }
0x1c15   :  { %v4116_v22 = vmul.f32 %v6601_v13, %v6587_v54  ;;  %v6603_v26 = vpop.eup %6602 }
0x1c16   :  { %v4112_v44 = vmul.f32 %v6603_v26, %v8287_v0 }
0x1c17   :  { %v4124_v41 = vpack.c.bf16 %v4116_v22, %v4116_v22  ;;  %v4250_v22 = vperm.slane %v8339_v46, 0 }
0x1c18   :  { %v4120_v18 = vpack.c.bf16 %v4112_v44, %v4112_v44 }
0x1c19   :  { %v4179_v58 = vunpack.c.l.b16 %v4124_v41 }
0x1c1a   :  { %v4132_v35 = vunpack.c.l.b16 %v4120_v18 }
0x1c1b   :  { %v4181_v62 = vpack.c.b16 %v4179_v58, %v4178_v48 }
0x1c1d   :  { %5770 = vmatmul.msk.bf16.gmra.mxu2 %vm519_vm6, %v4181_v62 }
0x1c20   :  { %v4085_v50 = vpop.xlane.xlu2 %4084 }
0x1c21   :  { %6604 = vrcp.f32 %v4085_v50 }
0x1c27   :  { %v6605_v3 = vpop.eup %6604 }
0x1c28   :  { %v4111_v37 = vmul.f32 %v6605_v3, %v6589_v57 }
0x1c2a   :  { %v4119_v30 = vpack.c.bf16 %v4111_v37, %v4111_v37 }
0x1c2c   :  { %v4131_v29 = vunpack.c.l.b16 %v4119_v30 }
0x1c2e   :  { %v4134_v54 = vpack.c.b16 %v4132_v35, %v4131_v29 }
0x1c30   :  { %5768 = vmatmul.msk.bf16.gmra.mxu0 %vm519_vm6, %v4134_v54 }
0x1c63   :  { %v4209_v39 = vpop.f32.mrf.mxu2 }
0x1c6b   :  { %v4211_v15 = vpop.f32.mrf.mxu2 }
0x1c6f   :  { %v4162_v24 = vpop.f32.mrf.mxu0 }
0x1c77   :  { %v4164_v10 = vpop.f32.mrf.mxu0 }
0x1c78   :  { %v6244_v1 = vpack.i.bf16 %v4211_v15, %v4164_v10 }
0x1c7a   :  { %6245 = vrot.lane.b32.xlu0 %v6244_v1, %s6762_s14 }
0x1c82   :  { %4488 = vrot.lane.b32.xlu0 %v5943_v59, %s6769_s24 }
0x1c8a   :  { %4486 = vrot.lane.b32.xlu0 %v5942_v47, %s6769_s24 }
0x1ca0   :  { %v4214_v60 = vpop.f32.mrf.mxu2 }
0x1ca8   :  { %v4216_v0 = vpop.f32.mrf.mxu2 }
0x1cad   :  { %v4167_v7 = vpop.f32.mrf.mxu0 }
0x1cae   :  { %v6249_v21 = vpack.i.bf16 %v4214_v60, %v4167_v7 }
0x1cb0   :  { %6250 = vrot.lane.b32.xlu1 %v6249_v21, %s6772_s25 }
0x1cb5   :  { %v4169_v57 = vpop.f32.mrf.mxu0 }
0x1cb6   :  { %v6254_v20 = vpack.i.bf16 %v4216_v0, %v4169_v57 }
0x1cb8   :  { %6255 = vrot.lane.b32.xlu2 %v6254_v20, %s6773_s26 }
0x1cec   :  { %v6246_v12 = vpop.permute.xlu0 %6245 }
0x1ced   :  { %v6248_v14 = vunpack.i.h.bf16 %v6246_v12  ;;  %v6247_v53 = vunpack.i.l.bf16 %v6246_v12 }
0x1cef   :  { %v4244_v61 = vsel %vm384_vm1, %v4209_v39, %v6248_v14  ;;  %v4243_v8 = vsel %vm384_vm1, %v4162_v24, %v6247_v53 }
0x1d12   :  { %v6256_v16 = vpop.permute.xlu2 %6255 }
0x1d13   :  { %v6258_v56 = vunpack.i.h.bf16 %v6256_v16  ;;  %v6257_v32 = vunpack.i.l.bf16 %v6256_v16 }
0x1d22   :  { %v6251_v43 = vpop.permute.xlu1 %6250 }
0x1d23   :  { %v6253_v42 = vunpack.i.h.bf16 %v6251_v43  ;;  %v6252_v2 = vunpack.i.l.bf16 %v6251_v43 }
0x1d25   :  { %v4245_v28 = vsel %vm910_vm10, %v4243_v8, %v6252_v2  ;;  %v4246_v45 = vsel %vm910_vm10, %v4244_v61, %v6253_v42 }
0x1d26   :  { %v4247_v4 = vsel %vm915_vm11, %v4245_v28, %v6257_v32  ;;  %v4248_v36 = vsel %vm915_vm11, %v4246_v45, %v6258_v56  ;;  %v5937_v56 = vld [vmem:[%s8730_s4 + $0x48] sm:$0xff] }
0x1d27   :  { %v4249_v13 = vpack.c.bf16 %v4248_v36, %v4247_v4  ;;  %4373 = vmatpush.bf16.msrb.mxu0 %v5937_v56  ;;  %v5936_v36 = vld [vmem:[%s8730_s4 + $0x40] sm:$0xff]  ;;  %v4384_v56 = vperm.slane %v8339_v46, 3 }
0x1d29   :  { %5779 = vmatmul.msk.bf16.vlgmr.msra.gmra.mxu3 %vm274_vm0, %v4249_v13 }
0x1d2b   :  { %4374 = vmatpush.bf16.msrb.mxu0 %v5936_v36 }
0x1d39   :  { %5835 = vmatmul.msk.bf16.vlgmr.msrb.gmra.mxu3 %vm274_vm0, %v8172_v38 }
0x1d49   :  { %5836 = vmatmul.msk.bf16.gmra.mxu3 %vm274_vm0, %v8182_v52 }
0x1dac   :  { %v4275_v41 = vpop.f32.mrf.mxu3 }
0x1dad   :  { %v4276_v23 = vadd.f32 %v4275_v41, %v4250_v22  ;;  %v5941_v41 = vld [vmem:[%s8731_s5 + $0x98] sm:$0xff] }
0x1dae   :  { %4416 = vmatpush.bf16.msra.mxu1 %v5941_v41 }
0x1daf   :  { %v4280_v48 = vadd.f32 %v4276_v23, %v7443_v25 }
0x1db1   :  { %v4282_v58 = vsel %vm274_vm0, %v4280_v48, 0.0 }
0x1db2   :  { %v4283_v62 = vrot.slane %v4282_v58, 4 }
0x1db4   :  { %v4284_v50 = vadd.f32 %v4283_v62, %v4282_v58  ;;  %v4277_v26 = vpop.f32.mrf.mxu3 }
0x1db5   :  { %v4278_v44 = vadd.f32 %v4277_v26, %v4250_v22 }
0x1db6   :  { %v4285_v3 = vrot.slane %v4284_v50, 2 }
0x1db7   :  { %v4281_v38 = vadd.f32 %v4278_v44, %v7445_v27 }
0x1db8   :  { %v4286_v18 = vadd.f32 %v4285_v3, %v4284_v50 }
0x1db9   :  { %v4289_v52 = vsel %vm274_vm0, %v4281_v38, 0.0 }
0x1dba   :  { %v4287_v37 = vrot.slane %v4286_v18, 1  ;;  %v4290_v30 = vrot.slane %v4289_v52, 4 }
0x1dbc   :  { %v4288_v35 = vadd.f32 %v4287_v37, %v4286_v18  ;;  %v4291_v29 = vadd.f32 %v4290_v30, %v4289_v52  ;;  %v8346_v54 = vpop.f32.mrf.mxu3 }
0x1dbd   :  { %v4549_v27 = vpack.c.bf16 %v8346_v54, %v8346_v54 }
0x1dbe   :  { %v4296_v25 = vmul.f32 %v4288_v35, %v7409_v17  ;;  %v4292_v39 = vrot.slane %v4291_v29, 2 }
0x1dbf   :  { %v8357_v59 = vunpack.c.l.b16 %v4549_v27 }
0x1dc0   :  { %v4298_v24 = vsub.f32 %v4280_v48, %v4296_v25  ;;  %v4293_v15 = vadd.f32 %v4292_v39, %v4291_v29  ;;  %v4342_v29 = vperm.slane %v8339_v46, 1 }
0x1dc2   :  { %v4300_v10 = vmul.f32 %v4298_v24, %v4298_v24  ;;  %v4294_v1 = vrot.slane %v4293_v15, 1 }
0x1dc4   :  { %v4302_v60 = vsel %vm274_vm0, %v4300_v10, 0.0  ;;  %v4295_v7 = vadd.f32 %v4294_v1, %v4293_v15  ;;  %v8352_v21 = vpop.f32.mrf.mxu3  ;;  %v4345_v10 = vperm.slane %v8339_v46, 2 }
0x1dc5   :  { %v4303_v0 = vrot.slane %v4302_v60, 4  ;;  %v4550_v20 = vpack.c.bf16 %v8352_v21, %v8352_v21 }
0x1dc6   :  { %v4297_v57 = vmul.f32 %v4295_v7, %v7409_v17 }
0x1dc7   :  { %v4304_v63 = vadd.f32 %v4303_v0, %v4302_v60  ;;  %v8359_v47 = vunpack.c.l.b16 %v4550_v20  ;;  %v5938_v20 = vld [vmem:[%s8731_s5 + $0x80] sm:$0xff] }
0x1dc8   :  { %v4299_v31 = vsub.f32 %v4281_v38, %v4297_v57  ;;  %v5939_v57 = vld [vmem:[%s8731_s5 + $0x88] sm:$0xff] }
0x1dc9   :  { %v4305_v12 = vrot.slane %v4304_v63, 2  ;;  %v4609_v53 = vpack.c.b16 %v8359_v47, %v8357_v59 }
0x1dca   :  { %v4301_v14 = vmul.f32 %v4299_v31, %v4299_v31 }
0x1dcb   :  { %v4306_v16 = vadd.f32 %v4305_v12, %v4304_v63 }
0x1dcc   :  { %v4309_v43 = vsel %vm274_vm0, %v4301_v14, 0.0  ;;  %v4481_v46 = vpop.f32.mrf.mxu3 }
0x1dcd   :  { %v4307_v42 = vrot.slane %v4306_v16, 1  ;;  %v4310_v2 = vrot.slane %v4309_v43, 4 }
0x1dcf   :  { %v4308_v61 = vadd.f32 %v4307_v42, %v4306_v16  ;;  %v4311_v8 = vadd.f32 %v4310_v2, %v4309_v43 }
0x1dd1   :  { %v4316_v32 = vmul.f32 %v4308_v61, %v7409_v17  ;;  %v4312_v28 = vrot.slane %v4311_v8, 2  ;;  %v4489_v61 = vpop.permute.xlu0 %4488 }
0x1dd2   :  { %4501 = vmatpush.bf16.msra.mxu0 %v4489_v61 }
0x1dd3   :  { %v4318_v45 = vadd.f32 1e-05, %v4316_v32  ;;  %v4313_v4 = vadd.f32 %v4312_v28, %v4311_v8 }
0x1dd5   :  { %6606 = vrsqrt.f32 %v4318_v45  ;;  %v4314_v13 = vrot.slane %v4313_v4, 1  ;;  %vm4326_vm14 = vweird.f32 %v4318_v45 }
0x1dd7   :  { %v4315_v22 = vadd.f32 %v4314_v13, %v4313_v4 }
0x1dd9   :  { %v4317_v23 = vmul.f32 %v4315_v22, %v7409_v17  ;;  %v4487_v8 = vpop.permute.xlu0 %4486 }
0x1dda   :  { %4502 = vmatpush.bf16.msra.mxu0 %v4487_v8 }
0x1ddb   :  { %v6607_v48 = vpop.eup %6606  ;;  %v4319_v58 = vadd.f32 1e-05, %v4317_v23  ;;  %v6274_v23 = vpack.i.bf16 %v8352_v21, %v8346_v54 }
0x1ddc   :  { %v4321_v62 = vmul.f32 %v6607_v48, %v4318_v45  ;;  %vm4327_vm13 = vweird.f32 %v6607_v48 }
0x1ddd   :  { %6608 = vrsqrt.f32 %v4319_v58  ;;  %vm4328_vm15 = vmor %vm4326_vm14, %vm4327_vm13  ;;  %vm4336_vm3 = vweird.f32 %v4319_v58 }
0x1dde   :  { %v4322_v50 = vmul.f32 %v6607_v48, %v4321_v62 }
0x1de0   :  { %v4323_v26 = vmul.f32 0.5, %v4322_v50 }
0x1de2   :  { %v4324_v44 = vsub.f32 1.5, %v4323_v26 }
0x1de3   :  { %v6609_v3 = vpop.eup %6608 }
0x1de4   :  { %v4325_v38 = vmul.f32 %v6607_v48, %v4324_v44  ;;  %v4331_v18 = vmul.f32 %v6609_v3, %v4319_v58  ;;  %vm4337_vm2 = vweird.f32 %v6609_v3 }
0x1de5   :  { %vm4338_vm4 = vmor %vm4336_vm3, %vm4337_vm2 }
0x1de6   :  { %v4332_v52 = vmul.f32 %v6609_v3, %v4331_v18  ;;  %v4329_v37 = vsel %vm4328_vm15, %v6607_v48, %v4325_v38  ;;  %v4483_v48 = vpop.f32.mrf.mxu3 }
0x1de7   :  { %v4340_v17 = vmul.f32 %v4329_v37, %v4298_v24  ;;  %v5940_v24 = vld [vmem:[%s8731_s5 + $0x90] sm:$0xff]  ;;  %v6289_v58 = vpack.i.bf16 %v4483_v48, %v4481_v46 }
0x1de8   :  { %v4333_v30 = vmul.f32 0.5, %v4332_v52  ;;  %4417 = vmatpush.bf16.msra.mxu1 %v5940_v24 }
0x1de9   :  { %v4343_v15 = vmul.f32 %v4342_v29, %v4340_v17 }
0x1dea   :  { %v4334_v35 = vsub.f32 1.5, %v4333_v30 }
0x1deb   :  { %v4346_v7 = vadd.f32 %v4345_v10, %v4343_v15 }
0x1dec   :  { %v4335_v25 = vmul.f32 %v6609_v3, %v4334_v35  ;;  %4418 = vmatpush.bf16.msra.mxu1 %v5939_v57 }
0x1dee   :  { %v4339_v39 = vsel %vm4338_vm4, %v6609_v3, %v4335_v25 }
0x1def   :  { %v4341_v1 = vmul.f32 %v4339_v39, %v4299_v31  ;;  %v6328_v31 = vld [vmem:[%s8733_s7 + $0x4] ss:$0 sm:$0xff] }
0x1df0   :  { %4419 = vmatpush.bf16.msra.mxu1 %v5938_v20 }
0x1df1   :  { %v4344_v60 = vmul.f32 %v4342_v29, %v4341_v1 }
0x1df3   :  { %v4347_v27 = vadd.f32 %v4345_v10, %v4344_v60 }
0x1df5   :  { %v4348_v0 = vpack.c.bf16 %v4347_v27, %v4346_v7 }
0x1df7   :  { %5788 = vmatmul.msk.bf16.vlgmr.msrb.gmra.mxu0 %vm274_vm0, %v4348_v0 }
0x1e74   :  { %v4376_v63 = vpop.f32.mrf.mxu0 }
0x1e75   :  { %v4377_v12 = vadd.f32 %v6328_v31, %v4376_v63 }
0x1e77   :  { %v4381_v43 = vmax.f32 %v4377_v12, 0.0  ;;  %v4558_v12 = vpack.c.bf16 %v4483_v48, %v4483_v48 }
0x1e7c   :  { %v4378_v14 = vpop.f32.mrf.mxu0 }
0x1e7d   :  { %v4379_v16 = vadd.f32 %v6328_v31, %v4378_v14 }
0x1e7f   :  { %v4382_v42 = vmax.f32 %v4379_v16, 0.0  ;;  %v4557_v16 = vpack.c.bf16 %v4481_v46, %v4481_v46 }
0x1e81   :  { %v4383_v2 = vpack.c.bf16 %v4382_v42, %v4381_v43  ;;  %v4679_v42 = vunpack.c.l.b16 %v4558_v12 }
0x1e83   :  { %5805 = vmatmul.msk.bf16.vlgmr.msra.gmra.mxu1 %vm519_vm6, %v4383_v2  ;;  %v4678_v2 = vunpack.c.l.b16 %v4557_v16 }
0x1e85   :  { %v4686_v61 = vpack.c.b16 %v4679_v42, %v4678_v2 }
0x1f00   :  { %v4421_v32 = vpop.f32.mrf.mxu1 }
0x1f01   :  { %v4422_v28 = vadd.f32 %v4421_v32, %v4384_v56 }
0x1f03   :  { %5375 = vst.msk [vmem:[#allocation7] sm:$0xff] %vm274_vm0, %v4422_v28 }
0x1f08   :  { %v4423_v45 = vpop.f32.mrf.mxu1 }
0x1f09   :  { %v4424_v4 = vadd.f32 %v4423_v45, %v4384_v56 }
0x1f0b   :  { %v4454_v36 = vpack.c.bf16 %v4424_v4, %v4422_v28  ;;  %5376 = vst.msk [vmem:[#allocation7 + $0x18] sm:$0xff] %vm274_vm0, %v4424_v4 }
0x1f0d   :  { %5837 = vmatmul.msk.bf16.vlgmr.msra.gmra.mxu0 %vm274_vm0, %v4454_v36 }
0x1f8a   :  { %v4504_v13 = vpop.f32.mrf.mxu0 }
0x1f8b   :  { %4579 = vrot.lane.b32.xlu2 %v4504_v13, %s6767_s22  ;;  %v4585_v15 = vpack.c.bf16 %v4504_v13, %v4504_v13 }
0x1f8d   :  { %v4617_v24 = vunpack.c.l.b16 %v4585_v15 }
0x1f92   :  { %v4506_v22 = vpop.f32.mrf.mxu0 }
0x1f93   :  { %v6259_v41 = vpack.i.bf16 %v4506_v22, %v4504_v13  ;;  %4569 = vrot.lane.b32.xlu2 %v4506_v22, %s6766_s21  ;;  %4581 = vrot.lane.b32.xlu0 %v4506_v22, %s6767_s22  ;;  %v4589_v10 = vpack.c.bf16 %v4506_v22, %v4506_v22 }
0x1f95   :  { %6260 = vrot.lane.b32.xlu1 %v6259_v41, %s6768_s23  ;;  %v4694_v20 = vunpack.c.l.b16 %v4589_v10 }
0x1f9b   :  { %6275 = vrot.lane.b32.xlu2 %v6274_v23, %s6768_s23  ;;  %6265 = vrot.lane.b32.xlu0 %v6274_v23, %s6766_s21 }
0x1f9d   :  { %4567 = vrot.lane.b32.xlu1 %v4504_v13, %s6766_s21 }
0x1fa3   :  { %6290 = vrot.lane.b32.xlu2 %v6289_v58, %s6767_s22  ;;  %6280 = vrot.lane.b32.xlu0 %v6289_v58, %s6768_s23 }
0x1fa5   :  { %6270 = vrot.lane.b32.xlu1 %v6289_v58, %s6766_s21 }
0x1fad   :  { %6285 = vrot.lane.b32.xlu1 %v6274_v23, %s6767_s22 }
0x1fe5   :  { %v4580_v62 = vpop.permute.xlu2 %4579 }
0x1fe6   :  { %v4588_v54 = vpack.c.bf16 %v4580_v62, %v4580_v62 }
0x1fe8   :  { %v4620_v37 = vunpack.c.l.b16 %v4588_v54 }
0x1fed   :  { %v4570_v38 = vpop.permute.xlu2 %4569 }
0x1fee   :  { %v4590_v29 = vpack.c.bf16 %v4570_v38, %v4570_v38 }
0x1ff0   :  { %v4695_v27 = vunpack.c.l.b16 %v4590_v29 }
0x1ff2   :  { %v8418_v31 = vpack.c.b16 %v4695_v27, %v4694_v20 }
0x1ff4   :  { %v4713_v43 = vsel %vm384_vm1, %v8418_v31, 0 }
0x2005   :  { %v4582_v50 = vpop.permute.xlu0 %4581 }
0x2006   :  { %v4592_v21 = vpack.c.bf16 %v4582_v50, %v4582_v50  ;;  %v6276_v50 = vpop.permute.xlu2 %6275 }
0x2007   :  { %v6261_v26 = vpop.permute.xlu1 %6260  ;;  %v6278_v47 = vunpack.i.h.bf16 %v6276_v50 }
0x2008   :  { %v6263_v44 = vunpack.i.h.bf16 %v6261_v26  ;;  %v6262_v3 = vunpack.i.l.bf16 %v6261_v26  ;;  %v4697_v30 = vunpack.c.l.b16 %v4592_v21 }
0x200a   :  { %v4591_v18 = vpack.c.bf16 %v6263_v44, %v6263_v44  ;;  %v4587_v52 = vpack.c.bf16 %v6262_v3, %v6262_v3  ;;  %v4554_v44 = vpack.c.bf16 %v6278_v47, %v6278_v47 }
0x200c   :  { %v4696_v35 = vunpack.c.l.b16 %v4591_v18  ;;  %v4619_v17 = vunpack.c.l.b16 %v4587_v52  ;;  %v4606_v52 = vunpack.c.l.b16 %v4554_v44 }
0x200d   :  { %v6266_v8 = vpop.permute.xlu0 %6265 }
0x200e   :  { %v8408_v25 = vpack.c.b16 %v4697_v30, %v4696_v35  ;;  %v8410_v39 = vpack.c.b16 %v4620_v37, %v4619_v17  ;;  %v6268_v32 = vunpack.i.h.bf16 %v6266_v8  ;;  %v6267_v28 = vunpack.i.l.bf16 %v6266_v8  ;;  %v6291_v10 = vpop.permute.xlu2 %6290 }
0x200f   :  { %v4568_v1 = vpop.permute.xlu1 %4567  ;;  %v6292_v27 = vunpack.i.l.bf16 %v6291_v10 }
0x2010   :  { %v4586_v60 = vpack.c.bf16 %v4568_v1, %v4568_v1  ;;  %v4639_v7 = vsel %vm384_vm1, %v8410_v39, 0  ;;  %v4716_v0 = vsel %vm384_vm1, %v8408_v25, 0  ;;  %v4552_v36 = vpack.c.bf16 %v6268_v32, %v6268_v32 }
0x2011   :  { %4647 = vmatpush.bf16.xpose.msrb.mxu1 %v4639_v7  ;;  %4724 = vmatpush.bf16.xpose.msra.mxu2 %v4716_v0  ;;  %v4551_v13 = vpack.c.bf16 %v6267_v28, %v6267_v28  ;;  %v6293_v7 = vunpack.i.h.bf16 %v6291_v10  ;;  %v4563_v20 = vpack.c.bf16 %v6292_v27, %v6292_v27 }
0x2012   :  { %v4618_v57 = vunpack.c.l.b16 %v4586_v60  ;;  %v4604_v46 = vunpack.c.l.b16 %v4552_v36 }
0x2013   :  { %v4603_v23 = vunpack.c.l.b16 %v4551_v13 }
0x2014   :  { %v8416_v63 = vpack.c.b16 %v4618_v57, %v4617_v24  ;;  %v4564_v57 = vpack.c.bf16 %v6293_v7, %v6293_v7 }
0x2015   :  { %v4610_v62 = vpack.c.b16 %v4604_v46, %v4603_v23  ;;  %v6281_v59 = vpop.permute.xlu0 %6280 }
0x2016   :  { %v4636_v14 = vsel %vm384_vm1, %v8416_v63, 0  ;;  %v6283_v54 = vunpack.i.h.bf16 %v6281_v59  ;;  %v6282_v21 = vunpack.i.l.bf16 %v6281_v59  ;;  %v4685_v16 = vunpack.c.l.b16 %v4564_v57 }
0x2017   :  { %v6271_v56 = vpop.permute.xlu1 %6270 }
0x2018   :  { %v6273_v45 = vunpack.i.h.bf16 %v6271_v56  ;;  %v6272_v4 = vunpack.i.l.bf16 %v6271_v56  ;;  %v4562_v38 = vpack.c.bf16 %v6283_v54, %v6283_v54  ;;  %v4561_v18 = vpack.c.bf16 %v6282_v21, %v6282_v21 }
0x2019   :  { %4648 = vmatpush.bf16.xpose.msrb.mxu1 %v4636_v14  ;;  %4725 = vmatpush.bf16.xpose.msra.mxu2 %v4713_v43  ;;  %v4684_v43 = vunpack.c.l.b16 %v4563_v20 }
0x201a   :  { %v4560_v22 = vpack.c.bf16 %v6273_v45, %v6273_v45  ;;  %v4559_v41 = vpack.c.bf16 %v6272_v4, %v6272_v4  ;;  %v4683_v30 = vunpack.c.l.b16 %v4562_v38  ;;  %v4682_v35 = vunpack.c.l.b16 %v4561_v18 }
0x201b   :  { %v4689_v2 = vpack.c.b16 %v4685_v16, %v4684_v43 }
0x201c   :  { %v4681_v48 = vunpack.c.l.b16 %v4560_v22  ;;  %v4680_v58 = vunpack.c.l.b16 %v4559_v41  ;;  %v4688_v29 = vpack.c.b16 %v4683_v30, %v4682_v35 }
0x201e   :  { %v4687_v26 = vpack.c.b16 %v4681_v48, %v4680_v58 }
0x201f   :  { %v6286_v15 = vpop.permute.xlu1 %6285 }
0x2020   :  { %5838 = vmatmul.msk.bf16.vlgmr.msrb.gmra.mxu1 %vm384_vm1, %v4609_v53  ;;  %5842 = vmatmul.msk.bf16.vlgmr.msra.gmra.mxu2 %vm384_vm1, %v4686_v61  ;;  %v6277_v53 = vunpack.i.l.bf16 %v6276_v50  ;;  %v6288_v1 = vunpack.i.h.bf16 %v6286_v15  ;;  %v6287_v60 = vunpack.i.l.bf16 %v6286_v15 }
0x2022   :  { %v4553_v3 = vpack.c.bf16 %v6277_v53, %v6277_v53  ;;  %v4556_v0 = vpack.c.bf16 %v6288_v1, %v6288_v1  ;;  %v4555_v24 = vpack.c.bf16 %v6287_v60, %v6287_v60 }
0x2024   :  { %v4605_v37 = vunpack.c.l.b16 %v4553_v3  ;;  %v4608_v12 = vunpack.c.l.b16 %v4556_v0  ;;  %v4607_v14 = vunpack.c.l.b16 %v4555_v24 }
0x2026   :  { %v4611_v17 = vpack.c.b16 %v4606_v52, %v4605_v37  ;;  %v4612_v42 = vpack.c.b16 %v4608_v12, %v4607_v14 }
0x2030   :  { %5839 = vmatmul.msk.bf16.gmra.mxu1 %vm384_vm1, %v4610_v62  ;;  %5843 = vmatmul.msk.bf16.gmra.mxu2 %vm384_vm1, %v4687_v26 }
0x2040   :  { %5840 = vmatmul.msk.bf16.gmra.mxu1 %vm384_vm1, %v4611_v17  ;;  %5844 = vmatmul.msk.bf16.gmra.mxu2 %vm384_vm1, %v4688_v29 }
0x2050   :  { %5841 = vmatmul.msk.bf16.gmra.mxu1 %vm384_vm1, %v4612_v42  ;;  %5845 = vmatmul.msk.bf16.gmra.mxu2 %vm384_vm1, %v4689_v2 }
0x209d   :  { %v4650_v61 = vpop.f32.mrf.mxu1 }
0x209e   :  { %v4651_v8 = vadd.f32 %v4650_v61, %v7511_v34 }
0x20a0   :  { %v8437_v56 = vadd.f32 %v4651_v8, %v7513_v33 }
0x20a2   :  { %v4763_v32 = vsel %vm274_vm0, %v8437_v56, -inf }
0x20a3   :  { %4764 = vmax.xlane.f32.xlu0 %v4763_v32  ;;  %v4727_v28 = vpop.f32.mrf.mxu2 }
0x20a4   :  { %v4728_v45 = vadd.f32 %v4727_v28, %v7511_v34 }
0x20a5   :  { %v4652_v4 = vpop.f32.mrf.mxu1 }
0x20a6   :  { %v4653_v36 = vadd.f32 %v4652_v4, %v7511_v34  ;;  %v8444_v13 = vadd.f32 %v4728_v45, %v7532_v11 }
0x20a8   :  { %v8447_v22 = vadd.f32 %v4653_v36, %v7513_v33  ;;  %v4787_v41 = vsel %vm274_vm0, %v8444_v13, -inf }
0x20a9   :  { %4788 = vmax.xlane.f32.xlu2 %v4787_v41 }
0x20aa   :  { %v4766_v46 = vsel %vm274_vm0, %v8447_v22, -inf }
0x20ab   :  { %4767 = vmax.xlane.f32.xlu1 %v4766_v46  ;;  %v4729_v23 = vpop.f32.mrf.mxu2 }
0x20ac   :  { %v4730_v48 = vadd.f32 %v4729_v23, %v7511_v34 }
0x20ad   :  { %v4655_v58 = vpop.f32.mrf.mxu1 }
0x20ae   :  { %v4656_v62 = vadd.f32 %v4655_v58, %v7530_v40  ;;  %v8456_v50 = vadd.f32 %v4730_v48, %v7532_v11 }
0x20b0   :  { %v8459_v26 = vadd.f32 %v4656_v62, %v7513_v33  ;;  %v4790_v59 = vsel %vm274_vm0, %v8456_v50, -inf }
0x20b1   :  { %4791 = vmax.xlane.f32.xlu0 %v4790_v59 }
0x20b2   :  { %v4769_v47 = vsel %vm274_vm0, %v8459_v26, -inf }
0x20b3   :  { %4770 = vmax.xlane.f32.xlu2 %v4769_v47  ;;  %v4732_v53 = vpop.f32.mrf.mxu2 }
0x20b4   :  { %v4733_v34 = vadd.f32 %v4732_v53, %v7530_v40 }
0x20b5   :  { %v4657_v54 = vpop.f32.mrf.mxu1 }
0x20b6   :  { %v4658_v21 = vadd.f32 %v4657_v54, %v7530_v40  ;;  %v8468_v44 = vadd.f32 %v4733_v34, %v7532_v11 }
0x20b8   :  { %v8471_v3 = vadd.f32 %v4658_v21, %v7513_v33  ;;  %v4793_v38 = vsel %vm274_vm0, %v8468_v44, -inf }
0x20b9   :  { %4794 = vmax.xlane.f32.xlu0 %v4793_v38 }
0x20ba   :  { %v4772_v18 = vsel %vm274_vm0, %v8471_v3, -inf }
0x20bb   :  { %4773 = vmax.xlane.f32.xlu1 %v4772_v18  ;;  %v4734_v52 = vpop.f32.mrf.mxu2 }
0x20bc   :  { %v4735_v37 = vadd.f32 %v4734_v52, %v7530_v40 }
0x20bd   :  { %v4660_v30 = vpop.f32.mrf.mxu1 }
0x20be   :  { %v4661_v35 = vadd.f32 %v4660_v30, %v7560_v5  ;;  %v8480_v17 = vadd.f32 %v4735_v37, %v7532_v11 }
0x20c0   :  { %v8483_v29 = vadd.f32 %v4661_v35, %v7513_v33  ;;  %v4796_v15 = vsel %vm274_vm0, %v8480_v17, -inf }
0x20c1   :  { %4797 = vmax.xlane.f32.xlu2 %v4796_v15 }
0x20c2   :  { %v4775_v10 = vsel %vm274_vm0, %v8483_v29, -inf }
0x20c3   :  { %4776 = vmax.xlane.f32.xlu1 %v4775_v10  ;;  %v4737_v1 = vpop.f32.mrf.mxu2 }
0x20c4   :  { %v4738_v40 = vadd.f32 %v4737_v1, %v7560_v5 }
0x20c5   :  { %v4662_v60 = vpop.f32.mrf.mxu1 }
0x20c6   :  { %v4663_v7 = vadd.f32 %v4662_v60, %v7560_v5  ;;  %v8492_v27 = vadd.f32 %v4738_v40, %v7532_v11 }
0x20c8   :  { %v8495_v0 = vadd.f32 %v4663_v7, %v7513_v33  ;;  %v4799_v24 = vsel %vm274_vm0, %v8492_v27, -inf }
0x20c9   :  { %4800 = vmax.xlane.f32.xlu2 %v4799_v24 }
0x20ca   :  { %v4778_v57 = vsel %vm274_vm0, %v8495_v0, -inf }
0x20cb   :  { %4779 = vmax.xlane.f32.xlu0 %v4778_v57  ;;  %v4739_v20 = vpop.f32.mrf.mxu2 }
0x20cc   :  { %v4740_v12 = vadd.f32 %v4739_v20, %v7560_v5 }
0x20cd   :  { %v4665_v14 = vpop.f32.mrf.mxu1 }
0x20ce   :  { %v4666_v16 = vadd.f32 %v4665_v14, %v7588_v9  ;;  %v8504_v43 = vadd.f32 %v4740_v12, %v7532_v11 }
0x20d0   :  { %v8507_v42 = vadd.f32 %v4666_v16, %v7513_v33  ;;  %v4802_v2 = vsel %vm274_vm0, %v8504_v43, -inf }
0x20d1   :  { %4803 = vmax.xlane.f32.xlu1 %v4802_v2 }
0x20d2   :  { %v4781_v61 = vsel %vm274_vm0, %v8507_v42, -inf }
0x20d3   :  { %4782 = vmax.xlane.f32.xlu0 %v4781_v61  ;;  %v4742_v8 = vpop.f32.mrf.mxu2 }
0x20d4   :  { %v4743_v45 = vadd.f32 %v4742_v8, %v7588_v9 }
0x20d5   :  { %v4667_v32 = vpop.f32.mrf.mxu1 }
0x20d6   :  { %v4668_v5 = vadd.f32 %v4667_v32, %v7588_v9  ;;  %v8522_v46 = vadd.f32 %v4743_v45, %v7532_v11 }
0x20d8   :  { %v8515_v28 = vadd.f32 %v4668_v5, %v7513_v33  ;;  %v4805_v33 = vsel %vm274_vm0, %v8522_v46, -inf }
0x20da   :  { %v4784_v4 = vsel %vm274_vm0, %v8515_v28, -inf }
0x20db   :  { %4785 = vmax.xlane.f32.xlu2 %v4784_v4  ;;  %v4744_v36 = vpop.f32.mrf.mxu2 }
0x20dc   :  { %v4745_v41 = vadd.f32 %v4744_v36, %v7588_v9 }
0x20de   :  { %v8525_v23 = vadd.f32 %v4745_v41, %v7532_v11 }
0x20e0   :  { %v4808_v48 = vsel %vm274_vm0, %v8525_v23, -inf }
0x20e1   :  { %4809 = vmax.xlane.f32.xlu1 %v4808_v48 }
0x20e3   :  { %4806 = vmax.xlane.f32.xlu2 %v4805_v33 }
0x20fb   :  { %4975 = vrot.lane.b32.xlu2 %v8416_v63, %s6769_s24 }
0x2116   :  { %v4765_v58 = vpop.xlane.xlu0 %4764 }
0x2117   :  { %v4811_v9 = vsub.f32 %v8437_v56, %v4765_v58 }
0x2119   :  { %v4827_v62 = vmul.f32 1.442695, %v4811_v9 }
0x211b   :  { %6610 = vpow2.f32 %v4827_v62 }
0x211c   :  { %v4789_v59 = vpop.xlane.xlu2 %4788 }
0x211d   :  { %v4819_v11 = vsub.f32 %v8444_v13, %v4789_v59 }
0x211e   :  { %v4768_v47 = vpop.xlane.xlu1 %4767 }
0x211f   :  { %v4812_v53 = vsub.f32 %v8447_v22, %v4768_v47  ;;  %v4843_v34 = vmul.f32 1.442695, %v4819_v11 }
0x2121   :  { %v8536_v54 = vpop.eup %6610  ;;  %v4829_v21 = vmul.f32 1.442695, %v4812_v53  ;;  %6612 = vpow2.f32 %v4843_v34 }
0x2122   :  { %v4859_v38 = vsel %vm274_vm0, %v8536_v54, 0.0 }
0x2123   :  { %6614 = vpow2.f32 %v4829_v21  ;;  %4860 = vadd.xlane.f32.xlu1 %v4859_v38 }
0x2124   :  { %v4792_v63 = vpop.xlane.xlu0 %4791 }
0x2125   :  { %v4820_v22 = vsub.f32 %v8456_v50, %v4792_v63 }
0x2126   :  { %v4771_v56 = vpop.xlane.xlu2 %4770 }
0x2127   :  { %v4813_v18 = vsub.f32 %v8459_v26, %v4771_v56  ;;  %v8541_v52 = vpop.eup %6612  ;;  %v4845_v15 = vmul.f32 1.442695, %v4820_v22 }
0x2128   :  { %v4883_v30 = vsel %vm274_vm0, %v8541_v52, 0.0 }
0x2129   :  { %v8543_v13 = vpop.eup %6614  ;;  %v4831_v37 = vmul.f32 1.442695, %v4813_v18  ;;  %4884 = vadd.xlane.f32.xlu2 %v4883_v30 }
0x212a   :  { %v4862_v35 = vsel %vm274_vm0, %v8543_v13, 0.0 }
0x212b   :  { %6616 = vpow2.f32 %v4831_v37  ;;  %4863 = vadd.xlane.f32.xlu0 %v4862_v35 }
0x212c   :  { %6618 = vpow2.f32 %v4845_v15  ;;  %v4795_v24 = vpop.xlane.xlu0 %4794 }
0x212d   :  { %v4821_v12 = vsub.f32 %v8468_v44, %v4795_v24 }
0x212e   :  { %v4774_v60 = vpop.xlane.xlu1 %4773 }
0x212f   :  { %v4814_v20 = vsub.f32 %v8471_v3, %v4774_v60  ;;  %v4847_v2 = vmul.f32 1.442695, %v4821_v12 }
0x2131   :  { %v8550_v10 = vpop.eup %6616  ;;  %v4833_v14 = vmul.f32 1.442695, %v4814_v20 }
0x2132   :  { %v4865_v26 = vsel %vm274_vm0, %v8550_v10, 0.0  ;;  %v8554_v1 = vpop.eup %6618 }
0x2133   :  { %4866 = vadd.xlane.f32.xlu1 %v4865_v26  ;;  %v4886_v50 = vsel %vm274_vm0, %v8554_v1, 0.0  ;;  %6620 = vpow2.f32 %v4833_v14 }
0x2134   :  { %v4798_v40 = vpop.xlane.xlu2 %4797  ;;  %6622 = vpow2.f32 %v4847_v2 }
0x2135   :  { %v4822_v41 = vsub.f32 %v8480_v17, %v4798_v40 }
0x2136   :  { %v4777_v57 = vpop.xlane.xlu1 %4776 }
0x2137   :  { %v4849_v9 = vmul.f32 1.442695, %v4822_v41 }
0x2139   :  { %v8568_v5 = vpop.eup %6620 }
0x213a   :  { %v8570_v4 = vpop.eup %6622  ;;  %v4868_v3 = vsel %vm274_vm0, %v8568_v5, 0.0 }
0x213b   :  { %4887 = vadd.xlane.f32.xlu1 %v4886_v50 }
0x213c   :  { %v4801_v7 = vpop.xlane.xlu2 %4800 }
0x213e   :  { %v4780_v32 = vpop.xlane.xlu0 %4779 }
0x213f   :  { %4977 = vrot.lane.b32.xlu0 %v8410_v39, %s6769_s24  ;;  %v4815_v39 = vsub.f32 %v8483_v29, %v4777_v57  ;;  %v4816_v44 = vsub.f32 %v8495_v0, %v4780_v32  ;;  %v4823_v0 = vsub.f32 %v8492_v27, %v4801_v7 }
0x2141   :  { %5042 = vrot.lane.b32.xlu2 %v8418_v31, %s6769_s24  ;;  %v4835_v8 = vmul.f32 1.442695, %v4815_v39  ;;  %v4837_v36 = vmul.f32 1.442695, %v4816_v44  ;;  %v4851_v59 = vmul.f32 1.442695, %v4823_v0 }
0x2143   :  { %6624 = vpow2.f32 %v4835_v8 }
0x2144   :  { %v4804_v61 = vpop.xlane.xlu1 %4803 }
0x2145   :  { %v4824_v31 = vsub.f32 %v8504_v43, %v4804_v61  ;;  %v4889_v43 = vsel %vm274_vm0, %v8570_v4, 0.0 }
0x2146   :  { %v4783_v17 = vpop.xlane.xlu0 %4782 }
0x2147   :  { %v4817_v27 = vsub.f32 %v8507_v42, %v4783_v17 }
0x2149   :  { %v8579_v48 = vpop.eup %6624  ;;  %v4839_v56 = vmul.f32 1.442695, %v4817_v27 }
0x214e   :  { %v4786_v16 = vpop.xlane.xlu2 %4785 }
0x214f   :  { %v4818_v11 = vsub.f32 %v8515_v28, %v4786_v16 }
0x2151   :  { %v4841_v34 = vmul.f32 1.442695, %v4818_v11 }
0x2154   :  { %5044 = vrot.lane.b32.xlu1 %v8408_v25, %s6769_s24  ;;  %v4853_v25 = vmul.f32 1.442695, %v4824_v31  ;;  %v4810_v28 = vpop.xlane.xlu1 %4809 }
0x2155   :  { %v4826_v42 = vsub.f32 %v8525_v23, %v4810_v28 }
0x2156   :  { %v4807_v45 = vpop.xlane.xlu2 %4806  ;;  %6626 = vpow2.f32 %v4853_v25 }
0x2157   :  { %v4825_v29 = vsub.f32 %v8522_v46, %v4807_v45  ;;  %6628 = vpow2.f32 %v4837_v36  ;;  %v4871_v46 = vsel %vm274_vm0, %v8579_v48, 0.0  ;;  %v4857_v35 = vmul.f32 1.442695, %v4826_v42 }
0x2159   :  { %v4855_v33 = vmul.f32 1.442695, %v4825_v29 }
0x215b   :  { %6630 = vpow2.f32 %v4855_v33 }
0x215c   :  { %v8581_v58 = vpop.eup %6626  ;;  %6632 = vpow2.f32 %v4849_v9 }
0x215d   :  { %v4898_v62 = vsel %vm274_vm0, %v8581_v58, 0.0  ;;  %v8589_v47 = vpop.eup %6628  ;;  %6634 = vpow2.f32 %v4851_v59 }
0x215e   :  { %v4874_v21 = vsel %vm274_vm0, %v8589_v47, 0.0  ;;  %6636 = vpow2.f32 %v4841_v34  ;;  %v4976_v16 = vpop.permute.xlu2 %4975 }
0x215f   :  { %6638 = vpow2.f32 %v4839_v56 }
0x2160   :  { %6640 = vpow2.f32 %v4857_v35 }
0x2161   :  { %v8591_v53 = vpop.eup %6630 }
0x2162   :  { %v8596_v38 = vpop.eup %6632  ;;  %v4901_v63 = vsel %vm274_vm0, %v8591_v53, 0.0 }
0x2163   :  { %v8600_v18 = vpop.eup %6634  ;;  %v4892_v22 = vsel %vm274_vm0, %v8596_v38, 0.0 }
0x2164   :  { %v4895_v37 = vsel %vm274_vm0, %v8600_v18, 0.0  ;;  %v8607_v30 = vpop.eup %6636 }
0x2165   :  { %v8609_v15 = vpop.eup %6638  ;;  %v4880_v26 = vsel %vm274_vm0, %v8607_v30, 0.0 }
0x2166   :  { %v4877_v50 = vsel %vm274_vm0, %v8609_v15, 0.0  ;;  %v8615_v40 = vpop.eup %6640 }
0x2167   :  { %v4904_v23 = vsel %vm274_vm0, %v8615_v40, 0.0 }
0x2169   :  { %4869 = vadd.xlane.f32.xlu0 %v4868_v3 }
0x216a   :  { %4890 = vadd.xlane.f32.xlu2 %v4889_v43 }
0x2171   :  { %4872 = vadd.xlane.f32.xlu0 %v4871_v46 }
0x2172   :  { %4899 = vadd.xlane.f32.xlu2 %v4898_v62 }
0x2179   :  { %4875 = vadd.xlane.f32.xlu0 %v4874_v21 }
0x217a   :  { %4902 = vadd.xlane.f32.xlu2 %v4901_v63 }
0x217e   :  { %4893 = vadd.xlane.f32.xlu1 %v4892_v22 }
0x2181   :  { %4896 = vadd.xlane.f32.xlu0 %v4895_v37 }
0x2186   :  { %4881 = vadd.xlane.f32.xlu1 %v4880_v26 }
0x2189   :  { %4878 = vadd.xlane.f32.xlu0 %v4877_v50 }
0x2191   :  { %4905 = vadd.xlane.f32.xlu0 %v4904_v23 }
0x2196   :  { %v4861_v7 = vpop.xlane.xlu1 %4860 }
0x219c   :  { %v4885_v25 = vpop.xlane.xlu2 %4884 }
0x219e   :  { %v4864_v60 = vpop.xlane.xlu0 %4863 }
0x219f   :  { %6642 = vrcp.f32 %v4864_v60 }
0x21a0   :  { %6644 = vrcp.f32 %v4861_v7 }
0x21a4   :  { %v5043_v0 = vpop.permute.xlu2 %5042 }
0x21a5   :  { %v6643_v24 = vpop.eup %6642 }
0x21a6   :  { %v6645_v57 = vpop.eup %6644  ;;  %v4867_v20 = vpop.xlane.xlu1 %4866  ;;  %v4924_v12 = vmul.f32 %v6643_v24, %v8543_v13 }
0x21a7   :  { %v4923_v14 = vmul.f32 %v6645_v57, %v8536_v54 }
0x21a8   :  { %v4940_v2 = vpack.c.bf16 %v4924_v12, %v4924_v12 }
0x21a9   :  { %v4939_v61 = vpack.c.bf16 %v4923_v14, %v4923_v14 }
0x21aa   :  { %v4964_v31 = vunpack.c.l.b16 %v4940_v2 }
0x21ab   :  { %v4963_v32 = vunpack.c.l.b16 %v4939_v61 }
0x21ad   :  { %v4971_v45 = vpack.c.b16 %v4964_v31, %v4963_v32 }
0x21ae   :  { %v4888_v8 = vpop.xlane.xlu1 %4887 }
0x21af   :  { %6646 = vrcp.f32 %v4888_v8 }
0x21b0   :  { %6648 = vrcp.f32 %v4885_v25 }
0x21b1   :  { %v4978_v39 = vpop.permute.xlu0 %4977  ;;  %6650 = vrcp.f32 %v4867_v20 }
0x21b2   :  { %4999 = vmatpush.bf16.msrb.mxu0 %v4978_v39 }
0x21b5   :  { %v6647_v44 = vpop.eup %6646 }
0x21b6   :  { %5000 = vmatpush.bf16.msrb.mxu0 %v4976_v16  ;;  %v6649_v3 = vpop.eup %6648  ;;  %v4932_v13 = vmul.f32 %v6647_v44, %v8554_v1 }
0x21b7   :  { %v4931_v54 = vmul.f32 %v6649_v3, %v8541_v52  ;;  %v6651_v62 = vpop.eup %6650 }
0x21b8   :  { %v4948_v29 = vpack.c.bf16 %v4932_v13, %v4932_v13  ;;  %v4925_v59 = vmul.f32 %v6651_v62, %v8550_v10 }
0x21b9   :  { %5846 = vmatmul.msk.bf16.vlgmr.msrb.gmra.mxu0 %vm274_vm0, %v4971_v45  ;;  %v4947_v43 = vpack.c.bf16 %v4931_v54, %v4931_v54 }
0x21ba   :  { %v5031_v41 = vunpack.c.l.b16 %v4948_v29  ;;  %v4941_v17 = vpack.c.bf16 %v4925_v59, %v4925_v59 }
0x21bb   :  { %v5030_v33 = vunpack.c.l.b16 %v4947_v43 }
0x21bc   :  { %v4965_v34 = vunpack.c.l.b16 %v4941_v17 }
0x21bd   :  { %v5038_v9 = vpack.c.b16 %v5031_v41, %v5030_v33 }
0x21c6   :  { %v5045_v36 = vpop.permute.xlu1 %5044 }
0x21c7   :  { %5066 = vmatpush.bf16.msra.mxu3 %v5045_v36 }
0x21cb   :  { %5067 = vmatpush.bf16.msra.mxu3 %v5043_v0 }
0x21ce   :  { %5850 = vmatmul.msk.bf16.vlgmr.msra.gmra.mxu3 %vm274_vm0, %v5038_v9 }
0x21dc   :  { %v4870_v46 = vpop.xlane.xlu0 %4869 }
0x21dd   :  { %6652 = vrcp.f32 %v4870_v46  ;;  %v4891_v63 = vpop.xlane.xlu2 %4890 }
0x21e3   :  { %v6653_v1 = vpop.eup %6652 }
0x21e4   :  { %v4926_v52 = vmul.f32 %v6653_v1, %v8568_v5  ;;  %v4873_v11 = vpop.xlane.xlu0 %4872 }
0x21e5   :  { %6654 = vrcp.f32 %v4873_v11  ;;  %v4900_v12 = vpop.xlane.xlu2 %4899 }
0x21e6   :  { %v4942_v27 = vpack.c.bf16 %v4926_v52, %v4926_v52  ;;  %6656 = vrcp.f32 %v4891_v63 }
0x21e8   :  { %v4966_v21 = vunpack.c.l.b16 %v4942_v27 }
0x21ea   :  { %v4972_v56 = vpack.c.b16 %v4966_v21, %v4965_v34 }
0x21eb   :  { %v6655_v22 = vpop.eup %6654 }
0x21ec   :  { %v4876_v28 = vpop.xlane.xlu0 %4875  ;;  %5847 = vmatmul.msk.bf16.gmra.mxu0 %vm274_vm0, %v4972_v56  ;;  %v4927_v42 = vmul.f32 %v6655_v22, %v8579_v48  ;;  %v6657_v37 = vpop.eup %6656 }
0x21ed   :  { %6658 = vrcp.f32 %v4876_v28  ;;  %v4933_v23 = vmul.f32 %v6657_v37, %v8570_v4  ;;  %v4903_v0 = vpop.xlane.xlu2 %4902 }
0x21ee   :  { %v4943_v5 = vpack.c.bf16 %v4927_v42, %v4927_v42 }
0x21ef   :  { %v4949_v20 = vpack.c.bf16 %v4933_v23, %v4933_v23 }
0x21f0   :  { %v4967_v24 = vunpack.c.l.b16 %v4943_v5 }
0x21f1   :  { %v4894_v10 = vpop.xlane.xlu1 %4893 }
0x21f2   :  { %6660 = vrcp.f32 %v4894_v10 }
0x21f3   :  { %v6659_v35 = vpop.eup %6658 }
0x21f4   :  { %v4928_v26 = vmul.f32 %v6659_v35, %v8589_v47  ;;  %v4897_v50 = vpop.xlane.xlu0 %4896  ;;  %v5032_v47 = vunpack.c.l.b16 %v4949_v20 }
0x21f5   :  { %6662 = vrcp.f32 %v4897_v50  ;;  %v5945_v50 = vld [vmem:[%s8729_s3 + $0x58] sm:$0xff] }
0x21f6   :  { %v4944_v60 = vpack.c.bf16 %v4928_v26, %v4928_v26  ;;  %5176 = vmatpush.bf16.msra.mxu1 %v5945_v50 }
0x21f8   :  { %v6661_v7 = vpop.eup %6660  ;;  %v4968_v57 = vunpack.c.l.b16 %v4944_v60 }
0x21f9   :  { %v4934_v14 = vmul.f32 %v6661_v7, %v8596_v38  ;;  %v4882_v48 = vpop.xlane.xlu1 %4881 }
0x21fa   :  { %6664 = vrcp.f32 %v4882_v48  ;;  %v4973_v16 = vpack.c.b16 %v4968_v57, %v4967_v24  ;;  %v5944_v48 = vld [vmem:[%s8729_s3 + $0x50] sm:$0xff] }
0x21fb   :  { %v4950_v2 = vpack.c.bf16 %v4934_v14, %v4934_v14  ;;  %6666 = vrcp.f32 %v4900_v12  ;;  %v6663_v4 = vpop.eup %6662  ;;  %5177 = vmatpush.bf16.msra.mxu1 %v5944_v48 }
0x21fc   :  { %v4879_v61 = vpop.xlane.xlu0 %4878  ;;  %5848 = vmatmul.msk.bf16.gmra.mxu0 %vm274_vm0, %v4973_v16  ;;  %v4935_v45 = vmul.f32 %v6663_v4, %v8600_v18 }
0x21fd   :  { %v5033_v39 = vunpack.c.l.b16 %v4950_v2  ;;  %6668 = vrcp.f32 %v4879_v61 }
0x21fe   :  { %v4951_v29 = vpack.c.bf16 %v4935_v45, %v4935_v45 }
0x21ff   :  { %v5039_v31 = vpack.c.b16 %v5033_v39, %v5032_v47 }
0x2200   :  { %v6665_v8 = vpop.eup %6664  ;;  %v5034_v9 = vunpack.c.l.b16 %v4951_v29 }
0x2201   :  { %v4930_v32 = vmul.f32 %v6665_v8, %v8607_v30  ;;  %5851 = vmatmul.msk.bf16.gmra.mxu3 %vm274_vm0, %v5039_v31  ;;  %v6667_v38 = vpop.eup %6666 }
0x2202   :  { %v4936_v13 = vmul.f32 %v6667_v38, %v8581_v58 }
0x2203   :  { %v6669_v25 = vpop.eup %6668  ;;  %v4946_v44 = vpack.c.bf16 %v4930_v32, %v4930_v32 }
0x2204   :  { %v4929_v3 = vmul.f32 %v6669_v25, %v8609_v15  ;;  %v4906_v43 = vpop.xlane.xlu0 %4905  ;;  %v4952_v33 = vpack.c.bf16 %v4936_v13, %v4936_v13 }
0x2205   :  { %v4970_v36 = vunpack.c.l.b16 %v4946_v44  ;;  %6670 = vrcp.f32 %v4906_v43 }
0x2206   :  { %v4945_v54 = vpack.c.bf16 %v4929_v3, %v4929_v3  ;;  %6672 = vrcp.f32 %v4903_v0  ;;  %v5035_v46 = vunpack.c.l.b16 %v4952_v33 }
0x2208   :  { %v4969_v41 = vunpack.c.l.b16 %v4945_v54  ;;  %v5040_v18 = vpack.c.b16 %v5035_v46, %v5034_v9 }
0x220a   :  { %v4974_v30 = vpack.c.b16 %v4970_v36, %v4969_v41 }
0x220b   :  { %v6671_v62 = vpop.eup %6670 }
0x220c   :  { %5849 = vmatmul.msk.bf16.gmra.mxu0 %vm274_vm0, %v4974_v30  ;;  %v6673_v15 = vpop.eup %6672  ;;  %v4938_v58 = vmul.f32 %v6671_v62, %v8615_v40 }
0x220d   :  { %v4937_v59 = vmul.f32 %v6673_v15, %v8591_v53 }
0x220e   :  { %v4954_v1 = vpack.c.bf16 %v4938_v58, %v4938_v58 }
0x220f   :  { %v4953_v17 = vpack.c.bf16 %v4937_v59, %v4937_v59 }
0x2210   :  { %v5037_v52 = vunpack.c.l.b16 %v4954_v1 }
0x2211   :  { %5852 = vmatmul.msk.bf16.gmra.mxu3 %vm274_vm0, %v5040_v18  ;;  %v5036_v11 = vunpack.c.l.b16 %v4953_v17 }
0x2213   :  { %v5041_v27 = vpack.c.b16 %v5037_v52, %v5036_v11  ;;  %v8669_v52 = vld [vmem:[#allocation5 + $0x14] sm:$0xf] }
0x2221   :  { %5853 = vmatmul.msk.bf16.gmra.mxu3 %vm274_vm0, %v5041_v27  ;;  %v5151_v27 = vperm.slane %v8669_v52, 0 }
0x2236   :  { %v5002_v34 = vpop.f32.mrf.mxu0 }
0x223e   :  { %v5004_v21 = vpop.f32.mrf.mxu0 }
0x2251   :  { %v5069_v28 = vpop.f32.mrf.mxu3 }
0x2259   :  { %v5071_v10 = vpop.f32.mrf.mxu3 }
0x2269   :  { %v5007_v63 = vpop.f32.mrf.mxu0 }
0x2271   :  { %v5009_v56 = vpop.f32.mrf.mxu0 }
0x2272   :  { %v6294_v22 = vpack.i.bf16 %v5009_v56, %v5007_v63 }
0x2274   :  { %6295 = vrot.lane.b32.xlu1 %v6294_v22, %s6762_s14 }
0x2279   :  { %v5012_v42 = vpop.f32.mrf.mxu0 }
0x2281   :  { %v5014_v40 = vpop.f32.mrf.mxu0 }
0x2282   :  { %v6299_v37 = vpack.i.bf16 %v5014_v40, %v5012_v42 }
0x2284   :  { %6300 = vrot.lane.b32.xlu2 %v6299_v37, %s6772_s25  ;;  %v5074_v53 = vpop.f32.mrf.mxu3 }
0x2289   :  { %v5017_v35 = vpop.f32.mrf.mxu0 }
0x228c   :  { %v5076_v5 = vpop.f32.mrf.mxu3 }
0x228d   :  { %v6309_v26 = vpack.i.bf16 %v5076_v5, %v5074_v53 }
0x228f   :  { %6310 = vrot.lane.b32.xlu1 %v6309_v26, %s6762_s14 }
0x2291   :  { %v5019_v23 = vpop.f32.mrf.mxu0 }
0x2292   :  { %v6304_v60 = vpack.i.bf16 %v5019_v23, %v5017_v35 }
0x2294   :  { %6305 = vrot.lane.b32.xlu0 %v6304_v60, %s6773_s26  ;;  %v5079_v7 = vpop.f32.mrf.mxu3 }
0x229c   :  { %v5081_v24 = vpop.f32.mrf.mxu3 }
0x229d   :  { %v6314_v57 = vpack.i.bf16 %v5081_v24, %v5079_v7 }
0x229f   :  { %6315 = vrot.lane.b32.xlu0 %v6314_v57, %s6772_s25 }
0x22a4   :  { %v5084_v20 = vpop.f32.mrf.mxu3 }
0x22ac   :  { %v5086_v12 = vpop.f32.mrf.mxu3 }
0x22ad   :  { %v6319_v14 = vpack.i.bf16 %v5086_v12, %v5084_v20 }
0x22af   :  { %6320 = vrot.lane.b32.xlu2 %v6319_v14, %s6773_s26 }
0x22de   :  { %v6301_v47 = vpop.permute.xlu2 %6300 }
0x22df   :  { %v6303_v31 = vunpack.i.h.bf16 %v6301_v47  ;;  %v6302_v8 = vunpack.i.l.bf16 %v6301_v47 }
0x22e6   :  { %v6296_v16 = vpop.permute.xlu1 %6295 }
0x22e7   :  { %v6298_v2 = vunpack.i.h.bf16 %v6296_v16  ;;  %v6297_v61 = vunpack.i.l.bf16 %v6296_v16 }
0x22e9   :  { %v5138_v39 = vsel %vm384_vm1, %v5004_v21, %v6298_v2  ;;  %v5137_v4 = vsel %vm384_vm1, %v5002_v34, %v6297_v61 }
0x22ea   :  { %v5141_v45 = vsel %vm910_vm10, %v5137_v4, %v6302_v8  ;;  %v5142_v44 = vsel %vm910_vm10, %v5138_v39, %v6303_v31 }
0x2301   :  { %v6311_v29 = vpop.permute.xlu1 %6310 }
0x2302   :  { %v6313_v43 = vunpack.i.h.bf16 %v6311_v29  ;;  %v6312_v36 = vunpack.i.l.bf16 %v6311_v29 }
0x2304   :  { %v5140_v9 = vsel %vm384_vm1, %v5071_v10, %v6313_v43  ;;  %v5139_v46 = vsel %vm384_vm1, %v5069_v28, %v6312_v36 }
0x2306   :  { %v6306_v32 = vpop.permute.xlu0 %6305 }
0x2307   :  { %v6308_v38 = vunpack.i.h.bf16 %v6306_v32  ;;  %v6307_v25 = vunpack.i.l.bf16 %v6306_v32 }
0x2309   :  { %v5145_v3 = vsel %vm915_vm11, %v5141_v45, %v6307_v25  ;;  %v5146_v13 = vsel %vm915_vm11, %v5142_v44, %v6308_v38  ;;  %v6321_v33 = vpop.permute.xlu2 %6320  ;;  %v5947_v38 = vld [vmem:[%s8730_s4 + $0x58] sm:$0xff] }
0x230a   :  { %v5149_v54 = vpack.c.bf16 %v5146_v13, %v5145_v3  ;;  %v6323_v15 = vunpack.i.h.bf16 %v6321_v33  ;;  %v6322_v58 = vunpack.i.l.bf16 %v6321_v33  ;;  %5306 = vmatpush.bf16.msrb.mxu2 %v5947_v38  ;;  %v5946_v13 = vld [vmem:[%s8730_s4 + $0x50] sm:$0xff] }
0x230c   :  { %5862 = vmatmul.msk.bf16.vlgmr.msra.gmra.mxu1 %vm274_vm0, %v5149_v54 }
0x230e   :  { %5307 = vmatpush.bf16.msrb.mxu2 %v5946_v13 }
0x2311   :  { %v6316_v41 = vpop.permute.xlu0 %6315 }
0x2312   :  { %v6318_v0 = vunpack.i.h.bf16 %v6316_v41  ;;  %v6317_v30 = vunpack.i.l.bf16 %v6316_v41 }
0x2314   :  { %v5144_v18 = vsel %vm910_vm10, %v5140_v9, %v6318_v0  ;;  %v5143_v62 = vsel %vm910_vm10, %v5139_v46, %v6317_v30 }
0x2315   :  { %v5147_v59 = vsel %vm915_vm11, %v5143_v62, %v6322_v58  ;;  %v5148_v1 = vsel %vm915_vm11, %v5144_v18, %v6323_v15 }
0x2316   :  { %v5150_v17 = vpack.c.bf16 %v5148_v1, %v5147_v59 }
0x231c   :  { %5863 = vmatmul.msk.bf16.gmra.mxu1 %vm274_vm0, %v5150_v17 }
0x2389   :  { %v5179_v11 = vpop.f32.mrf.mxu1 }
0x238a   :  { %v5180_v34 = vadd.f32 %v5179_v11, %v5151_v27 }
0x238c   :  { %v5189_v63 = vadd.f32 %v5180_v34, %v8166_v6 }
0x238e   :  { %v5193_v22 = vsel %vm274_vm0, %v5189_v63, 0.0 }
0x2391   :  { %v5181_v21 = vpop.f32.mrf.mxu1 }
0x2392   :  { %v5182_v56 = vadd.f32 %v5181_v21, %v5151_v27 }
0x2394   :  { %v5190_v28 = vadd.f32 %v5182_v56, %v8168_v51 }
0x2396   :  { %v5194_v42 = vsel %vm274_vm0, %v5190_v28, 0.0 }
0x2397   :  { %v5195_v10 = vadd.f32 %v5194_v42, %v5193_v22  ;;  %v5950_v22 = vld [vmem:[%s8731_s5 + $0xb0] sm:$0xff] }
0x2399   :  { %v5196_v40 = vrot.slane %v5195_v10, 4  ;;  %v5184_v37 = vpop.f32.mrf.mxu1 }
0x239a   :  { %v5185_v5 = vadd.f32 %v5184_v37, %v5151_v27  ;;  %v5267_v37 = vperm.slane %v8669_v52, 1 }
0x239b   :  { %v5197_v53 = vadd.f32 %v5196_v40, %v5195_v10 }
0x239c   :  { %v5191_v60 = vadd.f32 %v5185_v5, %v8176_v55 }
0x239d   :  { %v5198_v35 = vrot.slane %v5197_v53, 2 }
0x239e   :  { %v5202_v57 = vsel %vm274_vm0, %v5191_v60, 0.0 }
0x239f   :  { %v5199_v26 = vadd.f32 %v5198_v35, %v5197_v53  ;;  %v5949_v53 = vld [vmem:[%s8731_s5 + $0xa8] sm:$0xff]  ;;  %v5272_v35 = vperm.slane %v8669_v52, 2 }
0x23a1   :  { %v5200_v50 = vrot.slane %v5199_v26, 1  ;;  %v5186_v23 = vpop.f32.mrf.mxu1 }
0x23a2   :  { %v5187_v7 = vadd.f32 %v5186_v23, %v5151_v27 }
0x23a3   :  { %v5201_v6 = vadd.f32 %v5200_v50, %v5199_v26 }
0x23a4   :  { %v5192_v24 = vadd.f32 %v5187_v7, %v8178_v19 }
0x23a5   :  { %v5211_v51 = vmul.f32 %v5201_v6, %v7181_v49 }
0x23a6   :  { %v5203_v20 = vsel %vm274_vm0, %v5192_v24, 0.0 }
0x23a7   :  { %v5213_v12 = vsub.f32 %v5189_v63, %v5211_v51  ;;  %v5214_v14 = vsub.f32 %v5190_v28, %v5211_v51  ;;  %v5204_v48 = vadd.f32 %v5203_v20, %v5202_v57  ;;  %v5951_v63 = vld [vmem:[%s8731_s5 + $0xb8] sm:$0xff] }
0x23a8   :  { %5360 = vmatpush.bf16.msra.mxu0 %v5951_v63 }
0x23a9   :  { %v5217_v16 = vmul.f32 %v5213_v12, %v5213_v12  ;;  %v5218_v2 = vmul.f32 %v5214_v14, %v5214_v14  ;;  %v5205_v61 = vrot.slane %v5204_v48, 4 }
0x23ab   :  { %v5221_v47 = vsel %vm274_vm0, %v5217_v16, 0.0  ;;  %v5222_v55 = vsel %vm274_vm0, %v5218_v2, 0.0  ;;  %v5206_v39 = vadd.f32 %v5205_v61, %v5204_v48 }
0x23ac   :  { %v5223_v4 = vadd.f32 %v5222_v55, %v5221_v47  ;;  %5361 = vmatpush.bf16.msra.mxu0 %v5950_v22 }
0x23ad   :  { %v5207_v31 = vrot.slane %v5206_v39, 2 }
0x23ae   :  { %v5224_v19 = vrot.slane %v5223_v4, 4 }
0x23af   :  { %v5208_v8 = vadd.f32 %v5207_v31, %v5206_v39  ;;  %v5948_v31 = vld [vmem:[%s8731_s5 + $0xa0] sm:$0xff]  ;;  %s6777_s5 = smov [#allocation7]  }
0x23b0   :  { %v5225_v32 = vadd.f32 %v5224_v19, %v5223_v4  ;;  %5362 = vmatpush.bf16.msra.mxu0 %v5949_v53 }
0x23b1   :  { %v5209_v25 = vrot.slane %v5208_v8, 1 }
0x23b2   :  { %v5226_v45 = vrot.slane %v5225_v32, 2 }
0x23b3   :  { %v5210_v44 = vadd.f32 %v5209_v25, %v5208_v8  ;;  %v6329_v8 = vld [vmem:[%s8733_s7 + $0x5] ss:$0 sm:$0xff]  ;;  %s5385_s7 = sshll.u32 %s6777_s5, 4  ;;  %s5386_s7 = int_to_ptr.vmem [resolvable:$true] %s5385_s7 }
0x23b4   :  { %v5227_v3 = vadd.f32 %v5226_v45, %v5225_v32  ;;  %5363 = vmatpush.bf16.msra.mxu0 %v5948_v31 }
0x23b5   :  { %v5212_v54 = vmul.f32 %v5210_v44, %v7181_v49 }
0x23b6   :  { %v5228_v29 = vrot.slane %v5227_v3, 1 }
0x23b7   :  { %v5215_v43 = vsub.f32 %v5191_v60, %v5212_v54  ;;  %v5216_v36 = vsub.f32 %v5192_v24, %v5212_v54 }
0x23b8   :  { %v5229_v41 = vadd.f32 %v5228_v29, %v5227_v3 }
0x23b9   :  { %v5219_v33 = vmul.f32 %v5215_v43, %v5215_v43  ;;  %v5220_v0 = vmul.f32 %v5216_v36, %v5216_v36 }
0x23ba   :  { %v5239_v30 = vmul.f32 %v5229_v41, %v7181_v49 }
0x23bb   :  { %v5230_v9 = vsel %vm274_vm0, %v5219_v33, 0.0  ;;  %v5231_v46 = vsel %vm274_vm0, %v5220_v0, 0.0  ;;  %v5325_v0 = vperm.slane %v8669_v52, 3 }
0x23bc   :  { %v5241_v18 = vadd.f32 1e-05, %v5239_v30  ;;  %v5232_v62 = vadd.f32 %v5231_v46, %v5230_v9 }
0x23be   :  { %6674 = vrsqrt.f32 %v5241_v18  ;;  %v5233_v15 = vrot.slane %v5232_v62, 4  ;;  %vm5249_vm10 = vweird.f32 %v5241_v18 }
0x23c0   :  { %v5234_v58 = vadd.f32 %v5233_v15, %v5232_v62 }
0x23c2   :  { %v5235_v59 = vrot.slane %v5234_v58, 2 }
0x23c4   :  { %v6675_v1 = vpop.eup %6674  ;;  %v5236_v17 = vadd.f32 %v5235_v59, %v5234_v58 }
0x23c5   :  { %v5244_v11 = vmul.f32 %v6675_v1, %v5241_v18  ;;  %vm5250_vm1 = vweird.f32 %v6675_v1 }
0x23c6   :  { %v5237_v27 = vrot.slane %v5236_v17, 1  ;;  %vm5251_vm11 = vmor %vm5249_vm10, %vm5250_vm1 }
0x23c7   :  { %v5245_v34 = vmul.f32 %v6675_v1, %v5244_v11 }
0x23c8   :  { %v5238_v21 = vadd.f32 %v5237_v27, %v5236_v17 }
0x23c9   :  { %v5246_v56 = vmul.f32 0.5, %v5245_v34 }
0x23ca   :  { %v5240_v28 = vmul.f32 %v5238_v21, %v7181_v49 }
0x23cb   :  { %v5247_v42 = vsub.f32 1.5, %v5246_v56 }
0x23cc   :  { %v5242_v10 = vadd.f32 1e-05, %v5240_v28 }
0x23cd   :  { %v5248_v40 = vmul.f32 %v6675_v1, %v5247_v42 }
0x23ce   :  { %6676 = vrsqrt.f32 %v5242_v10  ;;  %vm5259_vm7 = vweird.f32 %v5242_v10 }
0x23cf   :  { %v5252_v49 = vsel %vm5251_vm11, %v6675_v1, %v5248_v40 }
0x23d0   :  { %v5263_v5 = vmul.f32 %v5252_v49, %v5213_v12  ;;  %v5264_v26 = vmul.f32 %v5252_v49, %v5214_v14 }
0x23d2   :  { %v5268_v50 = vmul.f32 %v5267_v37, %v5263_v5  ;;  %v5269_v23 = vmul.f32 %v5267_v37, %v5264_v26 }
0x23d4   :  { %v6677_v60 = vpop.eup %6676  ;;  %v5273_v7 = vadd.f32 %v5272_v35, %v5268_v50  ;;  %v5274_v6 = vadd.f32 %v5272_v35, %v5269_v23 }
0x23d5   :  { %v5254_v24 = vmul.f32 %v6677_v60, %v5242_v10  ;;  %vm5260_vm5 = vweird.f32 %v6677_v60 }
0x23d6   :  { %v5277_v51 = vpack.c.bf16 %v5274_v6, %v5273_v7  ;;  %vm5261_vm8 = vmor %vm5259_vm7, %vm5260_vm5 }
0x23d7   :  { %v5255_v57 = vmul.f32 %v6677_v60, %v5254_v24 }
0x23d8   :  { %5872 = vmatmul.msk.bf16.vlgmr.msrb.gmra.mxu2 %vm274_vm0, %v5277_v51 }
0x23d9   :  { %v5256_v20 = vmul.f32 0.5, %v5255_v57 }
0x23db   :  { %v5257_v48 = vsub.f32 1.5, %v5256_v20 }
0x23dd   :  { %v5258_v16 = vmul.f32 %v6677_v60, %v5257_v48 }
0x23df   :  { %v5262_v2 = vsel %vm5261_vm8, %v6677_v60, %v5258_v16 }
0x23e0   :  { %v5265_v12 = vmul.f32 %v5262_v2, %v5215_v43  ;;  %v5266_v14 = vmul.f32 %v5262_v2, %v5216_v36 }
0x23e2   :  { %v5270_v61 = vmul.f32 %v5267_v37, %v5265_v12  ;;  %v5271_v47 = vmul.f32 %v5267_v37, %v5266_v14 }
0x23e4   :  { %v5275_v55 = vadd.f32 %v5272_v35, %v5270_v61  ;;  %v5276_v39 = vadd.f32 %v5272_v35, %v5271_v47 }
0x23e6   :  { %v5278_v4 = vpack.c.bf16 %v5276_v39, %v5275_v55 }
0x23e8   :  { %5873 = vmatmul.msk.bf16.gmra.mxu2 %vm274_vm0, %v5278_v4 }
0x245b   :  { %v5309_v19 = vpop.f32.mrf.mxu2 }
0x245c   :  { %v5310_v32 = vadd.f32 %v6329_v8, %v5309_v19 }
0x245e   :  { %v5319_v45 = vmax.f32 %v5310_v32, 0.0 }
0x2463   :  { %v5311_v38 = vpop.f32.mrf.mxu2 }
0x2464   :  { %v5312_v25 = vadd.f32 %v6329_v8, %v5311_v38 }
0x2466   :  { %v5320_v44 = vmax.f32 %v5312_v25, 0.0 }
0x2468   :  { %v5323_v3 = vpack.c.bf16 %v5320_v44, %v5319_v45 }
0x246a   :  { %5890 = vmatmul.msk.bf16.vlgmr.msra.gmra.mxu0 %vm519_vm6, %v5323_v3 }
0x246b   :  { %v5314_v13 = vpop.f32.mrf.mxu2 }
0x246c   :  { %v5315_v54 = vadd.f32 %v6329_v8, %v5314_v13 }
0x246e   :  { %v5321_v36 = vmax.f32 %v5315_v54, 0.0 }
0x2473   :  { %v5316_v29 = vpop.f32.mrf.mxu2 }
0x2474   :  { %v5317_v43 = vadd.f32 %v6329_v8, %v5316_v29 }
0x2476   :  { %v5322_v41 = vmax.f32 %v5317_v43, 0.0 }
0x2478   :  { %v5324_v33 = vpack.c.bf16 %v5322_v41, %v5321_v36 }
0x247a   :  { %5891 = vmatmul.msk.bf16.gmra.mxu0 %vm519_vm6, %v5324_v33 }
0x24e7   :  { %v5365_v30 = vpop.f32.mrf.mxu0 }
0x24e8   :  { %v5366_v9 = vadd.f32 %v5365_v30, %v5325_v0 }
0x24ea   :  { %5377 = vst.msk [vmem:[#allocation7 + $0x8] sm:$0xff] %vm274_vm0, %v5366_v9 }
0x24ef   :  { %v5367_v46 = vpop.f32.mrf.mxu0 }
0x24f0   :  { %v5368_v18 = vadd.f32 %v5367_v46, %v5325_v0 }
0x24f2   :  { %5378 = vst.msk [vmem:[#allocation7 + $0x10] sm:$0xff] %vm274_vm0, %v5368_v18 }
0x24f7   :  { %v5370_v62 = vpop.f32.mrf.mxu0 }
0x24f8   :  { %v5371_v15 = vadd.f32 %v5370_v62, %v5325_v0 }
0x24fa   :  { %5379 = vst.msk [vmem:[#allocation7 + $0x20] sm:$0xff] %vm274_vm0, %v5371_v15 }
0x24ff   :  { %v5372_v58 = vpop.f32.mrf.mxu0 }
0x2500   :  { %v5373_v52 = vadd.f32 %v5372_v58, %v5325_v0 }
0x2502   :  { %5380 = vst.msk [vmem:[#allocation7 + $0x28] sm:$0xff] %vm274_vm0, %v5373_v52 }
0x2503   :  { %5393 = dma.vmem_to_hbm [thread:$0]  %s5386_s7, 768, %s5388_s0, [#allocation4], %s6761_s13, %s6761_s13, %s6762_s14  }
0x2504   :  { %6758 = dma.done.wait [#allocation4], 768  }
0x2505   :  { %6759 = vsyncadd [#allocation4], 4294966528 }
0x2506   :  { %5398 = vsyncpa [#allocation3], 1 }
0x2507   :  { %5399 = vsyncpa [#allocation6], 1 }
0x2508   :  { %5400 = vsyncpa [#allocation4], 1 }

</bundles_post_ra>
